<compile_context>
chip_gen: v7x
topology: tpu7x:2x2x1
jax: 0.10.0
libtpu: 0.0.40
codegen_flags: <defaults>
</compile_context>

<pallas_src>
import math
import functools

import jax
import jax.numpy as jnp
from jax.experimental import pallas as pl
from jax.experimental.pallas import tpu as pltpu

# ----- model hyper-parameters (small, consistent with the module's ctor) -----
NUM_ELECTRODES = 16
NUM_CLASSES = 16
D_MODEL = 32
NHEAD = 4
NUM_LAYERS = 2
DIM_FF = 64
MAX_LEN = 64
EPS = 1e-5  # nn.LayerNorm default

_VMEM = pl.BlockSpec(memory_space=pltpu.MemorySpace.VMEM)
_NEG_INF = -1e30


# ========================= fused forward kernel =============================

def _fused_forward_kernel(
        src_ref, pe_ref, be_w_ref,
        wqk_ref, bqk_ref, wvo_ref,
        w1_ref, b1_ref, w2_ref, vec_ref,
        cls_w_ref, cls_b_ref,
        out_ref, *, num_layers, nhead, t0, t1):
    f32 = jnp.float32
    R = t0 * t1
    inv_t1 = 1.0 / t1

    def layer_norm(v, g, b):
        mu = jnp.mean(v, axis=-1, keepdims=True)
        var = jnp.mean((v - mu) * (v - mu), axis=-1, keepdims=True)
        return (v - mu) * jax.lax.rsqrt(var + EPS) * g + b

    # Block-diagonal attention mask generated in-kernel (rows sharing the same
    # batch element t0 = r // t1 attend to each other).  Float floor of
    # (i + 0.5)/t1 is exact for these small integer ranges; no int vector div.
    ri = jax.lax.broadcasted_iota(jnp.int32, (R, R), 0).astype(f32)
    ci = jax.lax.broadcasted_iota(jnp.int32, (R, R), 1).astype(f32)
    row_g = jnp.floor((ri + 0.5) * inv_t1)
    col_g = jnp.floor((ci + 0.5) * inv_t1)
    mask = jnp.where(row_g == col_g, jnp.float32(0.0), jnp.float32(_NEG_INF))

    # brain encoder (sqrt(d_model) folded into be_w; its bias + the positional
    # encoding arrive pre-added as pe_ref).
    x = jnp.dot(src_ref[...], be_w_ref[...],
                preferred_element_type=f32) + pe_ref[...]             # (R, D)

    for li in range(num_layers):              # static unroll (2 layers)
        attn = jnp.zeros_like(x)
        for h in range(nhead):                # static unroll (4 heads)
            idx = li * nhead + h
            # scores: (x @ WqWk^T/sqrt(dh) + bq Wk^T/sqrt(dh)) @ x^T  + mask
            t = jnp.dot(x, wqk_ref[idx],
                        preferred_element_type=f32) + bqk_ref[idx]    # (R, D)
            s = jax.lax.dot_general(t, x, (((1,), (1,)), ((), ())),
                                    preferred_element_type=f32) + mask
            s = s - jnp.max(s, axis=-1, keepdims=True)
            p = jnp.exp(s)
            p = p / jnp.sum(p, axis=-1, keepdims=True)                # exact
            # value + output projection folded: x @ (Wv_h @ Wo_h)
            vh = jnp.dot(x, wvo_ref[idx], preferred_element_type=f32)  # (R, D)
            attn = attn + jnp.dot(p, vh, preferred_element_type=f32)   # (R, D)
        attn = attn + vec_ref[li * 6 + 0]     # bo + sum_h bv_h @ Wo_h

        # post-norm: LN(x + attn), then FFN, then LN(x + ffn)
        x = layer_norm(x + attn, vec_ref[li * 6 + 1], vec_ref[li * 6 + 2])
        hid = jnp.maximum(
            jnp.dot(x, w1_ref[li], preferred_element_type=f32) + b1_ref[li],
            0.0)
        ff = jnp.dot(hid, w2_ref[li],
                     preferred_element_type=f32) + vec_ref[li * 6 + 3]
        x = layer_norm(x + ff, vec_ref[li * 6 + 4], vec_ref[li * 6 + 5])

    # final LayerNorm + mean over the T1 sequence axis (in-kernel pooling
    # matrix) + classifier
    y = layer_norm(x, vec_ref[num_layers * 6], vec_ref[num_layers * 6 + 1])
    pr = jax.lax.broadcasted_iota(jnp.int32, (t0, R), 0).astype(f32)
    pc = jax.lax.broadcasted_iota(jnp.int32, (t0, R), 1).astype(f32)
    pool = jnp.where(pr == jnp.floor((pc + 0.5) * inv_t1),
                     jnp.float32(inv_t1), jnp.float32(0.0))            # (T0, R)
    pooled = jnp.dot(pool, y, preferred_element_type=f32)              # (T0, D)
    out_ref[...] = (jnp.dot(pooled, cls_w_ref[...],
                            preferred_element_type=f32) + cls_b_ref[...])


# ============================ parameters ====================================

def _make_pe(max_len, d_model):
    pos = jnp.arange(max_len, dtype=jnp.float32)[:, None]
    div = jnp.exp(jnp.arange(0, d_model, 2, dtype=jnp.float32)
                  * (-math.log(10000.0) / d_model))
    pe = jnp.zeros((max_len, d_model), jnp.float32)
    pe = pe.at[:, 0::2].set(jnp.sin(pos * div))
    pe = pe.at[:, 1::2].set(jnp.cos(pos * div))
    return pe


def _xavier(key, fan_in, fan_out):
    bound = math.sqrt(6.0 / (fan_in + fan_out))
    return jax.random.uniform(key, (fan_in, fan_out), jnp.float32, -bound, bound)


def _bias(key, fan_in, n):
    bound = 1.0 / math.sqrt(fan_in)
    return jax.random.uniform(key, (n,), jnp.float32, -bound, bound)


def init_params(key):
    """PyTorch-style (unfolded) parameters of the module."""
    keys = iter(jax.random.split(key, 64))
    layers = []
    for _ in range(NUM_LAYERS):
        layers.append({
            'w_in': _xavier(next(keys), D_MODEL, 3 * D_MODEL),
            'b_in': _bias(next(keys), D_MODEL, 3 * D_MODEL),
            'wo': _xavier(next(keys), D_MODEL, D_MODEL),
            'bo': _bias(next(keys), D_MODEL, D_MODEL),
            'w1': _xavier(next(keys), D_MODEL, DIM_FF),
            'b1': _bias(next(keys), D_MODEL, DIM_FF),
            'w2': _xavier(next(keys), DIM_FF, D_MODEL),
            'b2': _bias(next(keys), DIM_FF, D_MODEL),
            'ln1_g': jnp.ones((D_MODEL,), jnp.float32),
            'ln1_b': jnp.zeros((D_MODEL,), jnp.float32),
            'ln2_g': jnp.ones((D_MODEL,), jnp.float32),
            'ln2_b': jnp.zeros((D_MODEL,), jnp.float32),
        })
    return {
        'be_w': _xavier(next(keys), NUM_ELECTRODES, D_MODEL),
        'be_b': jnp.zeros((D_MODEL,), jnp.float32),   # zeroed in _reset_parameters
        'pe': _make_pe(MAX_LEN, D_MODEL),
        'layers': layers,
        'final_g': jnp.ones((D_MODEL,), jnp.float32),
        'final_b': jnp.zeros((D_MODEL,), jnp.float32),
        'cls_w': _xavier(next(keys), D_MODEL, NUM_CLASSES),
        'cls_b': jnp.zeros((NUM_CLASSES,), jnp.float32),
    }


def pack_params(p):
    """All scale / weight folds are done here, ONCE, at init time."""
    D, H, L = D_MODEL, NHEAD, NUM_LAYERS
    dh = D // H
    sqrt_d = math.sqrt(D)
    scale = 1.0 / math.sqrt(dh)

    wqk, bqk, wvo = [], [], []
    w1, b1, w2, vec = [], [], [], []
    for lyr in p['layers']:
        w_in, b_in = lyr['w_in'], lyr['b_in']
        wq, wk, wv = w_in[:, :D], w_in[:, D:2 * D], w_in[:, 2 * D:]
        bq, bv = b_in[:D], b_in[2 * D:]         # bk dropped: softmax-invariant
        wo, bo = lyr['wo'], lyr['bo']
        bo_folded = bo
        for h in range(H):
            lo, hi = h * dh, (h + 1) * dh
            wq_h, wk_h, wv_h = wq[:, lo:hi], wk[:, lo:hi], wv[:, lo:hi]
            wo_h = wo[lo:hi, :]
            wqk.append(scale * (wq_h @ wk_h.T))                    # (D, D)
            bqk.append((scale * (bq[lo:hi] @ wk_h.T))[None, :])    # (1, D)
            wvo.append(wv_h @ wo_h)                                # (D, D)
            bo_folded = bo_folded + bv[lo:hi] @ wo_h
        vec.extend([bo_folded, lyr['ln1_g'], lyr['ln1_b'],
                    lyr['b2'], lyr['ln2_g'], lyr['ln2_b']])
        w1.append(lyr['w1'])
        b1.append(lyr['b1'][None, :])
        w2.append(lyr['w2'])
    vec.extend([p['final_g'], p['final_b']])

    return {
        'be_w': p['be_w'] * sqrt_d,               # sqrt(d_model) folded
        'be_b_scaled': p['be_b'] * sqrt_d,
        'pe': p['pe'],
        'wqk': jnp.stack(wqk),                    # (L*H, D, D)
        'bqk': jnp.stack(bqk),                    # (L*H, 1, D)
        'wvo': jnp.stack(wvo),                    # (L*H, D, D)
        'w1': jnp.stack(w1),                      # (L, D, F)
        'b1': jnp.stack(b1),                      # (L, 1, F)
        'w2': jnp.stack(w2),                      # (L, F, D)
        'vec': jnp.stack(vec)[:, None, :],        # (L*6+2, 1, D)
        'cls_w': p['cls_w'],                      # (D, C)
        'cls_b': p['cls_b'][None, :],             # (1, C)
    }


# ============================ forward =======================================

def mental_mini_forward(src, packed):
    # src: (T0, T1, num_electrodes), f32
    T0, T1, E = src.shape
    R = T0 * T1
    src2d = src.reshape(R, E).astype(jnp.float32)      # row r = (t0, t1)

    # PE indexed by x.size(1) == T0 (faithful to pe[:, :x.size(1)] quirk),
    # broadcast over T1; brain-encoder bias (scaled) folded in.
    pe_bias = (jnp.repeat(packed['pe'][:T0], T1, axis=0)
               + packed['be_b_scaled'][None, :])                       # (R, D)

    kernel = functools.partial(_fused_forward_kernel,
                               num_layers=NUM_LAYERS, nhead=NHEAD,
                               t0=T0, t1=T1)
    return pl.pallas_call(
        kernel,
        out_shape=jax.ShapeDtypeStruct((T0, NUM_CLASSES), jnp.float32),
        in_specs=[_VMEM] * 12,
        out_specs=_VMEM,
    )(src2d, pe_bias, packed['be_w'],
      packed['wqk'], packed['bqk'], packed['wvo'],
      packed['w1'], packed['b1'], packed['w2'], packed['vec'],
      packed['cls_w'], packed['cls_b'])


# ===================== pure-JAX reference (for checking) ====================
# Uses the ORIGINAL (unfolded) parameters and the literal PyTorch math, so the
# init-time weight folds (Wq·Wk^T, Wv·Wo, dropped bk, folded biases) are
# actually validated.

def _ln_ref(v, g, b):
    mu = jnp.mean(v, axis=-1, keepdims=True)
    var = jnp.mean((v - mu) ** 2, axis=-1, keepdims=True)
    return (v - mu) * jax.lax.rsqrt(var + EPS) * g + b


def reference_forward(src, params):
    T0, T1, E = src.shape
    D, H = D_MODEL, NHEAD
    dh = D // H
    x = (src.reshape(-1, E) @ params['be_w'] + params['be_b']) * math.sqrt(D)
    x = jnp.transpose(x.reshape(T0, T1, D), (1, 0, 2))        # (T1, T0, D)
    x = x + params['pe'][:T0][None]                           # PE quirk
    Lx, N = x.shape[0], x.shape[1]
    x2 = x.reshape(Lx * N, D)
    for lyr in params['layers']:
        qkv = x2 @ lyr['w_in'] + lyr['b_in']
        q = qkv[:, :D].reshape(Lx, N, H, dh)
        k = qkv[:, D:2 * D].reshape(Lx, N, H, dh)
        v = qkv[:, 2 * D:].reshape(Lx, N, H, dh)
        s = jnp.einsum('qnhd,knhd->nhqk', q, k) / math.sqrt(dh)
        p = jax.nn.softmax(s, axis=-1)
        o = jnp.einsum('nhqk,knhd->qnhd', p, v).reshape(Lx * N, D)
        a = o @ lyr['wo'] + lyr['bo']
        x2 = _ln_ref(x2 + a, lyr['ln1_g'], lyr['ln1_b'])
        ff = jnp.maximum(x2 @ lyr['w1'] + lyr['b1'], 0.0) @ lyr['w2'] + lyr['b2']
        x2 = _ln_ref(x2 + ff, lyr['ln2_g'], lyr['ln2_b'])
    y = _ln_ref(x2, params['final_g'], params['final_b']).reshape(Lx, N, D)
    return y.mean(0) @ params['cls_w'] + params['cls_b']


# ============================ main ==========================================

if __name__ == "__main__":
    # Make the pure-JAX reference use full-f32 matmuls (the Pallas kernel
    # already does), so the correctness check can be tight.
    jax.config.update("jax_default_matmul_precision", "highest")

    key = jax.random.PRNGKey(0)
    pkey, xkey = jax.random.split(key)

    params = init_params(pkey)
    packed = pack_params(params)
    src = jax.random.normal(xkey, (8, 4, NUM_ELECTRODES), jnp.float32)

    out = jax.jit(mental_mini_forward)(src, packed)
    out = jax.block_until_ready(out)

    assert out.shape == (8, NUM_CLASSES) and out.dtype == jnp.float32

    ref = reference_forward(src, params)
    err = float(jnp.max(jnp.abs(out - ref)))
    assert bool(jnp.allclose(out, ref, atol=2e-3, rtol=2e-3)), err

    print("KERNEL_OK")
</pallas_src>

<mosaic_0001>
module attributes {stable_mosaic.version = 11 : i64} {
  func.func @_fused_forward_kernel(%arg0: memref<32x16xf32, #tpu.memory_space<vmem>>, %arg1: memref<32x32xf32, #tpu.memory_space<vmem>>, %arg2: memref<16x32xf32, #tpu.memory_space<vmem>>, %arg3: memref<8x32x32xf32, #tpu.memory_space<vmem>>, %arg4: memref<8x1x32xf32, #tpu.memory_space<vmem>>, %arg5: memref<8x32x32xf32, #tpu.memory_space<vmem>>, %arg6: memref<2x32x64xf32, #tpu.memory_space<vmem>>, %arg7: memref<2x1x64xf32, #tpu.memory_space<vmem>>, %arg8: memref<2x64x32xf32, #tpu.memory_space<vmem>>, %arg9: memref<14x1x32xf32, #tpu.memory_space<vmem>>, %arg10: memref<32x16xf32, #tpu.memory_space<vmem>>, %arg11: memref<1x16xf32, #tpu.memory_space<vmem>>, %arg12: memref<8x16xf32, #tpu.memory_space<vmem>>) attributes {dimension_semantics = [], scalar_prefetch = 0 : i64, scratch_operands = 0 : i64, tpu.core_type = #tpu.core_type<tc>} {
    %0 = tpu.iota {dimensions = array<i32: 0>} : vector<32x32xi32>
    %1 = arith.sitofp %0 : vector<32x32xi32> to vector<32x32xf32>
    %2 = tpu.iota {dimensions = array<i32: 1>} : vector<32x32xi32>
    %3 = arith.sitofp %2 : vector<32x32xi32> to vector<32x32xf32>
    %cst = arith.constant 5.000000e-01 : f32
    %4 = vector.broadcast %cst : f32 to vector<32x32xf32>
    %5 = arith.addf %1, %4 : vector<32x32xf32>
    %cst_0 = arith.constant 2.500000e-01 : f32
    %6 = vector.broadcast %cst_0 : f32 to vector<32x32xf32>
    %7 = arith.mulf %5, %6 : vector<32x32xf32>
    %8 = math.floor %7 : vector<32x32xf32>
    %cst_1 = arith.constant 5.000000e-01 : f32
    %9 = vector.broadcast %cst_1 : f32 to vector<32x32xf32>
    %10 = arith.addf %3, %9 : vector<32x32xf32>
    %cst_2 = arith.constant 2.500000e-01 : f32
    %11 = vector.broadcast %cst_2 : f32 to vector<32x32xf32>
    %12 = arith.mulf %10, %11 : vector<32x32xf32>
    %13 = math.floor %12 : vector<32x32xf32>
    %14 = arith.cmpf oeq, %8, %13 : vector<32x32xf32>
    %cst_3 = arith.constant 0.000000e+00 : f32
    %cst_4 = arith.constant -1.000000e+30 : f32
    %15 = vector.broadcast %cst_3 : f32 to vector<32x32xf32>
    %16 = vector.broadcast %cst_4 : f32 to vector<32x32xf32>
    %17 = arith.select %14, %15, %16 : vector<32x32xi1>, vector<32x32xf32>
    %c0 = arith.constant 0 : index
    %c0_5 = arith.constant 0 : index
    %18 = vector.load %arg0[%c0, %c0_5] : memref<32x16xf32, #tpu.memory_space<vmem>>, vector<32x16xf32>
    %c0_6 = arith.constant 0 : index
    %c0_7 = arith.constant 0 : index
    %19 = vector.load %arg2[%c0_6, %c0_7] : memref<16x32xf32, #tpu.memory_space<vmem>>, vector<16x32xf32>
    %cst_8 = arith.constant dense<0.000000e+00> : vector<32x32xf32>
    %20 = tpu.matmul %18, %19, %cst_8 {dimension_numbers = #tpu.dot_dimension_numbers<[1], [0], [0], [1], [0, 0, 1, 1], [], []>, precision = #tpu.contract_precision<fp32>} : vector<32x16xf32>, vector<16x32xf32>, vector<32x32xf32> -> vector<32x32xf32>
    %c0_9 = arith.constant 0 : index
    %c0_10 = arith.constant 0 : index
    %21 = vector.load %arg1[%c0_9, %c0_10] : memref<32x32xf32, #tpu.memory_space<vmem>>, vector<32x32xf32>
    %22 = arith.addf %20, %21 : vector<32x32xf32>
    %cst_11 = arith.constant 0.000000e+00 : f32
    %23 = vector.broadcast %cst_11 : f32 to vector<32x32xf32>
    %c0_12 = arith.constant 0 : index
    %c0_13 = arith.constant 0 : index
    %c0_14 = arith.constant 0 : index
    %24 = vector.load %arg3[%c0_12, %c0_13, %c0_14] : memref<8x32x32xf32, #tpu.memory_space<vmem>>, vector<1x32x32xf32>
    %25 = vector.shape_cast %24 : vector<1x32x32xf32> to vector<32x32xf32>
    %cst_15 = arith.constant dense<0.000000e+00> : vector<32x32xf32>
    %26 = tpu.matmul %22, %25, %cst_15 {dimension_numbers = #tpu.dot_dimension_numbers<[1], [0], [0], [1], [0, 0, 1, 1], [], []>, precision = #tpu.contract_precision<fp32>} : vector<32x32xf32>, vector<32x32xf32>, vector<32x32xf32> -> vector<32x32xf32>
    %c0_16 = arith.constant 0 : index
    %c0_17 = arith.constant 0 : index
    %c0_18 = arith.constant 0 : index
    %27 = vector.load %arg4[%c0_16, %c0_17, %c0_18] : memref<8x1x32xf32, #tpu.memory_space<vmem>>, vector<1x1x32xf32>
    %28 = vector.shape_cast %27 : vector<1x1x32xf32> to vector<1x32xf32>
    %29 = vector.broadcast %28 : vector<1x32xf32> to vector<32x32xf32>
    %30 = arith.addf %26, %29 : vector<32x32xf32>
    %cst_19 = arith.constant dense<0.000000e+00> : vector<32x32xf32>
    %31 = tpu.matmul %30, %22, %cst_19 {dimension_numbers = #tpu.dot_dimension_numbers<[1], [1], [0], [0], [0, 0, 1, 0], [], []>, precision = #tpu.contract_precision<fp32>} : vector<32x32xf32>, vector<32x32xf32>, vector<32x32xf32> -> vector<32x32xf32>
    %32 = arith.addf %31, %17 : vector<32x32xf32>
    %cst_20 = arith.constant dense<0xFF800000> : vector<32xf32>
    %33 = vector.multi_reduction <maximumf>, %32, %cst_20 [1] : vector<32x32xf32> to vector<32xf32>
    %34 = vector.shape_cast %33 : vector<32xf32> to vector<32x1xf32>
    %35 = vector.broadcast %34 : vector<32x1xf32> to vector<32x32xf32>
    %36 = arith.subf %32, %35 : vector<32x32xf32>
    %37 = math.exp %36 : vector<32x32xf32>
    %cst_21 = arith.constant dense<0.000000e+00> : vector<32xf32>
    %38 = vector.multi_reduction <add>, %37, %cst_21 [1] : vector<32x32xf32> to vector<32xf32>
    %39 = vector.shape_cast %38 : vector<32xf32> to vector<32x1xf32>
    %40 = vector.broadcast %39 : vector<32x1xf32> to vector<32x32xf32>
    %41 = arith.divf %37, %40 : vector<32x32xf32>
    %c0_22 = arith.constant 0 : index
    %c0_23 = arith.constant 0 : index
    %c0_24 = arith.constant 0 : index
    %42 = vector.load %arg5[%c0_22, %c0_23, %c0_24] : memref<8x32x32xf32, #tpu.memory_space<vmem>>, vector<1x32x32xf32>
    %43 = vector.shape_cast %42 : vector<1x32x32xf32> to vector<32x32xf32>
    %cst_25 = arith.constant dense<0.000000e+00> : vector<32x32xf32>
    %44 = tpu.matmul %22, %43, %cst_25 {dimension_numbers = #tpu.dot_dimension_numbers<[1], [0], [0], [1], [0, 0, 1, 1], [], []>, precision = #tpu.contract_precision<fp32>} : vector<32x32xf32>, vector<32x32xf32>, vector<32x32xf32> -> vector<32x32xf32>
    %cst_26 = arith.constant dense<0.000000e+00> : vector<32x32xf32>
    %45 = tpu.matmul %41, %44, %cst_26 {dimension_numbers = #tpu.dot_dimension_numbers<[1], [0], [0], [1], [0, 0, 1, 1], [], []>, precision = #tpu.contract_precision<fp32>} : vector<32x32xf32>, vector<32x32xf32>, vector<32x32xf32> -> vector<32x32xf32>
    %46 = arith.addf %23, %45 : vector<32x32xf32>
    %c1 = arith.constant 1 : index
    %c0_27 = arith.constant 0 : index
    %c0_28 = arith.constant 0 : index
    %47 = vector.load %arg3[%c1, %c0_27, %c0_28] : memref<8x32x32xf32, #tpu.memory_space<vmem>>, vector<1x32x32xf32>
    %48 = vector.shape_cast %47 : vector<1x32x32xf32> to vector<32x32xf32>
    %cst_29 = arith.constant dense<0.000000e+00> : vector<32x32xf32>
    %49 = tpu.matmul %22, %48, %cst_29 {dimension_numbers = #tpu.dot_dimension_numbers<[1], [0], [0], [1], [0, 0, 1, 1], [], []>, precision = #tpu.contract_precision<fp32>} : vector<32x32xf32>, vector<32x32xf32>, vector<32x32xf32> -> vector<32x32xf32>
    %c1_30 = arith.constant 1 : index
    %c0_31 = arith.constant 0 : index
    %c0_32 = arith.constant 0 : index
    %50 = vector.load %arg4[%c1_30, %c0_31, %c0_32] : memref<8x1x32xf32, #tpu.memory_space<vmem>>, vector<1x1x32xf32>
    %51 = vector.shape_cast %50 : vector<1x1x32xf32> to vector<1x32xf32>
    %52 = vector.broadcast %51 : vector<1x32xf32> to vector<32x32xf32>
    %53 = arith.addf %49, %52 : vector<32x32xf32>
    %cst_33 = arith.constant dense<0.000000e+00> : vector<32x32xf32>
    %54 = tpu.matmul %53, %22, %cst_33 {dimension_numbers = #tpu.dot_dimension_numbers<[1], [1], [0], [0], [0, 0, 1, 0], [], []>, precision = #tpu.contract_precision<fp32>} : vector<32x32xf32>, vector<32x32xf32>, vector<32x32xf32> -> vector<32x32xf32>
    %55 = arith.addf %54, %17 : vector<32x32xf32>
    %cst_34 = arith.constant dense<0xFF800000> : vector<32xf32>
    %56 = vector.multi_reduction <maximumf>, %55, %cst_34 [1] : vector<32x32xf32> to vector<32xf32>
    %57 = vector.shape_cast %56 : vector<32xf32> to vector<32x1xf32>
    %58 = vector.broadcast %57 : vector<32x1xf32> to vector<32x32xf32>
    %59 = arith.subf %55, %58 : vector<32x32xf32>
    %60 = math.exp %59 : vector<32x32xf32>
    %cst_35 = arith.constant dense<0.000000e+00> : vector<32xf32>
    %61 = vector.multi_reduction <add>, %60, %cst_35 [1] : vector<32x32xf32> to vector<32xf32>
    %62 = vector.shape_cast %61 : vector<32xf32> to vector<32x1xf32>
    %63 = vector.broadcast %62 : vector<32x1xf32> to vector<32x32xf32>
    %64 = arith.divf %60, %63 : vector<32x32xf32>
    %c1_36 = arith.constant 1 : index
    %c0_37 = arith.constant 0 : index
    %c0_38 = arith.constant 0 : index
    %65 = vector.load %arg5[%c1_36, %c0_37, %c0_38] : memref<8x32x32xf32, #tpu.memory_space<vmem>>, vector<1x32x32xf32>
    %66 = vector.shape_cast %65 : vector<1x32x32xf32> to vector<32x32xf32>
    %cst_39 = arith.constant dense<0.000000e+00> : vector<32x32xf32>
    %67 = tpu.matmul %22, %66, %cst_39 {dimension_numbers = #tpu.dot_dimension_numbers<[1], [0], [0], [1], [0, 0, 1, 1], [], []>, precision = #tpu.contract_precision<fp32>} : vector<32x32xf32>, vector<32x32xf32>, vector<32x32xf32> -> vector<32x32xf32>
    %cst_40 = arith.constant dense<0.000000e+00> : vector<32x32xf32>
    %68 = tpu.matmul %64, %67, %cst_40 {dimension_numbers = #tpu.dot_dimension_numbers<[1], [0], [0], [1], [0, 0, 1, 1], [], []>, precision = #tpu.contract_precision<fp32>} : vector<32x32xf32>, vector<32x32xf32>, vector<32x32xf32> -> vector<32x32xf32>
    %69 = arith.addf %46, %68 : vector<32x32xf32>
    %c2 = arith.constant 2 : index
    %c0_41 = arith.constant 0 : index
    %c0_42 = arith.constant 0 : index
    %70 = vector.load %arg3[%c2, %c0_41, %c0_42] : memref<8x32x32xf32, #tpu.memory_space<vmem>>, vector<1x32x32xf32>
    %71 = vector.shape_cast %70 : vector<1x32x32xf32> to vector<32x32xf32>
    %cst_43 = arith.constant dense<0.000000e+00> : vector<32x32xf32>
    %72 = tpu.matmul %22, %71, %cst_43 {dimension_numbers = #tpu.dot_dimension_numbers<[1], [0], [0], [1], [0, 0, 1, 1], [], []>, precision = #tpu.contract_precision<fp32>} : vector<32x32xf32>, vector<32x32xf32>, vector<32x32xf32> -> vector<32x32xf32>
    %c2_44 = arith.constant 2 : index
    %c0_45 = arith.constant 0 : index
    %c0_46 = arith.constant 0 : index
    %73 = vector.load %arg4[%c2_44, %c0_45, %c0_46] : memref<8x1x32xf32, #tpu.memory_space<vmem>>, vector<1x1x32xf32>
    %74 = vector.shape_cast %73 : vector<1x1x32xf32> to vector<1x32xf32>
    %75 = vector.broadcast %74 : vector<1x32xf32> to vector<32x32xf32>
    %76 = arith.addf %72, %75 : vector<32x32xf32>
    %cst_47 = arith.constant dense<0.000000e+00> : vector<32x32xf32>
    %77 = tpu.matmul %76, %22, %cst_47 {dimension_numbers = #tpu.dot_dimension_numbers<[1], [1], [0], [0], [0, 0, 1, 0], [], []>, precision = #tpu.contract_precision<fp32>} : vector<32x32xf32>, vector<32x32xf32>, vector<32x32xf32> -> vector<32x32xf32>
    %78 = arith.addf %77, %17 : vector<32x32xf32>
    %cst_48 = arith.constant dense<0xFF800000> : vector<32xf32>
    %79 = vector.multi_reduction <maximumf>, %78, %cst_48 [1] : vector<32x32xf32> to vector<32xf32>
    %80 = vector.shape_cast %79 : vector<32xf32> to vector<32x1xf32>
    %81 = vector.broadcast %80 : vector<32x1xf32> to vector<32x32xf32>
    %82 = arith.subf %78, %81 : vector<32x32xf32>
    %83 = math.exp %82 : vector<32x32xf32>
    %cst_49 = arith.constant dense<0.000000e+00> : vector<32xf32>
    %84 = vector.multi_reduction <add>, %83, %cst_49 [1] : vector<32x32xf32> to vector<32xf32>
    %85 = vector.shape_cast %84 : vector<32xf32> to vector<32x1xf32>
    %86 = vector.broadcast %85 : vector<32x1xf32> to vector<32x32xf32>
    %87 = arith.divf %83, %86 : vector<32x32xf32>
    %c2_50 = arith.constant 2 : index
    %c0_51 = arith.constant 0 : index
    %c0_52 = arith.constant 0 : index
    %88 = vector.load %arg5[%c2_50, %c0_51, %c0_52] : memref<8x32x32xf32, #tpu.memory_space<vmem>>, vector<1x32x32xf32>
    %89 = vector.shape_cast %88 : vector<1x32x32xf32> to vector<32x32xf32>
    %cst_53 = arith.constant dense<0.000000e+00> : vector<32x32xf32>
    %90 = tpu.matmul %22, %89, %cst_53 {dimension_numbers = #tpu.dot_dimension_numbers<[1], [0], [0], [1], [0, 0, 1, 1], [], []>, precision = #tpu.contract_precision<fp32>} : vector<32x32xf32>, vector<32x32xf32>, vector<32x32xf32> -> vector<32x32xf32>
    %cst_54 = arith.constant dense<0.000000e+00> : vector<32x32xf32>
    %91 = tpu.matmul %87, %90, %cst_54 {dimension_numbers = #tpu.dot_dimension_numbers<[1], [0], [0], [1], [0, 0, 1, 1], [], []>, precision = #tpu.contract_precision<fp32>} : vector<32x32xf32>, vector<32x32xf32>, vector<32x32xf32> -> vector<32x32xf32>
    %92 = arith.addf %69, %91 : vector<32x32xf32>
    %c3 = arith.constant 3 : index
    %c0_55 = arith.constant 0 : index
    %c0_56 = arith.constant 0 : index
    %93 = vector.load %arg3[%c3, %c0_55, %c0_56] : memref<8x32x32xf32, #tpu.memory_space<vmem>>, vector<1x32x32xf32>
    %94 = vector.shape_cast %93 : vector<1x32x32xf32> to vector<32x32xf32>
    %cst_57 = arith.constant dense<0.000000e+00> : vector<32x32xf32>
    %95 = tpu.matmul %22, %94, %cst_57 {dimension_numbers = #tpu.dot_dimension_numbers<[1], [0], [0], [1], [0, 0, 1, 1], [], []>, precision = #tpu.contract_precision<fp32>} : vector<32x32xf32>, vector<32x32xf32>, vector<32x32xf32> -> vector<32x32xf32>
    %c3_58 = arith.constant 3 : index
    %c0_59 = arith.constant 0 : index
    %c0_60 = arith.constant 0 : index
    %96 = vector.load %arg4[%c3_58, %c0_59, %c0_60] : memref<8x1x32xf32, #tpu.memory_space<vmem>>, vector<1x1x32xf32>
    %97 = vector.shape_cast %96 : vector<1x1x32xf32> to vector<1x32xf32>
    %98 = vector.broadcast %97 : vector<1x32xf32> to vector<32x32xf32>
    %99 = arith.addf %95, %98 : vector<32x32xf32>
    %cst_61 = arith.constant dense<0.000000e+00> : vector<32x32xf32>
    %100 = tpu.matmul %99, %22, %cst_61 {dimension_numbers = #tpu.dot_dimension_numbers<[1], [1], [0], [0], [0, 0, 1, 0], [], []>, precision = #tpu.contract_precision<fp32>} : vector<32x32xf32>, vector<32x32xf32>, vector<32x32xf32> -> vector<32x32xf32>
    %101 = arith.addf %100, %17 : vector<32x32xf32>
    %cst_62 = arith.constant dense<0xFF800000> : vector<32xf32>
    %102 = vector.multi_reduction <maximumf>, %101, %cst_62 [1] : vector<32x32xf32> to vector<32xf32>
    %103 = vector.shape_cast %102 : vector<32xf32> to vector<32x1xf32>
    %104 = vector.broadcast %103 : vector<32x1xf32> to vector<32x32xf32>
    %105 = arith.subf %101, %104 : vector<32x32xf32>
    %106 = math.exp %105 : vector<32x32xf32>
    %cst_63 = arith.constant dense<0.000000e+00> : vector<32xf32>
    %107 = vector.multi_reduction <add>, %106, %cst_63 [1] : vector<32x32xf32> to vector<32xf32>
    %108 = vector.shape_cast %107 : vector<32xf32> to vector<32x1xf32>
    %109 = vector.broadcast %108 : vector<32x1xf32> to vector<32x32xf32>
    %110 = arith.divf %106, %109 : vector<32x32xf32>
    %c3_64 = arith.constant 3 : index
    %c0_65 = arith.constant 0 : index
    %c0_66 = arith.constant 0 : index
    %111 = vector.load %arg5[%c3_64, %c0_65, %c0_66] : memref<8x32x32xf32, #tpu.memory_space<vmem>>, vector<1x32x32xf32>
    %112 = vector.shape_cast %111 : vector<1x32x32xf32> to vector<32x32xf32>
    %cst_67 = arith.constant dense<0.000000e+00> : vector<32x32xf32>
    %113 = tpu.matmul %22, %112, %cst_67 {dimension_numbers = #tpu.dot_dimension_numbers<[1], [0], [0], [1], [0, 0, 1, 1], [], []>, precision = #tpu.contract_precision<fp32>} : vector<32x32xf32>, vector<32x32xf32>, vector<32x32xf32> -> vector<32x32xf32>
    %cst_68 = arith.constant dense<0.000000e+00> : vector<32x32xf32>
    %114 = tpu.matmul %110, %113, %cst_68 {dimension_numbers = #tpu.dot_dimension_numbers<[1], [0], [0], [1], [0, 0, 1, 1], [], []>, precision = #tpu.contract_precision<fp32>} : vector<32x32xf32>, vector<32x32xf32>, vector<32x32xf32> -> vector<32x32xf32>
    %115 = arith.addf %92, %114 : vector<32x32xf32>
    %c0_69 = arith.constant 0 : index
    %c0_70 = arith.constant 0 : index
    %c0_71 = arith.constant 0 : index
    %116 = vector.load %arg9[%c0_69, %c0_70, %c0_71] : memref<14x1x32xf32, #tpu.memory_space<vmem>>, vector<1x1x32xf32>
    %117 = vector.shape_cast %116 : vector<1x1x32xf32> to vector<1x32xf32>
    %118 = vector.broadcast %117 : vector<1x32xf32> to vector<32x32xf32>
    %119 = arith.addf %115, %118 : vector<32x32xf32>
    %120 = arith.addf %22, %119 : vector<32x32xf32>
    %c1_72 = arith.constant 1 : index
    %c0_73 = arith.constant 0 : index
    %c0_74 = arith.constant 0 : index
    %121 = vector.load %arg9[%c1_72, %c0_73, %c0_74] : memref<14x1x32xf32, #tpu.memory_space<vmem>>, vector<1x1x32xf32>
    %122 = vector.shape_cast %121 : vector<1x1x32xf32> to vector<1x32xf32>
    %c2_75 = arith.constant 2 : index
    %c0_76 = arith.constant 0 : index
    %c0_77 = arith.constant 0 : index
    %123 = vector.load %arg9[%c2_75, %c0_76, %c0_77] : memref<14x1x32xf32, #tpu.memory_space<vmem>>, vector<1x1x32xf32>
    %124 = vector.shape_cast %123 : vector<1x1x32xf32> to vector<1x32xf32>
    %cst_78 = arith.constant dense<0.000000e+00> : vector<32xf32>
    %125 = vector.multi_reduction <add>, %120, %cst_78 [1] : vector<32x32xf32> to vector<32xf32>
    %126 = vector.shape_cast %125 : vector<32xf32> to vector<32x1xf32>
    %cst_79 = arith.constant 3.200000e+01 : f32
    %127 = vector.broadcast %cst_79 : f32 to vector<32x1xf32>
    %128 = arith.divf %126, %127 : vector<32x1xf32>
    %129 = vector.broadcast %128 : vector<32x1xf32> to vector<32x32xf32>
    %130 = arith.subf %120, %129 : vector<32x32xf32>
    %131 = vector.broadcast %128 : vector<32x1xf32> to vector<32x32xf32>
    %132 = arith.subf %120, %131 : vector<32x32xf32>
    %133 = arith.mulf %130, %132 : vector<32x32xf32>
    %cst_80 = arith.constant dense<0.000000e+00> : vector<32xf32>
    %134 = vector.multi_reduction <add>, %133, %cst_80 [1] : vector<32x32xf32> to vector<32xf32>
    %135 = vector.shape_cast %134 : vector<32xf32> to vector<32x1xf32>
    %cst_81 = arith.constant 3.200000e+01 : f32
    %136 = vector.broadcast %cst_81 : f32 to vector<32x1xf32>
    %137 = arith.divf %135, %136 : vector<32x1xf32>
    %138 = vector.broadcast %128 : vector<32x1xf32> to vector<32x32xf32>
    %139 = arith.subf %120, %138 : vector<32x32xf32>
    %cst_82 = arith.constant 9.99999974E-6 : f32
    %140 = vector.broadcast %cst_82 : f32 to vector<32x1xf32>
    %141 = arith.addf %137, %140 : vector<32x1xf32>
    %142 = math.rsqrt %141 : vector<32x1xf32>
    %143 = vector.broadcast %142 : vector<32x1xf32> to vector<32x32xf32>
    %144 = arith.mulf %139, %143 : vector<32x32xf32>
    %145 = vector.broadcast %122 : vector<1x32xf32> to vector<32x32xf32>
    %146 = arith.mulf %144, %145 : vector<32x32xf32>
    %147 = vector.broadcast %124 : vector<1x32xf32> to vector<32x32xf32>
    %148 = arith.addf %146, %147 : vector<32x32xf32>
    %c0_83 = arith.constant 0 : index
    %c0_84 = arith.constant 0 : index
    %c0_85 = arith.constant 0 : index
    %149 = vector.load %arg6[%c0_83, %c0_84, %c0_85] : memref<2x32x64xf32, #tpu.memory_space<vmem>>, vector<1x32x64xf32>
    %150 = vector.shape_cast %149 : vector<1x32x64xf32> to vector<32x64xf32>
    %cst_86 = arith.constant dense<0.000000e+00> : vector<32x64xf32>
    %151 = tpu.matmul %148, %150, %cst_86 {dimension_numbers = #tpu.dot_dimension_numbers<[1], [0], [0], [1], [0, 0, 1, 1], [], []>, precision = #tpu.contract_precision<fp32>} : vector<32x32xf32>, vector<32x64xf32>, vector<32x64xf32> -> vector<32x64xf32>
    %c0_87 = arith.constant 0 : index
    %c0_88 = arith.constant 0 : index
    %c0_89 = arith.constant 0 : index
    %152 = vector.load %arg7[%c0_87, %c0_88, %c0_89] : memref<2x1x64xf32, #tpu.memory_space<vmem>>, vector<1x1x64xf32>
    %153 = vector.shape_cast %152 : vector<1x1x64xf32> to vector<1x64xf32>
    %154 = vector.broadcast %153 : vector<1x64xf32> to vector<32x64xf32>
    %155 = arith.addf %151, %154 : vector<32x64xf32>
    %cst_90 = arith.constant 0.000000e+00 : f32
    %156 = vector.broadcast %cst_90 : f32 to vector<32x64xf32>
    %157 = arith.maximumf %155, %156 : vector<32x64xf32>
    %c0_91 = arith.constant 0 : index
    %c0_92 = arith.constant 0 : index
    %c0_93 = arith.constant 0 : index
    %158 = vector.load %arg8[%c0_91, %c0_92, %c0_93] : memref<2x64x32xf32, #tpu.memory_space<vmem>>, vector<1x64x32xf32>
    %159 = vector.shape_cast %158 : vector<1x64x32xf32> to vector<64x32xf32>
    %cst_94 = arith.constant dense<0.000000e+00> : vector<32x32xf32>
    %160 = tpu.matmul %157, %159, %cst_94 {dimension_numbers = #tpu.dot_dimension_numbers<[1], [0], [0], [1], [0, 0, 1, 1], [], []>, precision = #tpu.contract_precision<fp32>} : vector<32x64xf32>, vector<64x32xf32>, vector<32x32xf32> -> vector<32x32xf32>
    %c3_95 = arith.constant 3 : index
    %c0_96 = arith.constant 0 : index
    %c0_97 = arith.constant 0 : index
    %161 = vector.load %arg9[%c3_95, %c0_96, %c0_97] : memref<14x1x32xf32, #tpu.memory_space<vmem>>, vector<1x1x32xf32>
    %162 = vector.shape_cast %161 : vector<1x1x32xf32> to vector<1x32xf32>
    %163 = vector.broadcast %162 : vector<1x32xf32> to vector<32x32xf32>
    %164 = arith.addf %160, %163 : vector<32x32xf32>
    %165 = arith.addf %148, %164 : vector<32x32xf32>
    %c4 = arith.constant 4 : index
    %c0_98 = arith.constant 0 : index
    %c0_99 = arith.constant 0 : index
    %166 = vector.load %arg9[%c4, %c0_98, %c0_99] : memref<14x1x32xf32, #tpu.memory_space<vmem>>, vector<1x1x32xf32>
    %167 = vector.shape_cast %166 : vector<1x1x32xf32> to vector<1x32xf32>
    %c5 = arith.constant 5 : index
    %c0_100 = arith.constant 0 : index
    %c0_101 = arith.constant 0 : index
    %168 = vector.load %arg9[%c5, %c0_100, %c0_101] : memref<14x1x32xf32, #tpu.memory_space<vmem>>, vector<1x1x32xf32>
    %169 = vector.shape_cast %168 : vector<1x1x32xf32> to vector<1x32xf32>
    %cst_102 = arith.constant dense<0.000000e+00> : vector<32xf32>
    %170 = vector.multi_reduction <add>, %165, %cst_102 [1] : vector<32x32xf32> to vector<32xf32>
    %171 = vector.shape_cast %170 : vector<32xf32> to vector<32x1xf32>
    %cst_103 = arith.constant 3.200000e+01 : f32
    %172 = vector.broadcast %cst_103 : f32 to vector<32x1xf32>
    %173 = arith.divf %171, %172 : vector<32x1xf32>
    %174 = vector.broadcast %173 : vector<32x1xf32> to vector<32x32xf32>
    %175 = arith.subf %165, %174 : vector<32x32xf32>
    %176 = vector.broadcast %173 : vector<32x1xf32> to vector<32x32xf32>
    %177 = arith.subf %165, %176 : vector<32x32xf32>
    %178 = arith.mulf %175, %177 : vector<32x32xf32>
    %cst_104 = arith.constant dense<0.000000e+00> : vector<32xf32>
    %179 = vector.multi_reduction <add>, %178, %cst_104 [1] : vector<32x32xf32> to vector<32xf32>
    %180 = vector.shape_cast %179 : vector<32xf32> to vector<32x1xf32>
    %cst_105 = arith.constant 3.200000e+01 : f32
    %181 = vector.broadcast %cst_105 : f32 to vector<32x1xf32>
    %182 = arith.divf %180, %181 : vector<32x1xf32>
    %183 = vector.broadcast %173 : vector<32x1xf32> to vector<32x32xf32>
    %184 = arith.subf %165, %183 : vector<32x32xf32>
    %cst_106 = arith.constant 9.99999974E-6 : f32
    %185 = vector.broadcast %cst_106 : f32 to vector<32x1xf32>
    %186 = arith.addf %182, %185 : vector<32x1xf32>
    %187 = math.rsqrt %186 : vector<32x1xf32>
    %188 = vector.broadcast %187 : vector<32x1xf32> to vector<32x32xf32>
    %189 = arith.mulf %184, %188 : vector<32x32xf32>
    %190 = vector.broadcast %167 : vector<1x32xf32> to vector<32x32xf32>
    %191 = arith.mulf %189, %190 : vector<32x32xf32>
    %192 = vector.broadcast %169 : vector<1x32xf32> to vector<32x32xf32>
    %193 = arith.addf %191, %192 : vector<32x32xf32>
    %cst_107 = arith.constant 0.000000e+00 : f32
    %194 = vector.broadcast %cst_107 : f32 to vector<32x32xf32>
    %c4_108 = arith.constant 4 : index
    %c0_109 = arith.constant 0 : index
    %c0_110 = arith.constant 0 : index
    %195 = vector.load %arg3[%c4_108, %c0_109, %c0_110] : memref<8x32x32xf32, #tpu.memory_space<vmem>>, vector<1x32x32xf32>
    %196 = vector.shape_cast %195 : vector<1x32x32xf32> to vector<32x32xf32>
    %cst_111 = arith.constant dense<0.000000e+00> : vector<32x32xf32>
    %197 = tpu.matmul %193, %196, %cst_111 {dimension_numbers = #tpu.dot_dimension_numbers<[1], [0], [0], [1], [0, 0, 1, 1], [], []>, precision = #tpu.contract_precision<fp32>} : vector<32x32xf32>, vector<32x32xf32>, vector<32x32xf32> -> vector<32x32xf32>
    %c4_112 = arith.constant 4 : index
    %c0_113 = arith.constant 0 : index
    %c0_114 = arith.constant 0 : index
    %198 = vector.load %arg4[%c4_112, %c0_113, %c0_114] : memref<8x1x32xf32, #tpu.memory_space<vmem>>, vector<1x1x32xf32>
    %199 = vector.shape_cast %198 : vector<1x1x32xf32> to vector<1x32xf32>
    %200 = vector.broadcast %199 : vector<1x32xf32> to vector<32x32xf32>
    %201 = arith.addf %197, %200 : vector<32x32xf32>
    %cst_115 = arith.constant dense<0.000000e+00> : vector<32x32xf32>
    %202 = tpu.matmul %201, %193, %cst_115 {dimension_numbers = #tpu.dot_dimension_numbers<[1], [1], [0], [0], [0, 0, 1, 0], [], []>, precision = #tpu.contract_precision<fp32>} : vector<32x32xf32>, vector<32x32xf32>, vector<32x32xf32> -> vector<32x32xf32>
    %203 = arith.addf %202, %17 : vector<32x32xf32>
    %cst_116 = arith.constant dense<0xFF800000> : vector<32xf32>
    %204 = vector.multi_reduction <maximumf>, %203, %cst_116 [1] : vector<32x32xf32> to vector<32xf32>
    %205 = vector.shape_cast %204 : vector<32xf32> to vector<32x1xf32>
    %206 = vector.broadcast %205 : vector<32x1xf32> to vector<32x32xf32>
    %207 = arith.subf %203, %206 : vector<32x32xf32>
    %208 = math.exp %207 : vector<32x32xf32>
    %cst_117 = arith.constant dense<0.000000e+00> : vector<32xf32>
    %209 = vector.multi_reduction <add>, %208, %cst_117 [1] : vector<32x32xf32> to vector<32xf32>
    %210 = vector.shape_cast %209 : vector<32xf32> to vector<32x1xf32>
    %211 = vector.broadcast %210 : vector<32x1xf32> to vector<32x32xf32>
    %212 = arith.divf %208, %211 : vector<32x32xf32>
    %c4_118 = arith.constant 4 : index
    %c0_119 = arith.constant 0 : index
    %c0_120 = arith.constant 0 : index
    %213 = vector.load %arg5[%c4_118, %c0_119, %c0_120] : memref<8x32x32xf32, #tpu.memory_space<vmem>>, vector<1x32x32xf32>
    %214 = vector.shape_cast %213 : vector<1x32x32xf32> to vector<32x32xf32>
    %cst_121 = arith.constant dense<0.000000e+00> : vector<32x32xf32>
    %215 = tpu.matmul %193, %214, %cst_121 {dimension_numbers = #tpu.dot_dimension_numbers<[1], [0], [0], [1], [0, 0, 1, 1], [], []>, precision = #tpu.contract_precision<fp32>} : vector<32x32xf32>, vector<32x32xf32>, vector<32x32xf32> -> vector<32x32xf32>
    %cst_122 = arith.constant dense<0.000000e+00> : vector<32x32xf32>
    %216 = tpu.matmul %212, %215, %cst_122 {dimension_numbers = #tpu.dot_dimension_numbers<[1], [0], [0], [1], [0, 0, 1, 1], [], []>, precision = #tpu.contract_precision<fp32>} : vector<32x32xf32>, vector<32x32xf32>, vector<32x32xf32> -> vector<32x32xf32>
    %217 = arith.addf %194, %216 : vector<32x32xf32>
    %c5_123 = arith.constant 5 : index
    %c0_124 = arith.constant 0 : index
    %c0_125 = arith.constant 0 : index
    %218 = vector.load %arg3[%c5_123, %c0_124, %c0_125] : memref<8x32x32xf32, #tpu.memory_space<vmem>>, vector<1x32x32xf32>
    %219 = vector.shape_cast %218 : vector<1x32x32xf32> to vector<32x32xf32>
    %cst_126 = arith.constant dense<0.000000e+00> : vector<32x32xf32>
    %220 = tpu.matmul %193, %219, %cst_126 {dimension_numbers = #tpu.dot_dimension_numbers<[1], [0], [0], [1], [0, 0, 1, 1], [], []>, precision = #tpu.contract_precision<fp32>} : vector<32x32xf32>, vector<32x32xf32>, vector<32x32xf32> -> vector<32x32xf32>
    %c5_127 = arith.constant 5 : index
    %c0_128 = arith.constant 0 : index
    %c0_129 = arith.constant 0 : index
    %221 = vector.load %arg4[%c5_127, %c0_128, %c0_129] : memref<8x1x32xf32, #tpu.memory_space<vmem>>, vector<1x1x32xf32>
    %222 = vector.shape_cast %221 : vector<1x1x32xf32> to vector<1x32xf32>
    %223 = vector.broadcast %222 : vector<1x32xf32> to vector<32x32xf32>
    %224 = arith.addf %220, %223 : vector<32x32xf32>
    %cst_130 = arith.constant dense<0.000000e+00> : vector<32x32xf32>
    %225 = tpu.matmul %224, %193, %cst_130 {dimension_numbers = #tpu.dot_dimension_numbers<[1], [1], [0], [0], [0, 0, 1, 0], [], []>, precision = #tpu.contract_precision<fp32>} : vector<32x32xf32>, vector<32x32xf32>, vector<32x32xf32> -> vector<32x32xf32>
    %226 = arith.addf %225, %17 : vector<32x32xf32>
    %cst_131 = arith.constant dense<0xFF800000> : vector<32xf32>
    %227 = vector.multi_reduction <maximumf>, %226, %cst_131 [1] : vector<32x32xf32> to vector<32xf32>
    %228 = vector.shape_cast %227 : vector<32xf32> to vector<32x1xf32>
    %229 = vector.broadcast %228 : vector<32x1xf32> to vector<32x32xf32>
    %230 = arith.subf %226, %229 : vector<32x32xf32>
    %231 = math.exp %230 : vector<32x32xf32>
    %cst_132 = arith.constant dense<0.000000e+00> : vector<32xf32>
    %232 = vector.multi_reduction <add>, %231, %cst_132 [1] : vector<32x32xf32> to vector<32xf32>
    %233 = vector.shape_cast %232 : vector<32xf32> to vector<32x1xf32>
    %234 = vector.broadcast %233 : vector<32x1xf32> to vector<32x32xf32>
    %235 = arith.divf %231, %234 : vector<32x32xf32>
    %c5_133 = arith.constant 5 : index
    %c0_134 = arith.constant 0 : index
    %c0_135 = arith.constant 0 : index
    %236 = vector.load %arg5[%c5_133, %c0_134, %c0_135] : memref<8x32x32xf32, #tpu.memory_space<vmem>>, vector<1x32x32xf32>
    %237 = vector.shape_cast %236 : vector<1x32x32xf32> to vector<32x32xf32>
    %cst_136 = arith.constant dense<0.000000e+00> : vector<32x32xf32>
    %238 = tpu.matmul %193, %237, %cst_136 {dimension_numbers = #tpu.dot_dimension_numbers<[1], [0], [0], [1], [0, 0, 1, 1], [], []>, precision = #tpu.contract_precision<fp32>} : vector<32x32xf32>, vector<32x32xf32>, vector<32x32xf32> -> vector<32x32xf32>
    %cst_137 = arith.constant dense<0.000000e+00> : vector<32x32xf32>
    %239 = tpu.matmul %235, %238, %cst_137 {dimension_numbers = #tpu.dot_dimension_numbers<[1], [0], [0], [1], [0, 0, 1, 1], [], []>, precision = #tpu.contract_precision<fp32>} : vector<32x32xf32>, vector<32x32xf32>, vector<32x32xf32> -> vector<32x32xf32>
    %240 = arith.addf %217, %239 : vector<32x32xf32>
    %c6 = arith.constant 6 : index
    %c0_138 = arith.constant 0 : index
    %c0_139 = arith.constant 0 : index
    %241 = vector.load %arg3[%c6, %c0_138, %c0_139] : memref<8x32x32xf32, #tpu.memory_space<vmem>>, vector<1x32x32xf32>
    %242 = vector.shape_cast %241 : vector<1x32x32xf32> to vector<32x32xf32>
    %cst_140 = arith.constant dense<0.000000e+00> : vector<32x32xf32>
    %243 = tpu.matmul %193, %242, %cst_140 {dimension_numbers = #tpu.dot_dimension_numbers<[1], [0], [0], [1], [0, 0, 1, 1], [], []>, precision = #tpu.contract_precision<fp32>} : vector<32x32xf32>, vector<32x32xf32>, vector<32x32xf32> -> vector<32x32xf32>
    %c6_141 = arith.constant 6 : index
    %c0_142 = arith.constant 0 : index
    %c0_143 = arith.constant 0 : index
    %244 = vector.load %arg4[%c6_141, %c0_142, %c0_143] : memref<8x1x32xf32, #tpu.memory_space<vmem>>, vector<1x1x32xf32>
    %245 = vector.shape_cast %244 : vector<1x1x32xf32> to vector<1x32xf32>
    %246 = vector.broadcast %245 : vector<1x32xf32> to vector<32x32xf32>
    %247 = arith.addf %243, %246 : vector<32x32xf32>
    %cst_144 = arith.constant dense<0.000000e+00> : vector<32x32xf32>
    %248 = tpu.matmul %247, %193, %cst_144 {dimension_numbers = #tpu.dot_dimension_numbers<[1], [1], [0], [0], [0, 0, 1, 0], [], []>, precision = #tpu.contract_precision<fp32>} : vector<32x32xf32>, vector<32x32xf32>, vector<32x32xf32> -> vector<32x32xf32>
    %249 = arith.addf %248, %17 : vector<32x32xf32>
    %cst_145 = arith.constant dense<0xFF800000> : vector<32xf32>
    %250 = vector.multi_reduction <maximumf>, %249, %cst_145 [1] : vector<32x32xf32> to vector<32xf32>
    %251 = vector.shape_cast %250 : vector<32xf32> to vector<32x1xf32>
    %252 = vector.broadcast %251 : vector<32x1xf32> to vector<32x32xf32>
    %253 = arith.subf %249, %252 : vector<32x32xf32>
    %254 = math.exp %253 : vector<32x32xf32>
    %cst_146 = arith.constant dense<0.000000e+00> : vector<32xf32>
    %255 = vector.multi_reduction <add>, %254, %cst_146 [1] : vector<32x32xf32> to vector<32xf32>
    %256 = vector.shape_cast %255 : vector<32xf32> to vector<32x1xf32>
    %257 = vector.broadcast %256 : vector<32x1xf32> to vector<32x32xf32>
    %258 = arith.divf %254, %257 : vector<32x32xf32>
    %c6_147 = arith.constant 6 : index
    %c0_148 = arith.constant 0 : index
    %c0_149 = arith.constant 0 : index
    %259 = vector.load %arg5[%c6_147, %c0_148, %c0_149] : memref<8x32x32xf32, #tpu.memory_space<vmem>>, vector<1x32x32xf32>
    %260 = vector.shape_cast %259 : vector<1x32x32xf32> to vector<32x32xf32>
    %cst_150 = arith.constant dense<0.000000e+00> : vector<32x32xf32>
    %261 = tpu.matmul %193, %260, %cst_150 {dimension_numbers = #tpu.dot_dimension_numbers<[1], [0], [0], [1], [0, 0, 1, 1], [], []>, precision = #tpu.contract_precision<fp32>} : vector<32x32xf32>, vector<32x32xf32>, vector<32x32xf32> -> vector<32x32xf32>
    %cst_151 = arith.constant dense<0.000000e+00> : vector<32x32xf32>
    %262 = tpu.matmul %258, %261, %cst_151 {dimension_numbers = #tpu.dot_dimension_numbers<[1], [0], [0], [1], [0, 0, 1, 1], [], []>, precision = #tpu.contract_precision<fp32>} : vector<32x32xf32>, vector<32x32xf32>, vector<32x32xf32> -> vector<32x32xf32>
    %263 = arith.addf %240, %262 : vector<32x32xf32>
    %c7 = arith.constant 7 : index
    %c0_152 = arith.constant 0 : index
    %c0_153 = arith.constant 0 : index
    %264 = vector.load %arg3[%c7, %c0_152, %c0_153] : memref<8x32x32xf32, #tpu.memory_space<vmem>>, vector<1x32x32xf32>
    %265 = vector.shape_cast %264 : vector<1x32x32xf32> to vector<32x32xf32>
    %cst_154 = arith.constant dense<0.000000e+00> : vector<32x32xf32>
    %266 = tpu.matmul %193, %265, %cst_154 {dimension_numbers = #tpu.dot_dimension_numbers<[1], [0], [0], [1], [0, 0, 1, 1], [], []>, precision = #tpu.contract_precision<fp32>} : vector<32x32xf32>, vector<32x32xf32>, vector<32x32xf32> -> vector<32x32xf32>
    %c7_155 = arith.constant 7 : index
    %c0_156 = arith.constant 0 : index
    %c0_157 = arith.constant 0 : index
    %267 = vector.load %arg4[%c7_155, %c0_156, %c0_157] : memref<8x1x32xf32, #tpu.memory_space<vmem>>, vector<1x1x32xf32>
    %268 = vector.shape_cast %267 : vector<1x1x32xf32> to vector<1x32xf32>
    %269 = vector.broadcast %268 : vector<1x32xf32> to vector<32x32xf32>
    %270 = arith.addf %266, %269 : vector<32x32xf32>
    %cst_158 = arith.constant dense<0.000000e+00> : vector<32x32xf32>
    %271 = tpu.matmul %270, %193, %cst_158 {dimension_numbers = #tpu.dot_dimension_numbers<[1], [1], [0], [0], [0, 0, 1, 0], [], []>, precision = #tpu.contract_precision<fp32>} : vector<32x32xf32>, vector<32x32xf32>, vector<32x32xf32> -> vector<32x32xf32>
    %272 = arith.addf %271, %17 : vector<32x32xf32>
    %cst_159 = arith.constant dense<0xFF800000> : vector<32xf32>
    %273 = vector.multi_reduction <maximumf>, %272, %cst_159 [1] : vector<32x32xf32> to vector<32xf32>
    %274 = vector.shape_cast %273 : vector<32xf32> to vector<32x1xf32>
    %275 = vector.broadcast %274 : vector<32x1xf32> to vector<32x32xf32>
    %276 = arith.subf %272, %275 : vector<32x32xf32>
    %277 = math.exp %276 : vector<32x32xf32>
    %cst_160 = arith.constant dense<0.000000e+00> : vector<32xf32>
    %278 = vector.multi_reduction <add>, %277, %cst_160 [1] : vector<32x32xf32> to vector<32xf32>
    %279 = vector.shape_cast %278 : vector<32xf32> to vector<32x1xf32>
    %280 = vector.broadcast %279 : vector<32x1xf32> to vector<32x32xf32>
    %281 = arith.divf %277, %280 : vector<32x32xf32>
    %c7_161 = arith.constant 7 : index
    %c0_162 = arith.constant 0 : index
    %c0_163 = arith.constant 0 : index
    %282 = vector.load %arg5[%c7_161, %c0_162, %c0_163] : memref<8x32x32xf32, #tpu.memory_space<vmem>>, vector<1x32x32xf32>
    %283 = vector.shape_cast %282 : vector<1x32x32xf32> to vector<32x32xf32>
    %cst_164 = arith.constant dense<0.000000e+00> : vector<32x32xf32>
    %284 = tpu.matmul %193, %283, %cst_164 {dimension_numbers = #tpu.dot_dimension_numbers<[1], [0], [0], [1], [0, 0, 1, 1], [], []>, precision = #tpu.contract_precision<fp32>} : vector<32x32xf32>, vector<32x32xf32>, vector<32x32xf32> -> vector<32x32xf32>
    %cst_165 = arith.constant dense<0.000000e+00> : vector<32x32xf32>
    %285 = tpu.matmul %281, %284, %cst_165 {dimension_numbers = #tpu.dot_dimension_numbers<[1], [0], [0], [1], [0, 0, 1, 1], [], []>, precision = #tpu.contract_precision<fp32>} : vector<32x32xf32>, vector<32x32xf32>, vector<32x32xf32> -> vector<32x32xf32>
    %286 = arith.addf %263, %285 : vector<32x32xf32>
    %c6_166 = arith.constant 6 : index
    %c0_167 = arith.constant 0 : index
    %c0_168 = arith.constant 0 : index
    %287 = vector.load %arg9[%c6_166, %c0_167, %c0_168] : memref<14x1x32xf32, #tpu.memory_space<vmem>>, vector<1x1x32xf32>
    %288 = vector.shape_cast %287 : vector<1x1x32xf32> to vector<1x32xf32>
    %289 = vector.broadcast %288 : vector<1x32xf32> to vector<32x32xf32>
    %290 = arith.addf %286, %289 : vector<32x32xf32>
    %291 = arith.addf %193, %290 : vector<32x32xf32>
    %c7_169 = arith.constant 7 : index
    %c0_170 = arith.constant 0 : index
    %c0_171 = arith.constant 0 : index
    %292 = vector.load %arg9[%c7_169, %c0_170, %c0_171] : memref<14x1x32xf32, #tpu.memory_space<vmem>>, vector<1x1x32xf32>
    %293 = vector.shape_cast %292 : vector<1x1x32xf32> to vector<1x32xf32>
    %c8 = arith.constant 8 : index
    %c0_172 = arith.constant 0 : index
    %c0_173 = arith.constant 0 : index
    %294 = vector.load %arg9[%c8, %c0_172, %c0_173] : memref<14x1x32xf32, #tpu.memory_space<vmem>>, vector<1x1x32xf32>
    %295 = vector.shape_cast %294 : vector<1x1x32xf32> to vector<1x32xf32>
    %cst_174 = arith.constant dense<0.000000e+00> : vector<32xf32>
    %296 = vector.multi_reduction <add>, %291, %cst_174 [1] : vector<32x32xf32> to vector<32xf32>
    %297 = vector.shape_cast %296 : vector<32xf32> to vector<32x1xf32>
    %cst_175 = arith.constant 3.200000e+01 : f32
    %298 = vector.broadcast %cst_175 : f32 to vector<32x1xf32>
    %299 = arith.divf %297, %298 : vector<32x1xf32>
    %300 = vector.broadcast %299 : vector<32x1xf32> to vector<32x32xf32>
    %301 = arith.subf %291, %300 : vector<32x32xf32>
    %302 = vector.broadcast %299 : vector<32x1xf32> to vector<32x32xf32>
    %303 = arith.subf %291, %302 : vector<32x32xf32>
    %304 = arith.mulf %301, %303 : vector<32x32xf32>
    %cst_176 = arith.constant dense<0.000000e+00> : vector<32xf32>
    %305 = vector.multi_reduction <add>, %304, %cst_176 [1] : vector<32x32xf32> to vector<32xf32>
    %306 = vector.shape_cast %305 : vector<32xf32> to vector<32x1xf32>
    %cst_177 = arith.constant 3.200000e+01 : f32
    %307 = vector.broadcast %cst_177 : f32 to vector<32x1xf32>
    %308 = arith.divf %306, %307 : vector<32x1xf32>
    %309 = vector.broadcast %299 : vector<32x1xf32> to vector<32x32xf32>
    %310 = arith.subf %291, %309 : vector<32x32xf32>
    %cst_178 = arith.constant 9.99999974E-6 : f32
    %311 = vector.broadcast %cst_178 : f32 to vector<32x1xf32>
    %312 = arith.addf %308, %311 : vector<32x1xf32>
    %313 = math.rsqrt %312 : vector<32x1xf32>
    %314 = vector.broadcast %313 : vector<32x1xf32> to vector<32x32xf32>
    %315 = arith.mulf %310, %314 : vector<32x32xf32>
    %316 = vector.broadcast %293 : vector<1x32xf32> to vector<32x32xf32>
    %317 = arith.mulf %315, %316 : vector<32x32xf32>
    %318 = vector.broadcast %295 : vector<1x32xf32> to vector<32x32xf32>
    %319 = arith.addf %317, %318 : vector<32x32xf32>
    %c1_179 = arith.constant 1 : index
    %c0_180 = arith.constant 0 : index
    %c0_181 = arith.constant 0 : index
    %320 = vector.load %arg6[%c1_179, %c0_180, %c0_181] : memref<2x32x64xf32, #tpu.memory_space<vmem>>, vector<1x32x64xf32>
    %321 = vector.shape_cast %320 : vector<1x32x64xf32> to vector<32x64xf32>
    %cst_182 = arith.constant dense<0.000000e+00> : vector<32x64xf32>
    %322 = tpu.matmul %319, %321, %cst_182 {dimension_numbers = #tpu.dot_dimension_numbers<[1], [0], [0], [1], [0, 0, 1, 1], [], []>, precision = #tpu.contract_precision<fp32>} : vector<32x32xf32>, vector<32x64xf32>, vector<32x64xf32> -> vector<32x64xf32>
    %c1_183 = arith.constant 1 : index
    %c0_184 = arith.constant 0 : index
    %c0_185 = arith.constant 0 : index
    %323 = vector.load %arg7[%c1_183, %c0_184, %c0_185] : memref<2x1x64xf32, #tpu.memory_space<vmem>>, vector<1x1x64xf32>
    %324 = vector.shape_cast %323 : vector<1x1x64xf32> to vector<1x64xf32>
    %325 = vector.broadcast %324 : vector<1x64xf32> to vector<32x64xf32>
    %326 = arith.addf %322, %325 : vector<32x64xf32>
    %cst_186 = arith.constant 0.000000e+00 : f32
    %327 = vector.broadcast %cst_186 : f32 to vector<32x64xf32>
    %328 = arith.maximumf %326, %327 : vector<32x64xf32>
    %c1_187 = arith.constant 1 : index
    %c0_188 = arith.constant 0 : index
    %c0_189 = arith.constant 0 : index
    %329 = vector.load %arg8[%c1_187, %c0_188, %c0_189] : memref<2x64x32xf32, #tpu.memory_space<vmem>>, vector<1x64x32xf32>
    %330 = vector.shape_cast %329 : vector<1x64x32xf32> to vector<64x32xf32>
    %cst_190 = arith.constant dense<0.000000e+00> : vector<32x32xf32>
    %331 = tpu.matmul %328, %330, %cst_190 {dimension_numbers = #tpu.dot_dimension_numbers<[1], [0], [0], [1], [0, 0, 1, 1], [], []>, precision = #tpu.contract_precision<fp32>} : vector<32x64xf32>, vector<64x32xf32>, vector<32x32xf32> -> vector<32x32xf32>
    %c9 = arith.constant 9 : index
    %c0_191 = arith.constant 0 : index
    %c0_192 = arith.constant 0 : index
    %332 = vector.load %arg9[%c9, %c0_191, %c0_192] : memref<14x1x32xf32, #tpu.memory_space<vmem>>, vector<1x1x32xf32>
    %333 = vector.shape_cast %332 : vector<1x1x32xf32> to vector<1x32xf32>
    %334 = vector.broadcast %333 : vector<1x32xf32> to vector<32x32xf32>
    %335 = arith.addf %331, %334 : vector<32x32xf32>
    %336 = arith.addf %319, %335 : vector<32x32xf32>
    %c10 = arith.constant 10 : index
    %c0_193 = arith.constant 0 : index
    %c0_194 = arith.constant 0 : index
    %337 = vector.load %arg9[%c10, %c0_193, %c0_194] : memref<14x1x32xf32, #tpu.memory_space<vmem>>, vector<1x1x32xf32>
    %338 = vector.shape_cast %337 : vector<1x1x32xf32> to vector<1x32xf32>
    %c11 = arith.constant 11 : index
    %c0_195 = arith.constant 0 : index
    %c0_196 = arith.constant 0 : index
    %339 = vector.load %arg9[%c11, %c0_195, %c0_196] : memref<14x1x32xf32, #tpu.memory_space<vmem>>, vector<1x1x32xf32>
    %340 = vector.shape_cast %339 : vector<1x1x32xf32> to vector<1x32xf32>
    %cst_197 = arith.constant dense<0.000000e+00> : vector<32xf32>
    %341 = vector.multi_reduction <add>, %336, %cst_197 [1] : vector<32x32xf32> to vector<32xf32>
    %342 = vector.shape_cast %341 : vector<32xf32> to vector<32x1xf32>
    %cst_198 = arith.constant 3.200000e+01 : f32
    %343 = vector.broadcast %cst_198 : f32 to vector<32x1xf32>
    %344 = arith.divf %342, %343 : vector<32x1xf32>
    %345 = vector.broadcast %344 : vector<32x1xf32> to vector<32x32xf32>
    %346 = arith.subf %336, %345 : vector<32x32xf32>
    %347 = vector.broadcast %344 : vector<32x1xf32> to vector<32x32xf32>
    %348 = arith.subf %336, %347 : vector<32x32xf32>
    %349 = arith.mulf %346, %348 : vector<32x32xf32>
    %cst_199 = arith.constant dense<0.000000e+00> : vector<32xf32>
    %350 = vector.multi_reduction <add>, %349, %cst_199 [1] : vector<32x32xf32> to vector<32xf32>
    %351 = vector.shape_cast %350 : vector<32xf32> to vector<32x1xf32>
    %cst_200 = arith.constant 3.200000e+01 : f32
    %352 = vector.broadcast %cst_200 : f32 to vector<32x1xf32>
    %353 = arith.divf %351, %352 : vector<32x1xf32>
    %354 = vector.broadcast %344 : vector<32x1xf32> to vector<32x32xf32>
    %355 = arith.subf %336, %354 : vector<32x32xf32>
    %cst_201 = arith.constant 9.99999974E-6 : f32
    %356 = vector.broadcast %cst_201 : f32 to vector<32x1xf32>
    %357 = arith.addf %353, %356 : vector<32x1xf32>
    %358 = math.rsqrt %357 : vector<32x1xf32>
    %359 = vector.broadcast %358 : vector<32x1xf32> to vector<32x32xf32>
    %360 = arith.mulf %355, %359 : vector<32x32xf32>
    %361 = vector.broadcast %338 : vector<1x32xf32> to vector<32x32xf32>
    %362 = arith.mulf %360, %361 : vector<32x32xf32>
    %363 = vector.broadcast %340 : vector<1x32xf32> to vector<32x32xf32>
    %364 = arith.addf %362, %363 : vector<32x32xf32>
    %c12 = arith.constant 12 : index
    %c0_202 = arith.constant 0 : index
    %c0_203 = arith.constant 0 : index
    %365 = vector.load %arg9[%c12, %c0_202, %c0_203] : memref<14x1x32xf32, #tpu.memory_space<vmem>>, vector<1x1x32xf32>
    %366 = vector.shape_cast %365 : vector<1x1x32xf32> to vector<1x32xf32>
    %c13 = arith.constant 13 : index
    %c0_204 = arith.constant 0 : index
    %c0_205 = arith.constant 0 : index
    %367 = vector.load %arg9[%c13, %c0_204, %c0_205] : memref<14x1x32xf32, #tpu.memory_space<vmem>>, vector<1x1x32xf32>
    %368 = vector.shape_cast %367 : vector<1x1x32xf32> to vector<1x32xf32>
    %cst_206 = arith.constant dense<0.000000e+00> : vector<32xf32>
    %369 = vector.multi_reduction <add>, %364, %cst_206 [1] : vector<32x32xf32> to vector<32xf32>
    %370 = vector.shape_cast %369 : vector<32xf32> to vector<32x1xf32>
    %cst_207 = arith.constant 3.200000e+01 : f32
    %371 = vector.broadcast %cst_207 : f32 to vector<32x1xf32>
    %372 = arith.divf %370, %371 : vector<32x1xf32>
    %373 = vector.broadcast %372 : vector<32x1xf32> to vector<32x32xf32>
    %374 = arith.subf %364, %373 : vector<32x32xf32>
    %375 = vector.broadcast %372 : vector<32x1xf32> to vector<32x32xf32>
    %376 = arith.subf %364, %375 : vector<32x32xf32>
    %377 = arith.mulf %374, %376 : vector<32x32xf32>
    %cst_208 = arith.constant dense<0.000000e+00> : vector<32xf32>
    %378 = vector.multi_reduction <add>, %377, %cst_208 [1] : vector<32x32xf32> to vector<32xf32>
    %379 = vector.shape_cast %378 : vector<32xf32> to vector<32x1xf32>
    %cst_209 = arith.constant 3.200000e+01 : f32
    %380 = vector.broadcast %cst_209 : f32 to vector<32x1xf32>
    %381 = arith.divf %379, %380 : vector<32x1xf32>
    %382 = vector.broadcast %372 : vector<32x1xf32> to vector<32x32xf32>
    %383 = arith.subf %364, %382 : vector<32x32xf32>
    %cst_210 = arith.constant 9.99999974E-6 : f32
    %384 = vector.broadcast %cst_210 : f32 to vector<32x1xf32>
    %385 = arith.addf %381, %384 : vector<32x1xf32>
    %386 = math.rsqrt %385 : vector<32x1xf32>
    %387 = vector.broadcast %386 : vector<32x1xf32> to vector<32x32xf32>
    %388 = arith.mulf %383, %387 : vector<32x32xf32>
    %389 = vector.broadcast %366 : vector<1x32xf32> to vector<32x32xf32>
    %390 = arith.mulf %388, %389 : vector<32x32xf32>
    %391 = vector.broadcast %368 : vector<1x32xf32> to vector<32x32xf32>
    %392 = arith.addf %390, %391 : vector<32x32xf32>
    %393 = tpu.iota {dimensions = array<i32: 0>} : vector<8x32xi32>
    %394 = arith.sitofp %393 : vector<8x32xi32> to vector<8x32xf32>
    %395 = tpu.iota {dimensions = array<i32: 1>} : vector<8x32xi32>
    %396 = arith.sitofp %395 : vector<8x32xi32> to vector<8x32xf32>
    %cst_211 = arith.constant 5.000000e-01 : f32
    %397 = vector.broadcast %cst_211 : f32 to vector<8x32xf32>
    %398 = arith.addf %396, %397 : vector<8x32xf32>
    %cst_212 = arith.constant 2.500000e-01 : f32
    %399 = vector.broadcast %cst_212 : f32 to vector<8x32xf32>
    %400 = arith.mulf %398, %399 : vector<8x32xf32>
    %401 = math.floor %400 : vector<8x32xf32>
    %402 = arith.cmpf oeq, %394, %401 : vector<8x32xf32>
    %cst_213 = arith.constant 2.500000e-01 : f32
    %cst_214 = arith.constant 0.000000e+00 : f32
    %403 = vector.broadcast %cst_213 : f32 to vector<8x32xf32>
    %404 = vector.broadcast %cst_214 : f32 to vector<8x32xf32>
    %405 = arith.select %402, %403, %404 : vector<8x32xi1>, vector<8x32xf32>
    %cst_215 = arith.constant dense<0.000000e+00> : vector<8x32xf32>
    %406 = tpu.matmul %405, %392, %cst_215 {dimension_numbers = #tpu.dot_dimension_numbers<[1], [0], [0], [1], [0, 0, 1, 1], [], []>, precision = #tpu.contract_precision<fp32>} : vector<8x32xf32>, vector<32x32xf32>, vector<8x32xf32> -> vector<8x32xf32>
    %c0_216 = arith.constant 0 : index
    %c0_217 = arith.constant 0 : index
    %407 = vector.load %arg10[%c0_216, %c0_217] : memref<32x16xf32, #tpu.memory_space<vmem>>, vector<32x16xf32>
    %cst_218 = arith.constant dense<0.000000e+00> : vector<8x16xf32>
    %408 = tpu.matmul %406, %407, %cst_218 {dimension_numbers = #tpu.dot_dimension_numbers<[1], [0], [0], [1], [0, 0, 1, 1], [], []>, precision = #tpu.contract_precision<fp32>} : vector<8x32xf32>, vector<32x16xf32>, vector<8x16xf32> -> vector<8x16xf32>
    %c0_219 = arith.constant 0 : index
    %c0_220 = arith.constant 0 : index
    %409 = vector.load %arg11[%c0_219, %c0_220] : memref<1x16xf32, #tpu.memory_space<vmem>>, vector<1x16xf32>
    %410 = vector.broadcast %409 : vector<1x16xf32> to vector<8x16xf32>
    %411 = arith.addf %408, %410 : vector<8x16xf32>
    %c0_221 = arith.constant 0 : index
    %c0_222 = arith.constant 0 : index
    %412 = vector.load %arg12[%c0_221, %c0_222] : memref<8x16xf32, #tpu.memory_space<vmem>>, vector<8x16xf32>
    tpu.vector_store %arg12[%c0_221, %c0_222], %411 {strides = array<i32>} : memref<8x16xf32, #tpu.memory_space<vmem>>, vector<8x16xf32>,
    return
  }
}

</mosaic_0001>

<bundles_post_ra>
// kernel: mental_mini_forward.1
= control target key start
LH: loop header
LB: loop body
LE: loop exit
PB: predicated region body
PF: predicated region fallthrough
CT: control target
= control target key end

     0   :  { %17 = vsyncpa [#allocation3], 0  ;;  %s36715_s0 = inlined_call_operand.vmem [shape: f32[32,16], index: 0, kind: input, shape index: {}]   ;;  %s36716_s1 = inlined_call_operand.vmem [shape: f32[32,32], index: 1, kind: input, shape index: {}]   ;;  %s36717_s2 = inlined_call_operand.vmem [shape: f32[16,32], index: 2, kind: input, shape index: {}]   ;;  %s36718_s3 = inlined_call_operand.vmem [shape: f32[8,32,32], index: 3, kind: input, shape index: {}]   ;;  %s36719_s4 = inlined_call_operand.vmem [shape: f32[8,1,32], index: 4, kind: input, shape index: {}]   ;;  %s36720_s5 = inlined_call_operand.hbm [shape: f32[8,32,32], index: 5, kind: input, shape index: {}]   ;;  %s36721_s6 = inlined_call_operand.vmem [shape: f32[2,32,64], index: 6, kind: input, shape index: {}]   ;;  %s36722_s7 = inlined_call_operand.vmem [shape: f32[2,1,64], index: 7, kind: input, shape index: {}]   ;;  %s36723_s8 = inlined_call_operand.vmem [shape: f32[2,64,32], index: 8, kind: input, shape index: {}]   ;;  %s36724_s9 = inlined_call_operand.vmem [shape: f32[14,1,32], index: 9, kind: input, shape index: {}]   ;;  %s36725_s10 = inlined_call_operand.vmem [shape: f32[32,16], index: 10, kind: input, shape index: {}]   ;;  %s36726_s11 = inlined_call_operand.vmem [shape: f32[1,16], index: 11, kind: input, shape index: {}]   ;;  %s36727_s12 = inlined_call_operand.hbm [shape: f32[8,16], index: 12, kind: output, shape index: {}]  }
   0x1   :  { %18 = vsyncpa [#allocation4], 0  ;;  %s33461_s21 = smov [#allocation2]   ;;  %s33413_s25 = scalar_lea.hbm %s36720_s5, 4096 }
   0x2   :  { %s34_s22 = sshll.u32 %s33461_s21, 4  ;;  %p33414_p0 = scmp.ne.s32.totalorder %s36720_s5, %s33413_s25  ;;  %s35_s22 = int_to_ptr.vmem [resolvable:$true] %s34_s22 }
   0x3   :  { %p33417_p1 = scmp.lt.u32.totalorder %s33413_s25, %s36720_s5 }
   0x5   :  { %p33419_p2 = pnand %p33417_p1, %p33414_p0 }
   0x7   :  { %33422 = shalt.err (!%p33419_p2)
}
   0x8   :  { %s33423_s30 = scalar_lea.vmem %s35_s22, 4096  ;;  %p33428_p4 = scmp.lt.s32.totalorder %s35_s22, %s35_s22 }
   0x9   :  { %p33424_p3 = scmp.ne.s32.totalorder %s35_s22, %s33423_s30  ;;  %p33429_p5 = scmp.lt.s32.totalorder %s33423_s30, %s33423_s30 }
   0xb   :  { %p33430_p6 = por %p33429_p5, %p33428_p4 }
   0xd   :  { %p33431_p7 = pnand %p33430_p6, %p33424_p3 }
   0xf   :  { %33434 = shalt.err (!%p33431_p7)
}
  0x10   :  { %s33462_s13 = smov 128   ;;  %s33463_s14 = smov 8  }
  0x11   :  { %40 = dma.hbm_to_vmem [thread:$0]  %s36720_s5, 4096, %s35_s22, [#allocation3], %s33462_s13, %s33462_s13, %s33463_s14  }
  0x12   :  { %33457 = dma.done.wait [#allocation3], 4096  }
  0x13   :  { %33458 = vsyncadd [#allocation3], 4294963200  ;;  %vm101_vm0 = vcmask 130048   ;;  %v95_v0 = vld [vmem:[%s36717_s2] sm:$0xff]  ;;  %v96_v1 = vld [vmem:[%s36717_s2 + $0x8] sm:$0xff]  ;;  %vm713_vm1 = vcmask 261120  }
  0x14   :  { %v91_v2 = vld [vmem:[%s36715_s0] sm:$0xff]  ;;  %v115_v3 = vand.u32 4294901760, %v95_v0  ;;  %v118_v4 = vand.u32 4294901760, %v96_v1  ;;  %v92_v6 = vld [vmem:[%s36715_s0 + $0x8] sm:$0xff]  ;;  %v93_v7 = vld [vmem:[%s36715_s0 + $0x10] sm:$0xff]  ;;  %vm11637_vm6 = vcmask 523264  }
  0x15   :  { %v103_v5 = vsel %vm101_vm0, %v91_v2, 0  ;;  %v94_v8 = vld [vmem:[%s36715_s0 + $0x18] sm:$0xff]  ;;  %v106_v10 = vsel %vm101_vm0, %v92_v6, 0  ;;  %v109_v11 = vsel %vm101_vm0, %v93_v7, 0  ;;  %v702_v44 = vld [vmem:[%s36718_s3] sm:$0xff]  ;;  %v703_v45 = vld [vmem:[%s36718_s3 + $0x8] sm:$0xff] }
  0x16   :  { %v33565_v9 = vand.u32 4294901760, %v103_v5  ;;  %v112_v12 = vsel %vm101_vm0, %v94_v8, 0  ;;  %v30448_v13 = vpack.c.bf16 %v118_v4, %v115_v3  ;;  %v223_v14 = vsub.f32 %v95_v0, %v115_v3  ;;  %v704_v50 = vld [vmem:[%s36718_s3 + $0x10] sm:$0xff]  ;;  %v705_v51 = vld [vmem:[%s36718_s3 + $0x18] sm:$0xff] }
  0x17   :  { %v230_v15 = vsub.f32 %v96_v1, %v118_v4  ;;  %v191_v16 = vand.u32 4294901760, %v106_v10  ;;  %v201_v17 = vand.u32 4294901760, %v109_v11  ;;  %v211_v18 = vand.u32 4294901760, %v112_v12 }
  0x18   :  { %27150 = vmatprep.mubr.f32.mxu0 %v33565_v9  ;;  %v182_v19 = vsub.f32 %v103_v5, %v33565_v9  ;;  %v224_v20 = vand.u32 4294901760, %v223_v14  ;;  %30449 = vmatprep.subr.bf16.mxu1 %v30448_v13  ;;  %v727_v46 = vand.u32 4294901760, %v702_v44  ;;  %v730_v47 = vand.u32 4294901760, %v703_v45 }
  0x19   :  { %v231_v21 = vand.u32 4294901760, %v230_v15  ;;  %v192_v22 = vsub.f32 %v106_v10, %v191_v16  ;;  %v202_v23 = vsub.f32 %v109_v11, %v201_v17  ;;  %v212_v24 = vsub.f32 %v112_v12, %v211_v18  ;;  %30451 = vmatpush3.bf16.msra.mxu1 %v30448_v13 }
  0x1a   :  { %v183_v25 = vand.u32 4294901760, %v182_v19  ;;  %v225_v26 = vsub.f32 %v223_v14, %v224_v20  ;;  %v30456_v39 = vpack.c.bf16 %v230_v15, %v223_v14  ;;  %v837_v48 = vsub.f32 %v702_v44, %v727_v46 }
  0x1b   :  { %v232_v27 = vsub.f32 %v230_v15, %v231_v21  ;;  %v193_v28 = vand.u32 4294901760, %v192_v22  ;;  %v203_v29 = vand.u32 4294901760, %v202_v23  ;;  %v213_v30 = vand.u32 4294901760, %v212_v24 }
  0x1c   :  { %v184_v31 = vsub.f32 %v182_v19, %v183_v25  ;;  %v226_v32 = vand.u32 4294901760, %v225_v26  ;;  %v30464_v43 = vpack.c.bf16 %v231_v21, %v224_v20  ;;  %v33580_v49 = vpack.c.bf16 %v730_v47, %v727_v46  ;;  %v100_v20 = vld [vmem:[%s36716_s1 + $0x18] sm:$0xff]  ;;  %v99_v21 = vld [vmem:[%s36716_s1 + $0x10] sm:$0xff] }
  0x1d   :  { %v233_v33 = vand.u32 4294901760, %v232_v27  ;;  %v194_v34 = vsub.f32 %v192_v22, %v193_v28  ;;  %v204_v36 = vsub.f32 %v202_v23, %v203_v29  ;;  %v214_v37 = vsub.f32 %v212_v24, %v213_v30 }
  0x1e   :  { %v185_v35 = vand.u32 4294901760, %v184_v31  ;;  %v844_v52 = vsub.f32 %v703_v45, %v730_v47  ;;  %v733_v53 = vand.u32 4294901760, %v704_v50  ;;  %v736_v54 = vand.u32 4294901760, %v705_v51  ;;  %30473 = vmatprep.subr.bf16.mxu1 %v33580_v49 }
  0x1f   :  { %v30452_v38 = vpack.c.bf16 %v233_v33, %v226_v32  ;;  %v195_v40 = vand.u32 4294901760, %v194_v34  ;;  %v205_v41 = vand.u32 4294901760, %v204_v36  ;;  %v215_v42 = vand.u32 4294901760, %v214_v37 }
  0x20   :  { %27140 = vmatprep.mubr.f32.mxu1 %v185_v35  ;;  %v838_v55 = vand.u32 4294901760, %v837_v48  ;;  %v845_v56 = vand.u32 4294901760, %v844_v52  ;;  %v33590_v57 = vpack.c.bf16 %v736_v54, %v733_v53  ;;  %v851_v60 = vsub.f32 %v704_v50, %v733_v53 }
  0x21   :  { %30453 = vmatprep.subr.bf16.mxu0 %v30452_v38  ;;  %27141 = vmatmul.mubr.f32.vlgmr.msra.gmra.mrb[0].mxu1 %v195_v40  ;;  %v858_v61 = vsub.f32 %v705_v51, %v736_v54  ;;  %v33594_v8 = vpack.c.bf16 %v844_v52, %v837_v48  ;;  %vm33466_vm7 = vmmov 0  }
  0x22   :  { %30455 = vmatpush3.bf16.msra.mxu0 %v30452_v38  ;;  %27143 = vmatprep.mubr.f32.mxu1 %v205_v41  ;;  %v839_v58 = vsub.f32 %v837_v48, %v838_v55  ;;  %v846_v59 = vsub.f32 %v844_v52, %v845_v56  ;;  %v852_v0 = vand.u32 4294901760, %v851_v60  ;;  %v33598_v10 = vpack.c.bf16 %v845_v56, %v838_v55 }
  0x23   :  { %30457 = vmatprep.subr.bf16.mxu0 %v30456_v39  ;;  %30475 = vmatpush3.bf16.msra.mxu1 %v33580_v49  ;;  %v859_v1 = vand.u32 4294901760, %v858_v61 }
  0x24   :  { %30477 = vmatprep.subr.bf16.mxu1 %v33590_v57  ;;  %v840_v62 = vand.u32 4294901760, %v839_v58  ;;  %v847_v63 = vand.u32 4294901760, %v846_v59  ;;  %v853_v3 = vsub.f32 %v851_v60, %v852_v0 }
  0x25   :  { %27151 = vmatmul.mubr.f32.vlgmr.msra.gmra.mrb[0].mxu0 %v191_v16  ;;  %27144 = vmatmul.mubr.f32.gmra.mrb[2].mxu1 %v215_v42  ;;  %v860_v4 = vsub.f32 %v858_v61, %v859_v1  ;;  %v33600_v11 = vpack.c.bf16 %v859_v1, %v852_v0 }
  0x26   :  { %30459 = vmatpush3.bf16.msra.mxu0 %v30456_v39  ;;  %27153 = vmatprep.mubr.f32.mxu0 %v201_v17  ;;  %v30480_v2 = vpack.c.bf16 %v847_v63, %v840_v62  ;;  %v854_v5 = vand.u32 4294901760, %v853_v3  ;;  %v2011_v62 = vld [vmem:[#allocation2 + $0x8] sm:$0xff] }
  0x27   :  { %30461 = vmatprep.subr.bf16.mxu0 %v30448_v13  ;;  %30479 = vmatpush3.bf16.msra.mxu1 %v33590_v57  ;;  %v861_v6 = vand.u32 4294901760, %v860_v4  ;;  %v2018_v0 = vand.u32 4294901760, %v2011_v62 }
  0x28   :  { %30481 = vmatprep.subr.bf16.mxu1 %v30480_v2 }
  0x29   :  { %27154 = vmatmul.mubr.f32.gmra.mrb[2].mxu0 %v211_v18  ;;  %v30484_v7 = vpack.c.bf16 %v861_v6, %v854_v5  ;;  %v2132_v3 = vsub.f32 %v2011_v62, %v2018_v0 }
  0x2a   :  { %27160 = vmatprep.mubr.f32.mxu0 %v182_v19 }
  0x2b   :  { %v2133_v5 = vand.u32 4294901760, %v2132_v3 }
  0x2d   :  { %27161 = vmatmul.mubr.f32.vlgmr.msra.gmra.mrb[0].mxu0 %v192_v22 }
  0x2e   :  { %30463 = vmatpush3.bf16.msra.mxu0 %v30448_v13  ;;  %27163 = vmatprep.mubr.f32.mxu0 %v202_v23 }
  0x2f   :  { %30465 = vmatprep.subr.bf16.mxu0 %v30464_v43 }
  0x31   :  { %27164 = vmatmul.mubr.f32.gmra.mrb[2].mxu0 %v212_v24 }
  0x32   :  { %27170 = vmatprep.mubr.f32.mxu0 %v183_v25 }
  0x35   :  { %27171 = vmatmul.mubr.f32.vlgmr.msra.gmra.mrb[0].mxu0 %v193_v28 }
  0x36   :  { %30467 = vmatpush3.bf16.msra.mxu0 %v30464_v43  ;;  %27173 = vmatprep.mubr.f32.mxu0 %v203_v29 }
  0x37   :  { %30469 = vmatprep.subr.bf16.mxu0 %v30448_v13 }
  0x39   :  { %27174 = vmatmul.mubr.f32.gmra.mrb[2].mxu0 %v213_v30 }
  0x3a   :  { %27180 = vmatprep.mubr.f32.mxu0 %v33565_v9 }
  0x3d   :  { %27181 = vmatmul.mubr.f32.vlgmr.msra.gmra.mrb[0].mxu0 %v191_v16 }
  0x3e   :  { %30471 = vmatpush3.bf16.msra.mxu0 %v30448_v13  ;;  %27183 = vmatprep.mubr.f32.mxu0 %v201_v17 }
  0x41   :  { %27184 = vmatmul.mubr.f32.gmra.mrb[2].mxu0 %v211_v18 }
  0x42   :  { %27190 = vmatprep.mubr.f32.mxu0 %v33565_v9  ;;  %v33596_v9 = vpack.c.bf16 %v858_v61, %v851_v60 }
  0x45   :  { %27191 = vmatmul.mubr.f32.vlgmr.msra.gmra.mrb[0].mxu0 %v191_v16  ;;  %v98_v16 = vld [vmem:[%s36716_s1 + $0x8] sm:$0xff] }
  0x46   :  { %27193 = vmatprep.mubr.f32.mxu0 %v201_v17  ;;  %v97_v17 = vld [vmem:[%s36716_s1] sm:$0xff] }
  0x49   :  { %27194 = vmatmul.mubr.f32.gmra.mrb[2].mxu0 %v211_v18 }
  0xf4   :  { %v27142_v12 = vpop.f32.mrb[0].mxu1 }
  0xf5   :  { %v187_v13 = vpop.f32.mrb[1].mxu1  ;;  %v198_v18 = vadd.f32 %v27142_v12, %v98_v16 }
  0xf6   :  { %v188_v19 = vadd.f32 %v187_v13, %v97_v17  ;;  %v25175_v13 = vld [vmem:[%s36719_s4] ss:$0 sm:$0xff] }
  0xf8   :  { %v27145_v14 = vpop.f32.mrb[2].mxu1 }
  0xf9   :  { %v207_v15 = vpop.f32.mrb[3].mxu1  ;;  %v218_v24 = vadd.f32 %v27145_v14, %v100_v20 }
  0xfa   :  { %v208_v27 = vadd.f32 %v207_v15, %v99_v21 }
 0x118   :  { %v27192_v22 = vpop.f32.mrb[0].mxu0 }
 0x119   :  { %v33614_v23 = vadd.f32 %v27192_v22, %v198_v18  ;;  %v680_v25 = vpop.f32.mrb[1].mxu0  ;;  %v2012_v18 = vld [vmem:[#allocation2 + $0x10] sm:$0xff] }
 0x11a   :  { %v33616_v26 = vadd.f32 %v680_v25, %v188_v19  ;;  %v2013_v19 = vld [vmem:[#allocation2 + $0x18] sm:$0xff] }
 0x11b   :  { %36774 = vst [vmem:[#allocation8_spill] sm:$0xff] %v33614_v23  ;;  %v718_v28 = vsel %vm713_vm1, %v33614_v23, 0 }
 0x11c   :  { %36775 = vst [vmem:[#allocation9_spill] sm:$0xff] %v33616_v26  ;;  %v33620_v29 = vand.u32 4294901760, %v718_v28  ;;  %v715_v30 = vsel %vm713_vm1, %v33616_v26, 0  ;;  %v27195_v31 = vpop.f32.mrb[2].mxu0 }
 0x11d   :  { %v33624_v32 = vand.u32 4294901760, %v715_v30  ;;  %v33626_v33 = vadd.f32 %v27195_v31, %v218_v24  ;;  %v692_v34 = vpop.f32.mrb[3].mxu0  ;;  %v2024_v31 = vand.u32 4294901760, %v2013_v19 }
 0x11e   :  { %v33629_v35 = vsub.f32 %v718_v28, %v33620_v29  ;;  %v33631_v36 = vadd.f32 %v692_v34, %v208_v27 }
 0x11f   :  { %36776 = vst [vmem:[#allocation10_spill] sm:$0xff] %v33626_v33  ;;  %v33634_v37 = vsub.f32 %v715_v30, %v33624_v32  ;;  %v724_v38 = vsel %vm713_vm1, %v33626_v33, 0  ;;  %v33732_v61 = vpack.c.bf16 %v33620_v29, %v33624_v32  ;;  %v2021_v30 = vand.u32 4294901760, %v2012_v18 }
 0x120   :  { %36777 = vst [vmem:[#allocation11_spill] sm:$0xff] %v33631_v36  ;;  %v33639_v39 = vand.u32 4294901760, %v33629_v35  ;;  %v33641_v40 = vand.u32 4294901760, %v724_v38  ;;  %v721_v41 = vsel %vm713_vm1, %v33631_v36, 0 }
 0x121   :  { %v33646_v42 = vand.u32 4294901760, %v33634_v37  ;;  %v33648_v43 = vand.u32 4294901760, %v721_v41  ;;  %v33700_v60 = vpack.c.bf16 %v33629_v35, %v33634_v37 }
 0x122   :  { %v33651_v44 = vsub.f32 %v724_v38, %v33641_v40  ;;  %v808_v45 = vsub.f32 %v33629_v35, %v33639_v39 }
 0x123   :  { %v33656_v46 = vsub.f32 %v721_v41, %v33648_v43  ;;  %v798_v47 = vsub.f32 %v33634_v37, %v33646_v42 }
 0x124   :  { %v33661_v48 = vand.u32 4294901760, %v33651_v44  ;;  %v33663_v50 = vand.u32 4294901760, %v808_v45 }
 0x125   :  { %v33666_v51 = vand.u32 4294901760, %v33656_v46  ;;  %v33668_v52 = vand.u32 4294901760, %v798_v47 }
 0x126   :  { %v828_v53 = vsub.f32 %v33651_v44, %v33661_v48 }
 0x127   :  { %27204 = vmatprep.mubr.f32.mxu1 %v33668_v52  ;;  %v33675_v54 = vpack.c.bf16 %v33663_v50, %v33668_v52  ;;  %v818_v55 = vsub.f32 %v33656_v46, %v33666_v51 }
 0x128   :  { %27205 = vmatmul.mubr.f32.vlgmr.msra.gmra.mrb[4].mxu1 %v33663_v50  ;;  %v33680_v56 = vand.u32 4294901760, %v828_v53 }
 0x129   :  { %30483 = vmatpush3.bf16.msra.mxu1 %v30480_v2  ;;  %30529 = vmatprep.subr.bf16.mxu0 %v33675_v54  ;;  %v33683_v58 = vand.u32 4294901760, %v818_v55 }
 0x12a   :  { %30531 = vmatpush3.bf16.xpose.msra.mxu0 %v33675_v54  ;;  %30485 = vmatprep.subr.bf16.mxu1 %v30484_v7 }
 0x12b   :  { %27207 = vmatprep.mubr.f32.mxu1 %v33683_v58  ;;  %v33689_v59 = vpack.c.bf16 %v33680_v56, %v33683_v58 }
 0x12c   :  { %27208 = vmatmul.mubr.f32.gmra.mrb[6].mxu1 %v33680_v56 }
 0x12d   :  { %30487 = vmatpush3.bf16.msra.mxu1 %v30484_v7  ;;  %27218 = vmatprep.mubr.f32.mxu1 %v33624_v32  ;;  %v2134_v7 = vsub.f32 %v2132_v3, %v2133_v5 }
 0x12e   :  { %30533 = vmatprep.subr.bf16.mxu0 %v33689_v59  ;;  %30489 = vmatprep.subr.bf16.mxu1 %v33594_v8 }
 0x130   :  { %27219 = vmatmul.mubr.f32.vlgmr.msra.gmra.mrb[4].mxu1 %v33620_v29 }
 0x131   :  { %30491 = vmatpush3.bf16.msra.mxu1 %v33594_v8  ;;  %27221 = vmatprep.mubr.f32.mxu1 %v33648_v43 }
 0x132   :  { %30535 = vmatpush3.bf16.xpose.msra.mxu0 %v33689_v59  ;;  %30493 = vmatprep.subr.bf16.mxu1 %v33596_v9 }
 0x133   :  { %30537 = vmatprep.subr.bf16.mxu0 %v33700_v60 }
 0x134   :  { %27222 = vmatmul.mubr.f32.gmra.mrb[6].mxu1 %v33641_v40 }
 0x135   :  { %30495 = vmatpush3.bf16.msra.mxu1 %v33596_v9  ;;  %27232 = vmatprep.mubr.f32.mxu1 %v33634_v37  ;;  %v2135_v9 = vand.u32 4294901760, %v2134_v7 }
 0x136   :  { %30497 = vmatprep.subr.bf16.mxu1 %v33580_v49 }
 0x138   :  { %27233 = vmatmul.mubr.f32.vlgmr.msra.gmra.mrb[4].mxu1 %v33629_v35 }
 0x139   :  { %30499 = vmatpush3.bf16.msra.mxu1 %v33580_v49  ;;  %27235 = vmatprep.mubr.f32.mxu1 %v33656_v46 }
 0x13a   :  { %30501 = vmatprep.subr.bf16.mxu1 %v33590_v57 }
 0x13c   :  { %27236 = vmatmul.mubr.f32.gmra.mrb[6].mxu1 %v33651_v44 }
 0x13d   :  { %30503 = vmatpush3.bf16.msra.mxu1 %v33590_v57  ;;  %27246 = vmatprep.mubr.f32.mxu1 %v33646_v42 }
 0x13e   :  { %30505 = vmatprep.subr.bf16.mxu1 %v33598_v10 }
 0x140   :  { %27247 = vmatmul.mubr.f32.vlgmr.msra.gmra.mrb[4].mxu1 %v33639_v39 }
 0x141   :  { %30507 = vmatpush3.bf16.msra.mxu1 %v33598_v10  ;;  %27249 = vmatprep.mubr.f32.mxu1 %v33666_v51 }
 0x142   :  { %30509 = vmatprep.subr.bf16.mxu1 %v33600_v11 }
 0x144   :  { %27250 = vmatmul.mubr.f32.gmra.mrb[6].mxu1 %v33661_v48 }
 0x145   :  { %30511 = vmatpush3.bf16.msra.mxu1 %v33600_v11  ;;  %27260 = vmatprep.mubr.f32.mxu1 %v33624_v32 }
 0x146   :  { %30513 = vmatprep.subr.bf16.mxu1 %v33580_v49 }
 0x148   :  { %27261 = vmatmul.mubr.f32.vlgmr.msra.gmra.mrb[4].mxu1 %v33620_v29 }
 0x149   :  { %30515 = vmatpush3.bf16.msra.mxu1 %v33580_v49  ;;  %27263 = vmatprep.mubr.f32.mxu1 %v33648_v43  ;;  %v33742_v49 = vpack.c.bf16 %v33641_v40, %v33648_v43 }
 0x14a   :  { %30517 = vmatprep.subr.bf16.mxu1 %v33590_v57 }
 0x14c   :  { %27264 = vmatmul.mubr.f32.gmra.mrb[6].mxu1 %v33641_v40 }
 0x14d   :  { %30519 = vmatpush3.bf16.msra.mxu1 %v33590_v57  ;;  %27274 = vmatprep.mubr.f32.mxu1 %v33624_v32  ;;  %v2010_v57 = vld [vmem:[#allocation2] sm:$0xff] }
 0x14e   :  { %30521 = vmatprep.subr.bf16.mxu1 %v33732_v61  ;;  %v2015_v63 = vand.u32 4294901760, %v2010_v57 }
 0x150   :  { %27275 = vmatmul.mubr.f32.vlgmr.msra.gmra.mrb[4].mxu1 %v33620_v29  ;;  %v33747_v1 = vpack.c.bf16 %v2018_v0, %v2015_v63  ;;  %v2125_v2 = vsub.f32 %v2010_v57, %v2015_v63  ;;  %v33778_v57 = vpack.c.bf16 %v33651_v44, %v33656_v46  ;;  %v33783_v0 = vsub.f32 %v2012_v18, %v2021_v30 }
 0x151   :  { %27277 = vmatprep.mubr.f32.mxu1 %v33648_v43 }
 0x152   :  { %v2126_v4 = vand.u32 4294901760, %v2125_v2  ;;  %v33752_v11 = vpack.c.bf16 %v2132_v3, %v2125_v2 }
 0x154   :  { %27278 = vmatmul.mubr.f32.gmra.mrb[6].mxu1 %v33641_v40  ;;  %v2127_v6 = vsub.f32 %v2125_v2, %v2126_v4  ;;  %v33754_v12 = vpack.c.bf16 %v2133_v5, %v2126_v4  ;;  %v33785_v2 = vsub.f32 %v2013_v19, %v2024_v31 }
 0x156   :  { %30523 = vmatpush3.bf16.xpose.msra.mxu1 %v33732_v61  ;;  %v2128_v8 = vand.u32 4294901760, %v2127_v6 }
 0x157   :  { %30525 = vmatprep.subr.bf16.mxu1 %v33742_v49 }
 0x158   :  { %v33750_v10 = vpack.c.bf16 %v2135_v9, %v2128_v8 }
 0x15e   :  { %30527 = vmatpush3.bf16.xpose.msra.mxu1 %v33742_v49 }
 0x15f   :  { %30569 = vmatprep.subr.bf16.mxu1 %v33747_v1 }
 0x223   :  { %v27276_v14 = vpop.f32.mrb[4].mxu1 }
 0x224   :  { %v32376_v15 = vadd.f32 %v27276_v14, %v25175_v13  ;;  %v1318_v16 = vpop.f32.mrb[5].mxu1  ;;  %v2147_v14 = vand.u32 4294901760, %v33785_v2 }
 0x225   :  { %v32377_v17 = vadd.f32 %v25175_v13, %v1318_v16 }
 0x226   :  { %v1344_v20 = vsel %vm713_vm1, %v32376_v15, 0 }
 0x227   :  { %v33760_v21 = vand.u32 4294901760, %v1344_v20  ;;  %v1341_v22 = vsel %vm713_vm1, %v32377_v17, 0  ;;  %v27279_v24 = vpop.f32.mrb[6].mxu1  ;;  %v33801_v17 = vpack.c.bf16 %v2024_v31, %v2021_v30  ;;  %v33828_v31 = vpack.c.bf16 %v33639_v39, %v33646_v42 }
 0x228   :  { %v33763_v25 = vand.u32 4294901760, %v1341_v22  ;;  %v32378_v27 = vadd.f32 %v27279_v24, %v25175_v13  ;;  %v1330_v28 = vpop.f32.mrb[7].mxu1 }
 0x229   :  { %v33766_v34 = vsub.f32 %v1344_v20, %v33760_v21  ;;  %v32379_v38 = vadd.f32 %v25175_v13, %v1330_v28  ;;  %v2140_v13 = vand.u32 4294901760, %v33783_v0 }
 0x22a   :  { %v1422_v41 = vsub.f32 %v1341_v22, %v33763_v25  ;;  %v1350_v45 = vsel %vm713_vm1, %v32378_v27, 0  ;;  %27302 = vmatprep.mubr.f32.mxu0 %v33763_v25  ;;  %v2148_v22 = vsub.f32 %v33785_v2, %v2147_v14 }
 0x22b   :  { %v1433_v47 = vand.u32 4294901760, %v33766_v34  ;;  %v33772_v53 = vand.u32 4294901760, %v1350_v45  ;;  %v1347_v55 = vsel %vm713_vm1, %v32379_v38, 0  ;;  %27303 = vmatmul.mubr.f32.vlgmr.msra.gmra.mrb[4].mxu0 %v33760_v21  ;;  %v2141_v20 = vsub.f32 %v33783_v0, %v2140_v13 }
 0x22c   :  { %v33780_v62 = vand.u32 4294901760, %v1347_v55  ;;  %30539 = vmatpush3.bf16.xpose.msra.mxu0 %v33700_v60  ;;  %v1423_v63 = vand.u32 4294901760, %v1422_v41  ;;  %v2149_v28 = vand.u32 4294901760, %v2148_v22  ;;  %v30588_v38 = vpack.c.bf16 %v33785_v2, %v33783_v0 }
 0x22d   :  { %v1434_v3 = vsub.f32 %v33766_v34, %v1433_v47  ;;  %v33791_v4 = vsub.f32 %v1350_v45, %v33772_v53  ;;  %30541 = vmatprep.subr.bf16.mxu0 %v33778_v57  ;;  %v2142_v27 = vand.u32 4294901760, %v2141_v20 }
 0x22e   :  { %v1442_v5 = vsub.f32 %v1347_v55, %v33780_v62  ;;  %27305 = vmatprep.mubr.f32.mxu0 %v33780_v62  ;;  %v1424_v6 = vsub.f32 %v1422_v41, %v1423_v63  ;;  %v25178_v55 = vld [vmem:[%s36718_s3 + $0x30] sm:$0xff] }
 0x22f   :  { %27306 = vmatmul.mubr.f32.gmra.mrb[6].mxu0 %v33772_v53  ;;  %v1453_v7 = vand.u32 4294901760, %v33791_v4  ;;  %v1435_v15 = vand.u32 4294901760, %v1434_v3  ;;  %v30580_v30 = vpack.c.bf16 %v2149_v28, %v2142_v27  ;;  %v2648_v0 = vand.u32 4294901760, %v25178_v55  ;;  %v3927_v28 = vld [vmem:[#allocation2 + $0x28] sm:$0xff] }
 0x230   :  { %27316 = vmatprep.mubr.f32.mxu0 %v1422_v41  ;;  %v1425_v8 = vand.u32 4294901760, %v1424_v6  ;;  %v1443_v9 = vand.u32 4294901760, %v1442_v5  ;;  %v30604_v41 = vpack.c.bf16 %v2147_v14, %v2140_v13 }
 0x231   :  { %v1454_v16 = vsub.f32 %v33791_v4, %v1453_v7  ;;  %v33888_v6 = vsub.f32 %v25178_v55, %v2648_v0 }
 0x232   :  { %27288 = vmatprep.mubr.f32.mxu1 %v1425_v8  ;;  %v1444_v18 = vsub.f32 %v1442_v5, %v1443_v9 }
 0x233   :  { %27289 = vmatmul.mubr.f32.vlgmr.msra.gmra.mrb[8].mxu1 %v1435_v15  ;;  %v1455_v24 = vand.u32 4294901760, %v1454_v16  ;;  %v2767_v14 = vand.u32 4294901760, %v33888_v6 }
 0x234   :  { %30543 = vmatpush3.bf16.xpose.msra.mxu0 %v33778_v57  ;;  %30571 = vmatpush3.bf16.msra.mxu1 %v33747_v1  ;;  %v1445_v19 = vand.u32 4294901760, %v1444_v18 }
 0x235   :  { %30545 = vmatprep.subr.bf16.mxu0 %v33732_v61  ;;  %30573 = vmatprep.subr.bf16.mxu1 %v33801_v17 }
 0x236   :  { %27291 = vmatprep.mubr.f32.mxu1 %v1445_v19  ;;  %v2768_v19 = vsub.f32 %v33888_v6, %v2767_v14 }
 0x237   :  { %27292 = vmatmul.mubr.f32.gmra.mrb[10].mxu1 %v1455_v24 }
 0x238   :  { %30575 = vmatpush3.bf16.msra.mxu1 %v33801_v17  ;;  %27372 = vmatprep.mubr.f32.mxu1 %v33668_v52 }
 0x239   :  { %30577 = vmatprep.subr.bf16.mxu1 %v33750_v10 }
 0x23b   :  { %27317 = vmatmul.mubr.f32.vlgmr.msra.gmra.mrb[4].mxu0 %v33766_v34  ;;  %27373 = vmatmul.mubr.f32.vlgmr.msra.gmra.mrb[12].mxu1 %v33663_v50  ;;  %v25177_v34 = vld [vmem:[%s36718_s3 + $0x28] sm:$0xff] }
 0x23c   :  { %27319 = vmatprep.mubr.f32.mxu0 %v1442_v5  ;;  %30547 = vmatpush3.bf16.xpose.msra.mxu0 %v33732_v61 }
 0x23d   :  { %30549 = vmatprep.subr.bf16.mxu0 %v33742_v49  ;;  %27375 = vmatprep.mubr.f32.mxu1 %v33683_v58 }
 0x23e   :  { %30579 = vmatpush3.bf16.msra.mxu1 %v33750_v10  ;;  %v33844_v10 = vpack.c.bf16 %v33661_v48, %v33666_v51 }
 0x23f   :  { %27320 = vmatmul.mubr.f32.gmra.mrb[6].mxu0 %v33791_v4  ;;  %27376 = vmatmul.mubr.f32.gmra.mrb[14].mxu1 %v33680_v56 }
 0x240   :  { %27330 = vmatprep.mubr.f32.mxu0 %v1423_v63  ;;  %30581 = vmatprep.subr.bf16.mxu1 %v30580_v30  ;;  %v25179_v63 = vld [vmem:[%s36718_s3 + $0x38] sm:$0xff] }
 0x241   :  { %27386 = vmatprep.mubr.f32.mxu1 %v33624_v32  ;;  %v2651_v2 = vand.u32 4294901760, %v25179_v63 }
 0x242   :  { %30583 = vmatpush3.bf16.msra.mxu1 %v30580_v30 }
 0x243   :  { %30585 = vmatprep.subr.bf16.mxu1 %v33752_v11 }
 0x244   :  { %30551 = vmatpush3.bf16.xpose.msra.mxu0 %v33742_v49 }
 0x245   :  { %27387 = vmatmul.mubr.f32.vlgmr.msra.gmra.mrb[12].mxu1 %v33620_v29  ;;  %30553 = vmatprep.subr.bf16.mxu0 %v33828_v31 }
 0x246   :  { %27389 = vmatprep.mubr.f32.mxu1 %v33648_v43  ;;  %30587 = vmatpush3.bf16.msra.mxu1 %v33752_v11  ;;  %v25176_v11 = vld [vmem:[%s36718_s3 + $0x20] sm:$0xff] }
 0x247   :  { %30589 = vmatprep.subr.bf16.mxu1 %v30588_v38  ;;  %v2642_v45 = vand.u32 4294901760, %v25176_v11 }
 0x249   :  { %27390 = vmatmul.mubr.f32.gmra.mrb[14].mxu1 %v33641_v40  ;;  %v33878_v3 = vsub.f32 %v25176_v11, %v2642_v45  ;;  %v3934_v11 = vand.u32 4294901760, %v3927_v28 }
 0x24a   :  { %30591 = vmatpush3.bf16.msra.mxu1 %v30588_v38  ;;  %27400 = vmatprep.mubr.f32.mxu1 %v33634_v37 }
 0x24b   :  { %27331 = vmatmul.mubr.f32.vlgmr.msra.gmra.mrb[4].mxu0 %v1433_v47  ;;  %30593 = vmatprep.subr.bf16.mxu1 %v33747_v1  ;;  %v2645_v47 = vand.u32 4294901760, %v25177_v34  ;;  %v2753_v5 = vand.u32 4294901760, %v33878_v3 }
 0x24c   :  { %27333 = vmatprep.mubr.f32.mxu0 %v1443_v9  ;;  %30555 = vmatpush3.bf16.xpose.msra.mxu0 %v33828_v31 }
 0x24d   :  { %27401 = vmatmul.mubr.f32.vlgmr.msra.gmra.mrb[12].mxu1 %v33629_v35  ;;  %30557 = vmatprep.subr.bf16.mxu0 %v33844_v10  ;;  %v33880_v4 = vsub.f32 %v25177_v34, %v2645_v47  ;;  %v33898_v8 = vpack.c.bf16 %v2645_v47, %v2642_v45  ;;  %v2754_v9 = vsub.f32 %v33878_v3, %v2753_v5  ;;  %v3928_v34 = vld [vmem:[#allocation2 + $0x30] sm:$0xff] }
 0x24e   :  { %27403 = vmatprep.mubr.f32.mxu1 %v33656_v46  ;;  %30595 = vmatpush3.bf16.msra.mxu1 %v33747_v1  ;;  %v3937_v45 = vand.u32 4294901760, %v3928_v34 }
 0x24f   :  { %27334 = vmatmul.mubr.f32.gmra.mrb[6].mxu0 %v1453_v7  ;;  %30597 = vmatprep.subr.bf16.mxu1 %v33801_v17  ;;  %v33890_v7 = vsub.f32 %v25179_v63, %v2651_v2  ;;  %v2755_v16 = vand.u32 4294901760, %v2754_v9  ;;  %v30632_v27 = vpack.c.bf16 %v33880_v4, %v33878_v3  ;;  %v4048_v63 = vsub.f32 %v3927_v28, %v3934_v11 }
 0x250   :  { %27344 = vmatprep.mubr.f32.mxu0 %v33763_v25  ;;  %v4055_v3 = vsub.f32 %v3928_v34, %v3937_v45  ;;  %v56_v28 = vlaneseq }
 0x251   :  { %27404 = vmatmul.mubr.f32.gmra.mrb[14].mxu1 %v33651_v44  ;;  %v2774_v15 = vand.u32 4294901760, %v33890_v7 }
 0x252   :  { %30599 = vmatpush3.bf16.msra.mxu1 %v33801_v17  ;;  %27414 = vmatprep.mubr.f32.mxu1 %v33646_v42 }
 0x253   :  { %30601 = vmatprep.subr.bf16.mxu1 %v33754_v12  ;;  %v2775_v20 = vsub.f32 %v33890_v7, %v2774_v15  ;;  %v30652_v30 = vpack.c.bf16 %v2774_v15, %v2767_v14 }
 0x254   :  { %30559 = vmatpush3.bf16.xpose.msra.mxu0 %v33844_v10 }
 0x255   :  { %27415 = vmatmul.mubr.f32.vlgmr.msra.gmra.mrb[12].mxu1 %v33639_v39  ;;  %30561 = vmatprep.subr.bf16.mxu0 %v33732_v61  ;;  %v2776_v22 = vand.u32 4294901760, %v2775_v20 }
 0x256   :  { %27417 = vmatprep.mubr.f32.mxu1 %v33666_v51  ;;  %30603 = vmatpush3.bf16.msra.mxu1 %v33754_v12  ;;  %v2760_v12 = vand.u32 4294901760, %v33880_v4 }
 0x257   :  { %30605 = vmatprep.subr.bf16.mxu1 %v30604_v41 }
 0x258   :  { %v2761_v13 = vsub.f32 %v33880_v4, %v2760_v12 }
 0x259   :  { %27418 = vmatmul.mubr.f32.gmra.mrb[14].mxu1 %v33661_v48 }
 0x25a   :  { %30607 = vmatpush3.bf16.msra.mxu1 %v30604_v41  ;;  %27428 = vmatprep.mubr.f32.mxu1 %v33624_v32  ;;  %v2762_v18 = vand.u32 4294901760, %v2761_v13  ;;  %v3929_v41 = vld [vmem:[#allocation2 + $0x38] sm:$0xff] }
 0x25b   :  { %27345 = vmatmul.mubr.f32.vlgmr.msra.gmra.mrb[4].mxu0 %v33760_v21  ;;  %30609 = vmatprep.subr.bf16.mxu1 %v33747_v1  ;;  %v3940_v47 = vand.u32 4294901760, %v3929_v41 }
 0x25c   :  { %27347 = vmatprep.mubr.f32.mxu0 %v33780_v62  ;;  %30563 = vmatpush3.bf16.xpose.msra.mxu0 %v33732_v61 }
 0x25d   :  { %27429 = vmatmul.mubr.f32.vlgmr.msra.gmra.mrb[12].mxu1 %v33620_v29  ;;  %30565 = vmatprep.subr.bf16.mxu0 %v33742_v49  ;;  %v4062_v4 = vsub.f32 %v3929_v41, %v3940_v47  ;;  %v30716_v13 = vpack.c.bf16 %v3940_v47, %v3937_v45 }
 0x25e   :  { %27431 = vmatprep.mubr.f32.mxu1 %v33648_v43  ;;  %30611 = vmatpush3.bf16.msra.mxu1 %v33747_v1  ;;  %v33914_v1 = vpack.c.bf16 %v2651_v2, %v2648_v0  ;;  %v4049_v2 = vand.u32 4294901760, %v4048_v63 }
 0x25f   :  { %27348 = vmatmul.mubr.f32.gmra.mrb[6].mxu0 %v33772_v53  ;;  %30613 = vmatprep.subr.bf16.mxu1 %v33801_v17  ;;  %v4063_v9 = vand.u32 4294901760, %v4062_v4 }
 0x260   :  { %27358 = vmatprep.mubr.f32.mxu0 %v33763_v25  ;;  %v30624_v25 = vpack.c.bf16 %v2762_v18, %v2755_v16 }
 0x261   :  { %27432 = vmatmul.mubr.f32.gmra.mrb[14].mxu1 %v33641_v40  ;;  %v4064_v16 = vsub.f32 %v4062_v4, %v4063_v9 }
 0x262   :  { %30615 = vmatpush3.bf16.msra.mxu1 %v33801_v17  ;;  %27442 = vmatprep.mubr.f32.mxu1 %v33624_v32  ;;  %v2769_v17 = vand.u32 4294901760, %v2768_v19 }
 0x263   :  { %30617 = vmatprep.subr.bf16.mxu1 %v33898_v8  ;;  %v4065_v20 = vand.u32 4294901760, %v4064_v16 }
 0x264   :  { %30567 = vmatpush3.bf16.xpose.msra.mxu0 %v33742_v49  ;;  %v30628_v24 = vpack.c.bf16 %v2776_v22, %v2769_v17  ;;  %v30732_v17 = vpack.c.bf16 %v4062_v4, %v4055_v3 }
 0x265   :  { %27443 = vmatmul.mubr.f32.vlgmr.msra.gmra.mrb[12].mxu1 %v33620_v29  ;;  %30665 = vmatprep.subr.bf16.mxu0 %v33732_v61 }
 0x266   :  { %27445 = vmatprep.mubr.f32.mxu1 %v33648_v43  ;;  %30619 = vmatpush3.bf16.msra.mxu1 %v33898_v8 }
 0x267   :  { %30621 = vmatprep.subr.bf16.mxu1 %v33914_v1 }
 0x269   :  { %27446 = vmatmul.mubr.f32.gmra.mrb[14].mxu1 %v33641_v40 }
 0x26a   :  { %30623 = vmatpush3.bf16.msra.mxu1 %v33914_v1  ;;  %27456 = vmatprep.mubr.f32.mxu1 %v33668_v52 }
 0x26b   :  { %27359 = vmatmul.mubr.f32.vlgmr.msra.gmra.mrb[4].mxu0 %v33760_v21  ;;  %30625 = vmatprep.subr.bf16.mxu1 %v30624_v25  ;;  %v30636_v21 = vpack.c.bf16 %v33890_v7, %v33888_v6  ;;  %v4050_v6 = vsub.f32 %v4048_v63, %v4049_v2  ;;  %v4056_v7 = vand.u32 4294901760, %v4055_v3 }
 0x26c   :  { %27361 = vmatprep.mubr.f32.mxu0 %v33780_v62  ;;  %30667 = vmatpush3.bf16.xpose.msra.mxu0 %v33732_v61  ;;  %v3926_v62 = vld [vmem:[#allocation2 + $0x20] sm:$0xff] }
 0x26d   :  { %27457 = vmatmul.mubr.f32.vlgmr.msra.gmra.mrb[16].mxu1 %v33663_v50  ;;  %30669 = vmatprep.subr.bf16.mxu0 %v33742_v49  ;;  %v3931_v38 = vand.u32 4294901760, %v3926_v62  ;;  %v4057_v15 = vsub.f32 %v4055_v3, %v4056_v7 }
 0x26e   :  { %27459 = vmatprep.mubr.f32.mxu1 %v33683_v58  ;;  %30627 = vmatpush3.bf16.msra.mxu1 %v30624_v25 }
 0x26f   :  { %27362 = vmatmul.mubr.f32.gmra.mrb[6].mxu0 %v33772_v53  ;;  %30629 = vmatprep.subr.bf16.mxu1 %v30628_v24  ;;  %v30648_v53 = vpack.c.bf16 %v2760_v12, %v2753_v5  ;;  %v33961_v55 = vsub.f32 %v3926_v62, %v3931_v38  ;;  %v33970_v5 = vpack.c.bf16 %v3934_v11, %v3931_v38  ;;  %v4058_v19 = vand.u32 4294901760, %v4057_v15 }
 0x270   :  { %v66_v11 = vand.u32 127, %v56_v28 }
 0x271   :  { %27460 = vmatmul.mubr.f32.gmra.mrb[18].mxu1 %v33680_v56  ;;  %v4042_v0 = vand.u32 4294901760, %v33961_v55  ;;  %v30728_v25 = vpack.c.bf16 %v4048_v63, %v33961_v55 }
 0x272   :  { %30631 = vmatpush3.bf16.msra.mxu1 %v30628_v24  ;;  %27470 = vmatprep.mubr.f32.mxu1 %v33624_v32  ;;  %v30748_v24 = vpack.c.bf16 %v4063_v9, %v4056_v7  ;;  %v67_v45 = vcvt.s32.f32 %v66_v11 }
 0x273   :  { %30633 = vmatprep.subr.bf16.mxu1 %v30632_v27  ;;  %v4043_v12 = vsub.f32 %v33961_v55, %v4042_v0  ;;  %v30744_v22 = vpack.c.bf16 %v4049_v2, %v4042_v0 }
 0x274   :  { %30671 = vmatpush3.bf16.xpose.msra.mxu0 %v33742_v49  ;;  %v80_v2 = vadd.f32 0.5, %v67_v45 }
 0x275   :  { %27471 = vmatmul.mubr.f32.vlgmr.msra.gmra.mrb[16].mxu1 %v33620_v29  ;;  %30673 = vmatprep.subr.bf16.mxu0 %v33675_v54  ;;  %v4044_v14 = vand.u32 4294901760, %v4043_v12 }
 0x276   :  { %27473 = vmatprep.mubr.f32.mxu1 %v33648_v43  ;;  %30635 = vmatpush3.bf16.msra.mxu1 %v30632_v27 }
 0x277   :  { %30637 = vmatprep.subr.bf16.mxu1 %v30636_v21 }
 0x279   :  { %27474 = vmatmul.mubr.f32.gmra.mrb[18].mxu1 %v33641_v40 }
 0x27a   :  { %30639 = vmatpush3.bf16.msra.mxu1 %v30636_v21  ;;  %27484 = vmatprep.mubr.f32.mxu1 %v33634_v37 }
 0x27b   :  { %30641 = vmatprep.subr.bf16.mxu1 %v33898_v8 }
 0x27d   :  { %27485 = vmatmul.mubr.f32.vlgmr.msra.gmra.mrb[16].mxu1 %v33629_v35 }
 0x27e   :  { %27487 = vmatprep.mubr.f32.mxu1 %v33656_v46  ;;  %30643 = vmatpush3.bf16.msra.mxu1 %v33898_v8 }
 0x27f   :  { %30645 = vmatprep.subr.bf16.mxu1 %v33914_v1 }
 0x281   :  { %27488 = vmatmul.mubr.f32.gmra.mrb[18].mxu1 %v33651_v44 }
 0x282   :  { %30647 = vmatpush3.bf16.msra.mxu1 %v33914_v1  ;;  %27498 = vmatprep.mubr.f32.mxu1 %v33646_v42 }
 0x283   :  { %30649 = vmatprep.subr.bf16.mxu1 %v30648_v53 }
 0x285   :  { %27499 = vmatmul.mubr.f32.vlgmr.msra.gmra.mrb[16].mxu1 %v33639_v39 }
 0x286   :  { %27501 = vmatprep.mubr.f32.mxu1 %v33666_v51  ;;  %30651 = vmatpush3.bf16.msra.mxu1 %v30648_v53 }
 0x287   :  { %30653 = vmatprep.subr.bf16.mxu1 %v30652_v30 }
 0x289   :  { %27502 = vmatmul.mubr.f32.gmra.mrb[18].mxu1 %v33661_v48 }
 0x28a   :  { %30655 = vmatpush3.bf16.msra.mxu1 %v30652_v30  ;;  %27512 = vmatprep.mubr.f32.mxu1 %v33624_v32  ;;  %v34013_v30 = vshrl.u32 %v56_v28, 7 }
 0x28b   :  { %30657 = vmatprep.subr.bf16.mxu1 %v33898_v8 }
 0x28c   :  { %36778 = vst [vmem:[#allocation12_spill] sm:$0xff] %v34013_v30  ;;  %v58_v38 = vadd.s32 8, %v34013_v30  ;;  %v60_v34 = vadd.s32 24, %v34013_v30  ;;  %v36728_v47 = vcvt.s32.f32 %v34013_v30  ;;  %v59_v55 = vadd.s32 16, %v34013_v30 }
 0x28d   :  { %27513 = vmatmul.mubr.f32.vlgmr.msra.gmra.mrb[16].mxu1 %v33620_v29 }
 0x28e   :  { %27515 = vmatprep.mubr.f32.mxu1 %v33648_v43  ;;  %30659 = vmatpush3.bf16.msra.mxu1 %v33898_v8  ;;  %v4051_v8 = vand.u32 4294901760, %v4050_v6  ;;  %v62_v41 = vcvt.s32.f32 %v58_v38  ;;  %v64_v63 = vcvt.s32.f32 %v60_v34  ;;  %v68_v3 = vadd.f32 0.5, %v36728_v47 }
 0x28f   :  { %30661 = vmatprep.subr.bf16.mxu1 %v33914_v1  ;;  %v63_v4 = vcvt.s32.f32 %v59_v55  ;;  %v81_v6 = vmul.f32 0.25, %v80_v2 }
 0x290   :  { %v30720_v18 = vpack.c.bf16 %v4051_v8, %v4044_v14  ;;  %v69_v0 = vadd.f32 0.5, %v62_v41  ;;  %v72_v7 = vmul.f32 0.25, %v68_v3 }
 0x291   :  { %27516 = vmatmul.mubr.f32.gmra.mrb[18].mxu1 %v33641_v40  ;;  %v70_v9 = vadd.f32 0.5, %v63_v4  ;;  %v34021_v8 = vfloor.f32 %v81_v6 }
 0x292   :  { %30663 = vmatpush3.bf16.msra.mxu1 %v33914_v1  ;;  %27526 = vmatprep.mubr.f32.mxu1 %v33624_v32  ;;  %v30724_v1 = vpack.c.bf16 %v4065_v20, %v4058_v19  ;;  %v73_v12 = vmul.f32 0.25, %v69_v0  ;;  %v76_v15 = vfloor.f32 %v72_v7 }
 0x293   :  { %30713 = vmatprep.subr.bf16.mxu1 %v33970_v5  ;;  %36779 = vst [vmem:[#allocation13_spill] sm:$0xff] %v34021_v8  ;;  %v74_v16 = vmul.f32 0.25, %v70_v9 }
 0x294   :  { %v77_v14 = vfloor.f32 %v73_v12  ;;  %vm83_vm3 = vcmp.eq.f32.partialorder %v76_v15, %v34021_v8 }
 0x295   :  { %27527 = vmatmul.mubr.f32.vlgmr.msra.gmra.mrb[16].mxu1 %v33620_v29  ;;  %v78_v19 = vfloor.f32 %v74_v16 }
 0x296   :  { %27529 = vmatprep.mubr.f32.mxu1 %v33648_v43  ;;  %30715 = vmatpush3.bf16.msra.mxu1 %v33970_v5  ;;  %vm84_vm2 = vcmp.eq.f32.partialorder %v77_v14, %v34021_v8 }
 0x297   :  { %30717 = vmatprep.subr.bf16.mxu1 %v30716_v13  ;;  %vm85_vm5 = vcmp.eq.f32.partialorder %v78_v19, %v34021_v8 }
 0x299   :  { %27530 = vmatmul.mubr.f32.gmra.mrb[18].mxu1 %v33641_v40 }
 0x29a   :  { %30719 = vmatpush3.bf16.msra.mxu1 %v30716_v13  ;;  %27624 = vmatprep.mubr.f32.mxu1 %v33668_v52 }
 0x29b   :  { %30721 = vmatprep.subr.bf16.mxu1 %v30720_v18 }
 0x29d   :  { %27625 = vmatmul.mubr.f32.vlgmr.msra.gmra.mrb[20].mxu1 %v33663_v50 }
 0x29e   :  { %27627 = vmatprep.mubr.f32.mxu1 %v33683_v58  ;;  %30723 = vmatpush3.bf16.msra.mxu1 %v30720_v18 }
 0x29f   :  { %30725 = vmatprep.subr.bf16.mxu1 %v30724_v1 }
 0x2a1   :  { %27628 = vmatmul.mubr.f32.gmra.mrb[22].mxu1 %v33680_v56 }
 0x2a2   :  { %30727 = vmatpush3.bf16.msra.mxu1 %v30724_v1  ;;  %27638 = vmatprep.mubr.f32.mxu1 %v33624_v32 }
 0x2a3   :  { %30729 = vmatprep.subr.bf16.mxu1 %v30728_v25 }
 0x2a5   :  { %27639 = vmatmul.mubr.f32.vlgmr.msra.gmra.mrb[20].mxu1 %v33620_v29 }
 0x2a6   :  { %27641 = vmatprep.mubr.f32.mxu1 %v33648_v43  ;;  %30731 = vmatpush3.bf16.msra.mxu1 %v30728_v25 }
 0x2a7   :  { %30733 = vmatprep.subr.bf16.mxu1 %v30732_v17 }
 0x2a9   :  { %27642 = vmatmul.mubr.f32.gmra.mrb[22].mxu1 %v33641_v40 }
 0x2aa   :  { %30735 = vmatpush3.bf16.msra.mxu1 %v30732_v17  ;;  %27652 = vmatprep.mubr.f32.mxu1 %v33634_v37  ;;  %v33464_v17 = vmov -1e+30  }
 0x2ab   :  { %30737 = vmatprep.subr.bf16.mxu1 %v33970_v5  ;;  %v34028_v28 = vsel %vm83_vm3, 0.0, %v33464_v17  ;;  %v34039_v7 = vsel %vm85_vm5, 0.0, %v33464_v17 }
 0x2ac   :  { %36783 = vst [vmem:[#allocation17_spill] sm:$0xff] %v34039_v7 }
 0x2ad   :  { %27653 = vmatmul.mubr.f32.vlgmr.msra.gmra.mrb[20].mxu1 %v33629_v35 }
 0x2ae   :  { %27655 = vmatprep.mubr.f32.mxu1 %v33656_v46  ;;  %30739 = vmatpush3.bf16.msra.mxu1 %v33970_v5 }
 0x2af   :  { %30741 = vmatprep.subr.bf16.mxu1 %v30716_v13 }
 0x2b1   :  { %27656 = vmatmul.mubr.f32.gmra.mrb[22].mxu1 %v33651_v44 }
 0x2b2   :  { %30743 = vmatpush3.bf16.msra.mxu1 %v30716_v13  ;;  %27666 = vmatprep.mubr.f32.mxu1 %v33646_v42 }
 0x2b3   :  { %30745 = vmatprep.subr.bf16.mxu1 %v30744_v22 }
 0x2b5   :  { %27667 = vmatmul.mubr.f32.vlgmr.msra.gmra.mrb[20].mxu1 %v33639_v39 }
 0x2b6   :  { %27669 = vmatprep.mubr.f32.mxu1 %v33666_v51  ;;  %30747 = vmatpush3.bf16.msra.mxu1 %v30744_v22  ;;  %v34025_v22 = vsel %vm84_vm2, 0.0, %v33464_v17 }
 0x2b7   :  { %30749 = vmatprep.subr.bf16.mxu1 %v30748_v24 }
 0x2b9   :  { %27670 = vmatmul.mubr.f32.gmra.mrb[22].mxu1 %v33661_v48 }
 0x2ba   :  { %30751 = vmatpush3.bf16.msra.mxu1 %v30748_v24  ;;  %27680 = vmatprep.mubr.f32.mxu1 %v33624_v32 }
 0x2bb   :  { %30753 = vmatprep.subr.bf16.mxu1 %v33970_v5 }
 0x2bd   :  { %27681 = vmatmul.mubr.f32.vlgmr.msra.gmra.mrb[20].mxu1 %v33620_v29 }
 0x2be   :  { %27683 = vmatprep.mubr.f32.mxu1 %v33648_v43  ;;  %30755 = vmatpush3.bf16.msra.mxu1 %v33970_v5  ;;  %v71_v5 = vadd.f32 0.5, %v64_v63 }
 0x2bf   :  { %30757 = vmatprep.subr.bf16.mxu1 %v30716_v13 }
 0x2c1   :  { %27684 = vmatmul.mubr.f32.gmra.mrb[22].mxu1 %v33641_v40 }
 0x2c2   :  { %30759 = vmatpush3.bf16.msra.mxu1 %v30716_v13  ;;  %27694 = vmatprep.mubr.f32.mxu1 %v33624_v32  ;;  %v75_v13 = vmul.f32 0.25, %v71_v5 }
 0x2c4   :  { %v79_v18 = vfloor.f32 %v75_v13 }
 0x2c5   :  { %27695 = vmatmul.mubr.f32.vlgmr.msra.gmra.mrb[20].mxu1 %v33620_v29 }
 0x2c6   :  { %27697 = vmatprep.mubr.f32.mxu1 %v33648_v43  ;;  %vm86_vm4 = vcmp.eq.f32.partialorder %v79_v18, %v34021_v8 }
 0x2c7   :  { %v34034_v55 = vsel %vm86_vm4, 0.0, %v33464_v17 }
 0x2c8   :  { %36781 = vst [vmem:[#allocation15_spill] sm:$0xff] %v34034_v55 }
 0x2c9   :  { %27698 = vmatmul.mubr.f32.gmra.mrb[22].mxu1 %v33641_v40 }
 0x306   :  { %v27290_v27 = vpop.f32.mrb[8].mxu1 }
 0x307   :  { %v1427_v21 = vpop.f32.mrb[9].mxu1  ;;  %v1438_v45 = vadd.f32 %v27290_v27, %v34025_v22 }
 0x308   :  { %v1428_v3 = vadd.f32 %v1427_v21, %v34028_v28 }
 0x30a   :  { %v27293_v53 = vpop.f32.mrb[10].mxu1 }
 0x30b   :  { %v34011_v62 = vpop.f32.mrb[11].mxu1  ;;  %v1458_v21 = vadd.f32 %v27293_v53, %v34034_v55 }
 0x30c   :  { %v1448_v17 = vadd.f32 %v34011_v62, %v34039_v7  ;;  %v25181_v62 = vld [vmem:[%s36719_s4 + $0x1] ss:$0 sm:$0xff] }
 0x338   :  { %v27444_v20 = vpop.f32.mrb[12].mxu1 }
 0x339   :  { %v5186_v1 = vand.u32 4294901760, %v27444_v20  ;;  %v2606_v25 = vpop.f32.mrb[13].mxu1 }
 0x33a   :  { %v5183_v24 = vand.u32 4294901760, %v2606_v25 }
 0x33b   :  { %v5300_v38 = vsub.f32 %v27444_v20, %v5186_v1 }
 0x33c   :  { %v34031_v11 = vpack.c.bf16 %v5186_v1, %v5183_v24  ;;  %v5293_v34 = vsub.f32 %v2606_v25, %v5183_v24  ;;  %v27447_v41 = vpop.f32.mrb[14].mxu1 }
 0x33d   :  { %v5301_v63 = vand.u32 4294901760, %v5300_v38  ;;  %v5192_v0 = vand.u32 4294901760, %v27447_v41  ;;  %v2618_v2 = vpop.f32.mrb[15].mxu1 }
 0x33e   :  { %36780 = vst [vmem:[#allocation14_spill] sm:$0xff] %v34031_v11  ;;  %v5294_v4 = vand.u32 4294901760, %v5293_v34  ;;  %v5189_v5 = vand.u32 4294901760, %v2618_v2  ;;  %v27360_v12 = vpop.f32.mrb[4].mxu0  ;;  %v34037_v6 = vpack.c.bf16 %v5300_v38, %v5293_v34 }
 0x33f   :  { %v5302_v9 = vsub.f32 %v5300_v38, %v5301_v63  ;;  %v5314_v13 = vsub.f32 %v27447_v41, %v5192_v0  ;;  %v34041_v14 = vadd.f32 %v27360_v12, %v1438_v45  ;;  %v1944_v15 = vpop.f32.mrb[5].mxu0 }
 0x340   :  { %36782 = vst [vmem:[#allocation16_spill] sm:$0xff] %v34037_v6  ;;  %v5295_v27 = vsub.f32 %v5293_v34, %v5294_v4  ;;  %v34043_v16 = vpack.c.bf16 %v5192_v0, %v5189_v5  ;;  %v5307_v18 = vsub.f32 %v2618_v2, %v5189_v5  ;;  %v34045_v19 = vadd.f32 %v1944_v15, %v1428_v3 }
 0x341   :  { %v5315_v20 = vand.u32 4294901760, %v5314_v13  ;;  %v5303_v1 = vand.u32 4294901760, %v5302_v9  ;;  %v34048_v25 = vpack.c.bf16 %v5301_v63, %v5294_v4 }
 0x342   :  { %36784 = vst [vmem:[#allocation18_spill] sm:$0xff] %v34043_v16  ;;  %v5308_v24 = vand.u32 4294901760, %v5307_v18  ;;  %v27363_v38 = vpop.f32.mrb[6].mxu0  ;;  %v5296_v41 = vand.u32 4294901760, %v5295_v27  ;;  %v34052_v45 = vpack.c.bf16 %v5314_v13, %v5307_v18 }
 0x343   :  { %36785 = vst [vmem:[#allocation19_spill] sm:$0xff] %v34048_v25  ;;  %v5316_v34 = vsub.f32 %v5314_v13, %v5315_v20  ;;  %v34054_v0 = vadd.f32 %v27363_v38, %v1458_v21  ;;  %v1956_v2 = vpop.f32.mrb[7].mxu0 }
 0x344   :  { %36786 = vst [vmem:[#allocation20_spill] sm:$0xff] %v34052_v45  ;;  %v5309_v3 = vsub.f32 %v5307_v18, %v5308_v24  ;;  %v34056_v5 = vadd.f32 %v1956_v2, %v1448_v17  ;;  %v34058_v53 = vpack.c.bf16 %v5303_v1, %v5296_v41  ;;  %v34060_v63 = vpack.c.bf16 %v5315_v20, %v5308_v24 }
 0x345   :  { %v5317_v12 = vand.u32 4294901760, %v5316_v34 }
 0x346   :  { %36787 = vst [vmem:[#allocation21_spill] sm:$0xff] %v34058_v53  ;;  %36788 = vst [vmem:[#allocation22_spill] sm:$0xff] %v34060_v63  ;;  %v5310_v4 = vand.u32 4294901760, %v5309_v3 }
 0x348   :  { %v34062_v9 = vpack.c.bf16 %v5317_v12, %v5310_v4 }
 0x34a   :  { %36789 = vst [vmem:[#allocation23_spill] sm:$0xff] %v34062_v9 }
 0x368   :  { %v27528_v15 = vpop.f32.mrb[16].mxu1 }
 0x369   :  { %v32388_v13 = vadd.f32 %v27528_v15, %v25181_v62  ;;  %v3233_v27 = vpop.f32.mrb[17].mxu1 }
 0x36a   :  { %v32389_v21 = vadd.f32 %v25181_v62, %v3233_v27 }
 0x36b   :  { %v3259_v18 = vsel %vm713_vm1, %v32388_v13, 0 }
 0x36c   :  { %v34068_v17 = vand.u32 4294901760, %v3259_v18  ;;  %v3256_v1 = vsel %vm713_vm1, %v32389_v21, 0  ;;  %v27531_v38 = vpop.f32.mrb[18].mxu1 }
 0x36d   :  { %v34071_v20 = vand.u32 4294901760, %v3256_v1  ;;  %v32390_v24 = vadd.f32 %v27531_v38, %v25181_v62  ;;  %v3245_v41 = vpop.f32.mrb[19].mxu1 }
 0x36e   :  { %v34074_v34 = vsub.f32 %v3259_v18, %v34068_v17  ;;  %v32391_v2 = vadd.f32 %v25181_v62, %v3245_v41 }
 0x36f   :  { %v3337_v3 = vsub.f32 %v3256_v1, %v34071_v20  ;;  %v3265_v12 = vsel %vm713_vm1, %v32390_v24, 0 }
 0x370   :  { %v36730_v4 = vand.u32 4294901760, %v34074_v34  ;;  %v34079_v15 = vand.u32 4294901760, %v3265_v12  ;;  %v3262_v13 = vsel %vm713_vm1, %v32391_v2, 0 }
 0x371   :  { %v34082_v27 = vand.u32 4294901760, %v3262_v13  ;;  %v3338_v21 = vand.u32 4294901760, %v3337_v3 }
 0x372   :  { %v3349_v38 = vsub.f32 %v34074_v34, %v36730_v4  ;;  %v34088_v18 = vsub.f32 %v3265_v12, %v34079_v15 }
 0x373   :  { %v34091_v62 = vsub.f32 %v3262_v13, %v34082_v27  ;;  %v3339_v1 = vsub.f32 %v3337_v3, %v3338_v21 }
 0x374   :  { %v36731_v24 = vand.u32 4294901760, %v34088_v18  ;;  %v3350_v2 = vand.u32 4294901760, %v3349_v38 }
 0x375   :  { %v3340_v41 = vand.u32 4294901760, %v3339_v1  ;;  %v36732_v47 = vand.u32 4294901760, %v34091_v62 }
 0x376   :  { %v3369_v30 = vsub.f32 %v34088_v18, %v36731_v24 }
 0x377   :  { %27540 = vmatprep.mubr.f32.mxu0 %v3340_v41  ;;  %v3359_v12 = vsub.f32 %v34091_v62, %v36732_v47 }
 0x378   :  { %27541 = vmatmul.mubr.f32.vlgmr.msra.gmra.mrb[8].mxu0 %v3350_v2  ;;  %v3370_v4 = vand.u32 4294901760, %v3369_v30 }
 0x379   :  { %30675 = vmatpush3.bf16.xpose.msra.mxu0 %v33675_v54  ;;  %v3360_v13 = vand.u32 4294901760, %v3359_v12 }
 0x37a   :  { %30677 = vmatprep.subr.bf16.mxu0 %v33689_v59 }
 0x37b   :  { %27543 = vmatprep.mubr.f32.mxu0 %v3360_v13 }
 0x37c   :  { %27544 = vmatmul.mubr.f32.gmra.mrb[10].mxu0 %v3370_v4 }
 0x37d   :  { %27554 = vmatprep.mubr.f32.mxu0 %v34071_v20 }
 0x381   :  { %30679 = vmatpush3.bf16.xpose.msra.mxu0 %v33689_v59 }
 0x382   :  { %30681 = vmatprep.subr.bf16.mxu0 %v33700_v60 }
 0x388   :  { %27555 = vmatmul.mubr.f32.vlgmr.msra.gmra.mrb[8].mxu0 %v34068_v17 }
 0x389   :  { %27557 = vmatprep.mubr.f32.mxu0 %v34082_v27  ;;  %30683 = vmatpush3.bf16.xpose.msra.mxu0 %v33700_v60 }
 0x38a   :  { %30685 = vmatprep.subr.bf16.mxu0 %v33778_v57 }
 0x38c   :  { %27558 = vmatmul.mubr.f32.gmra.mrb[10].mxu0 %v34079_v15 }
 0x38d   :  { %27568 = vmatprep.mubr.f32.mxu0 %v3337_v3 }
 0x391   :  { %30687 = vmatpush3.bf16.xpose.msra.mxu0 %v33778_v57 }
 0x392   :  { %30689 = vmatprep.subr.bf16.mxu0 %v33732_v61 }
 0x398   :  { %27569 = vmatmul.mubr.f32.vlgmr.msra.gmra.mrb[8].mxu0 %v34074_v34  ;;  %v27696_v30 = vpop.f32.mrb[20].mxu1 }
 0x399   :  { %27571 = vmatprep.mubr.f32.mxu0 %v34091_v62  ;;  %30691 = vmatpush3.bf16.xpose.msra.mxu0 %v33732_v61  ;;  %v4560_v4 = vand.u32 4294901760, %v27696_v30  ;;  %v4522_v38 = vpop.f32.mrb[21].mxu1 }
 0x39a   :  { %30693 = vmatprep.subr.bf16.mxu0 %v33742_v49  ;;  %v4557_v1 = vand.u32 4294901760, %v4522_v38 }
 0x39b   :  { %v4674_v41 = vsub.f32 %v27696_v30, %v4560_v4 }
 0x39c   :  { %v34117_v2 = vpack.c.bf16 %v4560_v4, %v4557_v1  ;;  %v4667_v3 = vsub.f32 %v4522_v38, %v4557_v1  ;;  %27572 = vmatmul.mubr.f32.gmra.mrb[10].mxu0 %v34088_v18  ;;  %v27699_v12 = vpop.f32.mrb[22].mxu1 }
 0x39d   :  { %v4675_v13 = vand.u32 4294901760, %v4674_v41  ;;  %27582 = vmatprep.mubr.f32.mxu0 %v3338_v21  ;;  %v4566_v24 = vand.u32 4294901760, %v27699_v12  ;;  %v4534_v47 = vpop.f32.mrb[23].mxu1 }
 0x39e   :  { %v4668_v8 = vand.u32 4294901760, %v4667_v3  ;;  %v4563_v36 = vand.u32 4294901760, %v4534_v47  ;;  %30761 = vmatprep.subr.bf16.mxu1 %v34117_v2  ;;  %v34121_v33 = vpack.c.bf16 %v4674_v41, %v4667_v3 }
 0x39f   :  { %v4676_v26 = vsub.f32 %v4674_v41, %v4675_v13  ;;  %v4688_v23 = vsub.f32 %v27699_v12, %v4566_v24  ;;  %30763 = vmatpush3.bf16.msra.mxu1 %v34117_v2 }
 0x3a0   :  { %v4669_v30 = vsub.f32 %v4667_v3, %v4668_v8  ;;  %v34124_v4 = vpack.c.bf16 %v4566_v24, %v4563_v36  ;;  %v4681_v38 = vsub.f32 %v4534_v47, %v4563_v36  ;;  %v34126_v1 = vpack.c.bf16 %v4675_v13, %v4668_v8 }
 0x3a1   :  { %v4689_v63 = vand.u32 4294901760, %v4688_v23  ;;  %30695 = vmatpush3.bf16.xpose.msra.mxu0 %v33742_v49  ;;  %v4677_v21 = vand.u32 4294901760, %v4676_v26  ;;  %v36792_v8 = vand.u32 4294901760, %v34074_v34 }
 0x3a2   :  { %36790 = vst [vmem:[#allocation24_spill] sm:$0xff] %v34126_v1  ;;  %v4682_v25 = vand.u32 4294901760, %v4681_v38  ;;  %30697 = vmatprep.subr.bf16.mxu0 %v33828_v31  ;;  %30765 = vmatprep.subr.bf16.mxu1 %v34124_v4  ;;  %v4670_v45 = vand.u32 4294901760, %v4669_v30  ;;  %v34131_v41 = vpack.c.bf16 %v4688_v23, %v4681_v38  ;;  %v36793_v30 = vand.u32 4294901760, %v34091_v62  ;;  %v25185_v62 = vld [vmem:[%s36718_s3 + $0x58] sm:$0xff] }
 0x3a3   :  { %v4690_v12 = vsub.f32 %v4688_v23, %v4689_v63  ;;  %30767 = vmatpush3.bf16.msra.mxu1 %v34124_v4  ;;  %v36794_v23 = vand.u32 4294901760, %v34088_v18  ;;  %v25184_v18 = vld [vmem:[%s36718_s3 + $0x50] sm:$0xff] }
 0x3a4   :  { %v4683_v24 = vsub.f32 %v4681_v38, %v4682_v25  ;;  %v34134_v3 = vpack.c.bf16 %v4677_v21, %v4670_v45  ;;  %v34136_v36 = vpack.c.bf16 %v4689_v63, %v4682_v25  ;;  %v25182_v25 = vld [vmem:[%s36718_s3 + $0x40] sm:$0xff]  ;;  %v25183_v45 = vld [vmem:[%s36718_s3 + $0x48] sm:$0xff]  ;;  %v5816_v38 = vand.u32 4294901760, %v25184_v18 }
 0x3a5   :  { %v4691_v47 = vand.u32 4294901760, %v4690_v12  ;;  %v5810_v63 = vand.u32 4294901760, %v25182_v25  ;;  %v5813_v34 = vand.u32 4294901760, %v25183_v45  ;;  %v5819_v21 = vand.u32 4294901760, %v25185_v62 }
 0x3a6   :  { %36791 = vst [vmem:[#allocation25_spill] sm:$0xff] %v34136_v36  ;;  %30769 = vmatprep.subr.bf16.mxu1 %v34134_v3  ;;  %v4684_v26 = vand.u32 4294901760, %v4683_v24 }
 0x3a7   :  { %v5920_v12 = vsub.f32 %v25182_v25, %v5810_v63  ;;  %v5927_v24 = vsub.f32 %v25183_v45, %v5813_v34  ;;  %v30860_v25 = vpack.c.bf16 %v5819_v21, %v5816_v38 }
 0x3a8   :  { %27583 = vmatmul.mubr.f32.vlgmr.msra.gmra.mrb[8].mxu0 %v36792_v8  ;;  %v34141_v13 = vpack.c.bf16 %v4691_v47, %v4684_v26  ;;  %v34170_v47 = vpack.c.bf16 %v5813_v34, %v5810_v63 }
 0x3a9   :  { %27585 = vmatprep.mubr.f32.mxu0 %v36793_v30  ;;  %30699 = vmatpush3.bf16.xpose.msra.mxu0 %v33828_v31  ;;  %v5921_v26 = vand.u32 4294901760, %v5920_v12  ;;  %v5928_v8 = vand.u32 4294901760, %v5927_v24  ;;  %v5934_v30 = vsub.f32 %v25184_v18, %v5816_v38 }
 0x3aa   :  { %30701 = vmatprep.subr.bf16.mxu0 %v33844_v10 }
 0x3ab   :  { %v5922_v6 = vsub.f32 %v5920_v12, %v5921_v26  ;;  %v5929_v9 = vsub.f32 %v5927_v24, %v5928_v8  ;;  %v5935_v53 = vand.u32 4294901760, %v5934_v30 }
 0x3ac   :  { %27586 = vmatmul.mubr.f32.gmra.mrb[10].mxu0 %v36794_v23  ;;  %v5941_v23 = vsub.f32 %v25185_v62, %v5819_v21 }
 0x3ad   :  { %27596 = vmatprep.mubr.f32.mxu0 %v34071_v20  ;;  %v5923_v45 = vand.u32 4294901760, %v5922_v6  ;;  %v5930_v11 = vand.u32 4294901760, %v5929_v9  ;;  %v5936_v36 = vsub.f32 %v5934_v30, %v5935_v53  ;;  %v30872_v9 = vpack.c.bf16 %v5927_v24, %v5920_v12 }
 0x3ae   :  { %v5942_v16 = vand.u32 4294901760, %v5941_v23 }
 0x3af   :  { %v5937_v63 = vand.u32 4294901760, %v5936_v36 }
 0x3b0   :  { %v5943_v1 = vsub.f32 %v5941_v23, %v5942_v16 }
 0x3b1   :  { %30703 = vmatpush3.bf16.xpose.msra.mxu0 %v33844_v10 }
 0x3b2   :  { %30705 = vmatprep.subr.bf16.mxu0 %v33732_v61  ;;  %v5944_v34 = vand.u32 4294901760, %v5943_v1 }
 0x3b4   :  { %v30868_v6 = vpack.c.bf16 %v5944_v34, %v5937_v63 }
 0x3b8   :  { %27597 = vmatmul.mubr.f32.vlgmr.msra.gmra.mrb[8].mxu0 %v34068_v17 }
 0x3b9   :  { %27599 = vmatprep.mubr.f32.mxu0 %v34082_v27  ;;  %30707 = vmatpush3.bf16.xpose.msra.mxu0 %v33732_v61 }
 0x3ba   :  { %30709 = vmatprep.subr.bf16.mxu0 %v33742_v49 }
 0x3bc   :  { %27600 = vmatmul.mubr.f32.gmra.mrb[10].mxu0 %v34079_v15 }
 0x3bd   :  { %27610 = vmatprep.mubr.f32.mxu0 %v34071_v20  ;;  %v30864_v20 = vpack.c.bf16 %v5930_v11, %v5923_v45  ;;  %v30876_v11 = vpack.c.bf16 %v5941_v23, %v5934_v30  ;;  %v1972_v30 = vsel %vm713_vm1, %v34056_v5, -inf  ;;  %v1975_v23 = vsel %vm713_vm1, %v34054_v0, -inf }
 0x3c1   :  { %30711 = vmatpush3.bf16.xpose.msra.mxu0 %v33742_v49 }
 0x3c2   :  { %30857 = vmatprep.subr.bf16.mxu0 %v34170_v47 }
 0x3c8   :  { %27611 = vmatmul.mubr.f32.vlgmr.msra.gmra.mrb[8].mxu0 %v34068_v17  ;;  %v30888_v17 = vpack.c.bf16 %v5928_v8, %v5921_v26  ;;  %v1966_v26 = vsel %vm713_vm1, %v34045_v19, -inf  ;;  %v1969_v8 = vsel %vm713_vm1, %v34041_v14, -inf }
 0x3c9   :  { %27613 = vmatprep.mubr.f32.mxu0 %v34082_v27  ;;  %30859 = vmatpush3.bf16.msra.mxu0 %v34170_v47 }
 0x3ca   :  { %30861 = vmatprep.subr.bf16.mxu0 %v30860_v25 }
 0x3cc   :  { %27614 = vmatmul.mubr.f32.gmra.mrb[10].mxu0 %v34079_v15  ;;  %v30892_v15 = vpack.c.bf16 %v5942_v16, %v5935_v53 }
 0x3cd   :  { %30863 = vmatpush3.bf16.msra.mxu0 %v30860_v25  ;;  %27876 = vmatprep.mubr.f32.mxu0 %v33668_v52 }
 0x3ce   :  { %30865 = vmatprep.subr.bf16.mxu0 %v30864_v20 }
 0x3d0   :  { %27877 = vmatmul.mubr.f32.vlgmr.msra.gmra.mrb[12].mxu0 %v33663_v50 }
 0x3d1   :  { %27879 = vmatprep.mubr.f32.mxu0 %v33683_v58  ;;  %30867 = vmatpush3.bf16.msra.mxu0 %v30864_v20 }
 0x3d2   :  { %30869 = vmatprep.subr.bf16.mxu0 %v30868_v6 }
 0x3d4   :  { %27880 = vmatmul.mubr.f32.gmra.mrb[14].mxu0 %v33680_v56 }
 0x3d5   :  { %30871 = vmatpush3.bf16.msra.mxu0 %v30868_v6  ;;  %27890 = vmatprep.mubr.f32.mxu0 %v33624_v32 }
 0x3d6   :  { %30873 = vmatprep.subr.bf16.mxu0 %v30872_v9 }
 0x3d8   :  { %27891 = vmatmul.mubr.f32.vlgmr.msra.gmra.mrb[12].mxu0 %v33620_v29 }
 0x3d9   :  { %27893 = vmatprep.mubr.f32.mxu0 %v33648_v43  ;;  %30875 = vmatpush3.bf16.msra.mxu0 %v30872_v9 }
 0x3da   :  { %30877 = vmatprep.subr.bf16.mxu0 %v30876_v11 }
 0x3dc   :  { %27894 = vmatmul.mubr.f32.gmra.mrb[14].mxu0 %v33641_v40 }
 0x3dd   :  { %30879 = vmatpush3.bf16.msra.mxu0 %v30876_v11  ;;  %27904 = vmatprep.mubr.f32.mxu0 %v33634_v37 }
 0x3de   :  { %30881 = vmatprep.subr.bf16.mxu0 %v34170_v47 }
 0x3e0   :  { %27905 = vmatmul.mubr.f32.vlgmr.msra.gmra.mrb[12].mxu0 %v33629_v35 }
 0x3e1   :  { %27907 = vmatprep.mubr.f32.mxu0 %v33656_v46  ;;  %30883 = vmatpush3.bf16.msra.mxu0 %v34170_v47 }
 0x3e2   :  { %30885 = vmatprep.subr.bf16.mxu0 %v30860_v25 }
 0x3e4   :  { %27908 = vmatmul.mubr.f32.gmra.mrb[14].mxu0 %v33651_v44 }
 0x3e5   :  { %30887 = vmatpush3.bf16.msra.mxu0 %v30860_v25  ;;  %27918 = vmatprep.mubr.f32.mxu0 %v33646_v42 }
 0x3e6   :  { %30889 = vmatprep.subr.bf16.mxu0 %v30888_v17 }
 0x3e8   :  { %27919 = vmatmul.mubr.f32.vlgmr.msra.gmra.mrb[12].mxu0 %v33639_v39 }
 0x3e9   :  { %27921 = vmatprep.mubr.f32.mxu0 %v33666_v51  ;;  %30891 = vmatpush3.bf16.msra.mxu0 %v30888_v17 }
 0x3ea   :  { %30893 = vmatprep.subr.bf16.mxu0 %v30892_v15 }
 0x3ec   :  { %27922 = vmatmul.mubr.f32.gmra.mrb[14].mxu0 %v33661_v48 }
 0x3ed   :  { %30895 = vmatpush3.bf16.msra.mxu0 %v30892_v15  ;;  %27932 = vmatprep.mubr.f32.mxu0 %v33624_v32 }
 0x3ee   :  { %30897 = vmatprep.subr.bf16.mxu0 %v34170_v47 }
 0x3f0   :  { %27933 = vmatmul.mubr.f32.vlgmr.msra.gmra.mrb[12].mxu0 %v33620_v29 }
 0x3f1   :  { %27935 = vmatprep.mubr.f32.mxu0 %v33648_v43  ;;  %30899 = vmatpush3.bf16.msra.mxu0 %v34170_v47 }
 0x3f2   :  { %30901 = vmatprep.subr.bf16.mxu0 %v30860_v25 }
 0x3f4   :  { %27936 = vmatmul.mubr.f32.gmra.mrb[14].mxu0 %v33641_v40 }
 0x3f5   :  { %30903 = vmatpush3.bf16.msra.mxu0 %v30860_v25  ;;  %27946 = vmatprep.mubr.f32.mxu0 %v33624_v32  ;;  %v25187_v25 = vld [vmem:[%s36719_s4 + $0x2] ss:$0 sm:$0xff] }
 0x3f6   :  { %30905 = vmatprep.subr.bf16.mxu0 %v33732_v61 }
 0x3f8   :  { %27947 = vmatmul.mubr.f32.vlgmr.msra.gmra.mrb[12].mxu0 %v33620_v29 }
 0x3f9   :  { %27949 = vmatprep.mubr.f32.mxu0 %v33648_v43 }
 0x3fc   :  { %27950 = vmatmul.mubr.f32.gmra.mrb[14].mxu0 %v33641_v40 }
 0x3fe   :  { %30907 = vmatpush3.bf16.xpose.msra.mxu0 %v33732_v61 }
 0x3ff   :  { %30909 = vmatprep.subr.bf16.mxu0 %v33742_v49 }
 0x406   :  { %30911 = vmatpush3.bf16.xpose.msra.mxu0 %v33742_v49 }
 0x407   :  { %30913 = vmatprep.subr.bf16.mxu0 %v33675_v54 }
 0x49b   :  { %v27612_v16 = vpop.f32.mrb[8].mxu0 }
 0x49c   :  { %v3859_v53 = vpop.f32.mrb[9].mxu0  ;;  %v34215_v1 = vadd.f32 %v27612_v16, %v34025_v22 }
 0x49d   :  { %v34212_v27 = vadd.f32 %v3859_v53, %v34028_v28 }
 0x49e   :  { %v3884_v24 = vsel %vm713_vm1, %v34215_v1, -inf }
 0x49f   :  { %v27615_v36 = vpop.f32.mrb[10].mxu0  ;;  %v3881_v18 = vsel %vm713_vm1, %v34212_v27, -inf }
 0x4a0   :  { %v3871_v62 = vpop.f32.mrb[11].mxu0  ;;  %3882 = vmax.xlane.f32.xlu0 %v3881_v18  ;;  %v34223_v21 = vadd.f32 %v27615_v36, %v34034_v55 }
 0x4a1   :  { %v34220_v38 = vadd.f32 %v3871_v62, %v34039_v7 }
 0x4a2   :  { %v3890_v47 = vsel %vm713_vm1, %v34223_v21, -inf }
 0x4a3   :  { %v3887_v12 = vsel %vm713_vm1, %v34220_v38, -inf }
 0x4a4   :  { %3888 = vmax.xlane.f32.xlu1 %v3887_v12  ;;  %3885 = vmax.xlane.f32.xlu0 %v3884_v24 }
 0x4a8   :  { %3891 = vmax.xlane.f32.xlu1 %v3890_v47  ;;  %1967 = vmax.xlane.f32.xlu0 %v1966_v26 }
 0x4ac   :  { %1970 = vmax.xlane.f32.xlu1 %v1969_v8  ;;  %1973 = vmax.xlane.f32.xlu0 %v1972_v30 }
 0x4b0   :  { %1976 = vmax.xlane.f32.xlu1 %v1975_v23 }
 0x4cb   :  { %v27948_v45 = vpop.f32.mrb[12].mxu0 }
 0x4cc   :  { %v32396_v20 = vadd.f32 %v27948_v45, %v25187_v25  ;;  %v6401_v63 = vpop.f32.mrb[13].mxu0 }
 0x4cd   :  { %v32397_v34 = vadd.f32 %v25187_v25, %v6401_v63 }
 0x4ce   :  { %v6427_v6 = vsel %vm713_vm1, %v32396_v20, 0 }
 0x4cf   :  { %v34243_v9 = vand.u32 4294901760, %v6427_v6  ;;  %v6424_v11 = vsel %vm713_vm1, %v32397_v34, 0  ;;  %v27951_v17 = vpop.f32.mrb[14].mxu0 }
 0x4d0   :  { %v34246_v15 = vand.u32 4294901760, %v6424_v11  ;;  %v32398_v16 = vadd.f32 %v27951_v17, %v25187_v25  ;;  %v6413_v53 = vpop.f32.mrb[15].mxu0 }
 0x4d1   :  { %v6515_v36 = vsub.f32 %v6427_v6, %v34243_v9  ;;  %v32399_v18 = vadd.f32 %v25187_v25, %v6413_v53 }
 0x4d2   :  { %v6505_v62 = vsub.f32 %v6424_v11, %v34246_v15  ;;  %v6433_v12 = vsel %vm713_vm1, %v32398_v16, 0 }
 0x4d3   :  { %v6516_v24 = vand.u32 4294901760, %v6515_v36  ;;  %v34251_v47 = vand.u32 4294901760, %v6433_v12  ;;  %v6430_v26 = vsel %vm713_vm1, %v32399_v18, 0 }
 0x4d4   :  { %v34254_v8 = vand.u32 4294901760, %v6430_v26  ;;  %v6506_v30 = vand.u32 4294901760, %v6505_v62 }
 0x4d5   :  { %v6517_v23 = vsub.f32 %v6515_v36, %v6516_v24  ;;  %v6535_v45 = vsub.f32 %v6433_v12, %v34251_v47 }
 0x4d6   :  { %v6525_v20 = vsub.f32 %v6430_v26, %v34254_v8  ;;  %v6507_v63 = vsub.f32 %v6505_v62, %v6506_v30  ;;  %v25190_v26 = vld [vmem:[%s36718_s3 + $0x70] sm:$0xff] }
 0x4d7   :  { %v6536_v34 = vand.u32 4294901760, %v6535_v45  ;;  %v6518_v11 = vand.u32 4294901760, %v6517_v23  ;;  %v8362_v23 = vand.u32 4294901760, %v25190_v26 }
 0x4d8   :  { %v6508_v25 = vand.u32 4294901760, %v6507_v63  ;;  %v6526_v6 = vand.u32 4294901760, %v6525_v20 }
 0x4d9   :  { %v6537_v17 = vsub.f32 %v6535_v45, %v6536_v34 }
 0x4da   :  { %27960 = vmatprep.mubr.f32.mxu0 %v6508_v25  ;;  %v6527_v16 = vsub.f32 %v6525_v20, %v6526_v6 }
 0x4db   :  { %27961 = vmatmul.mubr.f32.vlgmr.msra.gmra.mrb[16].mxu0 %v6518_v11  ;;  %v6538_v18 = vand.u32 4294901760, %v6537_v17  ;;  %v34305_v11 = vsub.f32 %v25190_v26, %v8362_v23 }
 0x4dc   :  { %30915 = vmatpush3.bf16.xpose.msra.mxu0 %v33675_v54  ;;  %v6528_v53 = vand.u32 4294901760, %v6527_v16 }
 0x4dd   :  { %30917 = vmatprep.subr.bf16.mxu0 %v33689_v59 }
 0x4de   :  { %27963 = vmatprep.mubr.f32.mxu0 %v6528_v53  ;;  %v36748_v53 = vand.u32 4294901760, %v34305_v11 }
 0x4df   :  { %27964 = vmatmul.mubr.f32.gmra.mrb[18].mxu0 %v6538_v18 }
 0x4e0   :  { %27974 = vmatprep.mubr.f32.mxu0 %v34246_v15 }
 0x4e4   :  { %30919 = vmatpush3.bf16.xpose.msra.mxu0 %v33689_v59 }
 0x4e5   :  { %30921 = vmatprep.subr.bf16.mxu0 %v33700_v60 }
 0x4eb   :  { %27975 = vmatmul.mubr.f32.vlgmr.msra.gmra.mrb[16].mxu0 %v34243_v9 }
 0x4ec   :  { %27977 = vmatprep.mubr.f32.mxu0 %v34254_v8  ;;  %30923 = vmatpush3.bf16.xpose.msra.mxu0 %v33700_v60 }
 0x4ed   :  { %30925 = vmatprep.subr.bf16.mxu0 %v33778_v57 }
 0x4ef   :  { %27978 = vmatmul.mubr.f32.gmra.mrb[18].mxu0 %v34251_v47 }
 0x4f0   :  { %27988 = vmatprep.mubr.f32.mxu0 %v6505_v62  ;;  %v25189_v62 = vld [vmem:[%s36718_s3 + $0x68] sm:$0xff] }
 0x4f4   :  { %30927 = vmatpush3.bf16.xpose.msra.mxu0 %v33778_v57 }
 0x4f5   :  { %30929 = vmatprep.subr.bf16.mxu0 %v33732_v61 }
 0x4fb   :  { %27989 = vmatmul.mubr.f32.vlgmr.msra.gmra.mrb[16].mxu0 %v6515_v36  ;;  %v25188_v36 = vld [vmem:[%s36718_s3 + $0x60] sm:$0xff] }
 0x4fc   :  { %27991 = vmatprep.mubr.f32.mxu0 %v6525_v20  ;;  %30931 = vmatpush3.bf16.xpose.msra.mxu0 %v33732_v61  ;;  %v8356_v12 = vand.u32 4294901760, %v25188_v36 }
 0x4fd   :  { %30933 = vmatprep.subr.bf16.mxu0 %v33742_v49 }
 0x4fe   :  { %v34295_v20 = vsub.f32 %v25188_v36, %v8356_v12 }
 0x4ff   :  { %27992 = vmatmul.mubr.f32.gmra.mrb[18].mxu0 %v6535_v45 }
 0x500   :  { %28002 = vmatprep.mubr.f32.mxu0 %v6506_v30  ;;  %v25191_v30 = vld [vmem:[%s36718_s3 + $0x78] sm:$0xff]  ;;  %v8467_v25 = vand.u32 4294901760, %v34295_v20 }
 0x501   :  { %v8365_v45 = vand.u32 4294901760, %v25191_v30 }
 0x502   :  { %v8468_v16 = vsub.f32 %v34295_v20, %v8467_v25 }
 0x503   :  { %v34307_v17 = vsub.f32 %v25191_v30, %v8365_v45  ;;  %v34319_v36 = vpack.c.bf16 %v8365_v45, %v8362_v23 }
 0x504   :  { %30935 = vmatpush3.bf16.xpose.msra.mxu0 %v33742_v49 }
 0x505   :  { %30937 = vmatprep.subr.bf16.mxu0 %v33828_v31  ;;  %v36749_v18 = vand.u32 4294901760, %v34307_v17 }
 0x507   :  { %v8489_v26 = vsub.f32 %v34307_v17, %v36749_v18 }
 0x50b   :  { %28003 = vmatmul.mubr.f32.vlgmr.msra.gmra.mrb[16].mxu0 %v6516_v24  ;;  %v8359_v24 = vand.u32 4294901760, %v25189_v62 }
 0x50c   :  { %28005 = vmatprep.mubr.f32.mxu0 %v6526_v6  ;;  %30939 = vmatpush3.bf16.xpose.msra.mxu0 %v33828_v31 }
 0x50d   :  { %30941 = vmatprep.subr.bf16.mxu0 %v33844_v10  ;;  %v34297_v63 = vsub.f32 %v25189_v62, %v8359_v24  ;;  %v8469_v62 = vand.u32 4294901760, %v8468_v16  ;;  %v8490_v16 = vand.u32 4294901760, %v8489_v26 }
 0x50f   :  { %28006 = vmatmul.mubr.f32.gmra.mrb[18].mxu0 %v6536_v34  ;;  %v34301_v34 = vpack.c.bf16 %v8359_v24, %v8356_v12  ;;  %v36750_v6 = vand.u32 4294901760, %v34297_v63  ;;  %v8482_v24 = vsub.f32 %v34305_v11, %v36748_v53  ;;  %v31064_v26 = vpack.c.bf16 %v34297_v63, %v34295_v20 }
 0x510   :  { %28016 = vmatprep.mubr.f32.mxu0 %v34246_v15 }
 0x511   :  { %v8483_v45 = vand.u32 4294901760, %v8482_v24 }
 0x514   :  { %30943 = vmatpush3.bf16.xpose.msra.mxu0 %v33844_v10 }
 0x515   :  { %30945 = vmatprep.subr.bf16.mxu0 %v33732_v61 }
 0x51b   :  { %28017 = vmatmul.mubr.f32.vlgmr.msra.gmra.mrb[16].mxu0 %v34243_v9 }
 0x51c   :  { %28019 = vmatprep.mubr.f32.mxu0 %v34254_v8  ;;  %30947 = vmatpush3.bf16.xpose.msra.mxu0 %v33732_v61 }
 0x51d   :  { %30949 = vmatprep.subr.bf16.mxu0 %v33742_v49 }
 0x51f   :  { %28020 = vmatmul.mubr.f32.gmra.mrb[18].mxu0 %v34251_v47 }
 0x520   :  { %28030 = vmatprep.mubr.f32.mxu0 %v34246_v15  ;;  %v8475_v15 = vsub.f32 %v34297_v63, %v36750_v6 }
 0x522   :  { %v8476_v12 = vand.u32 4294901760, %v8475_v15 }
 0x524   :  { %30951 = vmatpush3.bf16.xpose.msra.mxu0 %v33742_v49  ;;  %v31056_v23 = vpack.c.bf16 %v8476_v12, %v8469_v62 }
 0x525   :  { %31049 = vmatprep.subr.bf16.mxu0 %v34301_v34 }
 0x52b   :  { %28031 = vmatmul.mubr.f32.vlgmr.msra.gmra.mrb[16].mxu0 %v34243_v9 }
 0x52c   :  { %28033 = vmatprep.mubr.f32.mxu0 %v34254_v8  ;;  %31051 = vmatpush3.bf16.msra.mxu0 %v34301_v34  ;;  %v31060_v8 = vpack.c.bf16 %v8490_v16, %v8483_v45 }
 0x52d   :  { %v3883_v30 = vpop.xlane.xlu0 %3882  ;;  %31053 = vmatprep.subr.bf16.mxu0 %v34319_v36 }
 0x52e   :  { %v3893_v15 = vsub.f32 %v34212_v27, %v3883_v30 }
 0x52f   :  { %28034 = vmatmul.mubr.f32.gmra.mrb[18].mxu0 %v34251_v47 }
 0x530   :  { %v3897_v53 = vmul.f32 1.442695, %v3893_v15  ;;  %31055 = vmatpush3.bf16.msra.mxu0 %v34319_v36  ;;  %28212 = vmatprep.mubr.f32.mxu0 %v33668_v52 }
 0x531   :  { %v3889_v9 = vpop.xlane.xlu1 %3888  ;;  %v3886_v18 = vpop.xlane.xlu0 %3885  ;;  %31057 = vmatprep.subr.bf16.mxu0 %v31056_v23 }
 0x532   :  { %33245 = vpow2.f32 %v3897_v53  ;;  %v3895_v6 = vsub.f32 %v34220_v38, %v3889_v9  ;;  %v3894_v62 = vsub.f32 %v34215_v1, %v3886_v18 }
 0x533   :  { %28213 = vmatmul.mubr.f32.vlgmr.msra.gmra.mrb[20].mxu0 %v33663_v50 }
 0x534   :  { %v3901_v12 = vmul.f32 1.442695, %v3895_v6  ;;  %v3899_v27 = vmul.f32 1.442695, %v3894_v62  ;;  %28215 = vmatprep.mubr.f32.mxu0 %v33683_v58  ;;  %31059 = vmatpush3.bf16.msra.mxu0 %v31056_v23  ;;  %v31068_v23 = vpack.c.bf16 %v34307_v17, %v34305_v11 }
 0x535   :  { %v3892_v47 = vpop.xlane.xlu1 %3891  ;;  %v1968_v24 = vpop.xlane.xlu0 %1967  ;;  %31061 = vmatprep.subr.bf16.mxu0 %v31060_v8 }
 0x536   :  { %33247 = vpow2.f32 %v3901_v12  ;;  %v3896_v53 = vsub.f32 %v34223_v21, %v3892_v47  ;;  %v1978_v38 = vsub.f32 %v34045_v19, %v1968_v24 }
 0x537   :  { %33249 = vpow2.f32 %v3899_v27  ;;  %28216 = vmatmul.mubr.f32.gmra.mrb[22].mxu0 %v33680_v56 }
 0x538   :  { %v3903_v1 = vmul.f32 1.442695, %v3896_v53  ;;  %v1982_v6 = vmul.f32 1.442695, %v1978_v38  ;;  %31063 = vmatpush3.bf16.msra.mxu0 %v31060_v8  ;;  %28226 = vmatprep.mubr.f32.mxu0 %v33624_v32  ;;  %v36795_v53 = vand.u32 4294901760, %v34297_v63 }
 0x539   :  { %v1971_v18 = vpop.xlane.xlu1 %1970  ;;  %v1974_v30 = vpop.xlane.xlu0 %1973  ;;  %31065 = vmatprep.subr.bf16.mxu0 %v31064_v26 }
 0x53a   :  { %33251 = vpow2.f32 %v3903_v1  ;;  %v1979_v45 = vsub.f32 %v34041_v14, %v1971_v18  ;;  %v1980_v21 = vsub.f32 %v34056_v5, %v1974_v30  ;;  %v31080_v38 = vpack.c.bf16 %v36795_v53, %v8467_v25  ;;  %v9641_v18 = vld [vmem:[#allocation2 + $0x68] sm:$0xff] }
 0x53b   :  { %33253 = vpow2.f32 %v1982_v6  ;;  %28227 = vmatmul.mubr.f32.vlgmr.msra.gmra.mrb[20].mxu0 %v33620_v29  ;;  %v9640_v6 = vld [vmem:[#allocation2 + $0x60] sm:$0xff]  ;;  %v36796_v25 = vand.u32 4294901760, %v34305_v11 }
 0x53c   :  { %v34350_v19 = vpop.eup %33245  ;;  %v1984_v16 = vmul.f32 1.442695, %v1979_v45  ;;  %v1986_v15 = vmul.f32 1.442695, %v1980_v21  ;;  %28229 = vmatprep.mubr.f32.mxu0 %v33648_v43  ;;  %31067 = vmatpush3.bf16.msra.mxu0 %v31064_v26  ;;  %v36797_v45 = vand.u32 4294901760, %v34307_v17 }
 0x53d   :  { %v1977_v9 = vpop.xlane.xlu1 %1976  ;;  %31069 = vmatprep.subr.bf16.mxu0 %v31068_v23  ;;  %v3905_v8 = vsel %vm713_vm1, %v34350_v19, 0.0 }
 0x53e   :  { %33255 = vpow2.f32 %v1984_v16  ;;  %v1981_v14 = vsub.f32 %v34054_v0, %v1977_v9  ;;  %3906 = vadd.xlane.f32.xlu0 %v3905_v8  ;;  %v31084_v21 = vpack.c.bf16 %v36797_v45, %v36796_v25  ;;  %v9645_v16 = vand.u32 4294901760, %v9640_v6  ;;  %v9642_v9 = vld [vmem:[#allocation2 + $0x70] sm:$0xff]  ;;  %v9643_v8 = vld [vmem:[#allocation2 + $0x78] sm:$0xff] }
 0x53f   :  { %33257 = vpow2.f32 %v1986_v15  ;;  %28230 = vmatmul.mubr.f32.gmra.mrb[22].mxu0 %v33641_v40  ;;  %v9648_v15 = vand.u32 4294901760, %v9641_v18  ;;  %v9651_v11 = vand.u32 4294901760, %v9642_v9  ;;  %v9654_v17 = vand.u32 4294901760, %v9643_v8 }
 0x540   :  { %v34357_v5 = vpop.eup %33247  ;;  %v1988_v62 = vmul.f32 1.442695, %v1981_v14  ;;  %31071 = vmatpush3.bf16.msra.mxu0 %v31068_v23  ;;  %28240 = vmatprep.mubr.f32.mxu0 %v33634_v37 }
 0x541   :  { %v34360_v12 = vpop.eup %33249  ;;  %31073 = vmatprep.subr.bf16.mxu0 %v34301_v34  ;;  %v3911_v27 = vsel %vm713_vm1, %v34357_v5, 0.0  ;;  %v31148_v45 = vpack.c.bf16 %v9654_v17, %v9651_v11 }
 0x542   :  { %33259 = vpow2.f32 %v1988_v62  ;;  %v3908_v0 = vsel %vm713_vm1, %v34360_v12, 0.0  ;;  %3912 = vadd.xlane.f32.xlu0 %v3911_v27  ;;  %v34404_v27 = vsub.f32 %v9640_v6, %v9645_v16  ;;  %v34416_v6 = vpack.c.bf16 %v9648_v15, %v9645_v16 }
 0x543   :  { %28241 = vmatmul.mubr.f32.vlgmr.msra.gmra.mrb[20].mxu0 %v33629_v35  ;;  %3909 = vadd.xlane.f32.xlu1 %v3908_v0  ;;  %v34406_v0 = vsub.f32 %v9641_v18, %v9648_v15 }
 0x544   :  { %v34368_v47 = vpop.eup %33251  ;;  %28243 = vmatprep.mubr.f32.mxu0 %v33656_v46  ;;  %31075 = vmatpush3.bf16.msra.mxu0 %v34301_v34 }
 0x545   :  { %v34372_v24 = vpop.eup %33253  ;;  %31077 = vmatprep.subr.bf16.mxu0 %v34319_v36  ;;  %v3914_v26 = vsel %vm713_vm1, %v34368_v47, 0.0  ;;  %v9763_v53 = vand.u32 4294901760, %v34406_v0 }
 0x546   :  { %v1990_v1 = vsel %vm713_vm1, %v34372_v24, 0.0 }
 0x547   :  { %28244 = vmatmul.mubr.f32.gmra.mrb[22].mxu0 %v33651_v44  ;;  %3915 = vadd.xlane.f32.xlu1 %v3914_v26  ;;  %v9756_v26 = vand.u32 4294901760, %v34404_v27 }
 0x548   :  { %v34384_v30 = vpop.eup %33255  ;;  %1991 = vadd.xlane.f32.xlu0 %v1990_v1  ;;  %31079 = vmatpush3.bf16.msra.mxu0 %v34319_v36  ;;  %v9776_v1 = vsub.f32 %v9643_v8, %v9654_v17 }
 0x549   :  { %v34387_v23 = vpop.eup %33257  ;;  %28254 = vmatprep.mubr.f32.mxu0 %v33646_v42  ;;  %31081 = vmatprep.subr.bf16.mxu0 %v31080_v38  ;;  %v1993_v20 = vsel %vm713_vm1, %v34384_v30, 0.0  ;;  %v9757_v18 = vsub.f32 %v34404_v27, %v9756_v26 }
 0x54a   :  { %v1996_v63 = vsel %vm713_vm1, %v34387_v23, 0.0  ;;  %v9777_v25 = vand.u32 4294901760, %v9776_v1 }
 0x54b   :  { %28255 = vmatmul.mubr.f32.vlgmr.msra.gmra.mrb[20].mxu0 %v33639_v39  ;;  %1994 = vadd.xlane.f32.xlu1 %v1993_v20  ;;  %v9764_v20 = vsub.f32 %v34406_v0, %v9763_v53 }
 0x54c   :  { %v34399_v14 = vpop.eup %33259  ;;  %1997 = vadd.xlane.f32.xlu0 %v1996_v63  ;;  %28257 = vmatprep.mubr.f32.mxu0 %v33666_v51  ;;  %v9778_v15 = vsub.f32 %v9776_v1, %v9777_v25 }
 0x54d   :  { %31083 = vmatpush3.bf16.msra.mxu0 %v31080_v38  ;;  %v1999_v62 = vsel %vm713_vm1, %v34399_v14, 0.0  ;;  %v9769_v38 = vsub.f32 %v9642_v9, %v9651_v11  ;;  %v31160_v11 = vpack.c.bf16 %v34406_v0, %v34404_v27  ;;  %v31176_v27 = vpack.c.bf16 %v9763_v53, %v9756_v26 }
 0x54e   :  { %31085 = vmatprep.subr.bf16.mxu0 %v31084_v21 }
 0x54f   :  { %28258 = vmatmul.mubr.f32.gmra.mrb[22].mxu0 %v33661_v48  ;;  %2000 = vadd.xlane.f32.xlu1 %v1999_v62  ;;  %v9770_v63 = vand.u32 4294901760, %v9769_v38  ;;  %v9779_v62 = vand.u32 4294901760, %v9778_v15  ;;  %v31164_v17 = vpack.c.bf16 %v9776_v1, %v9769_v38 }
 0x550   :  { %28268 = vmatprep.mubr.f32.mxu0 %v33624_v32 }
 0x551   :  { %31087 = vmatpush3.bf16.msra.mxu0 %v31084_v21  ;;  %v9765_v21 = vand.u32 4294901760, %v9764_v20  ;;  %v9771_v16 = vsub.f32 %v9769_v38, %v9770_v63  ;;  %v31180_v0 = vpack.c.bf16 %v9777_v25, %v9770_v63 }
 0x552   :  { %31089 = vmatprep.subr.bf16.mxu0 %v34301_v34 }
 0x553   :  { %v9772_v8 = vand.u32 4294901760, %v9771_v16 }
 0x554   :  { %28269 = vmatmul.mubr.f32.vlgmr.msra.gmra.mrb[20].mxu0 %v33620_v29 }
 0x555   :  { %28271 = vmatprep.mubr.f32.mxu0 %v33648_v43  ;;  %31091 = vmatpush3.bf16.msra.mxu0 %v34301_v34  ;;  %v9758_v34 = vand.u32 4294901760, %v9757_v18 }
 0x556   :  { %31093 = vmatprep.subr.bf16.mxu0 %v34319_v36 }
 0x557   :  { %v31152_v9 = vpack.c.bf16 %v9765_v21, %v9758_v34 }
 0x558   :  { %28272 = vmatmul.mubr.f32.gmra.mrb[22].mxu0 %v33641_v40 }
 0x559   :  { %31095 = vmatpush3.bf16.msra.mxu0 %v34319_v36  ;;  %28282 = vmatprep.mubr.f32.mxu0 %v33624_v32  ;;  %v31156_v36 = vpack.c.bf16 %v9779_v62, %v9772_v8 }
 0x55a   :  { %31145 = vmatprep.subr.bf16.mxu0 %v34416_v6 }
 0x55c   :  { %28283 = vmatmul.mubr.f32.vlgmr.msra.gmra.mrb[20].mxu0 %v33620_v29 }
 0x55d   :  { %28285 = vmatprep.mubr.f32.mxu0 %v33648_v43  ;;  %31147 = vmatpush3.bf16.msra.mxu0 %v34416_v6 }
 0x55e   :  { %31149 = vmatprep.subr.bf16.mxu0 %v31148_v45 }
 0x560   :  { %28286 = vmatmul.mubr.f32.gmra.mrb[22].mxu0 %v33641_v40 }
 0x561   :  { %31151 = vmatpush3.bf16.msra.mxu0 %v31148_v45  ;;  %28380 = vmatprep.mubr.f32.mxu0 %v33668_v52 }
 0x562   :  { %31153 = vmatprep.subr.bf16.mxu0 %v31152_v9 }
 0x564   :  { %28381 = vmatmul.mubr.f32.vlgmr.msra.gmra.mrb[24].mxu0 %v33663_v50 }
 0x565   :  { %28383 = vmatprep.mubr.f32.mxu0 %v33683_v58  ;;  %31155 = vmatpush3.bf16.msra.mxu0 %v31152_v9 }
 0x566   :  { %31157 = vmatprep.subr.bf16.mxu0 %v31156_v36 }
 0x568   :  { %28384 = vmatmul.mubr.f32.gmra.mrb[26].mxu0 %v33680_v56 }
 0x569   :  { %31159 = vmatpush3.bf16.msra.mxu0 %v31156_v36  ;;  %28394 = vmatprep.mubr.f32.mxu0 %v33624_v32 }
 0x56a   :  { %31161 = vmatprep.subr.bf16.mxu0 %v31160_v11 }
 0x56c   :  { %28395 = vmatmul.mubr.f32.vlgmr.msra.gmra.mrb[24].mxu0 %v33620_v29 }
 0x56d   :  { %28397 = vmatprep.mubr.f32.mxu0 %v33648_v43  ;;  %31163 = vmatpush3.bf16.msra.mxu0 %v31160_v11 }
 0x56e   :  { %31165 = vmatprep.subr.bf16.mxu0 %v31164_v17 }
 0x570   :  { %28398 = vmatmul.mubr.f32.gmra.mrb[26].mxu0 %v33641_v40 }
 0x571   :  { %31167 = vmatpush3.bf16.msra.mxu0 %v31164_v17  ;;  %28408 = vmatprep.mubr.f32.mxu0 %v33634_v37 }
 0x572   :  { %31169 = vmatprep.subr.bf16.mxu0 %v34416_v6 }
 0x574   :  { %28409 = vmatmul.mubr.f32.vlgmr.msra.gmra.mrb[24].mxu0 %v33629_v35 }
 0x575   :  { %28411 = vmatprep.mubr.f32.mxu0 %v33656_v46  ;;  %31171 = vmatpush3.bf16.msra.mxu0 %v34416_v6 }
 0x576   :  { %31173 = vmatprep.subr.bf16.mxu0 %v31148_v45 }
 0x578   :  { %28412 = vmatmul.mubr.f32.gmra.mrb[26].mxu0 %v33651_v44 }
 0x579   :  { %31175 = vmatpush3.bf16.msra.mxu0 %v31148_v45  ;;  %28422 = vmatprep.mubr.f32.mxu0 %v33646_v42 }
 0x57a   :  { %31177 = vmatprep.subr.bf16.mxu0 %v31176_v27 }
 0x57c   :  { %28423 = vmatmul.mubr.f32.vlgmr.msra.gmra.mrb[24].mxu0 %v33639_v39 }
 0x57d   :  { %28425 = vmatprep.mubr.f32.mxu0 %v33666_v51  ;;  %31179 = vmatpush3.bf16.msra.mxu0 %v31176_v27 }
 0x57e   :  { %31181 = vmatprep.subr.bf16.mxu0 %v31180_v0 }
 0x580   :  { %28426 = vmatmul.mubr.f32.gmra.mrb[26].mxu0 %v33661_v48 }
 0x581   :  { %31183 = vmatpush3.bf16.msra.mxu0 %v31180_v0  ;;  %28436 = vmatprep.mubr.f32.mxu0 %v33624_v32 }
 0x582   :  { %31185 = vmatprep.subr.bf16.mxu0 %v34416_v6 }
 0x584   :  { %28437 = vmatmul.mubr.f32.vlgmr.msra.gmra.mrb[24].mxu0 %v33620_v29 }
 0x585   :  { %28439 = vmatprep.mubr.f32.mxu0 %v33648_v43  ;;  %31187 = vmatpush3.bf16.msra.mxu0 %v34416_v6 }
 0x586   :  { %31189 = vmatprep.subr.bf16.mxu0 %v31148_v45 }
 0x588   :  { %28440 = vmatmul.mubr.f32.gmra.mrb[26].mxu0 %v33641_v40 }
 0x589   :  { %31191 = vmatpush3.bf16.msra.mxu0 %v31148_v45  ;;  %28450 = vmatprep.mubr.f32.mxu0 %v33624_v32 }
 0x58c   :  { %28451 = vmatmul.mubr.f32.vlgmr.msra.gmra.mrb[24].mxu0 %v33620_v29 }
 0x58d   :  { %28453 = vmatprep.mubr.f32.mxu0 %v33648_v43 }
 0x590   :  { %28454 = vmatmul.mubr.f32.gmra.mrb[26].mxu0 %v33641_v40 }
 0x5cb   :  { %v3907_v26 = vpop.xlane.xlu0 %3906 }
 0x5cc   :  { %33261 = vrcp.f32 %v3907_v26 }
 0x5cf   :  { %v3913_v53 = vpop.xlane.xlu0 %3912 }
 0x5d0   :  { %v3910_v38 = vpop.xlane.xlu1 %3909  ;;  %33263 = vrcp.f32 %v3913_v53 }
 0x5d1   :  { %33265 = vrcp.f32 %v3910_v38 }
 0x5d4   :  { %v3916_v1 = vpop.xlane.xlu1 %3915 }
 0x5d5   :  { %33267 = vrcp.f32 %v3916_v1 }
 0x5d6   :  { %v33262_v6 = vpop.eup %33261 }
 0x5d7   :  { %v3918_v18 = vmul.f32 %v33262_v6, %v34350_v19 }
 0x5d9   :  { %v4545_v20 = vsel %vm713_vm1, %v3918_v18, 0 }
 0x5da   :  { %v33264_v63 = vpop.eup %33263  ;;  %v34461_v25 = vand.u32 4294901760, %v4545_v20 }
 0x5db   :  { %v33266_v45 = vpop.eup %33265  ;;  %v3922_v34 = vmul.f32 %v33264_v63, %v34357_v5 }
 0x5dc   :  { %v3920_v21 = vmul.f32 %v33266_v45, %v34360_v12  ;;  %v4626_v16 = vsub.f32 %v4545_v20, %v34461_v25 }
 0x5dd   :  { %v4551_v15 = vsel %vm713_vm1, %v3922_v34, 0  ;;  %v1992_v34 = vpop.xlane.xlu0 %1991 }
 0x5de   :  { %v4548_v9 = vsel %vm713_vm1, %v3920_v21, 0  ;;  %v4627_v8 = vand.u32 4294901760, %v4626_v16  ;;  %v34468_v62 = vand.u32 4294901760, %v4551_v15  ;;  %33269 = vrcp.f32 %v1992_v34 }
 0x5df   :  { %v33268_v19 = vpop.eup %33267  ;;  %v34470_v36 = vand.u32 4294901760, %v4548_v9 }
 0x5e0   :  { %v3924_v11 = vmul.f32 %v33268_v19, %v34368_v47  ;;  %v4628_v17 = vsub.f32 %v4626_v16, %v4627_v8  ;;  %v34474_v27 = vsub.f32 %v4551_v15, %v34468_v62  ;;  %v1995_v15 = vpop.xlane.xlu1 %1994 }
 0x5e1   :  { %v4636_v5 = vsub.f32 %v4548_v9, %v34470_v36  ;;  %v1998_v9 = vpop.xlane.xlu0 %1997  ;;  %33271 = vrcp.f32 %v1995_v15 }
 0x5e2   :  { %v4629_v12 = vand.u32 4294901760, %v4628_v17  ;;  %v4647_v0 = vand.u32 4294901760, %v34474_v27  ;;  %v4554_v26 = vsel %vm713_vm1, %v3924_v11, 0  ;;  %33273 = vrcp.f32 %v1998_v9 }
 0x5e3   :  { %v4637_v53 = vand.u32 4294901760, %v4636_v5  ;;  %v34479_v38 = vand.u32 4294901760, %v4554_v26 }
 0x5e4   :  { %27708 = vmatprep.mubr.f32.mxu1 %v4629_v12  ;;  %v4648_v1 = vsub.f32 %v34474_v27, %v4647_v0 }
 0x5e5   :  { %v4638_v47 = vsub.f32 %v4636_v5, %v4637_v53  ;;  %v34485_v6 = vsub.f32 %v4554_v26, %v34479_v38 }
 0x5e6   :  { %v4649_v18 = vand.u32 4294901760, %v4648_v1 }
 0x5e7   :  { %v4639_v20 = vand.u32 4294901760, %v4638_v47  ;;  %v4657_v63 = vand.u32 4294901760, %v34485_v6 }
 0x5e9   :  { %27709 = vmatmul.mubr.f32.vlgmr.msra.gmra.mrb[24].mxu1 %v4639_v20  ;;  %v4658_v45 = vsub.f32 %v34485_v6, %v4657_v63 }
 0x5ea   :  { %30771 = vmatpush3.bf16.msra.mxu1 %v34134_v3  ;;  %27711 = vmatprep.mubr.f32.mxu1 %v4649_v18  ;;  %v2001_v3 = vpop.xlane.xlu1 %2000 }
 0x5eb   :  { %30773 = vmatprep.subr.bf16.mxu1 %v34141_v13  ;;  %v4659_v21 = vand.u32 4294901760, %v4658_v45  ;;  %33275 = vrcp.f32 %v2001_v3 }
 0x5ed   :  { %27712 = vmatmul.mubr.f32.gmra.mrb[26].mxu1 %v4659_v21 }
 0x5ee   :  { %30775 = vmatpush3.bf16.msra.mxu1 %v34141_v13  ;;  %27722 = vmatprep.mubr.f32.mxu1 %v34461_v25  ;;  %v33270_v13 = vpop.eup %33269 }
 0x5ef   :  { %30777 = vmatprep.subr.bf16.mxu1 %v34121_v33  ;;  %v2003_v19 = vmul.f32 %v33270_v13, %v34372_v24 }
 0x5f1   :  { %27723 = vmatmul.mubr.f32.vlgmr.msra.gmra.mrb[24].mxu1 %v34470_v36 }
 0x5f2   :  { %30779 = vmatpush3.bf16.msra.mxu1 %v34121_v33  ;;  %27725 = vmatprep.mubr.f32.mxu1 %v34468_v62  ;;  %v33272_v33 = vpop.eup %33271 }
 0x5f3   :  { %30781 = vmatprep.subr.bf16.mxu1 %v34131_v41  ;;  %v33274_v11 = vpop.eup %33273  ;;  %v2005_v12 = vmul.f32 %v33272_v33, %v34384_v30 }
 0x5f4   :  { %v2007_v24 = vmul.f32 %v33274_v11, %v34387_v23  ;;  %v36799_v23 = vld [vmem:[#allocation25_spill] sm:$0xff] }
 0x5f5   :  { %27726 = vmatmul.mubr.f32.gmra.mrb[26].mxu1 %v34479_v38  ;;  %v33276_v1 = vpop.eup %33275  ;;  %v5174_v20 = vsel %vm713_vm1, %v2005_v12, 0 }
 0x5f6   :  { %30783 = vmatpush3.bf16.msra.mxu1 %v34131_v41  ;;  %27736 = vmatprep.mubr.f32.mxu1 %v4626_v16  ;;  %v36798_v16 = vld [vmem:[#allocation24_spill] sm:$0xff]  ;;  %v2009_v45 = vmul.f32 %v33276_v1, %v34399_v14  ;;  %v34541_v9 = vand.u32 4294901760, %v5174_v20  ;;  %v36801_v1 = vld [vmem:[#allocation18_spill] sm:$0xff] }
 0x5f7   :  { %30785 = vmatprep.subr.bf16.mxu1 %v34117_v2 }
 0x5f8   :  { %v5180_v3 = vsel %vm713_vm1, %v2009_v45, 0  ;;  %v5262_v13 = vsub.f32 %v5174_v20, %v34541_v9  ;;  %v7094_v20 = vld [vmem:[#allocation2 + $0x40] sm:$0xff]  ;;  %v7095_v45 = vld [vmem:[#allocation2 + $0x48] sm:$0xff] }
 0x5f9   :  { %27737 = vmatmul.mubr.f32.vlgmr.msra.gmra.mrb[24].mxu1 %v4636_v5  ;;  %v34554_v33 = vand.u32 4294901760, %v5180_v3 }
 0x5fa   :  { %30787 = vmatpush3.bf16.msra.mxu1 %v34117_v2  ;;  %27739 = vmatprep.mubr.f32.mxu1 %v34474_v27  ;;  %v5177_v27 = vsel %vm713_vm1, %v2007_v24, 0 }
 0x5fb   :  { %30789 = vmatprep.subr.bf16.mxu1 %v34124_v4 }
 0x5fd   :  { %27740 = vmatmul.mubr.f32.gmra.mrb[26].mxu1 %v34485_v6 }
 0x5fe   :  { %30791 = vmatpush3.bf16.msra.mxu1 %v34124_v4  ;;  %27750 = vmatprep.mubr.f32.mxu1 %v4627_v8  ;;  %v28032_v41 = vpop.f32.mrb[16].mxu0  ;;  %v5171_v8 = vsel %vm713_vm1, %v2003_v19, 0 }
 0x5ff   :  { %30793 = vmatprep.subr.bf16.mxu1 %v36798_v16  ;;  %v34509_v17 = vadd.f32 %v28032_v41, %v34025_v22  ;;  %v7027_v5 = vpop.f32.mrb[17].mxu0  ;;  %v34533_v21 = vand.u32 4294901760, %v5171_v8  ;;  %v36800_v41 = vld [vmem:[#allocation14_spill] sm:$0xff] }
 0x600   :  { %v34513_v26 = vadd.f32 %v7027_v5, %v34028_v28 }
 0x601   :  { %27751 = vmatmul.mubr.f32.vlgmr.msra.gmra.mrb[24].mxu1 %v4637_v53  ;;  %v7052_v47 = vsel %vm713_vm1, %v34509_v17, -inf  ;;  %v5252_v14 = vsub.f32 %v5171_v8, %v34533_v21 }
 0x602   :  { %30795 = vmatpush3.bf16.msra.mxu1 %v36798_v16  ;;  %v28035_v6 = vpop.f32.mrb[18].mxu0  ;;  %7053 = vmax.xlane.f32.xlu1 %v7052_v47  ;;  %v7049_v18 = vsel %vm713_vm1, %v34513_v26, -inf  ;;  %v5282_v16 = vsub.f32 %v5180_v3, %v34554_v33 }
 0x603   :  { %v34523_v30 = vadd.f32 %v28035_v6, %v34034_v55  ;;  %27753 = vmatprep.mubr.f32.mxu1 %v4647_v0  ;;  %30797 = vmatprep.subr.bf16.mxu1 %v36799_v23  ;;  %v7039_v53 = vpop.f32.mrb[19].mxu0  ;;  %v5253_v19 = vand.u32 4294901760, %v5252_v14 }
 0x604   :  { %v34531_v34 = vadd.f32 %v7039_v53, %v34039_v7  ;;  %7050 = vmax.xlane.f32.xlu0 %v7049_v18  ;;  %v5283_v47 = vand.u32 4294901760, %v5282_v16  ;;  %v36805_v53 = vld [vmem:[#allocation20_spill] sm:$0xff] }
 0x605   :  { %27754 = vmatmul.mubr.f32.gmra.mrb[26].mxu1 %v4657_v63  ;;  %v7058_v15 = vsel %vm713_vm1, %v34523_v30, -inf  ;;  %v34546_v63 = vand.u32 4294901760, %v5177_v27  ;;  %v5254_v5 = vsub.f32 %v5252_v14, %v5253_v19 }
 0x606   :  { %30799 = vmatpush3.bf16.msra.mxu1 %v36799_v23  ;;  %7059 = vmax.xlane.f32.xlu1 %v7058_v15  ;;  %v7055_v0 = vsel %vm713_vm1, %v34531_v34, -inf  ;;  %v5284_v18 = vsub.f32 %v5282_v16, %v5283_v47  ;;  %v36806_v15 = vld [vmem:[#allocation19_spill] sm:$0xff] }
 0x607   :  { %27764 = vmatprep.mubr.f32.mxu1 %v34461_v25  ;;  %30801 = vmatprep.subr.bf16.mxu1 %v34117_v2  ;;  %v5272_v11 = vsub.f32 %v5177_v27, %v34546_v63 }
 0x608   :  { %7056 = vmax.xlane.f32.xlu0 %v7055_v0  ;;  %v5285_v23 = vand.u32 4294901760, %v5284_v18  ;;  %v7099_v0 = vand.u32 4294901760, %v7094_v20 }
 0x609   :  { %27765 = vmatmul.mubr.f32.vlgmr.msra.gmra.mrb[24].mxu1 %v34470_v36  ;;  %v5273_v12 = vand.u32 4294901760, %v5272_v11 }
 0x60a   :  { %30803 = vmatpush3.bf16.msra.mxu1 %v34117_v2  ;;  %27767 = vmatprep.mubr.f32.mxu1 %v34468_v62  ;;  %v5263_v2 = vand.u32 4294901760, %v5262_v13 }
 0x60b   :  { %30805 = vmatprep.subr.bf16.mxu1 %v34124_v4  ;;  %v5274_v8 = vsub.f32 %v5272_v11, %v5273_v12 }
 0x60c   :  { %v5264_v24 = vsub.f32 %v5262_v13, %v5263_v2 }
 0x60d   :  { %27768 = vmatmul.mubr.f32.gmra.mrb[26].mxu1 %v34479_v38 }
 0x60e   :  { %30807 = vmatpush3.bf16.msra.mxu1 %v34124_v4  ;;  %27778 = vmatprep.mubr.f32.mxu1 %v34461_v25  ;;  %v5255_v4 = vand.u32 4294901760, %v5254_v5  ;;  %v36802_v25 = vld [vmem:[#allocation21_spill] sm:$0xff]  ;;  %v5265_v6 = vand.u32 4294901760, %v5264_v24  ;;  %v7097_v5 = vld [vmem:[#allocation2 + $0x58] sm:$0xff] }
 0x60f   :  { %30809 = vmatprep.subr.bf16.mxu1 %v36800_v41 }
 0x611   :  { %27779 = vmatmul.mubr.f32.vlgmr.msra.gmra.mrb[24].mxu1 %v34470_v36  ;;  %v5275_v36 = vand.u32 4294901760, %v5274_v8 }
 0x612   :  { %30811 = vmatpush3.bf16.msra.mxu1 %v36800_v41  ;;  %27781 = vmatprep.mubr.f32.mxu1 %v34468_v62  ;;  %v36803_v62 = vld [vmem:[#allocation23_spill] sm:$0xff] }
 0x613   :  { %30813 = vmatprep.subr.bf16.mxu1 %v36801_v1 }
 0x615   :  { %27782 = vmatmul.mubr.f32.gmra.mrb[26].mxu1 %v34479_v38  ;;  %v36804_v38 = vld [vmem:[#allocation16_spill] sm:$0xff] }
 0x616   :  { %30815 = vmatpush3.bf16.msra.mxu1 %v36801_v1  ;;  %27792 = vmatprep.mubr.f32.mxu1 %v5255_v4  ;;  %v34593_v4 = vsub.f32 %v7094_v20, %v7099_v0 }
 0x617   :  { %30817 = vmatprep.subr.bf16.mxu1 %v36802_v25 }
 0x619   :  { %27793 = vmatmul.mubr.f32.vlgmr.msra.gmra.mrb[24].mxu1 %v5265_v6 }
 0x61a   :  { %30819 = vmatpush3.bf16.msra.mxu1 %v36802_v25  ;;  %27795 = vmatprep.mubr.f32.mxu1 %v5275_v36 }
 0x61b   :  { %30821 = vmatprep.subr.bf16.mxu1 %v36803_v62 }
 0x61d   :  { %27796 = vmatmul.mubr.f32.gmra.mrb[26].mxu1 %v5285_v23 }
 0x61e   :  { %30823 = vmatpush3.bf16.msra.mxu1 %v36803_v62  ;;  %27806 = vmatprep.mubr.f32.mxu1 %v34533_v21 }
 0x61f   :  { %30825 = vmatprep.subr.bf16.mxu1 %v36804_v38 }
 0x621   :  { %27807 = vmatmul.mubr.f32.vlgmr.msra.gmra.mrb[24].mxu1 %v34541_v9 }
 0x622   :  { %30827 = vmatpush3.bf16.msra.mxu1 %v36804_v38  ;;  %27809 = vmatprep.mubr.f32.mxu1 %v34546_v63 }
 0x623   :  { %30829 = vmatprep.subr.bf16.mxu1 %v36805_v53 }
 0x625   :  { %27810 = vmatmul.mubr.f32.gmra.mrb[26].mxu1 %v34554_v33 }
 0x626   :  { %30831 = vmatpush3.bf16.msra.mxu1 %v36805_v53  ;;  %27820 = vmatprep.mubr.f32.mxu1 %v5252_v14  ;;  %v7102_v14 = vand.u32 4294901760, %v7095_v45 }
 0x627   :  { %30833 = vmatprep.subr.bf16.mxu1 %v36800_v41 }
 0x628   :  { %v34595_v8 = vsub.f32 %v7095_v45, %v7102_v14  ;;  %v34607_v36 = vpack.c.bf16 %v7102_v14, %v7099_v0 }
 0x629   :  { %27821 = vmatmul.mubr.f32.vlgmr.msra.gmra.mrb[24].mxu1 %v5262_v13  ;;  %v7096_v13 = vld [vmem:[#allocation2 + $0x50] sm:$0xff] }
 0x62a   :  { %30835 = vmatpush3.bf16.msra.mxu1 %v36800_v41  ;;  %27823 = vmatprep.mubr.f32.mxu1 %v5272_v11  ;;  %v36807_v11 = vld [vmem:[#allocation22_spill] sm:$0xff]  ;;  %v7105_v24 = vand.u32 4294901760, %v7096_v13 }
 0x62b   :  { %30837 = vmatprep.subr.bf16.mxu1 %v36801_v1 }
 0x62c   :  { %v7223_v6 = vsub.f32 %v7096_v13, %v7105_v24 }
 0x62d   :  { %27824 = vmatmul.mubr.f32.gmra.mrb[26].mxu1 %v5282_v16 }
 0x62e   :  { %30839 = vmatpush3.bf16.msra.mxu1 %v36801_v1  ;;  %27834 = vmatprep.mubr.f32.mxu1 %v5253_v19  ;;  %v7108_v19 = vand.u32 4294901760, %v7097_v5  ;;  %v7224_v23 = vand.u32 4294901760, %v7223_v6 }
 0x62f   :  { %30841 = vmatprep.subr.bf16.mxu1 %v36806_v15  ;;  %v34585_v27 = vpop.f32.mrb[20].mxu0 }
 0x630   :  { %v34587_v3 = vpop.f32.mrb[21].mxu0  ;;  %v7230_v18 = vsub.f32 %v7097_v5, %v7108_v19  ;;  %v34615_v53 = vpack.c.bf16 %v7108_v19, %v7105_v24  ;;  %v7225_v45 = vsub.f32 %v7223_v6, %v7224_v23 }
 0x631   :  { %27835 = vmatmul.mubr.f32.vlgmr.msra.gmra.mrb[24].mxu1 %v5263_v2  ;;  %v7210_v2 = vand.u32 4294901760, %v34593_v4 }
 0x632   :  { %30843 = vmatpush3.bf16.msra.mxu1 %v36806_v15  ;;  %27837 = vmatprep.mubr.f32.mxu1 %v5273_v12  ;;  %v7217_v12 = vand.u32 4294901760, %v34595_v8  ;;  %v7231_v38 = vand.u32 4294901760, %v7230_v18 }
 0x633   :  { %30845 = vmatprep.subr.bf16.mxu1 %v36807_v11  ;;  %v34591_v16 = vpop.f32.mrb[22].mxu0 }
 0x634   :  { %v34597_v25 = vpop.f32.mrb[23].mxu0  ;;  %v7218_v62 = vsub.f32 %v34595_v8, %v7217_v12  ;;  %v7232_v15 = vsub.f32 %v7230_v18, %v7231_v38 }
 0x635   :  { %27838 = vmatmul.mubr.f32.gmra.mrb[26].mxu1 %v5283_v47  ;;  %v7211_v47 = vsub.f32 %v34593_v4, %v7210_v2 }
 0x636   :  { %30847 = vmatpush3.bf16.msra.mxu1 %v36807_v11  ;;  %27848 = vmatprep.mubr.f32.mxu1 %v34533_v21  ;;  %v7219_v20 = vand.u32 4294901760, %v7218_v62  ;;  %v7233_v14 = vand.u32 4294901760, %v7232_v15 }
 0x637   :  { %30849 = vmatprep.subr.bf16.mxu1 %v36800_v41 }
 0x639   :  { %27849 = vmatmul.mubr.f32.vlgmr.msra.gmra.mrb[24].mxu1 %v34541_v9 }
 0x63a   :  { %30851 = vmatpush3.bf16.msra.mxu1 %v36800_v41  ;;  %27851 = vmatprep.mubr.f32.mxu1 %v34546_v63  ;;  %v7212_v41 = vand.u32 4294901760, %v7211_v47 }
 0x63b   :  { %30853 = vmatprep.subr.bf16.mxu1 %v36801_v1 }
 0x63c   :  { %v30960_v0 = vpack.c.bf16 %v7219_v20, %v7212_v41 }
 0x63d   :  { %27852 = vmatmul.mubr.f32.gmra.mrb[26].mxu1 %v34554_v33 }
 0x63e   :  { %30855 = vmatpush3.bf16.msra.mxu1 %v36801_v1  ;;  %27862 = vmatprep.mubr.f32.mxu1 %v34533_v21  ;;  %v7226_v1 = vand.u32 4294901760, %v7225_v45 }
 0x63f   :  { %30953 = vmatprep.subr.bf16.mxu1 %v34607_v36 }
 0x640   :  { %v30964_v21 = vpack.c.bf16 %v7233_v14, %v7226_v1 }
 0x641   :  { %27863 = vmatmul.mubr.f32.vlgmr.msra.gmra.mrb[24].mxu1 %v34541_v9  ;;  %v30968_v9 = vpack.c.bf16 %v34595_v8, %v34593_v4 }
 0x642   :  { %27865 = vmatprep.mubr.f32.mxu1 %v34546_v63  ;;  %30955 = vmatpush3.bf16.msra.mxu1 %v34607_v36  ;;  %v30972_v63 = vpack.c.bf16 %v7230_v18, %v7223_v6 }
 0x643   :  { %30957 = vmatprep.subr.bf16.mxu1 %v34615_v53 }
 0x645   :  { %27866 = vmatmul.mubr.f32.gmra.mrb[26].mxu1 %v34554_v33 }
 0x646   :  { %30959 = vmatpush3.bf16.msra.mxu1 %v34615_v53  ;;  %28044 = vmatprep.mubr.f32.mxu1 %v33668_v52 }
 0x647   :  { %30961 = vmatprep.subr.bf16.mxu1 %v30960_v0 }
 0x649   :  { %28045 = vmatmul.mubr.f32.vlgmr.msra.gmra.mrb[28].mxu1 %v33663_v50  ;;  %v30984_v50 = vpack.c.bf16 %v7217_v12, %v7210_v2 }
 0x64a   :  { %28047 = vmatprep.mubr.f32.mxu1 %v33683_v58  ;;  %30963 = vmatpush3.bf16.msra.mxu1 %v30960_v0 }
 0x64b   :  { %30965 = vmatprep.subr.bf16.mxu1 %v30964_v21 }
 0x64d   :  { %28048 = vmatmul.mubr.f32.gmra.mrb[30].mxu1 %v33680_v56 }
 0x64e   :  { %30967 = vmatpush3.bf16.msra.mxu1 %v30964_v21  ;;  %28058 = vmatprep.mubr.f32.mxu1 %v33624_v32 }
 0x64f   :  { %30969 = vmatprep.subr.bf16.mxu1 %v30968_v9 }
 0x651   :  { %28059 = vmatmul.mubr.f32.vlgmr.msra.gmra.mrb[28].mxu1 %v33620_v29 }
 0x652   :  { %28061 = vmatprep.mubr.f32.mxu1 %v33648_v43  ;;  %30971 = vmatpush3.bf16.msra.mxu1 %v30968_v9 }
 0x653   :  { %30973 = vmatprep.subr.bf16.mxu1 %v30972_v63 }
 0x655   :  { %28062 = vmatmul.mubr.f32.gmra.mrb[30].mxu1 %v33641_v40 }
 0x656   :  { %30975 = vmatpush3.bf16.msra.mxu1 %v30972_v63  ;;  %28072 = vmatprep.mubr.f32.mxu1 %v33634_v37  ;;  %v30988_v37 = vpack.c.bf16 %v7231_v38, %v7224_v23 }
 0x657   :  { %30977 = vmatprep.subr.bf16.mxu1 %v34607_v36 }
 0x659   :  { %28073 = vmatmul.mubr.f32.vlgmr.msra.gmra.mrb[28].mxu1 %v33629_v35 }
 0x65a   :  { %28075 = vmatprep.mubr.f32.mxu1 %v33656_v46  ;;  %30979 = vmatpush3.bf16.msra.mxu1 %v34607_v36 }
 0x65b   :  { %30981 = vmatprep.subr.bf16.mxu1 %v34615_v53 }
 0x65d   :  { %28076 = vmatmul.mubr.f32.gmra.mrb[30].mxu1 %v33651_v44 }
 0x65e   :  { %30983 = vmatpush3.bf16.msra.mxu1 %v34615_v53  ;;  %28086 = vmatprep.mubr.f32.mxu1 %v33646_v42 }
 0x65f   :  { %v28452_v52 = vpop.f32.mrb[24].mxu0  ;;  %30985 = vmatprep.subr.bf16.mxu1 %v30984_v50 }
 0x660   :  { %v10274_v56 = vand.u32 4294901760, %v28452_v52  ;;  %v10236_v58 = vpop.f32.mrb[25].mxu0 }
 0x661   :  { %v10271_v33 = vand.u32 4294901760, %v10236_v58  ;;  %28087 = vmatmul.mubr.f32.vlgmr.msra.gmra.mrb[28].mxu1 %v33639_v39 }
 0x662   :  { %v10388_v35 = vsub.f32 %v28452_v52, %v10274_v56  ;;  %28089 = vmatprep.mubr.f32.mxu1 %v33666_v51  ;;  %30987 = vmatpush3.bf16.msra.mxu1 %v30984_v50 }
 0x663   :  { %v34645_v46 = vpack.c.bf16 %v10274_v56, %v10271_v33  ;;  %v10381_v13 = vsub.f32 %v10236_v58, %v10271_v33  ;;  %v28455_v44 = vpop.f32.mrb[26].mxu0  ;;  %30989 = vmatprep.subr.bf16.mxu1 %v30988_v37 }
 0x664   :  { %v10389_v5 = vand.u32 4294901760, %v10388_v35  ;;  %v10280_v11 = vand.u32 4294901760, %v28455_v44  ;;  %v10248_v42 = vpop.f32.mrb[27].mxu0 }
 0x665   :  { %v10382_v24 = vand.u32 4294901760, %v10381_v13  ;;  %v10277_v19 = vand.u32 4294901760, %v10248_v42  ;;  %28090 = vmatmul.mubr.f32.gmra.mrb[30].mxu1 %v33661_v48  ;;  %v34648_v4 = vpack.c.bf16 %v10388_v35, %v10381_v13 }
 0x666   :  { %v10390_v8 = vsub.f32 %v10388_v35, %v10389_v5  ;;  %v10402_v39 = vsub.f32 %v28455_v44, %v10280_v11  ;;  %30991 = vmatpush3.bf16.msra.mxu1 %v30988_v37  ;;  %28100 = vmatprep.mubr.f32.mxu1 %v33624_v32 }
 0x667   :  { %v10383_v51 = vsub.f32 %v10381_v13, %v10382_v24  ;;  %v34651_v2 = vpack.c.bf16 %v10280_v11, %v10277_v19  ;;  %v10395_v12 = vsub.f32 %v10248_v42, %v10277_v19  ;;  %30993 = vmatprep.subr.bf16.mxu1 %v34607_v36  ;;  %v34654_v6 = vpack.c.bf16 %v10389_v5, %v10382_v24 }
 0x668   :  { %v10403_v18 = vand.u32 4294901760, %v10402_v39  ;;  %v10391_v47 = vand.u32 4294901760, %v10390_v8 }
 0x669   :  { %v10396_v62 = vand.u32 4294901760, %v10395_v12  ;;  %28101 = vmatmul.mubr.f32.vlgmr.msra.gmra.mrb[28].mxu1 %v33620_v29  ;;  %v10384_v48 = vand.u32 4294901760, %v10383_v51  ;;  %v34657_v23 = vpack.c.bf16 %v10402_v39, %v10395_v12 }
 0x66a   :  { %v10404_v38 = vsub.f32 %v10402_v39, %v10403_v18  ;;  %28103 = vmatprep.mubr.f32.mxu1 %v33648_v43  ;;  %30995 = vmatpush3.bf16.msra.mxu1 %v34607_v36 }
 0x66b   :  { %v10397_v41 = vsub.f32 %v10395_v12, %v10396_v62  ;;  %30997 = vmatprep.subr.bf16.mxu1 %v34615_v53  ;;  %v34662_v20 = vpack.c.bf16 %v10391_v47, %v10384_v48  ;;  %v34664_v45 = vpack.c.bf16 %v10403_v18, %v10396_v62 }
 0x66c   :  { %v10405_v15 = vand.u32 4294901760, %v10404_v38 }
 0x66d   :  { %28104 = vmatmul.mubr.f32.gmra.mrb[30].mxu1 %v33641_v40  ;;  %v10398_v0 = vand.u32 4294901760, %v10397_v41 }
 0x66e   :  { %30999 = vmatpush3.bf16.msra.mxu1 %v34615_v53  ;;  %28114 = vmatprep.mubr.f32.mxu1 %v33624_v32 }
 0x66f   :  { %v34669_v1 = vpack.c.bf16 %v10405_v15, %v10398_v0 }
 0x671   :  { %28115 = vmatmul.mubr.f32.vlgmr.msra.gmra.mrb[28].mxu1 %v33620_v29 }
 0x672   :  { %28117 = vmatprep.mubr.f32.mxu1 %v33648_v43 }
 0x675   :  { %28118 = vmatmul.mubr.f32.gmra.mrb[30].mxu1 %v33641_v40 }
 0x68f   :  { %v7054_v36 = vpop.xlane.xlu1 %7053 }
 0x690   :  { %v7062_v14 = vsub.f32 %v34509_v17, %v7054_v36 }
 0x691   :  { %v7051_v21 = vpop.xlane.xlu0 %7050 }
 0x692   :  { %v7067_v9 = vmul.f32 1.442695, %v7062_v14  ;;  %v7061_v63 = vsub.f32 %v34513_v26, %v7051_v21 }
 0x693   :  { %v7060_v50 = vpop.xlane.xlu1 %7059 }
 0x694   :  { %33277 = vpow2.f32 %v7067_v9  ;;  %v7065_v53 = vmul.f32 1.442695, %v7061_v63  ;;  %v7064_v32 = vsub.f32 %v34523_v30, %v7060_v50 }
 0x695   :  { %v7057_v52 = vpop.xlane.xlu0 %7056 }
 0x696   :  { %33279 = vpow2.f32 %v7065_v53  ;;  %v7071_v37 = vmul.f32 1.442695, %v7064_v32  ;;  %v7063_v29 = vsub.f32 %v34531_v34, %v7057_v52 }
 0x698   :  { %33281 = vpow2.f32 %v7071_v37  ;;  %v7069_v43 = vmul.f32 1.442695, %v7063_v29 }
 0x69a   :  { %33283 = vpow2.f32 %v7069_v43 }
 0x69e   :  { %v33278_v40 = vpop.eup %33277 }
 0x69f   :  { %v7076_v17 = vsel %vm713_vm1, %v33278_v40, 0.0 }
 0x6a0   :  { %v33280_v56 = vpop.eup %33279  ;;  %7077 = vadd.xlane.f32.xlu1 %v7076_v17 }
 0x6a1   :  { %v7073_v26 = vsel %vm713_vm1, %v33280_v56, 0.0 }
 0x6a2   :  { %v33282_v58 = vpop.eup %33281  ;;  %7074 = vadd.xlane.f32.xlu0 %v7073_v26 }
 0x6a3   :  { %v7082_v33 = vsel %vm713_vm1, %v33282_v58, 0.0 }
 0x6a4   :  { %v33284_v30 = vpop.eup %33283  ;;  %7083 = vadd.xlane.f32.xlu1 %v7082_v33 }
 0x6a5   :  { %v7079_v35 = vsel %vm713_vm1, %v33284_v30, 0.0 }
 0x6a6   :  { %7080 = vadd.xlane.f32.xlu0 %v7079_v35 }
 0x72d   :  { %v7078_v34 = vpop.xlane.xlu1 %7077 }
 0x72e   :  { %33285 = vrcp.f32 %v7078_v34 }
 0x72f   :  { %v7075_v13 = vpop.xlane.xlu0 %7074 }
 0x730   :  { %33287 = vrcp.f32 %v7075_v13 }
 0x731   :  { %v7084_v44 = vpop.xlane.xlu1 %7083 }
 0x732   :  { %33289 = vrcp.f32 %v7084_v44 }
 0x733   :  { %v7081_v5 = vpop.xlane.xlu0 %7080 }
 0x734   :  { %33291 = vrcp.f32 %v7081_v5 }
 0x738   :  { %v33286_v11 = vpop.eup %33285 }
 0x739   :  { %v7088_v42 = vmul.f32 %v33286_v11, %v33278_v40 }
 0x73a   :  { %v33288_v24 = vpop.eup %33287 }
 0x73b   :  { %v7086_v19 = vmul.f32 %v33288_v24, %v33280_v56  ;;  %v7716_v39 = vsel %vm713_vm1, %v7088_v42, 0 }
 0x73c   :  { %v33290_v8 = vpop.eup %33289  ;;  %v34686_v62 = vand.u32 4294901760, %v7716_v39 }
 0x73d   :  { %v7092_v51 = vmul.f32 %v33290_v8, %v33282_v58  ;;  %v7713_v12 = vsel %vm713_vm1, %v7086_v19, 0 }
 0x73e   :  { %v33292_v18 = vpop.eup %33291  ;;  %v34684_v47 = vand.u32 4294901760, %v7713_v12  ;;  %v34697_v14 = vsub.f32 %v7716_v39, %v34686_v62 }
 0x73f   :  { %v7090_v48 = vmul.f32 %v33292_v18, %v33284_v30  ;;  %v7722_v41 = vsel %vm713_vm1, %v7092_v51, 0 }
 0x740   :  { %v34689_v38 = vsub.f32 %v7713_v12, %v34684_v47  ;;  %v34699_v21 = vand.u32 4294901760, %v7722_v41  ;;  %v7805_v43 = vand.u32 4294901760, %v34697_v14 }
 0x741   :  { %v7719_v15 = vsel %vm713_vm1, %v7090_v48, 0 }
 0x742   :  { %v7795_v0 = vand.u32 4294901760, %v34689_v38  ;;  %v34694_v36 = vand.u32 4294901760, %v7719_v15  ;;  %v34709_v40 = vsub.f32 %v7722_v41, %v34699_v21  ;;  %v7806_v42 = vsub.f32 %v34697_v14, %v7805_v43 }
 0x744   :  { %v28116_v9 = vpop.f32.mrb[28].mxu1  ;;  %v7796_v63 = vsub.f32 %v34689_v38, %v7795_v0  ;;  %v34705_v32 = vsub.f32 %v7719_v15, %v34694_v36  ;;  %v7825_v24 = vand.u32 4294901760, %v34709_v40 }
 0x745   :  { %v7728_v50 = vand.u32 4294901760, %v28116_v9  ;;  %v7690_v53 = vpop.f32.mrb[29].mxu1 }
 0x746   :  { %v7725_v52 = vand.u32 4294901760, %v7690_v53  ;;  %v7797_v37 = vand.u32 4294901760, %v7796_v63  ;;  %v7815_v35 = vand.u32 4294901760, %v34705_v32 }
 0x747   :  { %v7842_v29 = vsub.f32 %v28116_v9, %v7728_v50 }
 0x748   :  { %v34711_v17 = vpack.c.bf16 %v7728_v50, %v7725_v52  ;;  %v7835_v56 = vsub.f32 %v7690_v53, %v7725_v52  ;;  %28128 = vmatprep.mubr.f32.mxu1 %v7797_v37  ;;  %v28119_v26 = vpop.f32.mrb[30].mxu1  ;;  %v7816_v48 = vsub.f32 %v34705_v32, %v7815_v35  ;;  %v7807_v50 = vand.u32 4294901760, %v7806_v42 }
 0x749   :  { %v7843_v58 = vand.u32 4294901760, %v7842_v29  ;;  %v7734_v33 = vand.u32 4294901760, %v28119_v26  ;;  %v7702_v30 = vpop.f32.mrb[31].mxu1  ;;  %v7826_v37 = vsub.f32 %v34709_v40, %v7825_v24 }
 0x74a   :  { %v7836_v34 = vand.u32 4294901760, %v7835_v56  ;;  %v7731_v13 = vand.u32 4294901760, %v7702_v30  ;;  %31001 = vmatprep.subr.bf16.mxu1 %v34711_v17  ;;  %v31016_v44 = vpack.c.bf16 %v7842_v29, %v7835_v56 }
 0x74b   :  { %v7844_v5 = vsub.f32 %v7842_v29, %v7843_v58  ;;  %v7856_v11 = vsub.f32 %v28119_v26, %v7734_v33  ;;  %31003 = vmatpush3.bf16.msra.mxu1 %v34711_v17 }
 0x74c   :  { %v7837_v19 = vsub.f32 %v7835_v56, %v7836_v34  ;;  %v34720_v8 = vpack.c.bf16 %v7734_v33, %v7731_v13  ;;  %v7849_v39 = vsub.f32 %v7702_v30, %v7731_v13  ;;  %v31032_v51 = vpack.c.bf16 %v7843_v58, %v7836_v34  ;;  %v25193_v34 = vld [vmem:[%s36719_s4 + $0x3] ss:$0 sm:$0xff] }
 0x74d   :  { %v7857_v12 = vand.u32 4294901760, %v7856_v11  ;;  %v7845_v18 = vand.u32 4294901760, %v7844_v5  ;;  %v7817_v56 = vand.u32 4294901760, %v7816_v48  ;;  %v7827_v33 = vand.u32 4294901760, %v7826_v37 }
 0x74e   :  { %v7850_v41 = vand.u32 4294901760, %v7849_v39  ;;  %31005 = vmatprep.subr.bf16.mxu1 %v34720_v8  ;;  %v7838_v15 = vand.u32 4294901760, %v7837_v19  ;;  %v31020_v9 = vpack.c.bf16 %v7856_v11, %v7849_v39  ;;  %v32405_v13 = vadd.f32 %v25193_v34, %v34587_v3 }
 0x74f   :  { %v7858_v63 = vsub.f32 %v7856_v11, %v7857_v12  ;;  %31007 = vmatpush3.bf16.msra.mxu1 %v34720_v8 }
 0x750   :  { %v7851_v53 = vsub.f32 %v7849_v39, %v7850_v41  ;;  %v31008_v52 = vpack.c.bf16 %v7845_v18, %v7838_v15  ;;  %v31036_v29 = vpack.c.bf16 %v7857_v12, %v7850_v41 }
 0x751   :  { %v7859_v26 = vand.u32 4294901760, %v7858_v63 }
 0x752   :  { %28129 = vmatmul.mubr.f32.vlgmr.msra.gmra.mrb[24].mxu1 %v7807_v50  ;;  %31009 = vmatprep.subr.bf16.mxu1 %v31008_v52  ;;  %v7852_v58 = vand.u32 4294901760, %v7851_v53 }
 0x753   :  { %28131 = vmatprep.mubr.f32.mxu1 %v7817_v56  ;;  %31011 = vmatpush3.bf16.msra.mxu1 %v31008_v52 }
 0x754   :  { %v31012_v30 = vpack.c.bf16 %v7859_v26, %v7852_v58 }
 0x756   :  { %28132 = vmatmul.mubr.f32.gmra.mrb[26].mxu1 %v7827_v33  ;;  %31013 = vmatprep.subr.bf16.mxu1 %v31012_v30 }
 0x757   :  { %31015 = vmatpush3.bf16.msra.mxu1 %v31012_v30  ;;  %28142 = vmatprep.mubr.f32.mxu1 %v34684_v47 }
 0x758   :  { %31017 = vmatprep.subr.bf16.mxu1 %v31016_v44 }
 0x75a   :  { %28143 = vmatmul.mubr.f32.vlgmr.msra.gmra.mrb[24].mxu1 %v34686_v62 }
 0x75b   :  { %28145 = vmatprep.mubr.f32.mxu1 %v34694_v36  ;;  %31019 = vmatpush3.bf16.msra.mxu1 %v31016_v44  ;;  %v8970_v44 = vsel %vm713_vm1, %v32405_v13, 0 }
 0x75c   :  { %31021 = vmatprep.subr.bf16.mxu1 %v31020_v9 }
 0x75e   :  { %28146 = vmatmul.mubr.f32.gmra.mrb[26].mxu1 %v34699_v21 }
 0x75f   :  { %31023 = vmatpush3.bf16.msra.mxu1 %v31020_v9  ;;  %28156 = vmatprep.mubr.f32.mxu1 %v34689_v38 }
 0x760   :  { %31025 = vmatprep.subr.bf16.mxu1 %v34711_v17 }
 0x762   :  { %28157 = vmatmul.mubr.f32.vlgmr.msra.gmra.mrb[24].mxu1 %v34697_v14  ;;  %v32407_v14 = vadd.f32 %v25193_v34, %v34597_v25 }
 0x763   :  { %28159 = vmatprep.mubr.f32.mxu1 %v34705_v32  ;;  %31027 = vmatpush3.bf16.msra.mxu1 %v34711_v17  ;;  %v34747_v32 = vand.u32 4294901760, %v8970_v44 }
 0x764   :  { %31029 = vmatprep.subr.bf16.mxu1 %v34720_v8 }
 0x765   :  { %v9051_v3 = vsub.f32 %v8970_v44, %v34747_v32 }
 0x766   :  { %28160 = vmatmul.mubr.f32.gmra.mrb[26].mxu1 %v34709_v40 }
 0x767   :  { %31031 = vmatpush3.bf16.msra.mxu1 %v34720_v8  ;;  %28170 = vmatprep.mubr.f32.mxu1 %v7795_v0  ;;  %v9052_v38 = vand.u32 4294901760, %v9051_v3  ;;  %v32404_v0 = vadd.f32 %v34585_v27, %v25193_v34 }
 0x768   :  { %31033 = vmatprep.subr.bf16.mxu1 %v31032_v51 }
 0x769   :  { %v8973_v40 = vsel %vm713_vm1, %v32404_v0, 0 }
 0x76a   :  { %28171 = vmatmul.mubr.f32.vlgmr.msra.gmra.mrb[24].mxu1 %v7805_v43  ;;  %v9053_v43 = vsub.f32 %v9051_v3, %v9052_v38  ;;  %v9060_v27 = vand.u32 4294901760, %v8973_v40 }
 0x76b   :  { %28173 = vmatprep.mubr.f32.mxu1 %v7815_v35  ;;  %31035 = vmatpush3.bf16.msra.mxu1 %v31032_v51  ;;  %v8976_v35 = vsel %vm713_vm1, %v32407_v14, 0 }
 0x76c   :  { %31037 = vmatprep.subr.bf16.mxu1 %v31036_v29  ;;  %v9054_v5 = vand.u32 4294901760, %v9053_v43  ;;  %v9070_v11 = vand.u32 4294901760, %v8976_v35 }
 0x76e   :  { %28174 = vmatmul.mubr.f32.gmra.mrb[26].mxu1 %v7825_v24 }
 0x76f   :  { %31039 = vmatpush3.bf16.msra.mxu1 %v31036_v29  ;;  %28184 = vmatprep.mubr.f32.mxu1 %v34684_v47 }
 0x770   :  { %31041 = vmatprep.subr.bf16.mxu1 %v34711_v17 }
 0x772   :  { %28185 = vmatmul.mubr.f32.vlgmr.msra.gmra.mrb[24].mxu1 %v34686_v62 }
 0x773   :  { %28187 = vmatprep.mubr.f32.mxu1 %v34694_v36  ;;  %31043 = vmatpush3.bf16.msra.mxu1 %v34711_v17  ;;  %v32406_v17 = vadd.f32 %v34591_v16, %v25193_v34  ;;  %v9071_v16 = vsub.f32 %v8976_v35, %v9070_v11 }
 0x774   :  { %31045 = vmatprep.subr.bf16.mxu1 %v34720_v8 }
 0x775   :  { %v8979_v25 = vsel %vm713_vm1, %v32406_v17, 0  ;;  %v9072_v19 = vand.u32 4294901760, %v9071_v16 }
 0x776   :  { %28188 = vmatmul.mubr.f32.gmra.mrb[26].mxu1 %v34699_v21  ;;  %v9080_v42 = vand.u32 4294901760, %v8979_v25 }
 0x777   :  { %31047 = vmatpush3.bf16.msra.mxu1 %v34720_v8  ;;  %28198 = vmatprep.mubr.f32.mxu1 %v34684_v47  ;;  %v9061_v47 = vsub.f32 %v8973_v40, %v9060_v27  ;;  %v9073_v39 = vsub.f32 %v9071_v16, %v9072_v19 }
 0x778   :  { %31097 = vmatprep.subr.bf16.mxu1 %v33732_v61  ;;  %v9081_v24 = vsub.f32 %v8979_v25, %v9080_v42 }
 0x779   :  { %v9074_v12 = vand.u32 4294901760, %v9073_v39 }
 0x77a   :  { %28199 = vmatmul.mubr.f32.vlgmr.msra.gmra.mrb[24].mxu1 %v34686_v62  ;;  %v9062_v62 = vand.u32 4294901760, %v9061_v47  ;;  %v9082_v8 = vand.u32 4294901760, %v9081_v24 }
 0x77b   :  { %28201 = vmatprep.mubr.f32.mxu1 %v34694_v36 }
 0x77c   :  { %v9063_v36 = vsub.f32 %v9061_v47, %v9062_v62 }
 0x77e   :  { %28202 = vmatmul.mubr.f32.gmra.mrb[26].mxu1 %v34699_v21  ;;  %v9064_v51 = vand.u32 4294901760, %v9063_v36  ;;  %v9083_v21 = vsub.f32 %v9081_v24, %v9082_v8 }
 0x77f   :  { %28296 = vmatprep.mubr.f32.mxu1 %v9054_v5 }
 0x780   :  { %31099 = vmatpush3.bf16.xpose.msra.mxu1 %v33732_v61  ;;  %v9084_v18 = vand.u32 4294901760, %v9083_v21 }
 0x781   :  { %31101 = vmatprep.subr.bf16.mxu1 %v33742_v49 }
 0x788   :  { %31103 = vmatpush3.bf16.xpose.msra.mxu1 %v33742_v49 }
 0x789   :  { %31105 = vmatprep.subr.bf16.mxu1 %v33675_v54 }
 0x78f   :  { %28297 = vmatmul.mubr.f32.vlgmr.msra.gmra.mrb[32].mxu1 %v9064_v51 }
 0x790   :  { %28299 = vmatprep.mubr.f32.mxu1 %v9074_v12  ;;  %31107 = vmatpush3.bf16.xpose.msra.mxu1 %v33675_v54 }
 0x791   :  { %31109 = vmatprep.subr.bf16.mxu1 %v33689_v59 }
 0x793   :  { %28300 = vmatmul.mubr.f32.gmra.mrb[34].mxu1 %v9084_v18 }
 0x794   :  { %28310 = vmatprep.mubr.f32.mxu1 %v34747_v32 }
 0x798   :  { %31111 = vmatpush3.bf16.xpose.msra.mxu1 %v33689_v59 }
 0x799   :  { %31113 = vmatprep.subr.bf16.mxu1 %v33700_v60 }
 0x79f   :  { %28311 = vmatmul.mubr.f32.vlgmr.msra.gmra.mrb[32].mxu1 %v9060_v27 }
 0x7a0   :  { %28313 = vmatprep.mubr.f32.mxu1 %v9070_v11  ;;  %31115 = vmatpush3.bf16.xpose.msra.mxu1 %v33700_v60 }
 0x7a1   :  { %31117 = vmatprep.subr.bf16.mxu1 %v33778_v57 }
 0x7a3   :  { %28314 = vmatmul.mubr.f32.gmra.mrb[34].mxu1 %v9080_v42 }
 0x7a4   :  { %28324 = vmatprep.mubr.f32.mxu1 %v9051_v3 }
 0x7a8   :  { %31119 = vmatpush3.bf16.xpose.msra.mxu1 %v33778_v57 }
 0x7a9   :  { %31121 = vmatprep.subr.bf16.mxu1 %v33732_v61 }
 0x7af   :  { %28325 = vmatmul.mubr.f32.vlgmr.msra.gmra.mrb[32].mxu1 %v9061_v47 }
 0x7b0   :  { %28327 = vmatprep.mubr.f32.mxu1 %v9071_v16  ;;  %31123 = vmatpush3.bf16.xpose.msra.mxu1 %v33732_v61 }
 0x7b1   :  { %31125 = vmatprep.subr.bf16.mxu1 %v33742_v49 }
 0x7b3   :  { %28328 = vmatmul.mubr.f32.gmra.mrb[34].mxu1 %v9081_v24 }
 0x7b4   :  { %28338 = vmatprep.mubr.f32.mxu1 %v9052_v38 }
 0x7b8   :  { %31127 = vmatpush3.bf16.xpose.msra.mxu1 %v33742_v49 }
 0x7b9   :  { %31129 = vmatprep.subr.bf16.mxu1 %v33828_v31 }
 0x7bf   :  { %28339 = vmatmul.mubr.f32.vlgmr.msra.gmra.mrb[32].mxu1 %v9062_v62 }
 0x7c0   :  { %28341 = vmatprep.mubr.f32.mxu1 %v9072_v19  ;;  %31131 = vmatpush3.bf16.xpose.msra.mxu1 %v33828_v31 }
 0x7c1   :  { %31133 = vmatprep.subr.bf16.mxu1 %v33844_v10 }
 0x7c3   :  { %28342 = vmatmul.mubr.f32.gmra.mrb[34].mxu1 %v9082_v8 }
 0x7c4   :  { %28352 = vmatprep.mubr.f32.mxu1 %v34747_v32 }
 0x7c8   :  { %31135 = vmatpush3.bf16.xpose.msra.mxu1 %v33844_v10 }
 0x7c9   :  { %31137 = vmatprep.subr.bf16.mxu1 %v33732_v61 }
 0x7cf   :  { %28353 = vmatmul.mubr.f32.vlgmr.msra.gmra.mrb[32].mxu1 %v9060_v27 }
 0x7d0   :  { %28355 = vmatprep.mubr.f32.mxu1 %v9070_v11  ;;  %31139 = vmatpush3.bf16.xpose.msra.mxu1 %v33732_v61 }
 0x7d1   :  { %31141 = vmatprep.subr.bf16.mxu1 %v33742_v49 }
 0x7d3   :  { %28356 = vmatmul.mubr.f32.gmra.mrb[34].mxu1 %v9080_v42 }
 0x7d4   :  { %28366 = vmatprep.mubr.f32.mxu1 %v34747_v32 }
 0x7d8   :  { %31143 = vmatpush3.bf16.xpose.msra.mxu1 %v33742_v49 }
 0x7d9   :  { %31193 = vmatprep.subr.bf16.mxu1 %v34645_v46 }
 0x7df   :  { %28367 = vmatmul.mubr.f32.vlgmr.msra.gmra.mrb[32].mxu1 %v9060_v27 }
 0x7e0   :  { %28369 = vmatprep.mubr.f32.mxu1 %v9070_v11  ;;  %31195 = vmatpush3.bf16.msra.mxu1 %v34645_v46 }
 0x7e1   :  { %31197 = vmatprep.subr.bf16.mxu1 %v34651_v2 }
 0x7e3   :  { %28370 = vmatmul.mubr.f32.gmra.mrb[34].mxu1 %v9080_v42 }
 0x7e4   :  { %31199 = vmatpush3.bf16.msra.mxu1 %v34651_v2 }
 0x7e5   :  { %31201 = vmatprep.subr.bf16.mxu1 %v34662_v20 }
 0x8b2   :  { %v28368_v54 = vpop.f32.mrb[32].mxu1 }
 0x8b3   :  { %v32408_v59 = vadd.f32 %v28368_v54, %v34025_v22  ;;  %v9573_v60 = vpop.f32.mrb[33].mxu1 }
 0x8b4   :  { %v32409_v61 = vadd.f32 %v9573_v60, %v34028_v28 }
 0x8b5   :  { %v9598_v49 = vsel %vm713_vm1, %v32408_v59, -inf }
 0x8b6   :  { %9599 = vmax.xlane.f32.xlu1 %v9598_v49  ;;  %v28371_v57 = vpop.f32.mrb[34].mxu1  ;;  %v9595_v31 = vsel %vm713_vm1, %v32409_v61, -inf }
 0x8b7   :  { %v32410_v10 = vadd.f32 %v28371_v57, %v34034_v55  ;;  %v9585_v48 = vpop.f32.mrb[35].mxu1  ;;  %9596 = vmax.xlane.f32.xlu0 %v9595_v31 }
 0x8b8   :  { %v32411_v41 = vadd.f32 %v9585_v48, %v34039_v7 }
 0x8b9   :  { %v9604_v15 = vsel %vm713_vm1, %v32410_v10, -inf }
 0x8ba   :  { %9605 = vmax.xlane.f32.xlu1 %v9604_v15  ;;  %v9601_v9 = vsel %vm713_vm1, %v32411_v41, -inf }
 0x8bb   :  { %9602 = vmax.xlane.f32.xlu0 %v9601_v9 }
 0x943   :  { %v9600_v63 = vpop.xlane.xlu1 %9599 }
 0x944   :  { %v9608_v50 = vsub.f32 %v32408_v59, %v9600_v63  ;;  %v9597_v53 = vpop.xlane.xlu0 %9596 }
 0x945   :  { %v9607_v52 = vsub.f32 %v32409_v61, %v9597_v53 }
 0x946   :  { %v9613_v37 = vmul.f32 1.442695, %v9608_v50 }
 0x947   :  { %v9611_v29 = vmul.f32 1.442695, %v9607_v52  ;;  %v9606_v56 = vpop.xlane.xlu1 %9605 }
 0x948   :  { %33293 = vpow2.f32 %v9613_v37  ;;  %v9610_v26 = vsub.f32 %v32410_v10, %v9606_v56  ;;  %v9603_v58 = vpop.xlane.xlu0 %9602 }
 0x949   :  { %33295 = vpow2.f32 %v9611_v29  ;;  %v9609_v33 = vsub.f32 %v32411_v41, %v9603_v58  ;;  %v36809_v29 = vld [vmem:[#allocation9_spill] sm:$0xff] }
 0x94a   :  { %v9617_v30 = vmul.f32 1.442695, %v9610_v26 }
 0x94b   :  { %v9615_v34 = vmul.f32 1.442695, %v9609_v33 }
 0x94c   :  { %33297 = vpow2.f32 %v9617_v30 }
 0x94d   :  { %33299 = vpow2.f32 %v9615_v34  ;;  %v36810_v34 = vld [vmem:[#allocation10_spill] sm:$0xff] }
 0x952   :  { %v33294_v13 = vpop.eup %33293 }
 0x953   :  { %v33296_v44 = vpop.eup %33295  ;;  %v9622_v32 = vsel %vm713_vm1, %v33294_v13, 0.0 }
 0x954   :  { %9623 = vadd.xlane.f32.xlu1 %v9622_v32  ;;  %v9619_v3 = vsel %vm713_vm1, %v33296_v44, 0.0 }
 0x955   :  { %9620 = vadd.xlane.f32.xlu0 %v9619_v3 }
 0x956   :  { %v33298_v38 = vpop.eup %33297 }
 0x957   :  { %v33300_v0 = vpop.eup %33299  ;;  %v9628_v14 = vsel %vm713_vm1, %v33298_v38, 0.0 }
 0x958   :  { %9629 = vadd.xlane.f32.xlu1 %v9628_v14  ;;  %v9625_v43 = vsel %vm713_vm1, %v33300_v0, 0.0 }
 0x959   :  { %9626 = vadd.xlane.f32.xlu0 %v9625_v43 }
 0x9e1   :  { %v9624_v40 = vpop.xlane.xlu1 %9623 }
 0x9e2   :  { %33301 = vrcp.f32 %v9624_v40  ;;  %v9621_v17 = vpop.xlane.xlu0 %9620 }
 0x9e3   :  { %33303 = vrcp.f32 %v9621_v17 }
 0x9e5   :  { %v9630_v35 = vpop.xlane.xlu1 %9629 }
 0x9e6   :  { %33305 = vrcp.f32 %v9630_v35  ;;  %v9627_v27 = vpop.xlane.xlu0 %9626 }
 0x9e7   :  { %33307 = vrcp.f32 %v9627_v27 }
 0x9ec   :  { %v33302_v5 = vpop.eup %33301 }
 0x9ed   :  { %v33304_v25 = vpop.eup %33303  ;;  %v9634_v11 = vmul.f32 %v33302_v5, %v33294_v13 }
 0x9ee   :  { %v9632_v47 = vmul.f32 %v33304_v25, %v33296_v44  ;;  %v36811_v44 = vld [vmem:[#allocation11_spill] sm:$0xff] }
 0x9ef   :  { %v10262_v42 = vsel %vm713_vm1, %v9634_v11, 0 }
 0x9f0   :  { %v33306_v16 = vpop.eup %33305  ;;  %v34813_v62 = vand.u32 4294901760, %v10262_v42  ;;  %v10259_v24 = vsel %vm713_vm1, %v9632_v47, 0 }
 0x9f1   :  { %v33308_v19 = vpop.eup %33307  ;;  %v9638_v36 = vmul.f32 %v33306_v16, %v33298_v38  ;;  %v10339_v8 = vand.u32 4294901760, %v10259_v24 }
 0x9f2   :  { %v10350_v39 = vsub.f32 %v10262_v42, %v34813_v62  ;;  %v9636_v51 = vmul.f32 %v33308_v19, %v33300_v0 }
 0x9f3   :  { %v10340_v21 = vsub.f32 %v10259_v24, %v10339_v8  ;;  %v10268_v12 = vsel %vm713_vm1, %v9638_v36, 0 }
 0x9f4   :  { %v10351_v18 = vand.u32 4294901760, %v10350_v39  ;;  %v10265_v54 = vsel %vm713_vm1, %v9636_v51, 0  ;;  %v10369_v59 = vand.u32 4294901760, %v10268_v12 }
 0x9f5   :  { %v10341_v60 = vand.u32 4294901760, %v10340_v21  ;;  %v10359_v61 = vand.u32 4294901760, %v10265_v54 }
 0x9f6   :  { %v10352_v49 = vsub.f32 %v10350_v39, %v10351_v18  ;;  %v10370_v57 = vsub.f32 %v10268_v12, %v10369_v59  ;;  %v10981_v12 = vld [vmem:[%s36721_s6 + $0x8] sm:$0xff] }
 0x9f7   :  { %v10342_v31 = vsub.f32 %v10340_v21, %v10341_v60  ;;  %v10360_v10 = vsub.f32 %v10265_v54, %v10359_v61 }
 0x9f8   :  { %v10371_v48 = vand.u32 4294901760, %v10370_v57  ;;  %v10353_v9 = vand.u32 4294901760, %v10352_v49 }
 0x9f9   :  { %v10343_v41 = vand.u32 4294901760, %v10342_v31  ;;  %v10361_v15 = vand.u32 4294901760, %v10360_v10 }
 0x9fa   :  { %v10372_v63 = vsub.f32 %v10370_v57, %v10371_v48 }
 0x9fb   :  { %28464 = vmatprep.mubr.f32.mxu1 %v10343_v41  ;;  %v10362_v50 = vsub.f32 %v10360_v10, %v10361_v15 }
 0x9fc   :  { %28465 = vmatmul.mubr.f32.vlgmr.msra.gmra.mrb[24].mxu1 %v10353_v9  ;;  %v10373_v52 = vand.u32 4294901760, %v10372_v63 }
 0x9fd   :  { %31203 = vmatpush3.bf16.msra.mxu1 %v34662_v20  ;;  %v10363_v53 = vand.u32 4294901760, %v10362_v50 }
 0x9fe   :  { %31205 = vmatprep.subr.bf16.mxu1 %v34669_v1 }
 0x9ff   :  { %28467 = vmatprep.mubr.f32.mxu1 %v10363_v53 }
 0xa00   :  { %28468 = vmatmul.mubr.f32.gmra.mrb[26].mxu1 %v10373_v52 }
 0xa01   :  { %31207 = vmatpush3.bf16.msra.mxu1 %v34669_v1  ;;  %28478 = vmatprep.mubr.f32.mxu1 %v10339_v8 }
 0xa02   :  { %31209 = vmatprep.subr.bf16.mxu1 %v34648_v4 }
 0xa04   :  { %28479 = vmatmul.mubr.f32.vlgmr.msra.gmra.mrb[24].mxu1 %v34813_v62 }
 0xa05   :  { %31211 = vmatpush3.bf16.msra.mxu1 %v34648_v4  ;;  %28481 = vmatprep.mubr.f32.mxu1 %v10359_v61  ;;  %v25194_v4 = vld [vmem:[%s36724_s9] ss:$0 sm:$0xff] }
 0xa06   :  { %31213 = vmatprep.subr.bf16.mxu1 %v34657_v23 }
 0xa08   :  { %28482 = vmatmul.mubr.f32.gmra.mrb[26].mxu1 %v10369_v59 }
 0xa09   :  { %31215 = vmatpush3.bf16.msra.mxu1 %v34657_v23  ;;  %28492 = vmatprep.mubr.f32.mxu1 %v10340_v21  ;;  %v10980_v21 = vld [vmem:[%s36721_s6] sm:$0xff] }
 0xa0a   :  { %31217 = vmatprep.subr.bf16.mxu1 %v34645_v46  ;;  %v11004_v54 = vand.u32 4294901760, %v10980_v21 }
 0xa0c   :  { %28493 = vmatmul.mubr.f32.vlgmr.msra.gmra.mrb[24].mxu1 %v10350_v39 }
 0xa0d   :  { %31219 = vmatpush3.bf16.msra.mxu1 %v34645_v46  ;;  %28495 = vmatprep.mubr.f32.mxu1 %v10360_v10  ;;  %v11114_v10 = vsub.f32 %v10980_v21, %v11004_v54 }
 0xa0e   :  { %31221 = vmatprep.subr.bf16.mxu1 %v34651_v2 }
 0xa0f   :  { %v11115_v41 = vand.u32 4294901760, %v11114_v10 }
 0xa10   :  { %28496 = vmatmul.mubr.f32.gmra.mrb[26].mxu1 %v10370_v57 }
 0xa11   :  { %31223 = vmatpush3.bf16.msra.mxu1 %v34651_v2  ;;  %28506 = vmatprep.mubr.f32.mxu1 %v10341_v60  ;;  %v10983_v60 = vld [vmem:[%s36721_s6 + $0x18] sm:$0xff]  ;;  %v11116_v9 = vsub.f32 %v11114_v10, %v11115_v41 }
 0xa12   :  { %31225 = vmatprep.subr.bf16.mxu1 %v34654_v6  ;;  %v11013_v49 = vand.u32 4294901760, %v10983_v60 }
 0xa13   :  { %v11117_v52 = vand.u32 4294901760, %v11116_v9 }
 0xa14   :  { %28507 = vmatmul.mubr.f32.vlgmr.msra.gmra.mrb[24].mxu1 %v10351_v18  ;;  %v10982_v18 = vld [vmem:[%s36721_s6 + $0x10] sm:$0xff]  ;;  %v11135_v53 = vsub.f32 %v10983_v60, %v11013_v49 }
 0xa15   :  { %31227 = vmatpush3.bf16.msra.mxu1 %v34654_v6  ;;  %28509 = vmatprep.mubr.f32.mxu1 %v10361_v15 }
 0xa16   :  { %31229 = vmatprep.subr.bf16.mxu1 %v34664_v45 }
 0xa18   :  { %28510 = vmatmul.mubr.f32.gmra.mrb[26].mxu1 %v10371_v48 }
 0xa19   :  { %31231 = vmatpush3.bf16.msra.mxu1 %v34664_v45  ;;  %28520 = vmatprep.mubr.f32.mxu1 %v10339_v8 }
 0xa1a   :  { %31233 = vmatprep.subr.bf16.mxu1 %v34645_v46 }
 0xa1c   :  { %28521 = vmatmul.mubr.f32.vlgmr.msra.gmra.mrb[24].mxu1 %v34813_v62 }
 0xa1d   :  { %31235 = vmatpush3.bf16.msra.mxu1 %v34645_v46  ;;  %28523 = vmatprep.mubr.f32.mxu1 %v10359_v61  ;;  %v36808_v46 = vld [vmem:[#allocation8_spill] sm:$0xff] }
 0xa1e   :  { %31237 = vmatprep.subr.bf16.mxu1 %v34651_v2 }
 0xa20   :  { %28524 = vmatmul.mubr.f32.gmra.mrb[26].mxu1 %v10369_v59 }
 0xa21   :  { %31239 = vmatpush3.bf16.msra.mxu1 %v34651_v2  ;;  %28534 = vmatprep.mubr.f32.mxu1 %v10339_v8 }
 0xa24   :  { %28535 = vmatmul.mubr.f32.vlgmr.msra.gmra.mrb[24].mxu1 %v34813_v62 }
 0xa25   :  { %28537 = vmatprep.mubr.f32.mxu1 %v10359_v61  ;;  %v11010_v61 = vand.u32 4294901760, %v10982_v18 }
 0xa27   :  { %v34886_v31 = vpack.c.bf16 %v11013_v49, %v11010_v61  ;;  %v11128_v50 = vsub.f32 %v10982_v18, %v11010_v61 }
 0xa28   :  { %28538 = vmatmul.mubr.f32.gmra.mrb[26].mxu1 %v10369_v59  ;;  %v11007_v59 = vand.u32 4294901760, %v10981_v12 }
 0xa2a   :  { %v34884_v57 = vpack.c.bf16 %v11007_v59, %v11004_v54  ;;  %v11121_v48 = vsub.f32 %v10981_v12, %v11007_v59 }
 0xa2c   :  { %31241 = vmatprep.subr.bf16.mxu0 %v34884_v57  ;;  %v11122_v15 = vand.u32 4294901760, %v11121_v48 }
 0xa2d   :  { %31243 = vmatpush3.bf16.msra.mxu0 %v34884_v57 }
 0xa2e   :  { %31245 = vmatprep.subr.bf16.mxu0 %v34886_v31  ;;  %v11123_v63 = vsub.f32 %v11121_v48, %v11122_v15 }
 0xa31   :  { %31247 = vmatpush3.bf16.msra.mxu0 %v34886_v31 }
 0xaf7   :  { %v28536_v6 = vpop.f32.mrb[24].mxu1 }
 0xaf8   :  { %v10896_v23 = vadd.f32 %v28536_v6, %v25194_v4  ;;  %v10862_v20 = vpop.f32.mrb[25].mxu1  ;;  %v11129_v6 = vand.u32 4294901760, %v11128_v50 }
 0xaf9   :  { %v10895_v45 = vadd.f32 %v25194_v4, %v10862_v20 }
 0xafa   :  { %v10900_v1 = vadd.f32 %v36808_v46, %v10896_v23  ;;  %v11136_v23 = vand.u32 4294901760, %v11135_v53 }
 0xafb   :  { %v28539_v37 = vpop.f32.mrb[26].mxu1  ;;  %v10899_v56 = vadd.f32 %v36809_v29, %v10895_v45  ;;  %v11130_v45 = vsub.f32 %v11128_v50, %v11129_v6 }
 0xafc   :  { %v10898_v26 = vadd.f32 %v28539_v37, %v25194_v4  ;;  %v10874_v2 = vpop.f32.mrb[27].mxu1  ;;  %v10910_v58 = vsel %vm713_vm1, %v10900_v1, 0.0  ;;  %v11137_v46 = vsub.f32 %v11135_v53, %v11136_v23 }
 0xafd   :  { %v10897_v33 = vadd.f32 %v25194_v4, %v10874_v2  ;;  %10911 = vadd.xlane.f32.xlu1 %v10910_v58  ;;  %v10907_v30 = vsel %vm713_vm1, %v10899_v56, 0.0  ;;  %v11124_v4 = vand.u32 4294901760, %v11123_v63  ;;  %v34901_v2 = vpack.c.bf16 %v11122_v15, %v11115_v41 }
 0xafe   :  { %10908 = vadd.xlane.f32.xlu0 %v10907_v30  ;;  %v10902_v13 = vadd.f32 %v36810_v34, %v10898_v26  ;;  %v11138_v37 = vand.u32 4294901760, %v11137_v46  ;;  %v34899_v26 = vpack.c.bf16 %v11135_v53, %v11128_v50  ;;  %v34903_v58 = vpack.c.bf16 %v11136_v23, %v11129_v6 }
 0xaff   :  { %v10901_v32 = vadd.f32 %v36811_v44, %v10897_v33  ;;  %v34892_v20 = vpack.c.bf16 %v11124_v4, %v11117_v52 }
 0xb00   :  { %v10916_v3 = vsel %vm713_vm1, %v10902_v13, 0.0 }
 0xb01   :  { %10917 = vadd.xlane.f32.xlu1 %v10916_v3  ;;  %v10913_v38 = vsel %vm713_vm1, %v10901_v32, 0.0  ;;  %31249 = vmatprep.subr.bf16.mxu0 %v34892_v20 }
 0xb02   :  { %10914 = vadd.xlane.f32.xlu0 %v10913_v38 }
 0xb8a   :  { %v10912_v0 = vpop.xlane.xlu1 %10911 }
 0xb8b   :  { %v10921_v14 = vmul.f32 0.03125, %v10912_v0  ;;  %v10909_v43 = vpop.xlane.xlu0 %10908 }
 0xb8c   :  { %v10920_v40 = vmul.f32 0.03125, %v10909_v43 }
 0xb8d   :  { %v34852_v17 = vsub.f32 %v10900_v1, %v10921_v14  ;;  %v11131_v1 = vand.u32 4294901760, %v11130_v45 }
 0xb8e   :  { %v34854_v35 = vsub.f32 %v10899_v56, %v10920_v40  ;;  %v10918_v27 = vpop.xlane.xlu1 %10917  ;;  %v34897_v56 = vpack.c.bf16 %v11121_v48, %v11114_v10 }
 0xb8f   :  { %v10923_v5 = vmul.f32 0.03125, %v10918_v27  ;;  %v10915_v25 = vpop.xlane.xlu0 %10914  ;;  %v10929_v11 = vmul.f32 %v34852_v17, %v34852_v17  ;;  %v34895_v29 = vpack.c.bf16 %v11138_v37, %v11131_v1 }
 0xb90   :  { %v10922_v47 = vmul.f32 0.03125, %v10915_v25  ;;  %v10928_v42 = vmul.f32 %v34854_v35, %v34854_v35 }
 0xb91   :  { %v34860_v16 = vsub.f32 %v10902_v13, %v10923_v5  ;;  %v10935_v62 = vsel %vm713_vm1, %v10929_v11, 0.0  ;;  %v25197_v5 = vld [vmem:[%s36724_s9 + $0x1] ss:$0 sm:$0xff] }
 0xb92   :  { %v34863_v24 = vsub.f32 %v10901_v32, %v10922_v47  ;;  %10936 = vadd.xlane.f32.xlu1 %v10935_v62  ;;  %v10932_v19 = vsel %vm713_vm1, %v10928_v42, 0.0  ;;  %v25198_v42 = vld [vmem:[%s36724_s9 + $0x2] ss:$0 sm:$0xff] }
 0xb93   :  { %10933 = vadd.xlane.f32.xlu0 %v10932_v19  ;;  %v10931_v36 = vmul.f32 %v34860_v16, %v34860_v16 }
 0xb94   :  { %v10930_v8 = vmul.f32 %v34863_v24, %v34863_v24 }
 0xb95   :  { %v10941_v39 = vsel %vm713_vm1, %v10931_v36, 0.0 }
 0xb96   :  { %10942 = vadd.xlane.f32.xlu1 %v10941_v39  ;;  %v10938_v51 = vsel %vm713_vm1, %v10930_v8, 0.0 }
 0xb97   :  { %10939 = vadd.xlane.f32.xlu0 %v10938_v51 }
 0xc1f   :  { %v10937_v33 = vpop.xlane.xlu1 %10936 }
 0xc20   :  { %v10945_v30 = vmul.f32 0.03125, %v10937_v33  ;;  %v10934_v34 = vpop.xlane.xlu0 %10933 }
 0xc21   :  { %v10944_v13 = vmul.f32 0.03125, %v10934_v34 }
 0xc22   :  { %v10949_v44 = vadd.f32 1e-05, %v10945_v30 }
 0xc23   :  { %v10948_v32 = vadd.f32 1e-05, %v10944_v13  ;;  %v10943_v3 = vpop.xlane.xlu1 %10942 }
 0xc24   :  { %33309 = vrsqrt.f32 %v10949_v44  ;;  %v10947_v38 = vmul.f32 0.03125, %v10943_v3  ;;  %v10940_v0 = vpop.xlane.xlu0 %10939  ;;  %v11625_v44 = vld [vmem:[%s36723_s8 + $0x20] sm:$0xff] }
 0xc25   :  { %33311 = vrsqrt.f32 %v10948_v32  ;;  %v10946_v14 = vmul.f32 0.03125, %v10940_v0  ;;  %v11626_v32 = vld [vmem:[%s36723_s8 + $0x28] sm:$0xff]  ;;  %v11663_v3 = vand.u32 4294901760, %v11625_v44 }
 0xc26   :  { %v10951_v43 = vadd.f32 1e-05, %v10947_v38  ;;  %v11666_v38 = vand.u32 4294901760, %v11626_v32 }
 0xc27   :  { %v10950_v40 = vadd.f32 1e-05, %v10946_v14 }
 0xc28   :  { %33313 = vrsqrt.f32 %v10951_v43  ;;  %v34982_v0 = vpack.c.bf16 %v11666_v38, %v11663_v3 }
 0xc29   :  { %33315 = vrsqrt.f32 %v10950_v40  ;;  %v11627_v40 = vld [vmem:[%s36723_s8 + $0x30] sm:$0xff] }
 0xc2e   :  { %v33310_v27 = vpop.eup %33309 }
 0xc2f   :  { %v33312_v25 = vpop.eup %33311  ;;  %v10957_v11 = vmul.f32 %v33310_v27, %v34852_v17  ;;  %v11628_v27 = vld [vmem:[%s36723_s8 + $0x38] sm:$0xff] }
 0xc30   :  { %v10956_v47 = vmul.f32 %v33312_v25, %v34854_v35  ;;  %v11672_v25 = vand.u32 4294901760, %v11628_v27 }
 0xc31   :  { %v10967_v62 = vmul.f32 %v25197_v5, %v10957_v11 }
 0xc32   :  { %v33314_v19 = vpop.eup %33313  ;;  %v10966_v36 = vmul.f32 %v25197_v5, %v10956_v47 }
 0xc33   :  { %v33316_v8 = vpop.eup %33315  ;;  %v10959_v39 = vmul.f32 %v33314_v19, %v34860_v16  ;;  %v34914_v51 = vadd.f32 %v25198_v42, %v10967_v62 }
 0xc34   :  { %v10958_v21 = vmul.f32 %v33316_v8, %v34863_v24  ;;  %v34917_v12 = vadd.f32 %v25198_v42, %v10966_v36 }
 0xc35   :  { %v10995_v17 = vsel %vm713_vm1, %v34914_v51, 0  ;;  %v10969_v35 = vmul.f32 %v25197_v5, %v10959_v39 }
 0xc36   :  { %v10992_v18 = vsel %vm713_vm1, %v34917_v12, 0  ;;  %v34923_v54 = vand.u32 4294901760, %v10995_v17  ;;  %v10968_v59 = vmul.f32 %v25197_v5, %v10958_v21  ;;  %v11669_v5 = vand.u32 4294901760, %v11627_v40 }
 0xc37   :  { %v11072_v60 = vand.u32 4294901760, %v10992_v18  ;;  %v34925_v61 = vadd.f32 %v25198_v42, %v10969_v35 }
 0xc38   :  { %v11083_v16 = vsub.f32 %v10995_v17, %v34923_v54  ;;  %v34928_v49 = vadd.f32 %v25198_v42, %v10968_v59  ;;  %v34992_v42 = vpack.c.bf16 %v11672_v25, %v11669_v5  ;;  %v11793_v59 = vsub.f32 %v11625_v44, %v11663_v3  ;;  %v25199_v44 = vld [vmem:[%s36722_s7] ss:$0 sm:$0xff] }
 0xc39   :  { %v11073_v24 = vsub.f32 %v10992_v18, %v11072_v60  ;;  %v11001_v10 = vsel %vm713_vm1, %v34925_v61, 0 }
 0xc3a   :  { %v11084_v48 = vand.u32 4294901760, %v11083_v16  ;;  %v10998_v41 = vsel %vm713_vm1, %v34928_v49, 0  ;;  %v11102_v15 = vand.u32 4294901760, %v11001_v10 }
 0xc3b   :  { %v11074_v9 = vand.u32 4294901760, %v11073_v24  ;;  %v11092_v63 = vand.u32 4294901760, %v10998_v41 }
 0xc3c   :  { %v11085_v50 = vsub.f32 %v11083_v16, %v11084_v48  ;;  %v11103_v53 = vsub.f32 %v11001_v10, %v11102_v15  ;;  %v11794_v10 = vand.u32 4294901760, %v11793_v59 }
 0xc3d   :  { %v11075_v52 = vsub.f32 %v11073_v24, %v11074_v9  ;;  %v11093_v4 = vsub.f32 %v10998_v41, %v11092_v63 }
 0xc3e   :  { %v11104_v6 = vand.u32 4294901760, %v11103_v53  ;;  %v11086_v46 = vand.u32 4294901760, %v11085_v50  ;;  %v11814_v50 = vsub.f32 %v11628_v27, %v11672_v25 }
 0xc3f   :  { %v11076_v23 = vand.u32 4294901760, %v11075_v52  ;;  %v11094_v45 = vand.u32 4294901760, %v11093_v4 }
 0xc40   :  { %v11105_v1 = vsub.f32 %v11103_v53, %v11104_v6 }
 0xc41   :  { %28548 = vmatprep.mubr.f32.mxu0 %v11076_v23  ;;  %v11095_v37 = vsub.f32 %v11093_v4, %v11094_v45  ;;  %v11815_v23 = vand.u32 4294901760, %v11814_v50 }
 0xc42   :  { %28549 = vmatmul.mubr.f32.vlgmr.msra.gmra.mrb[28].mxu0 %v11086_v46  ;;  %v11106_v30 = vand.u32 4294901760, %v11105_v1 }
 0xc43   :  { %31251 = vmatpush3.bf16.msra.mxu0 %v34892_v20  ;;  %v11096_v33 = vand.u32 4294901760, %v11095_v37  ;;  %v11621_v20 = vld [vmem:[%s36723_s8] sm:$0xff]  ;;  %v11816_v1 = vsub.f32 %v11814_v50, %v11815_v23 }
 0xc44   :  { %31253 = vmatprep.subr.bf16.mxu0 %v34895_v29 }
 0xc45   :  { %28551 = vmatprep.mubr.f32.mxu0 %v11096_v33  ;;  %v11817_v33 = vand.u32 4294901760, %v11816_v1 }
 0xc46   :  { %28552 = vmatmul.mubr.f32.gmra.mrb[30].mxu0 %v11106_v30 }
 0xc47   :  { %31255 = vmatpush3.bf16.msra.mxu0 %v34895_v29  ;;  %28562 = vmatprep.mubr.f32.mxu0 %v11072_v60  ;;  %v11622_v29 = vld [vmem:[%s36723_s8 + $0x8] sm:$0xff] }
 0xc48   :  { %31257 = vmatprep.subr.bf16.mxu0 %v34897_v56 }
 0xc4a   :  { %28563 = vmatmul.mubr.f32.vlgmr.msra.gmra.mrb[28].mxu0 %v34923_v54 }
 0xc4b   :  { %28565 = vmatprep.mubr.f32.mxu0 %v11092_v63  ;;  %31259 = vmatpush3.bf16.msra.mxu0 %v34897_v56  ;;  %v11651_v56 = vand.u32 4294901760, %v11621_v20 }
 0xc4c   :  { %31261 = vmatprep.subr.bf16.mxu0 %v34899_v26 }
 0xc4d   :  { %v11765_v14 = vsub.f32 %v11621_v20, %v11651_v56 }
 0xc4e   :  { %28566 = vmatmul.mubr.f32.gmra.mrb[30].mxu0 %v11102_v15 }
 0xc4f   :  { %31263 = vmatpush3.bf16.msra.mxu0 %v34899_v26  ;;  %28576 = vmatprep.mubr.f32.mxu0 %v11073_v24  ;;  %v11766_v11 = vand.u32 4294901760, %v11765_v14 }
 0xc50   :  { %31265 = vmatprep.subr.bf16.mxu0 %v34884_v57 }
 0xc51   :  { %v11767_v62 = vsub.f32 %v11765_v14, %v11766_v11 }
 0xc52   :  { %28577 = vmatmul.mubr.f32.vlgmr.msra.gmra.mrb[28].mxu0 %v11083_v16 }
 0xc53   :  { %28579 = vmatprep.mubr.f32.mxu0 %v11093_v4  ;;  %31267 = vmatpush3.bf16.msra.mxu0 %v34884_v57  ;;  %v11768_v39 = vand.u32 4294901760, %v11767_v62 }
 0xc54   :  { %31269 = vmatprep.subr.bf16.mxu0 %v34886_v31 }
 0xc56   :  { %28580 = vmatmul.mubr.f32.gmra.mrb[30].mxu0 %v11103_v53 }
 0xc57   :  { %31271 = vmatpush3.bf16.msra.mxu0 %v34886_v31  ;;  %28590 = vmatprep.mubr.f32.mxu0 %v11074_v9 }
 0xc58   :  { %31273 = vmatprep.subr.bf16.mxu0 %v34901_v2 }
 0xc5a   :  { %28591 = vmatmul.mubr.f32.vlgmr.msra.gmra.mrb[28].mxu0 %v11084_v48 }
 0xc5b   :  { %28593 = vmatprep.mubr.f32.mxu0 %v11094_v45  ;;  %31275 = vmatpush3.bf16.msra.mxu0 %v34901_v2  ;;  %v11624_v2 = vld [vmem:[%s36723_s8 + $0x18] sm:$0xff] }
 0xc5c   :  { %31277 = vmatprep.subr.bf16.mxu0 %v34903_v58  ;;  %v11660_v34 = vand.u32 4294901760, %v11624_v2 }
 0xc5e   :  { %28594 = vmatmul.mubr.f32.gmra.mrb[30].mxu0 %v11104_v6  ;;  %v11786_v8 = vsub.f32 %v11624_v2, %v11660_v34 }
 0xc5f   :  { %31279 = vmatpush3.bf16.msra.mxu0 %v34903_v58  ;;  %28604 = vmatprep.mubr.f32.mxu0 %v11072_v60 }
 0xc60   :  { %31281 = vmatprep.subr.bf16.mxu0 %v34884_v57  ;;  %v11787_v35 = vand.u32 4294901760, %v11786_v8 }
 0xc62   :  { %28605 = vmatmul.mubr.f32.vlgmr.msra.gmra.mrb[28].mxu0 %v34923_v54  ;;  %v11788_v16 = vsub.f32 %v11786_v8, %v11787_v35 }
 0xc63   :  { %28607 = vmatprep.mubr.f32.mxu0 %v11092_v63  ;;  %31283 = vmatpush3.bf16.msra.mxu0 %v34884_v57  ;;  %v11654_v57 = vand.u32 4294901760, %v11622_v29 }
 0xc64   :  { %31285 = vmatprep.subr.bf16.mxu0 %v34886_v31  ;;  %v11789_v41 = vand.u32 4294901760, %v11788_v16 }
 0xc65   :  { %v34962_v26 = vpack.c.bf16 %v11654_v57, %v11651_v56  ;;  %v11772_v43 = vsub.f32 %v11622_v29, %v11654_v57 }
 0xc66   :  { %28608 = vmatmul.mubr.f32.gmra.mrb[30].mxu0 %v11102_v15 }
 0xc67   :  { %31287 = vmatpush3.bf16.msra.mxu0 %v34886_v31  ;;  %28618 = vmatprep.mubr.f32.mxu0 %v11072_v60  ;;  %v11623_v31 = vld [vmem:[%s36723_s8 + $0x10] sm:$0xff]  ;;  %v11773_v47 = vand.u32 4294901760, %v11772_v43  ;;  %v11800_v60 = vsub.f32 %v11626_v32, %v11666_v38  ;;  %v31320_v20 = vpack.c.bf16 %v11772_v43, %v11765_v14 }
 0xc68   :  { %31289 = vmatprep.subr.bf16.mxu0 %v34962_v26  ;;  %v11657_v58 = vand.u32 4294901760, %v11623_v31 }
 0xc69   :  { %v11774_v19 = vsub.f32 %v11772_v43, %v11773_v47  ;;  %v11801_v48 = vand.u32 4294901760, %v11800_v60  ;;  %v34999_v56 = vpack.c.bf16 %v11800_v60, %v11793_v59 }
 0xc6a   :  { %28619 = vmatmul.mubr.f32.vlgmr.msra.gmra.mrb[28].mxu0 %v34923_v54  ;;  %v34972_v13 = vpack.c.bf16 %v11660_v34, %v11657_v58  ;;  %v11779_v36 = vsub.f32 %v11623_v31, %v11657_v58  ;;  %v35003_v31 = vpack.c.bf16 %v11773_v47, %v11766_v11 }
 0xc6b   :  { %28621 = vmatprep.mubr.f32.mxu0 %v11092_v63  ;;  %31291 = vmatpush3.bf16.msra.mxu0 %v34962_v26  ;;  %v11775_v21 = vand.u32 4294901760, %v11774_v19  ;;  %v11802_v9 = vsub.f32 %v11800_v60, %v11801_v48  ;;  %v11807_v63 = vsub.f32 %v11627_v40, %v11669_v5  ;;  %v35007_v58 = vpack.c.bf16 %v11801_v48, %v11794_v10 }
 0xc6c   :  { %31293 = vmatprep.subr.bf16.mxu0 %v34972_v13  ;;  %v11780_v17 = vand.u32 4294901760, %v11779_v36  ;;  %v31324_v29 = vpack.c.bf16 %v11786_v8, %v11779_v36 }
 0xc6d   :  { %v34996_v18 = vpack.c.bf16 %v11775_v21, %v11768_v39  ;;  %v11803_v4 = vand.u32 4294901760, %v11802_v9  ;;  %v11808_v6 = vand.u32 4294901760, %v11807_v63  ;;  %v35001_v57 = vpack.c.bf16 %v11814_v50, %v11807_v63 }
 0xc6e   :  { %28622 = vmatmul.mubr.f32.gmra.mrb[30].mxu0 %v11102_v15  ;;  %v11781_v54 = vsub.f32 %v11779_v36, %v11780_v17  ;;  %v11795_v15 = vsub.f32 %v11793_v59, %v11794_v10  ;;  %v35005_v2 = vpack.c.bf16 %v11787_v35, %v11780_v17 }
 0xc6f   :  { %31295 = vmatpush3.bf16.msra.mxu0 %v34972_v13  ;;  %v11809_v46 = vsub.f32 %v11807_v63, %v11808_v6  ;;  %v35009_v34 = vpack.c.bf16 %v11815_v23, %v11808_v6 }
 0xc70   :  { %31297 = vmatprep.subr.bf16.mxu0 %v34982_v0  ;;  %v11782_v24 = vand.u32 4294901760, %v11781_v54  ;;  %v11796_v52 = vand.u32 4294901760, %v11795_v15 }
 0xc71   :  { %v11810_v37 = vand.u32 4294901760, %v11809_v46 }
 0xc72   :  { %v31308_v53 = vpack.c.bf16 %v11789_v41, %v11782_v24  ;;  %v31312_v45 = vpack.c.bf16 %v11803_v4, %v11796_v52 }
 0xc73   :  { %31299 = vmatpush3.bf16.msra.mxu0 %v34982_v0  ;;  %v31316_v30 = vpack.c.bf16 %v11817_v33, %v11810_v37 }
 0xc74   :  { %31301 = vmatprep.subr.bf16.mxu0 %v34992_v42 }
 0xc77   :  { %31303 = vmatpush3.bf16.msra.mxu0 %v34992_v42 }
 0xc78   :  { %31305 = vmatprep.subr.bf16.mxu0 %v34996_v18 }
 0xd3d   :  { %v28620_v32 = vpop.f32.mrb[28].mxu0 }
 0xd3e   :  { %v32412_v3 = vadd.f32 %v28620_v32, %v25199_v44  ;;  %v11595_v38 = vpop.f32.mrb[29].mxu0 }
 0xd3f   :  { %v32413_v14 = vadd.f32 %v25199_v44, %v11595_v38 }
 0xd40   :  { %v11618_v43 = vmax.f32 %v32412_v3, 0.0 }
 0xd41   :  { %v11617_v40 = vmax.f32 %v32413_v14, 0.0  ;;  %v28623_v27 = vpop.f32.mrb[30].mxu0 }
 0xd42   :  { %v11642_v5 = vsel %vm11637_vm6, %v11618_v43, 0  ;;  %v32414_v25 = vadd.f32 %v28623_v27, %v25199_v44  ;;  %v11607_v11 = vpop.f32.mrb[31].mxu0 }
 0xd43   :  { %v35015_v47 = vand.u32 4294901760, %v11642_v5  ;;  %v11639_v62 = vsel %vm11637_vm6, %v11617_v40, 0  ;;  %v32415_v19 = vadd.f32 %v25199_v44, %v11607_v11 }
 0xd44   :  { %v35018_v36 = vand.u32 4294901760, %v11639_v62  ;;  %v11620_v8 = vmax.f32 %v32414_v25, 0.0 }
 0xd45   :  { %v11734_v39 = vsub.f32 %v11642_v5, %v35015_v47  ;;  %v11619_v21 = vmax.f32 %v32415_v19, 0.0 }
 0xd46   :  { %v11724_v17 = vsub.f32 %v11639_v62, %v35018_v36  ;;  %v11648_v35 = vsel %vm11637_vm6, %v11620_v8, 0  ;;  %v25207_v8 = vld [vmem:[%s36718_s3 + $0x88] sm:$0xff] }
 0xd47   :  { %v11735_v54 = vand.u32 4294901760, %v11734_v39  ;;  %v35023_v59 = vand.u32 4294901760, %v11648_v35  ;;  %v11645_v60 = vsel %vm11637_vm6, %v11619_v21, 0  ;;  %v12425_v21 = vand.u32 4294901760, %v25207_v8 }
 0xd48   :  { %v35026_v16 = vand.u32 4294901760, %v11645_v60  ;;  %v11725_v24 = vand.u32 4294901760, %v11724_v17 }
 0xd49   :  { %v11736_v10 = vsub.f32 %v11734_v39, %v11735_v54  ;;  %v11754_v48 = vsub.f32 %v11648_v35, %v35023_v59  ;;  %v13707_v35 = vld [vmem:[#allocation2 + $0x88] sm:$0xff] }
 0xd4a   :  { %v11744_v41 = vsub.f32 %v11645_v60, %v35026_v16  ;;  %v11726_v15 = vsub.f32 %v11724_v17, %v11725_v24 }
 0xd4b   :  { %v11755_v9 = vand.u32 4294901760, %v11754_v48  ;;  %v11737_v52 = vand.u32 4294901760, %v11736_v10 }
 0xd4c   :  { %v11727_v63 = vand.u32 4294901760, %v11726_v15  ;;  %v11745_v50 = vand.u32 4294901760, %v11744_v41 }
 0xd4d   :  { %v11756_v4 = vsub.f32 %v11754_v48, %v11755_v9 }
 0xd4e   :  { %28640 = vmatprep.mubr.f32.mxu0 %v11727_v63  ;;  %v11746_v6 = vsub.f32 %v11744_v41, %v11745_v50  ;;  %v13708_v63 = vld [vmem:[#allocation2 + $0x90] sm:$0xff] }
 0xd4f   :  { %28641 = vmatmul.mubr.f32.vlgmr.msra.gmra.mrb[32].mxu0 %v11737_v52  ;;  %v11757_v46 = vand.u32 4294901760, %v11756_v4 }
 0xd50   :  { %31307 = vmatpush3.bf16.msra.mxu0 %v34996_v18  ;;  %v11747_v23 = vand.u32 4294901760, %v11746_v6  ;;  %v13717_v6 = vand.u32 4294901760, %v13708_v63 }
 0xd51   :  { %31309 = vmatprep.subr.bf16.mxu0 %v31308_v53 }
 0xd52   :  { %28643 = vmatprep.mubr.f32.mxu0 %v11747_v23 }
 0xd53   :  { %28644 = vmatmul.mubr.f32.gmra.mrb[34].mxu0 %v11757_v46 }
 0xd54   :  { %31311 = vmatpush3.bf16.msra.mxu0 %v31308_v53  ;;  %28662 = vmatprep.mubr.f32.mxu0 %v35018_v36 }
 0xd55   :  { %31313 = vmatprep.subr.bf16.mxu0 %v31312_v45 }
 0xd58   :  { %31315 = vmatpush3.bf16.msra.mxu0 %v31312_v45 }
 0xd59   :  { %31317 = vmatprep.subr.bf16.mxu0 %v31316_v30 }
 0xd5c   :  { %31319 = vmatpush3.bf16.msra.mxu0 %v31316_v30 }
 0xd5d   :  { %31321 = vmatprep.subr.bf16.mxu0 %v31320_v20 }
 0xd5f   :  { %28663 = vmatmul.mubr.f32.vlgmr.msra.gmra.mrb[32].mxu0 %v35015_v47 }
 0xd60   :  { %28665 = vmatprep.mubr.f32.mxu0 %v35026_v16  ;;  %31323 = vmatpush3.bf16.msra.mxu0 %v31320_v20 }
 0xd61   :  { %31325 = vmatprep.subr.bf16.mxu0 %v31324_v29 }
 0xd63   :  { %28666 = vmatmul.mubr.f32.gmra.mrb[34].mxu0 %v35023_v59 }
 0xd64   :  { %31327 = vmatpush3.bf16.msra.mxu0 %v31324_v29  ;;  %28684 = vmatprep.mubr.f32.mxu0 %v11724_v17  ;;  %v13706_v17 = vld [vmem:[#allocation2 + $0x80] sm:$0xff] }
 0xd65   :  { %31329 = vmatprep.subr.bf16.mxu0 %v34999_v56 }
 0xd68   :  { %31331 = vmatpush3.bf16.msra.mxu0 %v34999_v56 }
 0xd69   :  { %31333 = vmatprep.subr.bf16.mxu0 %v35001_v57 }
 0xd6c   :  { %31335 = vmatpush3.bf16.msra.mxu0 %v35001_v57 }
 0xd6d   :  { %31337 = vmatprep.subr.bf16.mxu0 %v34962_v26 }
 0xd6f   :  { %28685 = vmatmul.mubr.f32.vlgmr.msra.gmra.mrb[32].mxu0 %v11734_v39 }
 0xd70   :  { %28687 = vmatprep.mubr.f32.mxu0 %v11744_v41  ;;  %31339 = vmatpush3.bf16.msra.mxu0 %v34962_v26  ;;  %v25209_v41 = vld [vmem:[%s36718_s3 + $0x98] sm:$0xff] }
 0xd71   :  { %31341 = vmatprep.subr.bf16.mxu0 %v34972_v13 }
 0xd73   :  { %28688 = vmatmul.mubr.f32.gmra.mrb[34].mxu0 %v11754_v48  ;;  %v25208_v48 = vld [vmem:[%s36718_s3 + $0x90] sm:$0xff] }
 0xd74   :  { %31343 = vmatpush3.bf16.msra.mxu0 %v34972_v13  ;;  %28706 = vmatprep.mubr.f32.mxu0 %v11725_v24  ;;  %v12539_v24 = vsub.f32 %v25207_v8, %v12425_v21  ;;  %v12428_v15 = vand.u32 4294901760, %v25208_v48 }
 0xd75   :  { %31345 = vmatprep.subr.bf16.mxu0 %v34982_v0 }
 0xd76   :  { %v12540_v4 = vand.u32 4294901760, %v12539_v24 }
 0xd78   :  { %31347 = vmatpush3.bf16.msra.mxu0 %v34982_v0 }
 0xd79   :  { %31349 = vmatprep.subr.bf16.mxu0 %v34992_v42 }
 0xd7c   :  { %31351 = vmatpush3.bf16.msra.mxu0 %v34992_v42 }
 0xd7d   :  { %31353 = vmatprep.subr.bf16.mxu0 %v35003_v31 }
 0xd7f   :  { %28707 = vmatmul.mubr.f32.vlgmr.msra.gmra.mrb[32].mxu0 %v11735_v54  ;;  %v13711_v54 = vand.u32 4294901760, %v13706_v17 }
 0xd80   :  { %28709 = vmatprep.mubr.f32.mxu0 %v11745_v50  ;;  %31355 = vmatpush3.bf16.msra.mxu0 %v35003_v31  ;;  %v13709_v50 = vld [vmem:[#allocation2 + $0x98] sm:$0xff] }
 0xd81   :  { %31357 = vmatprep.subr.bf16.mxu0 %v35005_v2  ;;  %v13720_v23 = vand.u32 4294901760, %v13709_v50  ;;  %v13821_v46 = vsub.f32 %v13706_v17, %v13711_v54 }
 0xd83   :  { %28710 = vmatmul.mubr.f32.gmra.mrb[34].mxu0 %v11755_v9  ;;  %v12431_v9 = vand.u32 4294901760, %v25209_v41 }
 0xd84   :  { %31359 = vmatpush3.bf16.msra.mxu0 %v35005_v2  ;;  %28728 = vmatprep.mubr.f32.mxu0 %v35018_v36 }
 0xd85   :  { %31361 = vmatprep.subr.bf16.mxu0 %v35007_v58 }
 0xd88   :  { %31363 = vmatpush3.bf16.msra.mxu0 %v35007_v58 }
 0xd89   :  { %31365 = vmatprep.subr.bf16.mxu0 %v35009_v34 }
 0xd8c   :  { %31367 = vmatpush3.bf16.msra.mxu0 %v35009_v34 }
 0xd8d   :  { %31369 = vmatprep.subr.bf16.mxu0 %v34962_v26 }
 0xd8f   :  { %28729 = vmatmul.mubr.f32.vlgmr.msra.gmra.mrb[32].mxu0 %v35015_v47 }
 0xd90   :  { %28731 = vmatprep.mubr.f32.mxu0 %v35026_v16  ;;  %31371 = vmatpush3.bf16.msra.mxu0 %v34962_v26  ;;  %v25201_v26 = vld [vmem:[%s36724_s9 + $0x3] ss:$0 sm:$0xff] }
 0xd91   :  { %31373 = vmatprep.subr.bf16.mxu0 %v34972_v13 }
 0xd93   :  { %28732 = vmatmul.mubr.f32.gmra.mrb[34].mxu0 %v35023_v59 }
 0xd94   :  { %31375 = vmatpush3.bf16.msra.mxu0 %v34972_v13  ;;  %28750 = vmatprep.mubr.f32.mxu0 %v35018_v36  ;;  %v25206_v36 = vld [vmem:[%s36718_s3 + $0x80] sm:$0xff] }
 0xd95   :  { %31377 = vmatprep.subr.bf16.mxu0 %v34982_v0  ;;  %v12422_v39 = vand.u32 4294901760, %v25206_v36 }
 0xd97   :  { %v35108_v60 = vpack.c.bf16 %v12425_v21, %v12422_v39 }
 0xd98   :  { %31379 = vmatpush3.bf16.msra.mxu0 %v34982_v0 }
 0xd99   :  { %31381 = vmatprep.subr.bf16.mxu0 %v34992_v42  ;;  %31385 = vmatprep.subr.bf16.mxu1 %v35108_v60 }
 0xd9a   :  { %31387 = vmatpush3.bf16.msra.mxu1 %v35108_v60 }
 0xd9c   :  { %31383 = vmatpush3.bf16.msra.mxu0 %v34992_v42 }
 0xd9f   :  { %28751 = vmatmul.mubr.f32.vlgmr.msra.gmra.mrb[32].mxu0 %v35015_v47 }
 0xda0   :  { %28753 = vmatprep.mubr.f32.mxu0 %v35026_v16  ;;  %v12532_v16 = vsub.f32 %v25206_v36, %v12422_v39 }
 0xda2   :  { %v12533_v52 = vand.u32 4294901760, %v12532_v16  ;;  %v35140_v36 = vpack.c.bf16 %v12539_v24, %v12532_v16 }
 0xda3   :  { %28754 = vmatmul.mubr.f32.gmra.mrb[34].mxu0 %v35023_v59  ;;  %v13714_v59 = vand.u32 4294901760, %v13707_v35 }
 0xda4   :  { %v35148_v17 = vpack.c.bf16 %v12540_v4, %v12533_v52 }
 0xda5   :  { %v35110_v10 = vpack.c.bf16 %v13714_v59, %v13711_v54 }
 0xda7   :  { %31481 = vmatprep.subr.bf16.mxu0 %v35110_v10 }
 0xda8   :  { %31483 = vmatpush3.bf16.msra.mxu0 %v35110_v10 }
 0xe72   :  { %v28752_v13 = vpop.f32.mrb[32].mxu0 }
 0xe73   :  { %v32416_v18 = vadd.f32 %v28752_v13, %v25201_v26  ;;  %v12294_v53 = vpop.f32.mrb[33].mxu0  ;;  %v35122_v13 = vpack.c.bf16 %v12431_v9, %v12428_v15 }
 0xe74   :  { %v32417_v45 = vadd.f32 %v25201_v26, %v12294_v53  ;;  %v12541_v53 = vsub.f32 %v12539_v24, %v12540_v4 }
 0xe75   :  { %v12317_v0 = vadd.f32 %v32416_v18, %v34914_v51  ;;  %v12534_v18 = vsub.f32 %v12532_v16, %v12533_v52  ;;  %31389 = vmatprep.subr.bf16.mxu1 %v35122_v13 }
 0xe76   :  { %v28755_v1 = vpop.f32.mrb[34].mxu0  ;;  %v12316_v37 = vadd.f32 %v32417_v45, %v34917_v12  ;;  %v35124_v45 = vpack.c.bf16 %v13720_v23, %v13717_v6  ;;  %31391 = vmatpush3.bf16.msra.mxu1 %v35122_v13 }
 0xe77   :  { %v32418_v42 = vadd.f32 %v28755_v1, %v25201_v26  ;;  %v12306_v33 = vpop.f32.mrb[35].mxu0  ;;  %v12327_v30 = vsel %vm713_vm1, %v12317_v0, 0.0 }
 0xe78   :  { %v32419_v20 = vadd.f32 %v25201_v26, %v12306_v33  ;;  %12328 = vadd.xlane.f32.xlu1 %v12327_v30  ;;  %v12324_v29 = vsel %vm713_vm1, %v12316_v37, 0.0  ;;  %v13828_v26 = vsub.f32 %v13707_v35, %v13714_v59  ;;  %v12542_v33 = vand.u32 4294901760, %v12541_v53  ;;  %31485 = vmatprep.subr.bf16.mxu0 %v35124_v45 }
 0xe79   :  { %12325 = vadd.xlane.f32.xlu0 %v12324_v29  ;;  %v12319_v56 = vadd.f32 %v32418_v42, %v34925_v61  ;;  %v12535_v42 = vand.u32 4294901760, %v12534_v18  ;;  %v12553_v30 = vsub.f32 %v25209_v41, %v12431_v9  ;;  %31487 = vmatpush3.bf16.msra.mxu0 %v35124_v45 }
 0xe7a   :  { %v12318_v57 = vadd.f32 %v32419_v20, %v34928_v49  ;;  %v13829_v1 = vand.u32 4294901760, %v13828_v26  ;;  %v13835_v20 = vsub.f32 %v13708_v63, %v13717_v6  ;;  %v35142_v8 = vpack.c.bf16 %v13828_v26, %v13821_v46 }
 0xe7b   :  { %v12333_v31 = vsel %vm713_vm1, %v12319_v56, 0.0 }
 0xe7c   :  { %12334 = vadd.xlane.f32.xlu1 %v12333_v31  ;;  %v12330_v51 = vsel %vm713_vm1, %v12318_v57, 0.0  ;;  %v13842_v31 = vsub.f32 %v13709_v50, %v13720_v23 }
 0xe7d   :  { %12331 = vadd.xlane.f32.xlu0 %v12330_v51  ;;  %v35130_v51 = vpack.c.bf16 %v12542_v33, %v12535_v42 }
 0xe7e   :  { %v35146_v21 = vpack.c.bf16 %v13842_v31, %v13835_v20 }
 0xe7f   :  { %31393 = vmatprep.subr.bf16.mxu1 %v35130_v51 }
 0xf05   :  { %v12329_v12 = vpop.xlane.xlu1 %12328 }
 0xf06   :  { %v12337_v2 = vmul.f32 0.03125, %v12329_v12  ;;  %v12326_v58 = vpop.xlane.xlu0 %12325  ;;  %v12554_v12 = vand.u32 4294901760, %v12553_v30 }
 0xf07   :  { %v12336_v34 = vmul.f32 0.03125, %v12326_v58 }
 0xf08   :  { %v35082_v44 = vsub.f32 %v12317_v0, %v12337_v2  ;;  %v13822_v0 = vand.u32 4294901760, %v13821_v46  ;;  %v13836_v2 = vand.u32 4294901760, %v13835_v20 }
 0xf09   :  { %v35084_v32 = vsub.f32 %v12316_v37, %v12336_v34  ;;  %v12335_v3 = vpop.xlane.xlu1 %12334  ;;  %v12546_v37 = vsub.f32 %v25208_v48, %v12428_v15 }
 0xf0a   :  { %v12339_v38 = vmul.f32 0.03125, %v12335_v3  ;;  %v12332_v14 = vpop.xlane.xlu0 %12331  ;;  %v12345_v61 = vmul.f32 %v35082_v44, %v35082_v44  ;;  %v13823_v29 = vsub.f32 %v13821_v46, %v13822_v0  ;;  %v35150_v35 = vpack.c.bf16 %v13829_v1, %v13822_v0  ;;  %v25205_v0 = vld [vmem:[%s36724_s9 + $0x5] ss:$0 sm:$0xff] }
 0xf0b   :  { %v12338_v49 = vmul.f32 0.03125, %v12332_v14  ;;  %v12344_v43 = vmul.f32 %v35084_v32, %v35084_v32  ;;  %v12555_v14 = vsub.f32 %v12553_v30, %v12554_v12  ;;  %v35144_v39 = vpack.c.bf16 %v12553_v30, %v12546_v37 }
 0xf0c   :  { %v35090_v40 = vsub.f32 %v12319_v56, %v12339_v38  ;;  %v12351_v27 = vsel %vm713_vm1, %v12345_v61, 0.0  ;;  %v13830_v56 = vsub.f32 %v13828_v26, %v13829_v1  ;;  %v13824_v58 = vand.u32 4294901760, %v13823_v29  ;;  %v25204_v26 = vld [vmem:[%s36724_s9 + $0x4] ss:$0 sm:$0xff] }
 0xf0d   :  { %v35093_v5 = vsub.f32 %v12318_v57, %v12338_v49  ;;  %12352 = vadd.xlane.f32.xlu1 %v12351_v27  ;;  %v12348_v25 = vsel %vm713_vm1, %v12344_v43, 0.0  ;;  %v12547_v57 = vand.u32 4294901760, %v12546_v37  ;;  %v13843_v38 = vand.u32 4294901760, %v13842_v31 }
 0xf0e   :  { %12349 = vadd.xlane.f32.xlu0 %v12348_v25  ;;  %v12347_v11 = vmul.f32 %v35090_v40, %v35090_v40  ;;  %v13831_v34 = vand.u32 4294901760, %v13830_v56  ;;  %v13837_v61 = vsub.f32 %v13835_v20, %v13836_v2  ;;  %v12556_v25 = vand.u32 4294901760, %v12555_v14 }
 0xf0f   :  { %v12346_v47 = vmul.f32 %v35093_v5, %v35093_v5  ;;  %v12548_v3 = vsub.f32 %v12546_v37, %v12547_v57  ;;  %v13844_v27 = vsub.f32 %v13842_v31, %v13843_v38  ;;  %v35152_v54 = vpack.c.bf16 %v12554_v12, %v12547_v57 }
 0xf10   :  { %v12357_v62 = vsel %vm713_vm1, %v12347_v11, 0.0  ;;  %v35133_v49 = vpack.c.bf16 %v13831_v34, %v13824_v58  ;;  %v13838_v11 = vand.u32 4294901760, %v13837_v61  ;;  %v35154_v59 = vpack.c.bf16 %v13843_v38, %v13836_v2 }
 0xf11   :  { %12358 = vadd.xlane.f32.xlu1 %v12357_v62  ;;  %v12354_v19 = vsel %vm713_vm1, %v12346_v47, 0.0  ;;  %v12549_v43 = vand.u32 4294901760, %v12548_v3  ;;  %v13845_v47 = vand.u32 4294901760, %v13844_v27 }
 0xf12   :  { %12355 = vadd.xlane.f32.xlu0 %v12354_v19  ;;  %31489 = vmatprep.subr.bf16.mxu0 %v35133_v49 }
 0xf13   :  { %v35136_v62 = vpack.c.bf16 %v12556_v25, %v12549_v43  ;;  %v35138_v19 = vpack.c.bf16 %v13845_v47, %v13838_v11 }
 0xf9a   :  { %v12353_v48 = vpop.xlane.xlu1 %12352 }
 0xf9b   :  { %v12361_v41 = vmul.f32 0.03125, %v12353_v48  ;;  %v12350_v15 = vpop.xlane.xlu0 %12349 }
 0xf9c   :  { %v12360_v9 = vmul.f32 0.03125, %v12350_v15 }
 0xf9d   :  { %v12365_v16 = vadd.f32 1e-05, %v12361_v41 }
 0xf9e   :  { %v12364_v24 = vadd.f32 1e-05, %v12360_v9  ;;  %v12359_v63 = vpop.xlane.xlu1 %12358 }
 0xf9f   :  { %33317 = vrsqrt.f32 %v12365_v16  ;;  %v12363_v50 = vmul.f32 0.03125, %v12359_v63  ;;  %v12356_v6 = vpop.xlane.xlu0 %12355 }
 0xfa0   :  { %33319 = vrsqrt.f32 %v12364_v24  ;;  %v12362_v23 = vmul.f32 0.03125, %v12356_v6 }
 0xfa1   :  { %v12367_v52 = vadd.f32 1e-05, %v12363_v50 }
 0xfa2   :  { %v12366_v4 = vadd.f32 1e-05, %v12362_v23 }
 0xfa3   :  { %33321 = vrsqrt.f32 %v12367_v52 }
 0xfa4   :  { %33323 = vrsqrt.f32 %v12366_v4 }
 0xfa9   :  { %v33318_v46 = vpop.eup %33317 }
 0xfaa   :  { %v33320_v18 = vpop.eup %33319  ;;  %v12373_v53 = vmul.f32 %v33318_v46, %v35082_v44 }
 0xfab   :  { %v12372_v1 = vmul.f32 %v33320_v18, %v35084_v32 }
 0xfac   :  { %v12383_v37 = vmul.f32 %v25204_v26, %v12373_v53 }
 0xfad   :  { %v33322_v42 = vpop.eup %33321  ;;  %v12382_v33 = vmul.f32 %v25204_v26, %v12372_v1 }
 0xfae   :  { %v33324_v30 = vpop.eup %33323  ;;  %v35164_v20 = vadd.f32 %v25205_v0, %v12383_v37  ;;  %v12375_v29 = vmul.f32 %v33322_v42, %v35090_v40 }
 0xfaf   :  { %v35167_v56 = vadd.f32 %v25205_v0, %v12382_v33  ;;  %v12374_v57 = vmul.f32 %v33324_v30, %v35093_v5 }
 0xfb0   :  { %36812 = vst [vmem:[#allocation24_spill] sm:$0xff] %v35164_v20  ;;  %v12413_v44 = vsel %vm713_vm1, %v35164_v20, 0  ;;  %v12385_v31 = vmul.f32 %v25204_v26, %v12375_v29 }
 0xfb1   :  { %36813 = vst [vmem:[#allocation25_spill] sm:$0xff] %v35167_v56  ;;  %v35172_v12 = vand.u32 4294901760, %v12413_v44  ;;  %v12410_v32 = vsel %vm713_vm1, %v35167_v56, 0  ;;  %v12384_v2 = vmul.f32 %v25204_v26, %v12374_v57 }
 0xfb2   :  { %v35176_v58 = vand.u32 4294901760, %v12410_v32  ;;  %v35178_v34 = vadd.f32 %v25205_v0, %v12385_v31 }
 0xfb3   :  { %v35181_v40 = vsub.f32 %v12413_v44, %v35172_v12  ;;  %v35183_v3 = vadd.f32 %v25205_v0, %v12384_v2 }
 0xfb4   :  { %36814 = vst [vmem:[#allocation14_spill] sm:$0xff] %v35178_v34  ;;  %v35186_v5 = vsub.f32 %v12410_v32, %v35176_v58  ;;  %v12419_v38 = vsel %vm713_vm1, %v35178_v34, 0 }
 0xfb5   :  { %36815 = vst [vmem:[#allocation18_spill] sm:$0xff] %v35183_v3  ;;  %v35191_v14 = vand.u32 4294901760, %v35181_v40  ;;  %v35193_v61 = vand.u32 4294901760, %v12419_v38  ;;  %v12416_v43 = vsel %vm713_vm1, %v35183_v3, 0 }
 0xfb6   :  { %v35198_v27 = vand.u32 4294901760, %v35186_v5  ;;  %v35200_v25 = vand.u32 4294901760, %v12416_v43 }
 0xfb7   :  { %v35203_v11 = vsub.f32 %v12419_v38, %v35193_v61  ;;  %v12503_v47 = vsub.f32 %v35181_v40, %v35191_v14  ;;  %v15622_v38 = vld [vmem:[#allocation2 + $0xa0] sm:$0xff] }
 0xfb8   :  { %v35208_v48 = vsub.f32 %v12416_v43, %v35200_v25  ;;  %v12493_v41 = vsub.f32 %v35186_v5, %v35198_v27  ;;  %v35367_v29 = vpack.c.bf16 %v35193_v61, %v35200_v25  ;;  %v15623_v43 = vld [vmem:[#allocation2 + $0xa8] sm:$0xff] }
 0xfb9   :  { %v35213_v15 = vand.u32 4294901760, %v35203_v11  ;;  %v35220_v24 = vand.u32 4294901760, %v12503_v47 }
 0xfba   :  { %v35216_v9 = vand.u32 4294901760, %v35208_v48  ;;  %v35218_v16 = vand.u32 4294901760, %v12493_v41  ;;  %v15627_v41 = vand.u32 4294901760, %v15622_v38 }
 0xfbb   :  { %v12523_v63 = vsub.f32 %v35203_v11, %v35213_v15 }
 0xfbc   :  { %28764 = vmatprep.mubr.f32.mxu1 %v35218_v16  ;;  %28932 = vmatprep.mubr.f32.mxu0 %v35218_v16  ;;  %v12513_v50 = vsub.f32 %v35208_v48, %v35216_v9  ;;  %v35380_v31 = vpack.c.bf16 %v35220_v24, %v35218_v16 }
 0xfbd   :  { %28765 = vmatmul.mubr.f32.vlgmr.msra.gmra.mrb[36].mxu1 %v35220_v24  ;;  %28933 = vmatmul.mubr.f32.vlgmr.msra.gmra.mrb[36].mxu0 %v35220_v24  ;;  %v35235_v23 = vand.u32 4294901760, %v12523_v63  ;;  %v15630_v63 = vand.u32 4294901760, %v15623_v43 }
 0xfbe   :  { %31395 = vmatpush3.bf16.msra.mxu1 %v35130_v51  ;;  %31491 = vmatpush3.bf16.msra.mxu0 %v35133_v49  ;;  %v35232_v6 = vand.u32 4294901760, %v12513_v50  ;;  %v25212_v51 = vld [vmem:[%s36718_s3 + $0xa0] sm:$0xff]  ;;  %v25213_v49 = vld [vmem:[%s36718_s3 + $0xa8] sm:$0xff]  ;;  %v15624_v50 = vld [vmem:[#allocation2 + $0xb0] sm:$0xff] }
 0xfbf   :  { %31397 = vmatprep.subr.bf16.mxu1 %v35136_v62  ;;  %31493 = vmatprep.subr.bf16.mxu0 %v35138_v19 }
 0xfc0   :  { %28767 = vmatprep.mubr.f32.mxu1 %v35232_v6  ;;  %28935 = vmatprep.mubr.f32.mxu0 %v35232_v6 }
 0xfc1   :  { %28768 = vmatmul.mubr.f32.gmra.mrb[38].mxu1 %v35235_v23  ;;  %28936 = vmatmul.mubr.f32.gmra.mrb[38].mxu0 %v35235_v23 }
 0xfc2   :  { %31399 = vmatpush3.bf16.msra.mxu1 %v35136_v62  ;;  %28778 = vmatprep.mubr.f32.mxu1 %v35176_v58  ;;  %v14338_v62 = vand.u32 4294901760, %v25212_v51 }
 0xfc3   :  { %31495 = vmatpush3.bf16.msra.mxu0 %v35138_v19  ;;  %28946 = vmatprep.mubr.f32.mxu0 %v35176_v58  ;;  %v14341_v19 = vand.u32 4294901760, %v25213_v49 }
 0xfc4   :  { %31401 = vmatprep.subr.bf16.mxu1 %v35140_v36  ;;  %31497 = vmatprep.subr.bf16.mxu0 %v35142_v8 }
 0xfc5   :  { %28779 = vmatmul.mubr.f32.vlgmr.msra.gmra.mrb[36].mxu1 %v35172_v12  ;;  %v35303_v52 = vsub.f32 %v25213_v49, %v14341_v19  ;;  %v15633_v49 = vand.u32 4294901760, %v15624_v50 }
 0xfc6   :  { %31403 = vmatpush3.bf16.msra.mxu1 %v35140_v36  ;;  %28947 = vmatmul.mubr.f32.vlgmr.msra.gmra.mrb[36].mxu0 %v35172_v12  ;;  %v25214_v36 = vld [vmem:[%s36718_s3 + $0xb0] sm:$0xff] }
 0xfc7   :  { %28781 = vmatprep.mubr.f32.mxu1 %v35200_v25  ;;  %28949 = vmatprep.mubr.f32.mxu0 %v35200_v25  ;;  %v14456_v4 = vand.u32 4294901760, %v35303_v52 }
 0xfc8   :  { %31499 = vmatpush3.bf16.msra.mxu0 %v35142_v8  ;;  %31405 = vmatprep.subr.bf16.mxu1 %v35144_v39  ;;  %v25215_v8 = vld [vmem:[%s36718_s3 + $0xb8] sm:$0xff] }
 0xfc9   :  { %28782 = vmatmul.mubr.f32.gmra.mrb[38].mxu1 %v35193_v61  ;;  %31501 = vmatprep.subr.bf16.mxu0 %v35146_v21  ;;  %v14457_v18 = vsub.f32 %v35303_v52, %v14456_v4 }
 0xfca   :  { %31407 = vmatpush3.bf16.msra.mxu1 %v35144_v39  ;;  %28950 = vmatmul.mubr.f32.gmra.mrb[38].mxu0 %v35193_v61  ;;  %v35299_v39 = vsub.f32 %v25212_v51, %v14338_v62  ;;  %v15625_v51 = vld [vmem:[#allocation2 + $0xb8] sm:$0xff] }
 0xfcb   :  { %28792 = vmatprep.mubr.f32.mxu1 %v35186_v5  ;;  %28960 = vmatprep.mubr.f32.mxu0 %v35186_v5  ;;  %v14458_v37 = vand.u32 4294901760, %v14457_v18 }
 0xfcc   :  { %31503 = vmatpush3.bf16.msra.mxu0 %v35146_v21  ;;  %31409 = vmatprep.subr.bf16.mxu1 %v35108_v60  ;;  %v14344_v21 = vand.u32 4294901760, %v25214_v36  ;;  %v31544_v44 = vpack.c.bf16 %v35303_v52, %v35299_v39  ;;  %v35417_v52 = vpack.c.bf16 %v15630_v63, %v15627_v41 }
 0xfcd   :  { %28793 = vmatmul.mubr.f32.vlgmr.msra.gmra.mrb[36].mxu1 %v35181_v40  ;;  %31505 = vmatprep.subr.bf16.mxu0 %v35110_v10 }
 0xfce   :  { %31411 = vmatpush3.bf16.msra.mxu1 %v35108_v60  ;;  %28795 = vmatprep.mubr.f32.mxu1 %v35208_v48  ;;  %v35315_v46 = vsub.f32 %v25214_v36, %v14344_v21  ;;  %v15744_v36 = vsub.f32 %v15623_v43, %v15630_v63 }
 0xfcf   :  { %28961 = vmatmul.mubr.f32.vlgmr.msra.gmra.mrb[36].mxu0 %v35181_v40  ;;  %31413 = vmatprep.subr.bf16.mxu1 %v35122_v13 }
 0xfd0   :  { %28963 = vmatprep.mubr.f32.mxu0 %v35208_v48  ;;  %31507 = vmatpush3.bf16.msra.mxu0 %v35110_v10 }
 0xfd1   :  { %28796 = vmatmul.mubr.f32.gmra.mrb[38].mxu1 %v35203_v11  ;;  %31509 = vmatprep.subr.bf16.mxu0 %v35124_v45 }
 0xfd2   :  { %31415 = vmatpush3.bf16.msra.mxu1 %v35122_v13  ;;  %28806 = vmatprep.mubr.f32.mxu1 %v35198_v27 }
 0xfd3   :  { %28964 = vmatmul.mubr.f32.gmra.mrb[38].mxu0 %v35203_v11  ;;  %31417 = vmatprep.subr.bf16.mxu1 %v35148_v17 }
 0xfd4   :  { %31511 = vmatpush3.bf16.msra.mxu0 %v35124_v45  ;;  %28974 = vmatprep.mubr.f32.mxu0 %v35198_v27 }
 0xfd5   :  { %28807 = vmatmul.mubr.f32.vlgmr.msra.gmra.mrb[36].mxu1 %v35191_v14  ;;  %31513 = vmatprep.subr.bf16.mxu0 %v35150_v35 }
 0xfd6   :  { %31419 = vmatpush3.bf16.msra.mxu1 %v35148_v17  ;;  %28809 = vmatprep.mubr.f32.mxu1 %v35216_v9  ;;  %v14347_v17 = vand.u32 4294901760, %v25215_v8 }
 0xfd7   :  { %28975 = vmatmul.mubr.f32.vlgmr.msra.gmra.mrb[36].mxu0 %v35191_v14  ;;  %31421 = vmatprep.subr.bf16.mxu1 %v35152_v54 }
 0xfd8   :  { %28977 = vmatprep.mubr.f32.mxu0 %v35216_v9  ;;  %31515 = vmatpush3.bf16.msra.mxu0 %v35150_v35  ;;  %v14449_v35 = vand.u32 4294901760, %v35299_v39  ;;  %v35347_v0 = vpack.c.bf16 %v14347_v17, %v14344_v21  ;;  %v15751_v21 = vsub.f32 %v15624_v50, %v15633_v49 }
 0xfd9   :  { %28810 = vmatmul.mubr.f32.gmra.mrb[38].mxu1 %v35213_v15  ;;  %31517 = vmatprep.subr.bf16.mxu0 %v35154_v59 }
 0xfda   :  { %31423 = vmatpush3.bf16.msra.mxu1 %v35152_v54  ;;  %28820 = vmatprep.mubr.f32.mxu1 %v35176_v58  ;;  %v35317_v54 = vsub.f32 %v25215_v8, %v14347_v17  ;;  %v14450_v26 = vsub.f32 %v35299_v39, %v14449_v35  ;;  %v31560_v2 = vpack.c.bf16 %v14456_v4, %v14449_v35  ;;  %v15745_v39 = vand.u32 4294901760, %v15744_v36 }
 0xfdb   :  { %28978 = vmatmul.mubr.f32.gmra.mrb[38].mxu0 %v35213_v15  ;;  %31425 = vmatprep.subr.bf16.mxu1 %v35108_v60 }
 0xfdc   :  { %31519 = vmatpush3.bf16.msra.mxu0 %v35154_v59  ;;  %28988 = vmatprep.mubr.f32.mxu0 %v35176_v58  ;;  %v35325_v59 = vpack.c.bf16 %v14341_v19, %v14338_v62  ;;  %v14470_v53 = vand.u32 4294901760, %v35317_v54  ;;  %v14451_v1 = vand.u32 4294901760, %v14450_v26  ;;  %v31548_v32 = vpack.c.bf16 %v35317_v54, %v35315_v46 }
 0xfdd   :  { %28821 = vmatmul.mubr.f32.vlgmr.msra.gmra.mrb[36].mxu1 %v35172_v12  ;;  %31521 = vmatprep.subr.bf16.mxu0 %v35110_v10  ;;  %v15636_v62 = vand.u32 4294901760, %v15625_v51  ;;  %v35408_v19 = vsub.f32 %v15622_v38, %v15627_v41  ;;  %v15746_v4 = vsub.f32 %v15744_v36, %v15745_v39 }
 0xfde   :  { %31427 = vmatpush3.bf16.msra.mxu1 %v35108_v60  ;;  %28823 = vmatprep.mubr.f32.mxu1 %v35200_v25  ;;  %v35334_v60 = vpack.c.bf16 %v35172_v12, %v35176_v58  ;;  %v14471_v42 = vsub.f32 %v35317_v54, %v14470_v53 }
 0xfdf   :  { %28989 = vmatmul.mubr.f32.vlgmr.msra.gmra.mrb[36].mxu0 %v35172_v12  ;;  %31429 = vmatprep.subr.bf16.mxu1 %v35122_v13  ;;  %v15738_v8 = vand.u32 4294901760, %v35408_v19  ;;  %v15758_v17 = vsub.f32 %v15625_v51, %v15636_v62  ;;  %v31628_v26 = vpack.c.bf16 %v15636_v62, %v15633_v49 }
 0xfe0   :  { %28991 = vmatprep.mubr.f32.mxu0 %v35200_v25  ;;  %31523 = vmatpush3.bf16.msra.mxu0 %v35110_v10  ;;  %v14463_v10 = vand.u32 4294901760, %v35315_v46  ;;  %v14472_v30 = vand.u32 4294901760, %v14471_v42  ;;  %v31640_v42 = vpack.c.bf16 %v15744_v36, %v35408_v19 }
 0xfe1   :  { %28824 = vmatmul.mubr.f32.gmra.mrb[38].mxu1 %v35193_v61  ;;  %31525 = vmatprep.subr.bf16.mxu0 %v35124_v45  ;;  %v15739_v35 = vsub.f32 %v35408_v19, %v15738_v8  ;;  %v15759_v54 = vand.u32 4294901760, %v15758_v17 }
 0xfe2   :  { %31431 = vmatpush3.bf16.msra.mxu1 %v35122_v13  ;;  %28834 = vmatprep.mubr.f32.mxu1 %v35176_v58  ;;  %v14464_v13 = vsub.f32 %v35315_v46, %v14463_v10  ;;  %v31564_v47 = vpack.c.bf16 %v14470_v53, %v14463_v10  ;;  %v15752_v46 = vand.u32 4294901760, %v15751_v21 }
 0xfe3   :  { %28992 = vmatmul.mubr.f32.gmra.mrb[38].mxu0 %v35193_v61  ;;  %31433 = vmatprep.subr.bf16.mxu1 %v35334_v60  ;;  %v15740_v18 = vand.u32 4294901760, %v15739_v35  ;;  %v15760_v53 = vsub.f32 %v15758_v17, %v15759_v54 }
 0xfe4   :  { %31527 = vmatpush3.bf16.msra.mxu0 %v35124_v45  ;;  %29002 = vmatprep.mubr.f32.mxu0 %v35176_v58  ;;  %v31536_v45 = vpack.c.bf16 %v14458_v37, %v14451_v1  ;;  %v14465_v33 = vand.u32 4294901760, %v14464_v13  ;;  %v15753_v10 = vsub.f32 %v15751_v21, %v15752_v46 }
 0xfe5   :  { %28835 = vmatmul.mubr.f32.vlgmr.msra.gmra.mrb[36].mxu1 %v35172_v12  ;;  %31529 = vmatprep.subr.bf16.mxu0 %v35325_v59  ;;  %v15761_v13 = vand.u32 4294901760, %v15760_v53 }
 0xfe6   :  { %28837 = vmatprep.mubr.f32.mxu1 %v35200_v25  ;;  %v31540_v57 = vpack.c.bf16 %v14472_v30, %v14465_v33  ;;  %v15754_v37 = vand.u32 4294901760, %v15753_v10  ;;  %v31656_v33 = vpack.c.bf16 %v15745_v39, %v15738_v8  ;;  %v31660_v30 = vpack.c.bf16 %v15759_v54, %v15752_v46 }
 0xfe7   :  { %29003 = vmatmul.mubr.f32.vlgmr.msra.gmra.mrb[36].mxu0 %v35172_v12 }
 0xfe8   :  { %29005 = vmatprep.mubr.f32.mxu0 %v35200_v25  ;;  %31531 = vmatpush3.bf16.msra.mxu0 %v35325_v59 }
 0xfe9   :  { %28838 = vmatmul.mubr.f32.gmra.mrb[38].mxu1 %v35193_v61  ;;  %31533 = vmatprep.subr.bf16.mxu0 %v35347_v0 }
 0xfeb   :  { %29006 = vmatmul.mubr.f32.gmra.mrb[38].mxu0 %v35193_v61  ;;  %31435 = vmatpush3.bf16.xpose.msra.mxu1 %v35334_v60 }
 0xfec   :  { %31535 = vmatpush3.bf16.msra.mxu0 %v35347_v0  ;;  %29016 = vmatprep.mubr.f32.mxu0 %v35218_v16 }
 0xfed   :  { %31437 = vmatprep.subr.bf16.mxu1 %v35367_v29  ;;  %31537 = vmatprep.subr.bf16.mxu0 %v31536_v45 }
 0xfef   :  { %29017 = vmatmul.mubr.f32.vlgmr.msra.gmra.mrb[40].mxu0 %v35220_v24 }
 0xff0   :  { %29019 = vmatprep.mubr.f32.mxu0 %v35232_v6  ;;  %31539 = vmatpush3.bf16.msra.mxu0 %v31536_v45  ;;  %v31644_v45 = vpack.c.bf16 %v15758_v17, %v15751_v21 }
 0xff1   :  { %31541 = vmatprep.subr.bf16.mxu0 %v31540_v57 }
 0xff3   :  { %29020 = vmatmul.mubr.f32.gmra.mrb[42].mxu0 %v35235_v23  ;;  %31439 = vmatpush3.bf16.xpose.msra.mxu1 %v35367_v29 }
 0xff4   :  { %31543 = vmatpush3.bf16.msra.mxu0 %v31540_v57  ;;  %29030 = vmatprep.mubr.f32.mxu0 %v35176_v58  ;;  %v25211_v57 = vld [vmem:[%s36719_s4 + $0x4] ss:$0 sm:$0xff] }
 0xff5   :  { %31441 = vmatprep.subr.bf16.mxu1 %v35380_v31  ;;  %31545 = vmatprep.subr.bf16.mxu0 %v31544_v44 }
 0xff7   :  { %29031 = vmatmul.mubr.f32.vlgmr.msra.gmra.mrb[40].mxu0 %v35172_v12 }
 0xff8   :  { %29033 = vmatprep.mubr.f32.mxu0 %v35200_v25  ;;  %31547 = vmatpush3.bf16.msra.mxu0 %v31544_v44 }
 0xff9   :  { %31549 = vmatprep.subr.bf16.mxu0 %v31548_v32 }
 0xffb   :  { %29034 = vmatmul.mubr.f32.gmra.mrb[42].mxu0 %v35193_v61 }
 0xffc   :  { %31551 = vmatpush3.bf16.msra.mxu0 %v31548_v32  ;;  %29044 = vmatprep.mubr.f32.mxu0 %v35186_v5 }
 0xffd   :  { %31553 = vmatprep.subr.bf16.mxu0 %v35325_v59 }
 0xfff   :  { %29045 = vmatmul.mubr.f32.vlgmr.msra.gmra.mrb[40].mxu0 %v35181_v40 }
0x1000   :  { %29047 = vmatprep.mubr.f32.mxu0 %v35208_v48  ;;  %31555 = vmatpush3.bf16.msra.mxu0 %v35325_v59 }
0x1001   :  { %31557 = vmatprep.subr.bf16.mxu0 %v35347_v0 }
0x1003   :  { %29048 = vmatmul.mubr.f32.gmra.mrb[42].mxu0 %v35203_v11 }
0x1004   :  { %31559 = vmatpush3.bf16.msra.mxu0 %v35347_v0  ;;  %29058 = vmatprep.mubr.f32.mxu0 %v35198_v27 }
0x1005   :  { %31561 = vmatprep.subr.bf16.mxu0 %v31560_v2 }
0x1007   :  { %29059 = vmatmul.mubr.f32.vlgmr.msra.gmra.mrb[40].mxu0 %v35191_v14 }
0x1008   :  { %29061 = vmatprep.mubr.f32.mxu0 %v35216_v9  ;;  %31563 = vmatpush3.bf16.msra.mxu0 %v31560_v2 }
0x1009   :  { %31565 = vmatprep.subr.bf16.mxu0 %v31564_v47 }
0x100b   :  { %29062 = vmatmul.mubr.f32.gmra.mrb[42].mxu0 %v35213_v15 }
0x100c   :  { %31567 = vmatpush3.bf16.msra.mxu0 %v31564_v47  ;;  %29072 = vmatprep.mubr.f32.mxu0 %v35176_v58 }
0x100d   :  { %31569 = vmatprep.subr.bf16.mxu0 %v35325_v59 }
0x100f   :  { %29073 = vmatmul.mubr.f32.vlgmr.msra.gmra.mrb[40].mxu0 %v35172_v12 }
0x1010   :  { %29075 = vmatprep.mubr.f32.mxu0 %v35200_v25  ;;  %31571 = vmatpush3.bf16.msra.mxu0 %v35325_v59  ;;  %v15747_v59 = vand.u32 4294901760, %v15746_v4 }
0x1011   :  { %31573 = vmatprep.subr.bf16.mxu0 %v35347_v0 }
0x1012   :  { %v31632_v1 = vpack.c.bf16 %v15747_v59, %v15740_v18 }
0x1013   :  { %29076 = vmatmul.mubr.f32.gmra.mrb[42].mxu0 %v35193_v61 }
0x1014   :  { %31575 = vmatpush3.bf16.msra.mxu0 %v35347_v0  ;;  %29086 = vmatprep.mubr.f32.mxu0 %v35176_v58  ;;  %v31636_v0 = vpack.c.bf16 %v15761_v13, %v15754_v37 }
0x1015   :  { %31625 = vmatprep.subr.bf16.mxu0 %v35417_v52 }
0x1017   :  { %29087 = vmatmul.mubr.f32.vlgmr.msra.gmra.mrb[40].mxu0 %v35172_v12 }
0x1018   :  { %29089 = vmatprep.mubr.f32.mxu0 %v35200_v25  ;;  %31627 = vmatpush3.bf16.msra.mxu0 %v35417_v52 }
0x1019   :  { %31629 = vmatprep.subr.bf16.mxu0 %v31628_v26 }
0x101b   :  { %29090 = vmatmul.mubr.f32.gmra.mrb[42].mxu0 %v35193_v61 }
0x101c   :  { %31631 = vmatpush3.bf16.msra.mxu0 %v31628_v26  ;;  %29184 = vmatprep.mubr.f32.mxu0 %v35218_v16 }
0x101d   :  { %31633 = vmatprep.subr.bf16.mxu0 %v31632_v1 }
0x101f   :  { %29185 = vmatmul.mubr.f32.vlgmr.msra.gmra.mrb[44].mxu0 %v35220_v24 }
0x1020   :  { %29187 = vmatprep.mubr.f32.mxu0 %v35232_v6  ;;  %31635 = vmatpush3.bf16.msra.mxu0 %v31632_v1 }
0x1021   :  { %31637 = vmatprep.subr.bf16.mxu0 %v31636_v0 }
0x1023   :  { %29188 = vmatmul.mubr.f32.gmra.mrb[46].mxu0 %v35235_v23 }
0x1024   :  { %31639 = vmatpush3.bf16.msra.mxu0 %v31636_v0  ;;  %29198 = vmatprep.mubr.f32.mxu0 %v35176_v58 }
0x1025   :  { %31641 = vmatprep.subr.bf16.mxu0 %v31640_v42 }
0x1027   :  { %29199 = vmatmul.mubr.f32.vlgmr.msra.gmra.mrb[44].mxu0 %v35172_v12 }
0x1028   :  { %29201 = vmatprep.mubr.f32.mxu0 %v35200_v25  ;;  %31643 = vmatpush3.bf16.msra.mxu0 %v31640_v42 }
0x1029   :  { %31645 = vmatprep.subr.bf16.mxu0 %v31644_v45 }
0x102b   :  { %29202 = vmatmul.mubr.f32.gmra.mrb[46].mxu0 %v35193_v61 }
0x102c   :  { %31647 = vmatpush3.bf16.msra.mxu0 %v31644_v45  ;;  %29212 = vmatprep.mubr.f32.mxu0 %v35186_v5 }
0x102d   :  { %31649 = vmatprep.subr.bf16.mxu0 %v35417_v52 }
0x102f   :  { %29213 = vmatmul.mubr.f32.vlgmr.msra.gmra.mrb[44].mxu0 %v35181_v40 }
0x1030   :  { %29215 = vmatprep.mubr.f32.mxu0 %v35208_v48  ;;  %31651 = vmatpush3.bf16.msra.mxu0 %v35417_v52 }
0x1031   :  { %31653 = vmatprep.subr.bf16.mxu0 %v31628_v26 }
0x1033   :  { %29216 = vmatmul.mubr.f32.gmra.mrb[46].mxu0 %v35203_v11 }
0x1034   :  { %31655 = vmatpush3.bf16.msra.mxu0 %v31628_v26  ;;  %29226 = vmatprep.mubr.f32.mxu0 %v35198_v27 }
0x1035   :  { %31657 = vmatprep.subr.bf16.mxu0 %v31656_v33 }
0x1037   :  { %29227 = vmatmul.mubr.f32.vlgmr.msra.gmra.mrb[44].mxu0 %v35191_v14 }
0x1038   :  { %29229 = vmatprep.mubr.f32.mxu0 %v35216_v9  ;;  %31659 = vmatpush3.bf16.msra.mxu0 %v31656_v33 }
0x1039   :  { %31661 = vmatprep.subr.bf16.mxu0 %v31660_v30 }
0x103b   :  { %29230 = vmatmul.mubr.f32.gmra.mrb[46].mxu0 %v35213_v15 }
0x103c   :  { %31663 = vmatpush3.bf16.msra.mxu0 %v31660_v30  ;;  %29240 = vmatprep.mubr.f32.mxu0 %v35176_v58 }
0x103d   :  { %31665 = vmatprep.subr.bf16.mxu0 %v35417_v52 }
0x103f   :  { %29241 = vmatmul.mubr.f32.vlgmr.msra.gmra.mrb[44].mxu0 %v35172_v12 }
0x1040   :  { %29243 = vmatprep.mubr.f32.mxu0 %v35200_v25  ;;  %31667 = vmatpush3.bf16.msra.mxu0 %v35417_v52 }
0x1041   :  { %31669 = vmatprep.subr.bf16.mxu0 %v31628_v26 }
0x1043   :  { %29244 = vmatmul.mubr.f32.gmra.mrb[46].mxu0 %v35193_v61 }
0x1044   :  { %31671 = vmatpush3.bf16.msra.mxu0 %v31628_v26  ;;  %29254 = vmatprep.mubr.f32.mxu0 %v35176_v58 }
0x1047   :  { %29255 = vmatmul.mubr.f32.vlgmr.msra.gmra.mrb[44].mxu0 %v35172_v12 }
0x1048   :  { %29257 = vmatprep.mubr.f32.mxu0 %v35200_v25 }
0x104b   :  { %29258 = vmatmul.mubr.f32.gmra.mrb[46].mxu0 %v35193_v61 }
0x10b8   :  { %v28836_v44 = vpop.f32.mrb[36].mxu1 }
0x10b9   :  { %v32420_v32 = vadd.f32 %v28836_v44, %v25211_v57  ;;  %v13013_v2 = vpop.f32.mrb[37].mxu1 }
0x10ba   :  { %v29004_v38 = vpop.f32.mrb[36].mxu0  ;;  %v32421_v43 = vadd.f32 %v25211_v57, %v13013_v2 }
0x10bb   :  { %v13039_v47 = vsel %vm713_vm1, %v32420_v32, 0  ;;  %v16882_v41 = vand.u32 4294901760, %v29004_v38  ;;  %v14302_v63 = vpop.f32.mrb[37].mxu0 }
0x10bc   :  { %v35462_v50 = vand.u32 4294901760, %v13039_v47  ;;  %v13036_v51 = vsel %vm713_vm1, %v32421_v43, 0  ;;  %v16879_v49 = vand.u32 4294901760, %v14302_v63  ;;  %v28839_v62 = vpop.f32.mrb[38].mxu1 }
0x10bd   :  { %v16996_v19 = vsub.f32 %v29004_v38, %v16882_v41  ;;  %v35465_v36 = vand.u32 4294901760, %v13036_v51  ;;  %v32422_v8 = vadd.f32 %v28839_v62, %v25211_v57  ;;  %v13025_v39 = vpop.f32.mrb[39].mxu1 }
0x10be   :  { %v35468_v21 = vsub.f32 %v13039_v47, %v35462_v50  ;;  %v35470_v17 = vpack.c.bf16 %v16882_v41, %v16879_v49  ;;  %v16989_v52 = vsub.f32 %v14302_v63, %v16879_v49  ;;  %v29007_v35 = vpop.f32.mrb[38].mxu0  ;;  %v32423_v4 = vadd.f32 %v25211_v57, %v13025_v39 }
0x10bf   :  { %v16997_v46 = vand.u32 4294901760, %v16996_v19  ;;  %v35473_v54 = vsub.f32 %v13036_v51, %v35465_v36  ;;  %v13045_v26 = vsel %vm713_vm1, %v32422_v8, 0  ;;  %v16888_v18 = vand.u32 4294901760, %v29007_v35  ;;  %v14314_v59 = vpop.f32.mrb[39].mxu0 }
0x10c0   :  { %36816 = vst [vmem:[#allocation21_spill] sm:$0xff] %v35470_v17  ;;  %v36751_v10 = vand.u32 4294901760, %v35468_v21  ;;  %v16990_v53 = vand.u32 4294901760, %v16989_v52  ;;  %v35477_v1 = vand.u32 4294901760, %v13045_v26  ;;  %v13042_v37 = vsel %vm713_vm1, %v32423_v4, 0 }
0x10c1   :  { %v16998_v13 = vsub.f32 %v16996_v19, %v16997_v46  ;;  %v17010_v0 = vsub.f32 %v29007_v35, %v16888_v18  ;;  %v35480_v42 = vand.u32 4294901760, %v13042_v37  ;;  %v16885_v45 = vand.u32 4294901760, %v14314_v59 }
0x10c2   :  { %v13129_v33 = vsub.f32 %v35468_v21, %v36751_v10  ;;  %v16991_v30 = vsub.f32 %v16989_v52, %v16990_v53  ;;  %v35486_v57 = vsub.f32 %v13045_v26, %v35477_v1  ;;  %v13118_v44 = vand.u32 4294901760, %v35473_v54 }
0x10c3   :  { %v17011_v32 = vand.u32 4294901760, %v17010_v0  ;;  %v13137_v2 = vsub.f32 %v13042_v37, %v35480_v42  ;;  %v35490_v38 = vpack.c.bf16 %v16888_v18, %v16885_v45  ;;  %v17003_v43 = vsub.f32 %v14314_v59, %v16885_v45 }
0x10c4   :  { %v13130_v47 = vand.u32 4294901760, %v13129_v33  ;;  %v13119_v41 = vsub.f32 %v35473_v54, %v13118_v44  ;;  %v13148_v63 = vand.u32 4294901760, %v35486_v57  ;;  %v16992_v51 = vand.u32 4294901760, %v16991_v30 }
0x10c5   :  { %36817 = vst [vmem:[#allocation23_spill] sm:$0xff] %v35490_v38  ;;  %v17012_v49 = vsub.f32 %v17010_v0, %v17011_v32  ;;  %v17004_v62 = vand.u32 4294901760, %v17003_v43  ;;  %v13138_v8 = vand.u32 4294901760, %v13137_v2  ;;  %v16999_v39 = vand.u32 4294901760, %v16998_v13 }
0x10c6   :  { %v13120_v35 = vand.u32 4294901760, %v13119_v41  ;;  %v13149_v4 = vsub.f32 %v35486_v57, %v13148_v63  ;;  %v35495_v26 = vpack.c.bf16 %v16996_v19, %v16989_v52  ;;  %v35497_v10 = vpack.c.bf16 %v17010_v0, %v17003_v43 }
0x10c7   :  { %v17005_v18 = vsub.f32 %v17003_v43, %v17004_v62  ;;  %v13139_v37 = vsub.f32 %v13137_v2, %v13138_v8  ;;  %v35499_v59 = vpack.c.bf16 %v16999_v39, %v16992_v51  ;;  %v17013_v45 = vand.u32 4294901760, %v17012_v49 }
0x10c8   :  { %36818 = vst [vmem:[#allocation16_spill] sm:$0xff] %v35495_v26  ;;  %36819 = vst [vmem:[#allocation20_spill] sm:$0xff] %v35497_v10  ;;  %28848 = vmatprep.mubr.f32.mxu1 %v13120_v35  ;;  %v35501_v33 = vpack.c.bf16 %v16997_v46, %v16990_v53  ;;  %v35503_v30 = vpack.c.bf16 %v17011_v32, %v17004_v62  ;;  %v35507_v13 = vpack.c.bf16 %v35235_v23, %v35232_v6 }
0x10c9   :  { %36820 = vst [vmem:[#allocation19_spill] sm:$0xff] %v35499_v59  ;;  %28849 = vmatmul.mubr.f32.vlgmr.msra.gmra.mrb[40].mxu1 %v13130_v47  ;;  %v13140_v41 = vand.u32 4294901760, %v13139_v37  ;;  %v17006_v19 = vand.u32 4294901760, %v17005_v18  ;;  %v13150_v52 = vand.u32 4294901760, %v13149_v4  ;;  %v35516_v46 = vpack.c.bf16 %v35181_v40, %v35186_v5 }
0x10ca   :  { %36821 = vst [vmem:[#allocation22_spill] sm:$0xff] %v35501_v33  ;;  %36822 = vst [vmem:[#allocation8_spill] sm:$0xff] %v35503_v30  ;;  %31443 = vmatpush3.bf16.xpose.msra.mxu1 %v35380_v31  ;;  %v35523_v53 = vpack.c.bf16 %v35203_v11, %v35208_v48  ;;  %v35546_v49 = vpack.c.bf16 %v35213_v15, %v35216_v9 }
0x10cb   :  { %31445 = vmatprep.subr.bf16.mxu1 %v35507_v13  ;;  %28851 = vmatprep.mubr.f32.mxu1 %v13140_v41  ;;  %v35511_v0 = vpack.c.bf16 %v17013_v45, %v17006_v19 }
0x10cd   :  { %36823 = vst [vmem:[#allocation9_spill] sm:$0xff] %v35511_v0  ;;  %28852 = vmatmul.mubr.f32.gmra.mrb[42].mxu1 %v13150_v52 }
0x10ce   :  { %28862 = vmatprep.mubr.f32.mxu1 %v35465_v36 }
0x10d2   :  { %31447 = vmatpush3.bf16.xpose.msra.mxu1 %v35507_v13 }
0x10d3   :  { %31449 = vmatprep.subr.bf16.mxu1 %v35516_v46 }
0x10d9   :  { %28863 = vmatmul.mubr.f32.vlgmr.msra.gmra.mrb[40].mxu1 %v35462_v50 }
0x10da   :  { %28865 = vmatprep.mubr.f32.mxu1 %v35480_v42  ;;  %31451 = vmatpush3.bf16.xpose.msra.mxu1 %v35516_v46 }
0x10db   :  { %31453 = vmatprep.subr.bf16.mxu1 %v35523_v53 }
0x10dd   :  { %28866 = vmatmul.mubr.f32.gmra.mrb[42].mxu1 %v35477_v1 }
0x10de   :  { %28876 = vmatprep.mubr.f32.mxu1 %v35473_v54  ;;  %v35538_v54 = vpack.c.bf16 %v35191_v14, %v35198_v27 }
0x10e2   :  { %31455 = vmatpush3.bf16.xpose.msra.mxu1 %v35523_v53 }
0x10e3   :  { %31457 = vmatprep.subr.bf16.mxu1 %v35334_v60 }
0x10e9   :  { %28877 = vmatmul.mubr.f32.vlgmr.msra.gmra.mrb[40].mxu1 %v35468_v21 }
0x10ea   :  { %28879 = vmatprep.mubr.f32.mxu1 %v13137_v2  ;;  %31459 = vmatpush3.bf16.xpose.msra.mxu1 %v35334_v60  ;;  %v29088_v32 = vpop.f32.mrb[40].mxu0  ;;  %v36824_v2 = vand.u32 4294901760, %v35468_v21 }
0x10eb   :  { %31461 = vmatprep.subr.bf16.mxu1 %v35367_v29  ;;  %v14929_v43 = vpop.f32.mrb[41].mxu0 }
0x10ed   :  { %28880 = vmatmul.mubr.f32.gmra.mrb[42].mxu1 %v35486_v57  ;;  %v25217_v57 = vld [vmem:[%s36719_s4 + $0x5] ss:$0 sm:$0xff] }
0x10ee   :  { %28890 = vmatprep.mubr.f32.mxu1 %v13118_v44  ;;  %v29091_v47 = vpop.f32.mrb[42].mxu0  ;;  %v32429_v21 = vadd.f32 %v25217_v57, %v14929_v43  ;;  %v32428_v62 = vadd.f32 %v29088_v32, %v25217_v57 }
0x10ef   :  { %v14941_v51 = vpop.f32.mrb[43].mxu0  ;;  %v32430_v4 = vadd.f32 %v29091_v47, %v25217_v57 }
0x10f0   :  { %v14952_v44 = vsel %vm713_vm1, %v32429_v21, 0  ;;  %v32431_v39 = vadd.f32 %v25217_v57, %v14941_v51  ;;  %v14955_v35 = vsel %vm713_vm1, %v32428_v62, 0 }
0x10f1   :  { %v35573_v45 = vand.u32 4294901760, %v14955_v35 }
0x10f2   :  { %31463 = vmatpush3.bf16.xpose.msra.mxu1 %v35367_v29  ;;  %v14958_v37 = vsel %vm713_vm1, %v32431_v39, 0 }
0x10f3   :  { %31465 = vmatprep.subr.bf16.mxu1 %v35538_v54  ;;  %v35576_v41 = vand.u32 4294901760, %v14958_v37  ;;  %v35585_v32 = vsub.f32 %v14955_v35, %v35573_v45 }
0x10f5   :  { %v36758_v39 = vand.u32 4294901760, %v35585_v32 }
0x10f7   :  { %v15045_v56 = vsub.f32 %v35585_v32, %v36758_v39 }
0x10f9   :  { %28891 = vmatmul.mubr.f32.vlgmr.msra.gmra.mrb[40].mxu1 %v36824_v2  ;;  %v35591_v2 = vsub.f32 %v14958_v37, %v35576_v41  ;;  %v15046_v33 = vand.u32 4294901760, %v15045_v56  ;;  %v36826_v56 = vand.u32 4294901760, %v35585_v32 }
0x10fa   :  { %28893 = vmatprep.mubr.f32.mxu1 %v13138_v8  ;;  %31467 = vmatpush3.bf16.xpose.msra.mxu1 %v35538_v54 }
0x10fb   :  { %31469 = vmatprep.subr.bf16.mxu1 %v35546_v49 }
0x10fd   :  { %28894 = vmatmul.mubr.f32.gmra.mrb[42].mxu1 %v13148_v63  ;;  %v35561_v63 = vand.u32 4294901760, %v14952_v44 }
0x10fe   :  { %28904 = vmatprep.mubr.f32.mxu1 %v35465_v36 }
0x10ff   :  { %v35566_v8 = vsub.f32 %v14952_v44, %v35561_v63 }
0x1101   :  { %v36752_v18 = vand.u32 4294901760, %v35566_v8 }
0x1102   :  { %31471 = vmatpush3.bf16.xpose.msra.mxu1 %v35546_v49 }
0x1103   :  { %31473 = vmatprep.subr.bf16.mxu1 %v35334_v60  ;;  %v15035_v19 = vsub.f32 %v35566_v8, %v36752_v18 }
0x1105   :  { %v15036_v21 = vand.u32 4294901760, %v15035_v19  ;;  %v15054_v19 = vand.u32 4294901760, %v35591_v2 }
0x1109   :  { %28905 = vmatmul.mubr.f32.vlgmr.msra.gmra.mrb[40].mxu1 %v35462_v50 }
0x110a   :  { %28907 = vmatprep.mubr.f32.mxu1 %v35480_v42  ;;  %31475 = vmatpush3.bf16.xpose.msra.mxu1 %v35334_v60 }
0x110b   :  { %31477 = vmatprep.subr.bf16.mxu1 %v35367_v29 }
0x110d   :  { %28908 = vmatmul.mubr.f32.gmra.mrb[42].mxu1 %v35477_v1 }
0x110e   :  { %28918 = vmatprep.mubr.f32.mxu1 %v35465_v36  ;;  %v14961_v36 = vsel %vm713_vm1, %v32430_v4, 0 }
0x110f   :  { %v35587_v43 = vand.u32 4294901760, %v14961_v36 }
0x1111   :  { %v35598_v35 = vsub.f32 %v14961_v36, %v35587_v43 }
0x1112   :  { %31479 = vmatpush3.bf16.xpose.msra.mxu1 %v35367_v29 }
0x1113   :  { %31577 = vmatprep.subr.bf16.mxu1 %v35334_v60 }
0x1119   :  { %28919 = vmatmul.mubr.f32.vlgmr.msra.gmra.mrb[40].mxu1 %v35462_v50 }
0x111a   :  { %28921 = vmatprep.mubr.f32.mxu1 %v35480_v42  ;;  %31579 = vmatpush3.bf16.xpose.msra.mxu1 %v35334_v60  ;;  %v29256_v52 = vpop.f32.mrb[44].mxu0 }
0x111b   :  { %v16256_v47 = vand.u32 4294901760, %v29256_v52  ;;  %31581 = vmatprep.subr.bf16.mxu1 %v35367_v29  ;;  %v16218_v51 = vpop.f32.mrb[45].mxu0 }
0x111c   :  { %v16253_v57 = vand.u32 4294901760, %v16218_v51 }
0x111d   :  { %v16370_v50 = vsub.f32 %v29256_v52, %v16256_v47  ;;  %28922 = vmatmul.mubr.f32.gmra.mrb[42].mxu1 %v35477_v1 }
0x111e   :  { %v35594_v42 = vpack.c.bf16 %v16256_v47, %v16253_v57  ;;  %v16363_v44 = vsub.f32 %v16218_v51, %v16253_v57  ;;  %29100 = vmatprep.mubr.f32.mxu1 %v15036_v21  ;;  %v29259_v62 = vpop.f32.mrb[46].mxu0 }
0x111f   :  { %v16371_v4 = vand.u32 4294901760, %v16370_v50  ;;  %v16262_v18 = vand.u32 4294901760, %v29259_v62  ;;  %v16230_v3 = vpop.f32.mrb[47].mxu0 }
0x1120   :  { %v16364_v37 = vand.u32 4294901760, %v16363_v44  ;;  %v16259_v34 = vand.u32 4294901760, %v16230_v3  ;;  %31673 = vmatprep.subr.bf16.mxu0 %v35594_v42  ;;  %v35602_v1 = vpack.c.bf16 %v16370_v50, %v16363_v44 }
0x1121   :  { %v16372_v52 = vsub.f32 %v16370_v50, %v16371_v4  ;;  %v16384_v47 = vsub.f32 %v29259_v62, %v16262_v18  ;;  %31675 = vmatpush3.bf16.msra.mxu0 %v35594_v42  ;;  %v15064_v50 = vand.u32 4294901760, %v35598_v35 }
0x1122   :  { %v16365_v51 = vsub.f32 %v16363_v44, %v16364_v37  ;;  %v35605_v57 = vpack.c.bf16 %v16262_v18, %v16259_v34  ;;  %v16377_v36 = vsub.f32 %v16230_v3, %v16259_v34  ;;  %31583 = vmatpush3.bf16.xpose.msra.mxu1 %v35367_v29  ;;  %v35608_v21 = vpack.c.bf16 %v16371_v4, %v16364_v37 }
0x1123   :  { %v16385_v20 = vand.u32 4294901760, %v16384_v47  ;;  %31585 = vmatprep.subr.bf16.mxu1 %v35380_v31  ;;  %v16373_v30 = vand.u32 4294901760, %v16372_v52  ;;  %v15055_v34 = vsub.f32 %v35591_v2, %v15054_v19  ;;  %v15065_v52 = vsub.f32 %v35598_v35, %v15064_v50 }
0x1124   :  { %v16378_v62 = vand.u32 4294901760, %v16377_v36  ;;  %31677 = vmatprep.subr.bf16.mxu0 %v35605_v57  ;;  %v16366_v18 = vand.u32 4294901760, %v16365_v51  ;;  %v35617_v3 = vpack.c.bf16 %v16384_v47, %v16377_v36 }
0x1125   :  { %v16386_v44 = vsub.f32 %v16384_v47, %v16385_v20  ;;  %31679 = vmatpush3.bf16.msra.mxu0 %v35605_v57  ;;  %v15056_v26 = vand.u32 4294901760, %v15055_v34 }
0x1126   :  { %v16379_v4 = vsub.f32 %v16377_v36, %v16378_v62  ;;  %v35620_v37 = vpack.c.bf16 %v16373_v30, %v16366_v18  ;;  %v35622_v39 = vpack.c.bf16 %v16385_v20, %v16378_v62  ;;  %v15066_v30 = vand.u32 4294901760, %v15065_v52 }
0x1127   :  { %v16387_v10 = vand.u32 4294901760, %v16386_v44  ;;  %v36825_v20 = vand.u32 4294901760, %v35566_v8 }
0x1128   :  { %31681 = vmatprep.subr.bf16.mxu0 %v35620_v37  ;;  %v16380_v51 = vand.u32 4294901760, %v16379_v4 }
0x1129   :  { %29101 = vmatmul.mubr.f32.vlgmr.msra.gmra.mrb[44].mxu1 %v15046_v33 }
0x112a   :  { %29103 = vmatprep.mubr.f32.mxu1 %v15056_v26  ;;  %31587 = vmatpush3.bf16.xpose.msra.mxu1 %v35380_v31  ;;  %v35627_v47 = vpack.c.bf16 %v16387_v10, %v16380_v51  ;;  %v25218_v10 = vld [vmem:[%s36718_s3 + $0xc0] sm:$0xff]  ;;  %v25219_v26 = vld [vmem:[%s36718_s3 + $0xc8] sm:$0xff] }
0x112b   :  { %31589 = vmatprep.subr.bf16.mxu1 %v35507_v13  ;;  %v17506_v33 = vand.u32 4294901760, %v25218_v10 }
0x112d   :  { %29104 = vmatmul.mubr.f32.gmra.mrb[46].mxu1 %v15066_v30  ;;  %v17616_v36 = vsub.f32 %v25218_v10, %v17506_v33 }
0x112e   :  { %29114 = vmatprep.mubr.f32.mxu1 %v35561_v63 }
0x112f   :  { %v17617_v18 = vand.u32 4294901760, %v17616_v36 }
0x1131   :  { %v17618_v52 = vsub.f32 %v17616_v36, %v17617_v18 }
0x1132   :  { %31591 = vmatpush3.bf16.xpose.msra.mxu1 %v35507_v13 }
0x1133   :  { %31593 = vmatprep.subr.bf16.mxu1 %v35516_v46  ;;  %v17619_v10 = vand.u32 4294901760, %v17618_v52 }
0x1139   :  { %29115 = vmatmul.mubr.f32.vlgmr.msra.gmra.mrb[44].mxu1 %v35573_v45 }
0x113a   :  { %29117 = vmatprep.mubr.f32.mxu1 %v35576_v41  ;;  %31595 = vmatpush3.bf16.xpose.msra.mxu1 %v35516_v46 }
0x113b   :  { %31597 = vmatprep.subr.bf16.mxu1 %v35523_v53 }
0x113d   :  { %29118 = vmatmul.mubr.f32.gmra.mrb[46].mxu1 %v35587_v43 }
0x113e   :  { %29128 = vmatprep.mubr.f32.mxu1 %v35566_v8  ;;  %v17509_v8 = vand.u32 4294901760, %v25219_v26 }
0x1140   :  { %v35675_v62 = vpack.c.bf16 %v17509_v8, %v17506_v33 }
0x1142   :  { %31599 = vmatpush3.bf16.xpose.msra.mxu1 %v35523_v53 }
0x1143   :  { %31601 = vmatprep.subr.bf16.mxu1 %v35334_v60 }
0x1149   :  { %29129 = vmatmul.mubr.f32.vlgmr.msra.gmra.mrb[44].mxu1 %v35585_v32  ;;  %v25220_v32 = vld [vmem:[%s36718_s3 + $0xd0] sm:$0xff] }
0x114a   :  { %29131 = vmatprep.mubr.f32.mxu1 %v35591_v2  ;;  %31603 = vmatpush3.bf16.xpose.msra.mxu1 %v35334_v60  ;;  %v25221_v2 = vld [vmem:[%s36718_s3 + $0xd8] sm:$0xff] }
0x114b   :  { %31605 = vmatprep.subr.bf16.mxu1 %v35367_v29 }
0x114d   :  { %29132 = vmatmul.mubr.f32.gmra.mrb[46].mxu1 %v35598_v35  ;;  %v17512_v35 = vand.u32 4294901760, %v25220_v32 }
0x114e   :  { %29142 = vmatprep.mubr.f32.mxu1 %v36825_v20 }
0x114f   :  { %v17630_v44 = vsub.f32 %v25220_v32, %v17512_v35 }
0x1151   :  { %v17631_v30 = vand.u32 4294901760, %v17630_v44 }
0x1152   :  { %31607 = vmatpush3.bf16.xpose.msra.mxu1 %v35367_v29 }
0x1153   :  { %31609 = vmatprep.subr.bf16.mxu1 %v35538_v54  ;;  %v17632_v0 = vsub.f32 %v17630_v44, %v17631_v30 }
0x1155   :  { %v17633_v33 = vand.u32 4294901760, %v17632_v0 }
0x1159   :  { %29143 = vmatmul.mubr.f32.vlgmr.msra.gmra.mrb[44].mxu1 %v36826_v56 }
0x115a   :  { %29145 = vmatprep.mubr.f32.mxu1 %v15054_v19  ;;  %31611 = vmatpush3.bf16.xpose.msra.mxu1 %v35538_v54  ;;  %v17515_v19 = vand.u32 4294901760, %v25221_v2 }
0x115b   :  { %31613 = vmatprep.subr.bf16.mxu1 %v35546_v49 }
0x115c   :  { %v17637_v4 = vsub.f32 %v25221_v2, %v17515_v19  ;;  %v31772_v56 = vpack.c.bf16 %v17515_v19, %v17512_v35 }
0x115d   :  { %29146 = vmatmul.mubr.f32.gmra.mrb[46].mxu1 %v15064_v50  ;;  %v17623_v50 = vsub.f32 %v25219_v26, %v17509_v8 }
0x115e   :  { %29156 = vmatprep.mubr.f32.mxu1 %v35561_v63  ;;  %v17638_v20 = vand.u32 4294901760, %v17637_v4 }
0x115f   :  { %v17624_v34 = vand.u32 4294901760, %v17623_v50 }
0x1160   :  { %v17639_v59 = vsub.f32 %v17637_v4, %v17638_v20 }
0x1161   :  { %v17625_v51 = vsub.f32 %v17623_v50, %v17624_v34  ;;  %v31800_v0 = vpack.c.bf16 %v17624_v34, %v17617_v18 }
0x1162   :  { %31615 = vmatpush3.bf16.xpose.msra.mxu1 %v35546_v49  ;;  %v17640_v8 = vand.u32 4294901760, %v17639_v59  ;;  %v31788_v59 = vpack.c.bf16 %v17637_v4, %v17630_v44 }
0x1163   :  { %31617 = vmatprep.subr.bf16.mxu1 %v35334_v60  ;;  %v17626_v26 = vand.u32 4294901760, %v17625_v51 }
0x1164   :  { %v31780_v32 = vpack.c.bf16 %v17640_v8, %v17633_v33 }
0x1169   :  { %29157 = vmatmul.mubr.f32.vlgmr.msra.gmra.mrb[44].mxu1 %v35573_v45 }
0x116a   :  { %29159 = vmatprep.mubr.f32.mxu1 %v35576_v41  ;;  %31619 = vmatpush3.bf16.xpose.msra.mxu1 %v35334_v60 }
0x116b   :  { %31621 = vmatprep.subr.bf16.mxu1 %v35367_v29 }
0x116d   :  { %29160 = vmatmul.mubr.f32.gmra.mrb[46].mxu1 %v35587_v43 }
0x116e   :  { %29170 = vmatprep.mubr.f32.mxu1 %v35561_v63  ;;  %v31776_v63 = vpack.c.bf16 %v17626_v26, %v17619_v10 }
0x1172   :  { %31623 = vmatpush3.bf16.xpose.msra.mxu1 %v35367_v29 }
0x1173   :  { %31769 = vmatprep.subr.bf16.mxu1 %v35675_v62 }
0x1179   :  { %29171 = vmatmul.mubr.f32.vlgmr.msra.gmra.mrb[44].mxu1 %v35573_v45  ;;  %v31784_v45 = vpack.c.bf16 %v17623_v50, %v17616_v36 }
0x117a   :  { %29173 = vmatprep.mubr.f32.mxu1 %v35576_v41  ;;  %31771 = vmatpush3.bf16.msra.mxu1 %v35675_v62  ;;  %v31804_v41 = vpack.c.bf16 %v17638_v20, %v17631_v30 }
0x117b   :  { %31773 = vmatprep.subr.bf16.mxu1 %v31772_v56 }
0x117d   :  { %29174 = vmatmul.mubr.f32.gmra.mrb[46].mxu1 %v35587_v43 }
0x117e   :  { %31775 = vmatpush3.bf16.msra.mxu1 %v31772_v56  ;;  %29436 = vmatprep.mubr.f32.mxu1 %v35218_v16 }
0x117f   :  { %31777 = vmatprep.subr.bf16.mxu1 %v31776_v63 }
0x1181   :  { %29437 = vmatmul.mubr.f32.vlgmr.msra.gmra.mrb[48].mxu1 %v35220_v24 }
0x1182   :  { %29439 = vmatprep.mubr.f32.mxu1 %v35232_v6  ;;  %31779 = vmatpush3.bf16.msra.mxu1 %v31776_v63 }
0x1183   :  { %31781 = vmatprep.subr.bf16.mxu1 %v31780_v32 }
0x1185   :  { %29440 = vmatmul.mubr.f32.gmra.mrb[50].mxu1 %v35235_v23 }
0x1186   :  { %31783 = vmatpush3.bf16.msra.mxu1 %v31780_v32  ;;  %29450 = vmatprep.mubr.f32.mxu1 %v35176_v58 }
0x1187   :  { %31785 = vmatprep.subr.bf16.mxu1 %v31784_v45 }
0x1189   :  { %29451 = vmatmul.mubr.f32.vlgmr.msra.gmra.mrb[48].mxu1 %v35172_v12 }
0x118a   :  { %29453 = vmatprep.mubr.f32.mxu1 %v35200_v25  ;;  %31787 = vmatpush3.bf16.msra.mxu1 %v31784_v45 }
0x118b   :  { %31789 = vmatprep.subr.bf16.mxu1 %v31788_v59 }
0x118d   :  { %29454 = vmatmul.mubr.f32.gmra.mrb[50].mxu1 %v35193_v61 }
0x118e   :  { %31791 = vmatpush3.bf16.msra.mxu1 %v31788_v59  ;;  %29464 = vmatprep.mubr.f32.mxu1 %v35186_v5 }
0x118f   :  { %31793 = vmatprep.subr.bf16.mxu1 %v35675_v62 }
0x1191   :  { %29465 = vmatmul.mubr.f32.vlgmr.msra.gmra.mrb[48].mxu1 %v35181_v40 }
0x1192   :  { %29467 = vmatprep.mubr.f32.mxu1 %v35208_v48  ;;  %31795 = vmatpush3.bf16.msra.mxu1 %v35675_v62 }
0x1193   :  { %31797 = vmatprep.subr.bf16.mxu1 %v31772_v56 }
0x1195   :  { %29468 = vmatmul.mubr.f32.gmra.mrb[50].mxu1 %v35203_v11 }
0x1196   :  { %31799 = vmatpush3.bf16.msra.mxu1 %v31772_v56  ;;  %29478 = vmatprep.mubr.f32.mxu1 %v35198_v27 }
0x1197   :  { %31801 = vmatprep.subr.bf16.mxu1 %v31800_v0 }
0x1199   :  { %29479 = vmatmul.mubr.f32.vlgmr.msra.gmra.mrb[48].mxu1 %v35191_v14 }
0x119a   :  { %29481 = vmatprep.mubr.f32.mxu1 %v35216_v9  ;;  %31803 = vmatpush3.bf16.msra.mxu1 %v31800_v0  ;;  %v25223_v0 = vld [vmem:[%s36719_s4 + $0x6] ss:$0 sm:$0xff] }
0x119b   :  { %31805 = vmatprep.subr.bf16.mxu1 %v31804_v41 }
0x119d   :  { %29482 = vmatmul.mubr.f32.gmra.mrb[50].mxu1 %v35213_v15 }
0x119e   :  { %31807 = vmatpush3.bf16.msra.mxu1 %v31804_v41  ;;  %29492 = vmatprep.mubr.f32.mxu1 %v35176_v58 }
0x119f   :  { %31809 = vmatprep.subr.bf16.mxu1 %v35675_v62 }
0x11a1   :  { %29493 = vmatmul.mubr.f32.vlgmr.msra.gmra.mrb[48].mxu1 %v35172_v12 }
0x11a2   :  { %29495 = vmatprep.mubr.f32.mxu1 %v35200_v25  ;;  %31811 = vmatpush3.bf16.msra.mxu1 %v35675_v62 }
0x11a3   :  { %31813 = vmatprep.subr.bf16.mxu1 %v31772_v56 }
0x11a5   :  { %29496 = vmatmul.mubr.f32.gmra.mrb[50].mxu1 %v35193_v61 }
0x11a6   :  { %31815 = vmatpush3.bf16.msra.mxu1 %v31772_v56  ;;  %29506 = vmatprep.mubr.f32.mxu1 %v35176_v58 }
0x11a7   :  { %31817 = vmatprep.subr.bf16.mxu1 %v35334_v60 }
0x11a9   :  { %29507 = vmatmul.mubr.f32.vlgmr.msra.gmra.mrb[48].mxu1 %v35172_v12 }
0x11aa   :  { %29509 = vmatprep.mubr.f32.mxu1 %v35200_v25 }
0x11ad   :  { %29510 = vmatmul.mubr.f32.gmra.mrb[50].mxu1 %v35193_v61 }
0x11af   :  { %31819 = vmatpush3.bf16.xpose.msra.mxu1 %v35334_v60 }
0x11b0   :  { %31821 = vmatprep.subr.bf16.mxu1 %v35367_v29 }
0x11b7   :  { %31823 = vmatpush3.bf16.xpose.msra.mxu1 %v35367_v29 }
0x11b8   :  { %31825 = vmatprep.subr.bf16.mxu1 %v35380_v31 }
0x11ec   :  { %v28920_v43 = vpop.f32.mrb[40].mxu1 }
0x11ed   :  { %v13639_v2 = vpop.f32.mrb[41].mxu1  ;;  %v35733_v20 = vadd.f32 %v28920_v43, %v34025_v22 }
0x11ee   :  { %v35738_v10 = vadd.f32 %v13639_v2, %v34028_v28 }
0x11ef   :  { %v13664_v33 = vsel %vm713_vm1, %v35733_v20, -inf }
0x11f0   :  { %v28923_v35 = vpop.f32.mrb[42].mxu1  ;;  %v13661_v32 = vsel %vm713_vm1, %v35738_v10, -inf }
0x11f1   :  { %v13651_v19 = vpop.f32.mrb[43].mxu1  ;;  %v35743_v63 = vadd.f32 %v28923_v35, %v34034_v55 }
0x11f2   :  { %v35748_v8 = vadd.f32 %v13651_v19, %v34039_v7 }
0x11f3   :  { %v13670_v45 = vsel %vm713_vm1, %v35743_v63, -inf }
0x11f4   :  { %v13667_v59 = vsel %vm713_vm1, %v35748_v8, -inf }
0x124c   :  { %v29172_v36 = vpop.f32.mrb[44].mxu1 }
0x124d   :  { %v35717_v50 = vadd.f32 %v29172_v36, %v34025_v22  ;;  %v15555_v62 = vpop.f32.mrb[45].mxu1 }
0x124e   :  { %v35720_v18 = vadd.f32 %v15555_v62, %v34028_v28 }
0x124f   :  { %v15580_v34 = vsel %vm713_vm1, %v35717_v50, -inf }
0x1250   :  { %15581 = vmax.xlane.f32.xlu1 %v15580_v34  ;;  %v29175_v44 = vpop.f32.mrb[46].mxu1  ;;  %v15577_v4 = vsel %vm713_vm1, %v35720_v18, -inf }
0x1251   :  { %v35727_v52 = vadd.f32 %v29175_v44, %v34034_v55  ;;  %v15567_v51 = vpop.f32.mrb[47].mxu1  ;;  %15578 = vmax.xlane.f32.xlu0 %v15577_v4 }
0x1252   :  { %v35730_v30 = vadd.f32 %v15567_v51, %v34039_v7 }
0x1253   :  { %v15586_v56 = vsel %vm713_vm1, %v35727_v52, -inf }
0x1254   :  { %15587 = vmax.xlane.f32.xlu1 %v15586_v56  ;;  %v15583_v26 = vsel %vm713_vm1, %v35730_v30, -inf }
0x1255   :  { %15584 = vmax.xlane.f32.xlu0 %v15583_v26 }
0x1258   :  { %13665 = vmax.xlane.f32.xlu1 %v13664_v33 }
0x1259   :  { %13662 = vmax.xlane.f32.xlu0 %v13661_v32 }
0x125c   :  { %13671 = vmax.xlane.f32.xlu1 %v13670_v45 }
0x125d   :  { %13668 = vmax.xlane.f32.xlu0 %v13667_v59 }
0x127c   :  { %v29508_v41 = vpop.f32.mrb[48].mxu1 }
0x127d   :  { %v32436_v43 = vadd.f32 %v29508_v41, %v25223_v0  ;;  %v18097_v2 = vpop.f32.mrb[49].mxu1 }
0x127e   :  { %v32437_v35 = vadd.f32 %v25223_v0, %v18097_v2 }
0x127f   :  { %v18123_v19 = vsel %vm713_vm1, %v32436_v43, 0 }
0x1280   :  { %v35760_v36 = vand.u32 4294901760, %v18123_v19  ;;  %v18120_v62 = vsel %vm713_vm1, %v32437_v35, 0  ;;  %v29511_v34 = vpop.f32.mrb[50].mxu1 }
0x1281   :  { %v35763_v44 = vand.u32 4294901760, %v18120_v62  ;;  %v32438_v4 = vadd.f32 %v29511_v34, %v25223_v0  ;;  %v18109_v51 = vpop.f32.mrb[51].mxu1 }
0x1282   :  { %v18211_v56 = vsub.f32 %v18123_v19, %v35760_v36  ;;  %v32439_v26 = vadd.f32 %v25223_v0, %v18109_v51 }
0x1283   :  { %v18201_v33 = vsub.f32 %v18120_v62, %v35763_v44  ;;  %v18129_v32 = vsel %vm713_vm1, %v32438_v4, 0 }
0x1284   :  { %v18212_v45 = vand.u32 4294901760, %v18211_v56  ;;  %v35768_v59 = vand.u32 4294901760, %v18129_v32  ;;  %v18126_v41 = vsel %vm713_vm1, %v32439_v26, 0 }
0x1285   :  { %v35771_v43 = vand.u32 4294901760, %v18126_v41  ;;  %v18202_v2 = vand.u32 4294901760, %v18201_v33 }
0x1286   :  { %v18213_v35 = vsub.f32 %v18211_v56, %v18212_v45  ;;  %v18231_v38 = vsub.f32 %v18129_v32, %v35768_v59 }
0x1287   :  { %v18221_v34 = vsub.f32 %v18126_v41, %v35771_v43  ;;  %v18203_v17 = vsub.f32 %v18201_v33, %v18202_v2 }
0x1288   :  { %v18232_v19 = vand.u32 4294901760, %v18231_v38  ;;  %v18214_v62 = vand.u32 4294901760, %v18213_v35 }
0x1289   :  { %v18204_v0 = vand.u32 4294901760, %v18203_v17  ;;  %v18222_v51 = vand.u32 4294901760, %v18221_v34 }
0x128a   :  { %v18233_v7 = vsub.f32 %v18231_v38, %v18232_v19 }
0x128b   :  { %29520 = vmatprep.mubr.f32.mxu1 %v18204_v0  ;;  %v18223_v4 = vsub.f32 %v18221_v34, %v18222_v51 }
0x128c   :  { %29521 = vmatmul.mubr.f32.vlgmr.msra.gmra.mrb[52].mxu1 %v18214_v62  ;;  %v18234_v55 = vand.u32 4294901760, %v18233_v7  ;;  %v25225_v7 = vld [vmem:[%s36718_s3 + $0xe8] sm:$0xff] }
0x128d   :  { %31827 = vmatpush3.bf16.xpose.msra.mxu1 %v35380_v31  ;;  %v18224_v26 = vand.u32 4294901760, %v18223_v4 }
0x128e   :  { %31829 = vmatprep.subr.bf16.mxu1 %v35507_v13 }
0x128f   :  { %29523 = vmatprep.mubr.f32.mxu1 %v18224_v26 }
0x1290   :  { %29524 = vmatmul.mubr.f32.gmra.mrb[54].mxu1 %v18234_v55  ;;  %v25224_v55 = vld [vmem:[%s36718_s3 + $0xe0] sm:$0xff] }
0x1291   :  { %29534 = vmatprep.mubr.f32.mxu1 %v35763_v44  ;;  %v20052_v17 = vand.u32 4294901760, %v25224_v55 }
0x1293   :  { %v35812_v41 = vsub.f32 %v25224_v55, %v20052_v17 }
0x1295   :  { %31831 = vmatpush3.bf16.xpose.msra.mxu1 %v35507_v13 }
0x1296   :  { %31833 = vmatprep.subr.bf16.mxu1 %v35516_v46 }
0x129c   :  { %29535 = vmatmul.mubr.f32.vlgmr.msra.gmra.mrb[52].mxu1 %v35760_v36 }
0x129d   :  { %29537 = vmatprep.mubr.f32.mxu1 %v35771_v43  ;;  %31835 = vmatpush3.bf16.xpose.msra.mxu1 %v35516_v46 }
0x129e   :  { %31837 = vmatprep.subr.bf16.mxu1 %v35523_v53 }
0x12a0   :  { %29538 = vmatmul.mubr.f32.gmra.mrb[54].mxu1 %v35768_v59 }
0x12a1   :  { %29548 = vmatprep.mubr.f32.mxu1 %v18201_v33  ;;  %v25227_v33 = vld [vmem:[%s36718_s3 + $0xf8] sm:$0xff] }
0x12a5   :  { %31839 = vmatpush3.bf16.xpose.msra.mxu1 %v35523_v53 }
0x12a6   :  { %31841 = vmatprep.subr.bf16.mxu1 %v35334_v60 }
0x12ac   :  { %29549 = vmatmul.mubr.f32.vlgmr.msra.gmra.mrb[52].mxu1 %v18211_v56  ;;  %v25226_v56 = vld [vmem:[%s36718_s3 + $0xf0] sm:$0xff]  ;;  %s33468_s3 = smov [#allocation5]  }
0x12ad   :  { %29551 = vmatprep.mubr.f32.mxu1 %v18221_v34  ;;  %31843 = vmatpush3.bf16.xpose.msra.mxu1 %v35334_v60  ;;  %v20058_v32 = vand.u32 4294901760, %v25226_v56  ;;  %v36772_v34 = vand.u32 4294901760, %v35812_v41  ;;  %s25166_s23 = sshll.u32 %s33468_s3, 4  ;;  %s25167_s23 = int_to_ptr.vmem [resolvable:$true] %s25166_s23 }
0x12ae   :  { %31845 = vmatprep.subr.bf16.mxu1 %v35367_v29  ;;  %p33440_p9 = scmp.lt.s32.totalorder %s25167_s23, %s25167_s23 }
0x12af   :  { %v35822_v0 = vsub.f32 %v25226_v56, %v20058_v32  ;;  %v20164_v62 = vsub.f32 %v35812_v41, %v36772_v34 }
0x12b0   :  { %29552 = vmatmul.mubr.f32.gmra.mrb[54].mxu1 %v18231_v38  ;;  %v20055_v38 = vand.u32 4294901760, %v25225_v7 }
0x12b1   :  { %29562 = vmatprep.mubr.f32.mxu1 %v18202_v2  ;;  %v36771_v4 = vand.u32 4294901760, %v35822_v0 }
0x12b2   :  { %v35814_v2 = vsub.f32 %v25225_v7, %v20055_v38  ;;  %v35818_v35 = vpack.c.bf16 %v20055_v38, %v20052_v17  ;;  %v20165_v7 = vand.u32 4294901760, %v20164_v62 }
0x12b3   :  { %v20178_v38 = vsub.f32 %v35822_v0, %v36771_v4 }
0x12b5   :  { %31847 = vmatpush3.bf16.xpose.msra.mxu1 %v35367_v29 }
0x12b6   :  { %31849 = vmatprep.subr.bf16.mxu1 %v35538_v54 }
0x12bc   :  { %29563 = vmatmul.mubr.f32.vlgmr.msra.gmra.mrb[52].mxu1 %v18212_v45  ;;  %v20061_v45 = vand.u32 4294901760, %v25227_v33 }
0x12bd   :  { %29565 = vmatprep.mubr.f32.mxu1 %v18222_v51  ;;  %31851 = vmatpush3.bf16.xpose.msra.mxu1 %v35538_v54 }
0x12be   :  { %31853 = vmatprep.subr.bf16.mxu1 %v35546_v49  ;;  %v35824_v51 = vsub.f32 %v25227_v33, %v20061_v45  ;;  %v35836_v55 = vpack.c.bf16 %v20061_v45, %v20058_v32 }
0x12c0   :  { %29566 = vmatmul.mubr.f32.gmra.mrb[54].mxu1 %v18232_v19  ;;  %v36770_v19 = vand.u32 4294901760, %v35814_v2  ;;  %v36773_v26 = vand.u32 4294901760, %v35824_v51 }
0x12c1   :  { %29576 = vmatprep.mubr.f32.mxu1 %v35763_v44 }
0x12c2   :  { %v20185_v56 = vsub.f32 %v35824_v51, %v36773_v26 }
0x12c5   :  { %31855 = vmatpush3.bf16.xpose.msra.mxu1 %v35546_v49 }
0x12c6   :  { %31857 = vmatprep.subr.bf16.mxu1 %v35334_v60 }
0x12cc   :  { %29577 = vmatmul.mubr.f32.vlgmr.msra.gmra.mrb[52].mxu1 %v35760_v36 }
0x12cd   :  { %29579 = vmatprep.mubr.f32.mxu1 %v35771_v43  ;;  %31859 = vmatpush3.bf16.xpose.msra.mxu1 %v35334_v60 }
0x12ce   :  { %31861 = vmatprep.subr.bf16.mxu1 %v35367_v29 }
0x12d0   :  { %29580 = vmatmul.mubr.f32.gmra.mrb[54].mxu1 %v35768_v59 }
0x12d1   :  { %29590 = vmatprep.mubr.f32.mxu1 %v35763_v44  ;;  %v20171_v44 = vsub.f32 %v35814_v2, %v36770_v19  ;;  %v20186_v19 = vand.u32 4294901760, %v20185_v56 }
0x12d3   :  { %v20172_v17 = vand.u32 4294901760, %v20171_v44  ;;  %v20179_v44 = vand.u32 4294901760, %v20178_v38 }
0x12d5   :  { %31863 = vmatpush3.bf16.xpose.msra.mxu1 %v35367_v29  ;;  %v31968_v62 = vpack.c.bf16 %v20172_v17, %v20165_v7 }
0x12d6   :  { %31961 = vmatprep.subr.bf16.mxu1 %v35818_v35 }
0x12dc   :  { %29591 = vmatmul.mubr.f32.vlgmr.msra.gmra.mrb[52].mxu1 %v35760_v36 }
0x12dd   :  { %29593 = vmatprep.mubr.f32.mxu1 %v35771_v43  ;;  %31963 = vmatpush3.bf16.msra.mxu1 %v35818_v35  ;;  %v15582_v33 = vpop.xlane.xlu1 %15581 }
0x12de   :  { %v15590_v32 = vsub.f32 %v35717_v50, %v15582_v33  ;;  %v15579_v45 = vpop.xlane.xlu0 %15578  ;;  %31965 = vmatprep.subr.bf16.mxu1 %v35836_v55  ;;  %v31972_v33 = vpack.c.bf16 %v20186_v19, %v20179_v44 }
0x12df   :  { %v15589_v4 = vsub.f32 %v35720_v18, %v15579_v45 }
0x12e0   :  { %v15595_v34 = vmul.f32 1.442695, %v15590_v32  ;;  %29594 = vmatmul.mubr.f32.gmra.mrb[54].mxu1 %v35768_v59  ;;  %v31980_v32 = vpack.c.bf16 %v35824_v51, %v35822_v0 }
0x12e1   :  { %v15593_v26 = vmul.f32 1.442695, %v15589_v4  ;;  %31967 = vmatpush3.bf16.msra.mxu1 %v35836_v55  ;;  %29772 = vmatprep.mubr.f32.mxu1 %v35218_v16  ;;  %v15588_v36 = vpop.xlane.xlu1 %15587 }
0x12e2   :  { %33325 = vpow2.f32 %v15595_v34  ;;  %v15592_v50 = vsub.f32 %v35727_v52, %v15588_v36  ;;  %v15585_v43 = vpop.xlane.xlu0 %15584  ;;  %31969 = vmatprep.subr.bf16.mxu1 %v31968_v62  ;;  %v31976_v52 = vpack.c.bf16 %v35814_v2, %v35812_v41 }
0x12e3   :  { %33327 = vpow2.f32 %v15593_v26  ;;  %v15591_v7 = vsub.f32 %v35730_v30, %v15585_v43 }
0x12e4   :  { %v15599_v17 = vmul.f32 1.442695, %v15592_v50  ;;  %29773 = vmatmul.mubr.f32.vlgmr.msra.gmra.mrb[56].mxu1 %v35220_v24 }
0x12e5   :  { %v15597_v18 = vmul.f32 1.442695, %v15591_v7  ;;  %29775 = vmatprep.mubr.f32.mxu1 %v35232_v6  ;;  %31971 = vmatpush3.bf16.msra.mxu1 %v31968_v62  ;;  %v13666_v59 = vpop.xlane.xlu1 %13665 }
0x12e6   :  { %33329 = vpow2.f32 %v15599_v17  ;;  %v13674_v4 = vsub.f32 %v35733_v20, %v13666_v59  ;;  %v13663_v34 = vpop.xlane.xlu0 %13662  ;;  %31973 = vmatprep.subr.bf16.mxu1 %v31972_v33 }
0x12e7   :  { %33331 = vpow2.f32 %v15597_v18  ;;  %v13673_v19 = vsub.f32 %v35738_v10, %v13663_v34  ;;  %v36827_v34 = vand.u32 4294901760, %v35812_v41 }
0x12e8   :  { %v13679_v30 = vmul.f32 1.442695, %v13674_v4  ;;  %29776 = vmatmul.mubr.f32.gmra.mrb[58].mxu1 %v35235_v23 }
0x12e9   :  { %v13677_v26 = vmul.f32 1.442695, %v13673_v19  ;;  %31975 = vmatpush3.bf16.msra.mxu1 %v31972_v33  ;;  %29786 = vmatprep.mubr.f32.mxu1 %v35176_v58  ;;  %v13672_v38 = vpop.xlane.xlu1 %13671 }
0x12ea   :  { %33333 = vpow2.f32 %v13679_v30  ;;  %v13676_v56 = vsub.f32 %v35743_v63, %v13672_v38  ;;  %v13669_v20 = vpop.xlane.xlu0 %13668  ;;  %31977 = vmatprep.subr.bf16.mxu1 %v31976_v52  ;;  %v21336_v30 = vld [vmem:[#allocation2 + $0xe0] sm:$0xff] }
0x12eb   :  { %33335 = vpow2.f32 %v13677_v26  ;;  %v13675_v45 = vsub.f32 %v35748_v8, %v13669_v20  ;;  %v21337_v26 = vld [vmem:[#allocation2 + $0xe8] sm:$0xff] }
0x12ec   :  { %v35867_v10 = vpop.eup %33325  ;;  %v13683_v62 = vmul.f32 1.442695, %v13676_v56  ;;  %29787 = vmatmul.mubr.f32.vlgmr.msra.gmra.mrb[56].mxu1 %v35172_v12 }
0x12ed   :  { %v35870_v44 = vpop.eup %33327  ;;  %v13681_v36 = vmul.f32 1.442695, %v13675_v45  ;;  %29789 = vmatprep.mubr.f32.mxu1 %v35200_v25  ;;  %31979 = vmatpush3.bf16.msra.mxu1 %v31976_v52  ;;  %v15604_v63 = vsel %vm713_vm1, %v35867_v10, 0.0  ;;  %v36828_v52 = vand.u32 4294901760, %v35814_v2  ;;  %v36829_v2 = vand.u32 4294901760, %v35822_v0 }
0x12ee   :  { %33337 = vpow2.f32 %v13683_v62  ;;  %15605 = vadd.xlane.f32.xlu1 %v15604_v63  ;;  %31981 = vmatprep.subr.bf16.mxu1 %v31980_v32  ;;  %v15601_v8 = vsel %vm713_vm1, %v35870_v44, 0.0  ;;  %v21341_v62 = vand.u32 4294901760, %v21336_v30  ;;  %v21338_v63 = vld [vmem:[#allocation2 + $0xf0] sm:$0xff] }
0x12ef   :  { %33339 = vpow2.f32 %v13681_v36  ;;  %15602 = vadd.xlane.f32.xlu0 %v15601_v8  ;;  %v31992_v19 = vpack.c.bf16 %v36828_v52, %v36827_v34  ;;  %v21344_v36 = vand.u32 4294901760, %v21337_v26  ;;  %v21339_v8 = vld [vmem:[#allocation2 + $0xf8] sm:$0xff] }
0x12f0   :  { %v35877_v50 = vpop.eup %33329  ;;  %29790 = vmatmul.mubr.f32.gmra.mrb[58].mxu1 %v35193_v61 }
0x12f1   :  { %v35880_v43 = vpop.eup %33331  ;;  %31983 = vmatpush3.bf16.msra.mxu1 %v31980_v32  ;;  %29800 = vmatprep.mubr.f32.mxu1 %v35186_v5  ;;  %v15610_v33 = vsel %vm713_vm1, %v35877_v50, 0.0  ;;  %v36830_v32 = vand.u32 4294901760, %v35824_v51 }
0x12f2   :  { %15611 = vadd.xlane.f32.xlu1 %v15610_v33  ;;  %31985 = vmatprep.subr.bf16.mxu1 %v35818_v35  ;;  %v15607_v7 = vsel %vm713_vm1, %v35880_v43, 0.0  ;;  %v21347_v33 = vand.u32 4294901760, %v21338_v63 }
0x12f3   :  { %15608 = vadd.xlane.f32.xlu0 %v15607_v7  ;;  %v31996_v45 = vpack.c.bf16 %v36830_v32, %v36829_v2  ;;  %v21350_v7 = vand.u32 4294901760, %v21339_v8 }
0x12f4   :  { %v35888_v17 = vpop.eup %33333  ;;  %29801 = vmatmul.mubr.f32.vlgmr.msra.gmra.mrb[56].mxu1 %v35181_v40  ;;  %v21465_v34 = vsub.f32 %v21338_v63, %v21347_v33 }
0x12f5   :  { %v35891_v18 = vpop.eup %33335  ;;  %29803 = vmatprep.mubr.f32.mxu1 %v35208_v48  ;;  %31987 = vmatpush3.bf16.msra.mxu1 %v35818_v35  ;;  %v13688_v59 = vsel %vm713_vm1, %v35888_v17, 0.0  ;;  %v21472_v52 = vsub.f32 %v21339_v8, %v21350_v7  ;;  %v32060_v2 = vpack.c.bf16 %v21350_v7, %v21347_v33 }
0x12f6   :  { %13689 = vadd.xlane.f32.xlu1 %v13688_v59  ;;  %31989 = vmatprep.subr.bf16.mxu1 %v35836_v55  ;;  %v13685_v4 = vsel %vm713_vm1, %v35891_v18, 0.0  ;;  %v35921_v59 = vsub.f32 %v21336_v30, %v21341_v62 }
0x12f7   :  { %13686 = vadd.xlane.f32.xlu0 %v13685_v4  ;;  %v21458_v4 = vsub.f32 %v21337_v26, %v21344_v36  ;;  %v32076_v7 = vpack.c.bf16 %v21472_v52, %v21465_v34 }
0x12f8   :  { %v35904_v38 = vpop.eup %33337  ;;  %29804 = vmatmul.mubr.f32.gmra.mrb[58].mxu1 %v35203_v11  ;;  %v21452_v0 = vand.u32 4294901760, %v35921_v59 }
0x12f9   :  { %v35907_v56 = vpop.eup %33339  ;;  %31991 = vmatpush3.bf16.msra.mxu1 %v35836_v55  ;;  %29814 = vmatprep.mubr.f32.mxu1 %v35198_v27  ;;  %v13694_v20 = vsel %vm713_vm1, %v35904_v38, 0.0  ;;  %v21459_v51 = vand.u32 4294901760, %v21458_v4  ;;  %v32072_v33 = vpack.c.bf16 %v21458_v4, %v35921_v59 }
0x12fa   :  { %13695 = vadd.xlane.f32.xlu1 %v13694_v20  ;;  %31993 = vmatprep.subr.bf16.mxu1 %v31992_v19  ;;  %v13691_v41 = vsel %vm713_vm1, %v35907_v56, 0.0  ;;  %v21453_v30 = vsub.f32 %v35921_v59, %v21452_v0  ;;  %v21466_v20 = vand.u32 4294901760, %v21465_v34 }
0x12fb   :  { %13692 = vadd.xlane.f32.xlu0 %v13691_v41  ;;  %v21460_v26 = vsub.f32 %v21458_v4, %v21459_v51  ;;  %v21473_v41 = vand.u32 4294901760, %v21472_v52  ;;  %v32088_v59 = vpack.c.bf16 %v21459_v51, %v21452_v0 }
0x12fc   :  { %29815 = vmatmul.mubr.f32.vlgmr.msra.gmra.mrb[56].mxu1 %v35191_v14  ;;  %v21454_v32 = vand.u32 4294901760, %v21453_v30 }
0x12fd   :  { %29817 = vmatprep.mubr.f32.mxu1 %v35216_v9  ;;  %31995 = vmatpush3.bf16.msra.mxu1 %v31992_v19  ;;  %v35930_v19 = vpack.c.bf16 %v21344_v36, %v21341_v62  ;;  %v21474_v62 = vsub.f32 %v21472_v52, %v21473_v41  ;;  %v32092_v4 = vpack.c.bf16 %v21473_v41, %v21466_v20 }
0x12fe   :  { %31997 = vmatprep.subr.bf16.mxu1 %v31996_v45 }
0x12ff   :  { %v21475_v8 = vand.u32 4294901760, %v21474_v62 }
0x1300   :  { %29818 = vmatmul.mubr.f32.gmra.mrb[58].mxu1 %v35213_v15 }
0x1301   :  { %31999 = vmatpush3.bf16.msra.mxu1 %v31996_v45  ;;  %29828 = vmatprep.mubr.f32.mxu1 %v35176_v58  ;;  %v21467_v45 = vsub.f32 %v21465_v34, %v21466_v20 }
0x1302   :  { %32001 = vmatprep.subr.bf16.mxu1 %v35818_v35 }
0x1303   :  { %v21468_v63 = vand.u32 4294901760, %v21467_v45 }
0x1304   :  { %29829 = vmatmul.mubr.f32.vlgmr.msra.gmra.mrb[56].mxu1 %v35172_v12 }
0x1305   :  { %29831 = vmatprep.mubr.f32.mxu1 %v35200_v25  ;;  %32003 = vmatpush3.bf16.msra.mxu1 %v35818_v35  ;;  %v21461_v35 = vand.u32 4294901760, %v21460_v26 }
0x1306   :  { %32005 = vmatprep.subr.bf16.mxu1 %v35836_v55 }
0x1307   :  { %v32064_v36 = vpack.c.bf16 %v21461_v35, %v21454_v32 }
0x1308   :  { %29832 = vmatmul.mubr.f32.gmra.mrb[58].mxu1 %v35193_v61 }
0x1309   :  { %32007 = vmatpush3.bf16.msra.mxu1 %v35836_v55  ;;  %29842 = vmatprep.mubr.f32.mxu1 %v35176_v58  ;;  %v32068_v55 = vpack.c.bf16 %v21475_v8, %v21468_v63 }
0x130a   :  { %32057 = vmatprep.subr.bf16.mxu1 %v35930_v19 }
0x130c   :  { %29843 = vmatmul.mubr.f32.vlgmr.msra.gmra.mrb[56].mxu1 %v35172_v12 }
0x130d   :  { %29845 = vmatprep.mubr.f32.mxu1 %v35200_v25  ;;  %32059 = vmatpush3.bf16.msra.mxu1 %v35930_v19 }
0x130e   :  { %32061 = vmatprep.subr.bf16.mxu1 %v32060_v2 }
0x1310   :  { %29846 = vmatmul.mubr.f32.gmra.mrb[58].mxu1 %v35193_v61 }
0x1311   :  { %32063 = vmatpush3.bf16.msra.mxu1 %v32060_v2  ;;  %29940 = vmatprep.mubr.f32.mxu1 %v35218_v16 }
0x1312   :  { %32065 = vmatprep.subr.bf16.mxu1 %v32064_v36 }
0x1314   :  { %29941 = vmatmul.mubr.f32.vlgmr.msra.gmra.mrb[60].mxu1 %v35220_v24 }
0x1315   :  { %29943 = vmatprep.mubr.f32.mxu1 %v35232_v6  ;;  %32067 = vmatpush3.bf16.msra.mxu1 %v32064_v36 }
0x1316   :  { %32069 = vmatprep.subr.bf16.mxu1 %v32068_v55 }
0x1318   :  { %29944 = vmatmul.mubr.f32.gmra.mrb[62].mxu1 %v35235_v23 }
0x1319   :  { %32071 = vmatpush3.bf16.msra.mxu1 %v32068_v55  ;;  %29954 = vmatprep.mubr.f32.mxu1 %v35176_v58 }
0x131a   :  { %32073 = vmatprep.subr.bf16.mxu1 %v32072_v33 }
0x131c   :  { %29955 = vmatmul.mubr.f32.vlgmr.msra.gmra.mrb[60].mxu1 %v35172_v12 }
0x131d   :  { %29957 = vmatprep.mubr.f32.mxu1 %v35200_v25  ;;  %32075 = vmatpush3.bf16.msra.mxu1 %v32072_v33 }
0x131e   :  { %32077 = vmatprep.subr.bf16.mxu1 %v32076_v7 }
0x1320   :  { %29958 = vmatmul.mubr.f32.gmra.mrb[62].mxu1 %v35193_v61 }
0x1321   :  { %32079 = vmatpush3.bf16.msra.mxu1 %v32076_v7  ;;  %29968 = vmatprep.mubr.f32.mxu1 %v35186_v5 }
0x1322   :  { %32081 = vmatprep.subr.bf16.mxu1 %v35930_v19 }
0x1324   :  { %29969 = vmatmul.mubr.f32.vlgmr.msra.gmra.mrb[60].mxu1 %v35181_v40 }
0x1325   :  { %29971 = vmatprep.mubr.f32.mxu1 %v35208_v48  ;;  %32083 = vmatpush3.bf16.msra.mxu1 %v35930_v19 }
0x1326   :  { %32085 = vmatprep.subr.bf16.mxu1 %v32060_v2 }
0x1328   :  { %29972 = vmatmul.mubr.f32.gmra.mrb[62].mxu1 %v35203_v11 }
0x1329   :  { %32087 = vmatpush3.bf16.msra.mxu1 %v32060_v2  ;;  %29982 = vmatprep.mubr.f32.mxu1 %v35198_v27 }
0x132a   :  { %32089 = vmatprep.subr.bf16.mxu1 %v32088_v59 }
0x132c   :  { %29983 = vmatmul.mubr.f32.vlgmr.msra.gmra.mrb[60].mxu1 %v35191_v14 }
0x132d   :  { %29985 = vmatprep.mubr.f32.mxu1 %v35216_v9  ;;  %32091 = vmatpush3.bf16.msra.mxu1 %v32088_v59 }
0x132e   :  { %32093 = vmatprep.subr.bf16.mxu1 %v32092_v4 }
0x1330   :  { %29986 = vmatmul.mubr.f32.gmra.mrb[62].mxu1 %v35213_v15 }
0x1331   :  { %32095 = vmatpush3.bf16.msra.mxu1 %v32092_v4  ;;  %29996 = vmatprep.mubr.f32.mxu1 %v35176_v58 }
0x1332   :  { %32097 = vmatprep.subr.bf16.mxu1 %v35930_v19 }
0x1334   :  { %29997 = vmatmul.mubr.f32.vlgmr.msra.gmra.mrb[60].mxu1 %v35172_v12 }
0x1335   :  { %29999 = vmatprep.mubr.f32.mxu1 %v35200_v25  ;;  %32099 = vmatpush3.bf16.msra.mxu1 %v35930_v19 }
0x1336   :  { %32101 = vmatprep.subr.bf16.mxu1 %v32060_v2 }
0x1338   :  { %30000 = vmatmul.mubr.f32.gmra.mrb[62].mxu1 %v35193_v61 }
0x1339   :  { %32103 = vmatpush3.bf16.msra.mxu1 %v32060_v2  ;;  %30010 = vmatprep.mubr.f32.mxu1 %v35176_v58 }
0x133c   :  { %30011 = vmatmul.mubr.f32.vlgmr.msra.gmra.mrb[60].mxu1 %v35172_v12 }
0x133d   :  { %30013 = vmatprep.mubr.f32.mxu1 %v35200_v25 }
0x1340   :  { %30014 = vmatmul.mubr.f32.gmra.mrb[62].mxu1 %v35193_v61 }
0x137b   :  { %v15606_v0 = vpop.xlane.xlu1 %15605 }
0x137c   :  { %33341 = vrcp.f32 %v15606_v0  ;;  %v15603_v51 = vpop.xlane.xlu0 %15602 }
0x137d   :  { %33343 = vrcp.f32 %v15603_v51 }
0x137f   :  { %v15612_v34 = vpop.xlane.xlu1 %15611 }
0x1380   :  { %33345 = vrcp.f32 %v15612_v34  ;;  %v15609_v52 = vpop.xlane.xlu0 %15608 }
0x1381   :  { %33347 = vrcp.f32 %v15609_v52 }
0x1386   :  { %v33342_v19 = vpop.eup %33341 }
0x1387   :  { %v33344_v30 = vpop.eup %33343  ;;  %v15616_v26 = vmul.f32 %v33342_v19, %v35867_v10 }
0x1388   :  { %v15614_v20 = vmul.f32 %v33344_v30, %v35870_v44 }
0x1389   :  { %v16244_v41 = vsel %vm713_vm1, %v15616_v26, 0 }
0x138a   :  { %v33346_v2 = vpop.eup %33345  ;;  %v35974_v32 = vand.u32 4294901760, %v16244_v41  ;;  %v16241_v35 = vsel %vm713_vm1, %v15614_v20, 0 }
0x138b   :  { %v33348_v45 = vpop.eup %33347  ;;  %v15620_v62 = vmul.f32 %v33346_v2, %v35877_v50  ;;  %v35978_v36 = vand.u32 4294901760, %v16241_v35  ;;  %v13687_v2 = vpop.xlane.xlu0 %13686 }
0x138c   :  { %v16332_v63 = vsub.f32 %v16244_v41, %v35974_v32  ;;  %v15618_v8 = vmul.f32 %v33348_v45, %v35880_v43  ;;  %v13690_v45 = vpop.xlane.xlu1 %13689  ;;  %33349 = vrcp.f32 %v13687_v2 }
0x138d   :  { %v16322_v10 = vsub.f32 %v16241_v35, %v35978_v36  ;;  %v16250_v44 = vsel %vm713_vm1, %v15620_v62, 0  ;;  %33351 = vrcp.f32 %v13690_v45 }
0x138e   :  { %v16333_v55 = vand.u32 4294901760, %v16332_v63  ;;  %v16247_v33 = vsel %vm713_vm1, %v15618_v8, 0  ;;  %v35985_v7 = vand.u32 4294901760, %v16250_v44 }
0x138f   :  { %v16323_v59 = vand.u32 4294901760, %v16322_v10  ;;  %v35987_v4 = vand.u32 4294901760, %v16247_v33  ;;  %v13693_v62 = vpop.xlane.xlu0 %13692 }
0x1390   :  { %v16334_v0 = vsub.f32 %v16332_v63, %v16333_v55  ;;  %v35990_v50 = vsub.f32 %v16250_v44, %v35985_v7  ;;  %33353 = vrcp.f32 %v13693_v62 }
0x1391   :  { %v16324_v51 = vsub.f32 %v16322_v10, %v16323_v59  ;;  %v16342_v34 = vsub.f32 %v16247_v33, %v35987_v4 }
0x1392   :  { %v16353_v43 = vand.u32 4294901760, %v35990_v50  ;;  %v16335_v30 = vand.u32 4294901760, %v16334_v0 }
0x1393   :  { %v16325_v52 = vand.u32 4294901760, %v16324_v51  ;;  %v16343_v19 = vand.u32 4294901760, %v16342_v34 }
0x1394   :  { %v16354_v26 = vsub.f32 %v35990_v50, %v16353_v43 }
0x1395   :  { %29268 = vmatprep.mubr.f32.mxu0 %v16325_v52  ;;  %v16344_v20 = vsub.f32 %v16342_v34, %v16343_v19 }
0x1396   :  { %29269 = vmatmul.mubr.f32.vlgmr.msra.gmra.mrb[48].mxu0 %v16335_v30  ;;  %v16355_v35 = vand.u32 4294901760, %v16354_v26 }
0x1397   :  { %31683 = vmatpush3.bf16.msra.mxu0 %v35620_v37  ;;  %v16345_v41 = vand.u32 4294901760, %v16344_v20  ;;  %v13696_v37 = vpop.xlane.xlu1 %13695  ;;  %v36832_v20 = vld [vmem:[#allocation17_spill] sm:$0xff] }
0x1398   :  { %31685 = vmatprep.subr.bf16.mxu0 %v35627_v47  ;;  %33355 = vrcp.f32 %v13696_v37 }
0x1399   :  { %29271 = vmatprep.mubr.f32.mxu0 %v16345_v41 }
0x139a   :  { %29272 = vmatmul.mubr.f32.gmra.mrb[50].mxu0 %v16355_v35 }
0x139b   :  { %31687 = vmatpush3.bf16.msra.mxu0 %v35627_v47  ;;  %29282 = vmatprep.mubr.f32.mxu0 %v35978_v36  ;;  %v33350_v47 = vpop.eup %33349 }
0x139c   :  { %31689 = vmatprep.subr.bf16.mxu0 %v35602_v1  ;;  %v13698_v8 = vmul.f32 %v33350_v47, %v35891_v18 }
0x139e   :  { %29283 = vmatmul.mubr.f32.vlgmr.msra.gmra.mrb[48].mxu0 %v35974_v32  ;;  %v16867_v33 = vsel %vm713_vm1, %v13698_v8, 0 }
0x139f   :  { %31691 = vmatpush3.bf16.msra.mxu0 %v35602_v1  ;;  %29285 = vmatprep.mubr.f32.mxu0 %v35987_v4  ;;  %v33352_v1 = vpop.eup %33351 }
0x13a0   :  { %31693 = vmatprep.subr.bf16.mxu0 %v35617_v3  ;;  %v33354_v44 = vpop.eup %33353 }
0x13a2   :  { %29286 = vmatmul.mubr.f32.gmra.mrb[50].mxu0 %v35985_v7 }
0x13a3   :  { %31695 = vmatpush3.bf16.msra.mxu0 %v35617_v3  ;;  %29296 = vmatprep.mubr.f32.mxu0 %v16322_v10  ;;  %v13700_v3 = vmul.f32 %v33352_v1, %v35888_v17  ;;  %v13702_v10 = vmul.f32 %v33354_v44, %v35907_v56  ;;  %v36026_v56 = vand.u32 4294901760, %v16867_v33 }
0x13a4   :  { %31697 = vmatprep.subr.bf16.mxu0 %v35594_v42 }
0x13a6   :  { %29297 = vmatmul.mubr.f32.vlgmr.msra.gmra.mrb[48].mxu0 %v16332_v63  ;;  %v33356_v63 = vpop.eup %33355 }
0x13a7   :  { %31699 = vmatpush3.bf16.msra.mxu0 %v35594_v42  ;;  %29299 = vmatprep.mubr.f32.mxu0 %v16342_v34  ;;  %v13704_v17 = vmul.f32 %v33356_v63, %v35904_v38  ;;  %v36831_v38 = vld [vmem:[#allocation15_spill] sm:$0xff] }
0x13a8   :  { %31701 = vmatprep.subr.bf16.mxu0 %v35605_v57 }
0x13a9   :  { %v16876_v2 = vsel %vm713_vm1, %v13704_v17, 0 }
0x13aa   :  { %29300 = vmatmul.mubr.f32.gmra.mrb[50].mxu0 %v35990_v50  ;;  %v16870_v50 = vsel %vm713_vm1, %v13700_v3, 0  ;;  %v36058_v37 = vand.u32 4294901760, %v16876_v2 }
0x13ab   :  { %31703 = vmatpush3.bf16.msra.mxu0 %v35605_v57  ;;  %29310 = vmatprep.mubr.f32.mxu0 %v16323_v59 }
0x13ac   :  { %31705 = vmatprep.subr.bf16.mxu0 %v35608_v21  ;;  %v16978_v44 = vsub.f32 %v16876_v2, %v36058_v37 }
0x13ae   :  { %29311 = vmatmul.mubr.f32.vlgmr.msra.gmra.mrb[48].mxu0 %v16333_v55  ;;  %v16873_v55 = vsel %vm713_vm1, %v13702_v10, 0  ;;  %v36834_v10 = vld [vmem:[#allocation23_spill] sm:$0xff] }
0x13af   :  { %31707 = vmatpush3.bf16.msra.mxu0 %v35608_v21  ;;  %v29592_v0 = vpop.f32.mrb[52].mxu1  ;;  %29313 = vmatprep.mubr.f32.mxu0 %v16343_v19  ;;  %v36034_v19 = vand.u32 4294901760, %v16870_v50  ;;  %v36047_v41 = vand.u32 4294901760, %v16873_v55 }
0x13b0   :  { %v36018_v18 = vadd.f32 %v29592_v0, %v34025_v22  ;;  %31709 = vmatprep.subr.bf16.mxu0 %v35622_v39  ;;  %v18723_v59 = vpop.f32.mrb[53].mxu1 }
0x13b1   :  { %v36024_v51 = vadd.f32 %v18723_v59, %v34028_v28  ;;  %v16958_v62 = vsub.f32 %v16870_v50, %v36034_v19  ;;  %v16968_v1 = vsub.f32 %v16873_v55, %v36047_v41  ;;  %v36835_v59 = vld [vmem:[#allocation19_spill] sm:$0xff]  ;;  %v36838_v55 = vld [vmem:[#allocation20_spill] sm:$0xff] }
0x13b2   :  { %v18748_v21 = vsel %vm713_vm1, %v36018_v18, -inf  ;;  %29314 = vmatmul.mubr.f32.gmra.mrb[50].mxu0 %v16353_v43 }
0x13b3   :  { %18749 = vmax.xlane.f32.xlu1 %v18748_v21  ;;  %31711 = vmatpush3.bf16.msra.mxu0 %v35622_v39  ;;  %v29595_v34 = vpop.f32.mrb[54].mxu1  ;;  %v18745_v52 = vsel %vm713_vm1, %v36024_v51, -inf  ;;  %v36045_v39 = vsub.f32 %v16867_v33, %v36026_v56  ;;  %v16959_v8 = vand.u32 4294901760, %v16958_v62  ;;  %v16969_v63 = vand.u32 4294901760, %v16968_v1 }
0x13b4   :  { %v36037_v30 = vadd.f32 %v29595_v34, %v36831_v38  ;;  %v18735_v26 = vpop.f32.mrb[55].mxu1  ;;  %18746 = vmax.xlane.f32.xlu0 %v18745_v52  ;;  %29324 = vmatprep.mubr.f32.mxu0 %v35978_v36  ;;  %v18790_v34 = vld [vmem:[#allocation2 + $0xc0] sm:$0xff]  ;;  %v18791_v52 = vld [vmem:[#allocation2 + $0xc8] sm:$0xff] }
0x13b5   :  { %v36041_v43 = vadd.f32 %v18735_v26, %v36832_v20  ;;  %31713 = vmatprep.subr.bf16.mxu0 %v35594_v42  ;;  %v16949_v47 = vand.u32 4294901760, %v36045_v39  ;;  %v16960_v33 = vsub.f32 %v16958_v62, %v16959_v8  ;;  %v36839_v26 = vld [vmem:[#allocation22_spill] sm:$0xff]  ;;  %v18795_v2 = vand.u32 4294901760, %v18790_v34 }
0x13b6   :  { %v18754_v35 = vsel %vm713_vm1, %v36037_v30, -inf  ;;  %29325 = vmatmul.mubr.f32.vlgmr.msra.gmra.mrb[48].mxu0 %v35974_v32 }
0x13b7   :  { %18755 = vmax.xlane.f32.xlu1 %v18754_v35  ;;  %31715 = vmatpush3.bf16.msra.mxu0 %v35594_v42  ;;  %v18751_v45 = vsel %vm713_vm1, %v36041_v43, -inf  ;;  %v36833_v42 = vld [vmem:[#allocation21_spill] sm:$0xff]  ;;  %v16950_v3 = vsub.f32 %v36045_v39, %v16949_v47  ;;  %v16961_v50 = vand.u32 4294901760, %v16960_v33  ;;  %v18798_v35 = vand.u32 4294901760, %v18791_v52 }
0x13b8   :  { %18752 = vmax.xlane.f32.xlu0 %v18751_v45  ;;  %29327 = vmatprep.mubr.f32.mxu0 %v35987_v4  ;;  %v18792_v45 = vld [vmem:[#allocation2 + $0xd0] sm:$0xff] }
0x13b9   :  { %31717 = vmatprep.subr.bf16.mxu0 %v35605_v57  ;;  %v16951_v0 = vand.u32 4294901760, %v16950_v3 }
0x13ba   :  { %29328 = vmatmul.mubr.f32.gmra.mrb[50].mxu0 %v35985_v7 }
0x13bb   :  { %31719 = vmatpush3.bf16.msra.mxu0 %v35605_v57  ;;  %29338 = vmatprep.mubr.f32.mxu0 %v35978_v36  ;;  %v16979_v57 = vand.u32 4294901760, %v16978_v44  ;;  %v16970_v36 = vsub.f32 %v16968_v1, %v16969_v63 }
0x13bc   :  { %31721 = vmatprep.subr.bf16.mxu0 %v36833_v42 }
0x13bd   :  { %v16980_v17 = vsub.f32 %v16978_v44, %v16979_v57 }
0x13be   :  { %29339 = vmatmul.mubr.f32.vlgmr.msra.gmra.mrb[48].mxu0 %v35974_v32  ;;  %v16971_v32 = vand.u32 4294901760, %v16970_v36 }
0x13bf   :  { %31723 = vmatpush3.bf16.msra.mxu0 %v36833_v42  ;;  %29341 = vmatprep.mubr.f32.mxu0 %v35987_v4  ;;  %v36836_v4 = vld [vmem:[#allocation9_spill] sm:$0xff]  ;;  %v16981_v21 = vand.u32 4294901760, %v16980_v17 }
0x13c0   :  { %31725 = vmatprep.subr.bf16.mxu0 %v36834_v10 }
0x13c2   :  { %29342 = vmatmul.mubr.f32.gmra.mrb[50].mxu0 %v35985_v7  ;;  %v36837_v7 = vld [vmem:[#allocation16_spill] sm:$0xff] }
0x13c3   :  { %31727 = vmatpush3.bf16.msra.mxu0 %v36834_v10  ;;  %29352 = vmatprep.mubr.f32.mxu0 %v16951_v0  ;;  %v36099_v0 = vsub.f32 %v18790_v34, %v18795_v2 }
0x13c4   :  { %31729 = vmatprep.subr.bf16.mxu0 %v36835_v59 }
0x13c6   :  { %29353 = vmatmul.mubr.f32.vlgmr.msra.gmra.mrb[48].mxu0 %v16961_v50 }
0x13c7   :  { %31731 = vmatpush3.bf16.msra.mxu0 %v36835_v59  ;;  %29355 = vmatprep.mubr.f32.mxu0 %v16971_v32 }
0x13c8   :  { %31733 = vmatprep.subr.bf16.mxu0 %v36836_v4 }
0x13ca   :  { %29356 = vmatmul.mubr.f32.gmra.mrb[50].mxu0 %v16981_v21 }
0x13cb   :  { %31735 = vmatpush3.bf16.msra.mxu0 %v36836_v4  ;;  %29366 = vmatprep.mubr.f32.mxu0 %v36026_v56 }
0x13cc   :  { %31737 = vmatprep.subr.bf16.mxu0 %v36837_v7 }
0x13ce   :  { %29367 = vmatmul.mubr.f32.vlgmr.msra.gmra.mrb[48].mxu0 %v36034_v19 }
0x13cf   :  { %31739 = vmatpush3.bf16.msra.mxu0 %v36837_v7  ;;  %29369 = vmatprep.mubr.f32.mxu0 %v36047_v41 }
0x13d0   :  { %31741 = vmatprep.subr.bf16.mxu0 %v36838_v55 }
0x13d2   :  { %29370 = vmatmul.mubr.f32.gmra.mrb[50].mxu0 %v36058_v37 }
0x13d3   :  { %31743 = vmatpush3.bf16.msra.mxu0 %v36838_v55  ;;  %29380 = vmatprep.mubr.f32.mxu0 %v36045_v39  ;;  %v18793_v39 = vld [vmem:[#allocation2 + $0xd8] sm:$0xff] }
0x13d4   :  { %31745 = vmatprep.subr.bf16.mxu0 %v36833_v42  ;;  %v18804_v33 = vand.u32 4294901760, %v18793_v39 }
0x13d6   :  { %29381 = vmatmul.mubr.f32.vlgmr.msra.gmra.mrb[48].mxu0 %v16958_v62  ;;  %v18926_v17 = vsub.f32 %v18793_v39, %v18804_v33 }
0x13d7   :  { %31747 = vmatpush3.bf16.msra.mxu0 %v36833_v42  ;;  %29383 = vmatprep.mubr.f32.mxu0 %v16968_v1  ;;  %v36840_v1 = vld [vmem:[#allocation8_spill] sm:$0xff] }
0x13d8   :  { %31749 = vmatprep.subr.bf16.mxu0 %v36834_v10  ;;  %v18927_v7 = vand.u32 4294901760, %v18926_v17 }
0x13da   :  { %29384 = vmatmul.mubr.f32.gmra.mrb[50].mxu0 %v16978_v44  ;;  %v18801_v44 = vand.u32 4294901760, %v18792_v45 }
0x13db   :  { %31751 = vmatpush3.bf16.msra.mxu0 %v36834_v10  ;;  %29394 = vmatprep.mubr.f32.mxu0 %v16949_v47  ;;  %v36101_v47 = vsub.f32 %v18791_v52, %v18798_v35 }
0x13dc   :  { %31753 = vmatprep.subr.bf16.mxu0 %v36839_v26  ;;  %v18919_v50 = vsub.f32 %v18792_v45, %v18801_v44  ;;  %v36123_v55 = vpack.c.bf16 %v18804_v33, %v18801_v44 }
0x13dd   :  { %v18913_v59 = vand.u32 4294901760, %v36101_v47 }
0x13de   :  { %29395 = vmatmul.mubr.f32.vlgmr.msra.gmra.mrb[48].mxu0 %v16959_v8  ;;  %v18920_v21 = vand.u32 4294901760, %v18919_v50 }
0x13df   :  { %31755 = vmatpush3.bf16.msra.mxu0 %v36839_v26  ;;  %v36094_v62 = vpop.f32.mrb[56].mxu1  ;;  %29397 = vmatprep.mubr.f32.mxu0 %v16969_v63  ;;  %v18906_v63 = vand.u32 4294901760, %v36099_v0  ;;  %v18914_v4 = vsub.f32 %v36101_v47, %v18913_v59  ;;  %v18928_v26 = vsub.f32 %v18926_v17, %v18927_v7 }
0x13e0   :  { %31757 = vmatprep.subr.bf16.mxu0 %v36840_v1  ;;  %v36097_v3 = vpop.f32.mrb[57].mxu1  ;;  %v18921_v52 = vsub.f32 %v18919_v50, %v18920_v21 }
0x13e1   :  { %v18907_v32 = vsub.f32 %v36099_v0, %v18906_v63  ;;  %v18915_v34 = vand.u32 4294901760, %v18914_v4 }
0x13e2   :  { %29398 = vmatmul.mubr.f32.gmra.mrb[50].mxu0 %v16979_v57  ;;  %v36115_v57 = vpack.c.bf16 %v18798_v35, %v18795_v2  ;;  %v18929_v35 = vand.u32 4294901760, %v18928_v26 }
0x13e3   :  { %31759 = vmatpush3.bf16.msra.mxu0 %v36840_v1  ;;  %v36104_v36 = vpop.f32.mrb[58].mxu1  ;;  %29408 = vmatprep.mubr.f32.mxu0 %v36026_v56 }
0x13e4   :  { %31761 = vmatprep.subr.bf16.mxu0 %v36833_v42  ;;  %v36108_v8 = vpop.f32.mrb[59].mxu1 }
0x13e6   :  { %29409 = vmatmul.mubr.f32.vlgmr.msra.gmra.mrb[48].mxu0 %v36034_v19 }
0x13e7   :  { %31763 = vmatpush3.bf16.msra.mxu0 %v36833_v42  ;;  %29411 = vmatprep.mubr.f32.mxu0 %v36047_v41  ;;  %v18908_v42 = vand.u32 4294901760, %v18907_v32 }
0x13e8   :  { %31765 = vmatprep.subr.bf16.mxu0 %v36834_v10 }
0x13e9   :  { %v31872_v2 = vpack.c.bf16 %v18915_v34, %v18908_v42 }
0x13ea   :  { %29412 = vmatmul.mubr.f32.gmra.mrb[50].mxu0 %v36058_v37 }
0x13eb   :  { %31767 = vmatpush3.bf16.msra.mxu0 %v36834_v10  ;;  %29422 = vmatprep.mubr.f32.mxu0 %v36026_v56  ;;  %v18922_v10 = vand.u32 4294901760, %v18921_v52 }
0x13ec   :  { %31865 = vmatprep.subr.bf16.mxu0 %v36115_v57 }
0x13ed   :  { %v31876_v56 = vpack.c.bf16 %v18929_v35, %v18922_v10 }
0x13ee   :  { %29423 = vmatmul.mubr.f32.vlgmr.msra.gmra.mrb[48].mxu0 %v36034_v19  ;;  %v31880_v19 = vpack.c.bf16 %v36101_v47, %v36099_v0 }
0x13ef   :  { %29425 = vmatprep.mubr.f32.mxu0 %v36047_v41  ;;  %31867 = vmatpush3.bf16.msra.mxu0 %v36115_v57  ;;  %v31884_v41 = vpack.c.bf16 %v18926_v17, %v18919_v50 }
0x13f0   :  { %31869 = vmatprep.subr.bf16.mxu0 %v36123_v55 }
0x13f2   :  { %29426 = vmatmul.mubr.f32.gmra.mrb[50].mxu0 %v36058_v37 }
0x13f3   :  { %31871 = vmatpush3.bf16.msra.mxu0 %v36123_v55  ;;  %29604 = vmatprep.mubr.f32.mxu0 %v35218_v16  ;;  %v31896_v16 = vpack.c.bf16 %v18913_v59, %v18906_v63 }
0x13f4   :  { %31873 = vmatprep.subr.bf16.mxu0 %v31872_v2 }
0x13f6   :  { %29605 = vmatmul.mubr.f32.vlgmr.msra.gmra.mrb[52].mxu0 %v35220_v24  ;;  %v31900_v24 = vpack.c.bf16 %v18927_v7, %v18920_v21 }
0x13f7   :  { %29607 = vmatprep.mubr.f32.mxu0 %v35232_v6  ;;  %31875 = vmatpush3.bf16.msra.mxu0 %v31872_v2 }
0x13f8   :  { %31877 = vmatprep.subr.bf16.mxu0 %v31876_v56 }
0x13fa   :  { %29608 = vmatmul.mubr.f32.gmra.mrb[54].mxu0 %v35235_v23 }
0x13fb   :  { %31879 = vmatpush3.bf16.msra.mxu0 %v31876_v56  ;;  %29618 = vmatprep.mubr.f32.mxu0 %v35176_v58 }
0x13fc   :  { %31881 = vmatprep.subr.bf16.mxu0 %v31880_v19 }
0x13fe   :  { %29619 = vmatmul.mubr.f32.vlgmr.msra.gmra.mrb[52].mxu0 %v35172_v12 }
0x13ff   :  { %29621 = vmatprep.mubr.f32.mxu0 %v35200_v25  ;;  %31883 = vmatpush3.bf16.msra.mxu0 %v31880_v19 }
0x1400   :  { %31885 = vmatprep.subr.bf16.mxu0 %v31884_v41 }
0x1402   :  { %29622 = vmatmul.mubr.f32.gmra.mrb[54].mxu0 %v35193_v61 }
0x1403   :  { %31887 = vmatpush3.bf16.msra.mxu0 %v31884_v41  ;;  %29632 = vmatprep.mubr.f32.mxu0 %v35186_v5 }
0x1404   :  { %31889 = vmatprep.subr.bf16.mxu0 %v36115_v57 }
0x1406   :  { %29633 = vmatmul.mubr.f32.vlgmr.msra.gmra.mrb[52].mxu0 %v35181_v40 }
0x1407   :  { %29635 = vmatprep.mubr.f32.mxu0 %v35208_v48  ;;  %31891 = vmatpush3.bf16.msra.mxu0 %v36115_v57 }
0x1408   :  { %31893 = vmatprep.subr.bf16.mxu0 %v36123_v55 }
0x140a   :  { %29636 = vmatmul.mubr.f32.gmra.mrb[54].mxu0 %v35203_v11 }
0x140b   :  { %31895 = vmatpush3.bf16.msra.mxu0 %v36123_v55  ;;  %29646 = vmatprep.mubr.f32.mxu0 %v35198_v27 }
0x140c   :  { %31897 = vmatprep.subr.bf16.mxu0 %v31896_v16 }
0x140e   :  { %29647 = vmatmul.mubr.f32.vlgmr.msra.gmra.mrb[52].mxu0 %v35191_v14 }
0x140f   :  { %v30012_v5 = vpop.f32.mrb[60].mxu1  ;;  %29649 = vmatprep.mubr.f32.mxu0 %v35216_v9  ;;  %31899 = vmatpush3.bf16.msra.mxu0 %v31896_v16 }
0x1410   :  { %v21970_v40 = vand.u32 4294901760, %v30012_v5  ;;  %v21932_v48 = vpop.f32.mrb[61].mxu1  ;;  %31901 = vmatprep.subr.bf16.mxu0 %v31900_v24 }
0x1411   :  { %v21967_v6 = vand.u32 4294901760, %v21932_v48 }
0x1412   :  { %v22084_v23 = vsub.f32 %v30012_v5, %v21970_v40  ;;  %29650 = vmatmul.mubr.f32.gmra.mrb[54].mxu0 %v35213_v15 }
0x1413   :  { %v36154_v11 = vpack.c.bf16 %v21970_v40, %v21967_v6  ;;  %v22077_v37 = vsub.f32 %v21932_v48, %v21967_v6  ;;  %v30015_v45 = vpop.f32.mrb[62].mxu1  ;;  %31903 = vmatpush3.bf16.msra.mxu0 %v31900_v24  ;;  %29660 = vmatprep.mubr.f32.mxu0 %v35176_v58 }
0x1414   :  { %v22085_v27 = vand.u32 4294901760, %v22084_v23  ;;  %v21976_v14 = vand.u32 4294901760, %v30015_v45  ;;  %v21944_v39 = vpop.f32.mrb[63].mxu1  ;;  %31905 = vmatprep.subr.bf16.mxu0 %v36115_v57 }
0x1415   :  { %v22078_v9 = vand.u32 4294901760, %v22077_v37  ;;  %v21973_v1 = vand.u32 4294901760, %v21944_v39  ;;  %v36158_v44 = vpack.c.bf16 %v22084_v23, %v22077_v37 }
0x1416   :  { %v22086_v33 = vsub.f32 %v22084_v23, %v22085_v27  ;;  %v22098_v0 = vsub.f32 %v30015_v45, %v21976_v14  ;;  %29661 = vmatmul.mubr.f32.vlgmr.msra.gmra.mrb[52].mxu0 %v35172_v12 }
0x1417   :  { %v22079_v15 = vsub.f32 %v22077_v37, %v22078_v9  ;;  %v36161_v47 = vpack.c.bf16 %v21976_v14, %v21973_v1  ;;  %v22091_v63 = vsub.f32 %v21944_v39, %v21973_v1  ;;  %29663 = vmatprep.mubr.f32.mxu0 %v35200_v25  ;;  %31907 = vmatpush3.bf16.msra.mxu0 %v36115_v57 }
0x1418   :  { %v22099_v59 = vand.u32 4294901760, %v22098_v0  ;;  %31909 = vmatprep.subr.bf16.mxu0 %v36123_v55  ;;  %v22087_v50 = vand.u32 4294901760, %v22086_v33  ;;  %v36166_v17 = vpack.c.bf16 %v22085_v27, %v22078_v9 }
0x1419   :  { %v22092_v32 = vand.u32 4294901760, %v22091_v63  ;;  %v22080_v4 = vand.u32 4294901760, %v22079_v15  ;;  %v36168_v21 = vpack.c.bf16 %v22098_v0, %v22091_v63 }
0x141a   :  { %v22100_v7 = vsub.f32 %v22098_v0, %v22099_v59  ;;  %29664 = vmatmul.mubr.f32.gmra.mrb[54].mxu0 %v35193_v61 }
0x141b   :  { %v22093_v42 = vsub.f32 %v22091_v63, %v22092_v32  ;;  %31911 = vmatpush3.bf16.msra.mxu0 %v36123_v55  ;;  %29674 = vmatprep.mubr.f32.mxu0 %v35176_v58  ;;  %v36173_v34 = vpack.c.bf16 %v22087_v50, %v22080_v4  ;;  %v36175_v57 = vpack.c.bf16 %v22099_v59, %v22092_v32 }
0x141c   :  { %v22101_v52 = vand.u32 4294901760, %v22100_v7 }
0x141d   :  { %v22094_v26 = vand.u32 4294901760, %v22093_v42 }
0x141e   :  { %29675 = vmatmul.mubr.f32.vlgmr.msra.gmra.mrb[52].mxu0 %v35172_v12 }
0x141f   :  { %29677 = vmatprep.mubr.f32.mxu0 %v35200_v25  ;;  %v36179_v2 = vpack.c.bf16 %v22101_v52, %v22094_v26 }
0x1422   :  { %29678 = vmatmul.mubr.f32.gmra.mrb[54].mxu0 %v35193_v61 }
0x1440   :  { %v18750_v10 = vpop.xlane.xlu1 %18749 }
0x1441   :  { %v18758_v35 = vsub.f32 %v36018_v18, %v18750_v10  ;;  %v18747_v55 = vpop.xlane.xlu0 %18746 }
0x1442   :  { %v18757_v58 = vsub.f32 %v36024_v51, %v18747_v55 }
0x1443   :  { %v18763_v56 = vmul.f32 1.442695, %v18758_v35 }
0x1444   :  { %v18761_v19 = vmul.f32 1.442695, %v18757_v58  ;;  %v18756_v41 = vpop.xlane.xlu1 %18755 }
0x1445   :  { %33357 = vpow2.f32 %v18763_v56  ;;  %v18760_v16 = vsub.f32 %v36037_v30, %v18756_v41  ;;  %v18753_v24 = vpop.xlane.xlu0 %18752 }
0x1446   :  { %33359 = vpow2.f32 %v18761_v19  ;;  %v18759_v12 = vsub.f32 %v36041_v43, %v18753_v24 }
0x1447   :  { %v18767_v25 = vmul.f32 1.442695, %v18760_v16 }
0x1448   :  { %v18765_v5 = vmul.f32 1.442695, %v18759_v12 }
0x1449   :  { %33361 = vpow2.f32 %v18767_v25 }
0x144a   :  { %33363 = vpow2.f32 %v18765_v5 }
0x144f   :  { %v33358_v61 = vpop.eup %33357 }
0x1450   :  { %v33360_v40 = vpop.eup %33359  ;;  %v18772_v18 = vsel %vm713_vm1, %v33358_v61, 0.0 }
0x1451   :  { %18773 = vadd.xlane.f32.xlu1 %v18772_v18  ;;  %v18769_v51 = vsel %vm713_vm1, %v33360_v40, 0.0 }
0x1452   :  { %18770 = vadd.xlane.f32.xlu0 %v18769_v51 }
0x1453   :  { %v33362_v48 = vpop.eup %33361 }
0x1454   :  { %v33364_v6 = vpop.eup %33363  ;;  %v18778_v30 = vsel %vm713_vm1, %v33362_v48, 0.0 }
0x1455   :  { %18779 = vadd.xlane.f32.xlu1 %v18778_v30  ;;  %v18775_v23 = vsel %vm713_vm1, %v33364_v6, 0.0 }
0x1456   :  { %18776 = vadd.xlane.f32.xlu0 %v18775_v23 }
0x14de   :  { %v18774_v43 = vpop.xlane.xlu1 %18773 }
0x14df   :  { %33365 = vrcp.f32 %v18774_v43  ;;  %v18771_v37 = vpop.xlane.xlu0 %18770 }
0x14e0   :  { %33367 = vrcp.f32 %v18771_v37 }
0x14e2   :  { %v18780_v45 = vpop.xlane.xlu1 %18779 }
0x14e3   :  { %33369 = vrcp.f32 %v18780_v45  ;;  %v18777_v27 = vpop.xlane.xlu0 %18776 }
0x14e4   :  { %33371 = vrcp.f32 %v18777_v27 }
0x14e9   :  { %v33366_v14 = vpop.eup %33365 }
0x14ea   :  { %v33368_v39 = vpop.eup %33367  ;;  %v18784_v9 = vmul.f32 %v33366_v14, %v33358_v61 }
0x14eb   :  { %v18782_v1 = vmul.f32 %v33368_v39, %v33360_v40 }
0x14ec   :  { %v19412_v33 = vsel %vm713_vm1, %v18784_v9, 0 }
0x14ed   :  { %v33370_v0 = vpop.eup %33369  ;;  %v36191_v15 = vand.u32 4294901760, %v19412_v33  ;;  %v19409_v63 = vsel %vm713_vm1, %v18782_v1, 0 }
0x14ee   :  { %v33372_v59 = vpop.eup %33371  ;;  %v18788_v50 = vmul.f32 %v33370_v0, %v33362_v48  ;;  %v36194_v32 = vand.u32 4294901760, %v19409_v63 }
0x14ef   :  { %v18786_v4 = vmul.f32 %v33372_v59, %v33364_v6  ;;  %v36197_v7 = vsub.f32 %v19412_v33, %v36191_v15 }
0x14f0   :  { %v36200_v42 = vsub.f32 %v19409_v63, %v36194_v32  ;;  %v19418_v52 = vsel %vm713_vm1, %v18788_v50, 0 }
0x14f1   :  { %v29676_v26 = vpop.f32.mrb[52].mxu0  ;;  %v19415_v10 = vsel %vm713_vm1, %v18786_v4, 0  ;;  %v36204_v35 = vand.u32 4294901760, %v19418_v52  ;;  %v19501_v12 = vand.u32 4294901760, %v36197_v7 }
0x14f2   :  { %v19424_v55 = vand.u32 4294901760, %v29676_v26  ;;  %v19386_v58 = vpop.f32.mrb[53].mxu0  ;;  %v19491_v56 = vand.u32 4294901760, %v36200_v42  ;;  %v36207_v19 = vand.u32 4294901760, %v19415_v10 }
0x14f3   :  { %v19421_v41 = vand.u32 4294901760, %v19386_v58  ;;  %v36219_v18 = vsub.f32 %v19418_v52, %v36204_v35  ;;  %v19502_v39 = vsub.f32 %v36197_v7, %v19501_v12 }
0x14f4   :  { %v19538_v16 = vsub.f32 %v29676_v26, %v19424_v55  ;;  %v19492_v24 = vsub.f32 %v36200_v42, %v19491_v56  ;;  %v36214_v25 = vsub.f32 %v19415_v10, %v36207_v19 }
0x14f5   :  { %v36216_v5 = vpack.c.bf16 %v19424_v55, %v19421_v41  ;;  %v19531_v61 = vsub.f32 %v19386_v58, %v19421_v41  ;;  %v29679_v40 = vpop.f32.mrb[54].mxu0  ;;  %v19521_v0 = vand.u32 4294901760, %v36219_v18  ;;  %v19503_v58 = vand.u32 4294901760, %v19502_v39 }
0x14f6   :  { %v19539_v51 = vand.u32 4294901760, %v19538_v16  ;;  %v19430_v48 = vand.u32 4294901760, %v29679_v40  ;;  %v19398_v6 = vpop.f32.mrb[55].mxu0  ;;  %v19493_v30 = vand.u32 4294901760, %v19492_v24  ;;  %v19511_v23 = vand.u32 4294901760, %v36214_v25 }
0x14f7   :  { %v19532_v43 = vand.u32 4294901760, %v19531_v61  ;;  %v19427_v37 = vand.u32 4294901760, %v19398_v6  ;;  %31913 = vmatprep.subr.bf16.mxu0 %v36216_v5  ;;  %v31928_v45 = vpack.c.bf16 %v19538_v16, %v19531_v61  ;;  %v19522_v24 = vsub.f32 %v36219_v18, %v19521_v0 }
0x14f8   :  { %v19540_v27 = vsub.f32 %v19538_v16, %v19539_v51  ;;  %v19552_v14 = vsub.f32 %v29679_v40, %v19430_v48  ;;  %29688 = vmatprep.mubr.f32.mxu0 %v19493_v30  ;;  %31915 = vmatpush3.bf16.msra.mxu0 %v36216_v5  ;;  %v19512_v50 = vsub.f32 %v36214_v25, %v19511_v23 }
0x14f9   :  { %v19533_v9 = vsub.f32 %v19531_v61, %v19532_v43  ;;  %v36227_v1 = vpack.c.bf16 %v19430_v48, %v19427_v37  ;;  %v19545_v33 = vsub.f32 %v19398_v6, %v19427_v37  ;;  %v31944_v4 = vpack.c.bf16 %v19539_v51, %v19532_v43  ;;  %v25229_v43 = vld [vmem:[%s36719_s4 + $0x7] ss:$0 sm:$0xff]  ;;  %s33435_s4 = scalar_lea.vmem %s25167_s23, 128 }
0x14fa   :  { %v19553_v63 = vand.u32 4294901760, %v19552_v14  ;;  %v19541_v59 = vand.u32 4294901760, %v19540_v27  ;;  %v19513_v40 = vand.u32 4294901760, %v19512_v50  ;;  %v19523_v51 = vand.u32 4294901760, %v19522_v24  ;;  %p33436_p8 = scmp.ne.s32.totalorder %s25167_s23, %s33435_s4  ;;  %p33441_p10 = scmp.lt.s32.totalorder %s33435_s4, %s33435_s4 }
0x14fb   :  { %v19546_v52 = vand.u32 4294901760, %v19545_v33  ;;  %31917 = vmatprep.subr.bf16.mxu0 %v36227_v1  ;;  %v19534_v26 = vand.u32 4294901760, %v19533_v9  ;;  %v31932_v10 = vpack.c.bf16 %v19552_v14, %v19545_v33  ;;  %v32445_v37 = vadd.f32 %v25229_v43, %v36097_v3 }
0x14fc   :  { %v19554_v55 = vsub.f32 %v19552_v14, %v19553_v63  ;;  %31919 = vmatpush3.bf16.msra.mxu0 %v36227_v1  ;;  %p33442_p11 = por %p33441_p10, %p33440_p9 }
0x14fd   :  { %v19547_v41 = vsub.f32 %v19545_v33, %v19546_v52  ;;  %v31920_v16 = vpack.c.bf16 %v19541_v59, %v19534_v26  ;;  %v31948_v61 = vpack.c.bf16 %v19553_v63, %v19546_v52 }
0x14fe   :  { %v19555_v48 = vand.u32 4294901760, %v19554_v55  ;;  %p33443_p12 = pnand %p33442_p11, %p33436_p8 }
0x14ff   :  { %29689 = vmatmul.mubr.f32.vlgmr.msra.gmra.mrb[48].mxu0 %v19503_v58  ;;  %31921 = vmatprep.subr.bf16.mxu0 %v31920_v16  ;;  %v19548_v6 = vand.u32 4294901760, %v19547_v41 }
0x1500   :  { %29691 = vmatprep.mubr.f32.mxu0 %v19513_v40  ;;  %31923 = vmatpush3.bf16.msra.mxu0 %v31920_v16 }
0x1501   :  { %v31924_v30 = vpack.c.bf16 %v19555_v48, %v19548_v6 }
0x1503   :  { %29692 = vmatmul.mubr.f32.gmra.mrb[50].mxu0 %v19523_v51  ;;  %31925 = vmatprep.subr.bf16.mxu0 %v31924_v30 }
0x1504   :  { %31927 = vmatpush3.bf16.msra.mxu0 %v31924_v30  ;;  %29702 = vmatprep.mubr.f32.mxu0 %v36194_v32 }
0x1505   :  { %31929 = vmatprep.subr.bf16.mxu0 %v31928_v45 }
0x1507   :  { %29703 = vmatmul.mubr.f32.vlgmr.msra.gmra.mrb[48].mxu0 %v36191_v15 }
0x1508   :  { %29705 = vmatprep.mubr.f32.mxu0 %v36207_v19  ;;  %31931 = vmatpush3.bf16.msra.mxu0 %v31928_v45  ;;  %v20666_v45 = vsel %vm713_vm1, %v32445_v37, 0 }
0x1509   :  { %31933 = vmatprep.subr.bf16.mxu0 %v31932_v10 }
0x150b   :  { %29706 = vmatmul.mubr.f32.gmra.mrb[50].mxu0 %v36204_v35 }
0x150c   :  { %31935 = vmatpush3.bf16.msra.mxu0 %v31932_v10  ;;  %29716 = vmatprep.mubr.f32.mxu0 %v36200_v42  ;;  %v32444_v42 = vadd.f32 %v36094_v62, %v25229_v43 }
0x150d   :  { %31937 = vmatprep.subr.bf16.mxu0 %v36216_v5 }
0x150f   :  { %29717 = vmatmul.mubr.f32.vlgmr.msra.gmra.mrb[48].mxu0 %v36197_v7 }
0x1510   :  { %29719 = vmatprep.mubr.f32.mxu0 %v36214_v25  ;;  %31939 = vmatpush3.bf16.msra.mxu0 %v36216_v5  ;;  %v36255_v25 = vand.u32 4294901760, %v20666_v45 }
0x1511   :  { %31941 = vmatprep.subr.bf16.mxu0 %v36227_v1 }
0x1512   :  { %v20747_v3 = vsub.f32 %v20666_v45, %v36255_v25 }
0x1513   :  { %29720 = vmatmul.mubr.f32.gmra.mrb[50].mxu0 %v36219_v18  ;;  %v20669_v18 = vsel %vm713_vm1, %v32444_v42, 0 }
0x1514   :  { %31943 = vmatpush3.bf16.msra.mxu0 %v36227_v1  ;;  %29730 = vmatprep.mubr.f32.mxu0 %v19491_v56  ;;  %v20748_v7 = vand.u32 4294901760, %v20747_v3  ;;  %v32447_v56 = vadd.f32 %v25229_v43, %v36108_v8  ;;  %v20756_v62 = vand.u32 4294901760, %v20669_v18 }
0x1515   :  { %31945 = vmatprep.subr.bf16.mxu0 %v31944_v4 }
0x1517   :  { %29731 = vmatmul.mubr.f32.vlgmr.msra.gmra.mrb[48].mxu0 %v19501_v12  ;;  %v20749_v12 = vsub.f32 %v20747_v3, %v20748_v7 }
0x1518   :  { %29733 = vmatprep.mubr.f32.mxu0 %v19511_v23  ;;  %31947 = vmatpush3.bf16.msra.mxu0 %v31944_v4  ;;  %v20672_v23 = vsel %vm713_vm1, %v32447_v56, 0 }
0x1519   :  { %31949 = vmatprep.subr.bf16.mxu0 %v31948_v61  ;;  %v20750_v27 = vand.u32 4294901760, %v20749_v12  ;;  %v20766_v14 = vand.u32 4294901760, %v20672_v23 }
0x151b   :  { %29734 = vmatmul.mubr.f32.gmra.mrb[50].mxu0 %v19521_v0 }
0x151c   :  { %31951 = vmatpush3.bf16.msra.mxu0 %v31948_v61  ;;  %29744 = vmatprep.mubr.f32.mxu0 %v36194_v32 }
0x151d   :  { %31953 = vmatprep.subr.bf16.mxu0 %v36216_v5 }
0x151f   :  { %29745 = vmatmul.mubr.f32.vlgmr.msra.gmra.mrb[48].mxu0 %v36191_v15 }
0x1520   :  { %29747 = vmatprep.mubr.f32.mxu0 %v36207_v19  ;;  %31955 = vmatpush3.bf16.msra.mxu0 %v36216_v5  ;;  %v32446_v5 = vadd.f32 %v36104_v36, %v25229_v43  ;;  %v20767_v36 = vsub.f32 %v20672_v23, %v20766_v14 }
0x1521   :  { %31957 = vmatprep.subr.bf16.mxu0 %v36227_v1 }
0x1522   :  { %v20675_v8 = vsel %vm713_vm1, %v32446_v5, 0 }
0x1523   :  { %29748 = vmatmul.mubr.f32.gmra.mrb[50].mxu0 %v36204_v35  ;;  %v20776_v39 = vand.u32 4294901760, %v20675_v8 }
0x1524   :  { %31959 = vmatpush3.bf16.msra.mxu0 %v36227_v1  ;;  %29758 = vmatprep.mubr.f32.mxu0 %v36194_v32  ;;  %v20757_v32 = vsub.f32 %v20669_v18, %v20756_v62  ;;  %v20768_v1 = vand.u32 4294901760, %v20767_v36 }
0x1525   :  { %32009 = vmatprep.subr.bf16.mxu0 %v35334_v60  ;;  %v20777_v9 = vsub.f32 %v20675_v8, %v20776_v39 }
0x1526   :  { %v20769_v0 = vsub.f32 %v20767_v36, %v20768_v1 }
0x1527   :  { %29759 = vmatmul.mubr.f32.vlgmr.msra.gmra.mrb[48].mxu0 %v36191_v15  ;;  %v20758_v15 = vand.u32 4294901760, %v20757_v32  ;;  %v20778_v33 = vand.u32 4294901760, %v20777_v9 }
0x1528   :  { %29761 = vmatprep.mubr.f32.mxu0 %v36207_v19  ;;  %v20770_v59 = vand.u32 4294901760, %v20769_v0 }
0x1529   :  { %v20759_v19 = vsub.f32 %v20757_v32, %v20758_v15 }
0x152b   :  { %29762 = vmatmul.mubr.f32.gmra.mrb[50].mxu0 %v36204_v35  ;;  %v20760_v63 = vand.u32 4294901760, %v20759_v19  ;;  %v20779_v35 = vsub.f32 %v20777_v9, %v20778_v33 }
0x152c   :  { %29856 = vmatprep.mubr.f32.mxu0 %v20750_v27 }
0x152d   :  { %32011 = vmatpush3.bf16.xpose.msra.mxu0 %v35334_v60  ;;  %v20780_v50 = vand.u32 4294901760, %v20779_v35 }
0x152e   :  { %32013 = vmatprep.subr.bf16.mxu0 %v35367_v29 }
0x1535   :  { %32015 = vmatpush3.bf16.xpose.msra.mxu0 %v35367_v29 }
0x1536   :  { %32017 = vmatprep.subr.bf16.mxu0 %v35380_v31 }
0x153c   :  { %29857 = vmatmul.mubr.f32.vlgmr.msra.gmra.mrb[56].mxu0 %v20760_v63 }
0x153d   :  { %29859 = vmatprep.mubr.f32.mxu0 %v20770_v59  ;;  %32019 = vmatpush3.bf16.xpose.msra.mxu0 %v35380_v31 }
0x153e   :  { %32021 = vmatprep.subr.bf16.mxu0 %v35507_v13 }
0x1540   :  { %29860 = vmatmul.mubr.f32.gmra.mrb[58].mxu0 %v20780_v50 }
0x1541   :  { %29870 = vmatprep.mubr.f32.mxu0 %v36255_v25 }
0x1545   :  { %32023 = vmatpush3.bf16.xpose.msra.mxu0 %v35507_v13 }
0x1546   :  { %32025 = vmatprep.subr.bf16.mxu0 %v35516_v46 }
0x154c   :  { %29871 = vmatmul.mubr.f32.vlgmr.msra.gmra.mrb[56].mxu0 %v20756_v62 }
0x154d   :  { %29873 = vmatprep.mubr.f32.mxu0 %v20766_v14  ;;  %32027 = vmatpush3.bf16.xpose.msra.mxu0 %v35516_v46 }
0x154e   :  { %32029 = vmatprep.subr.bf16.mxu0 %v35523_v53 }
0x1550   :  { %29874 = vmatmul.mubr.f32.gmra.mrb[58].mxu0 %v20776_v39 }
0x1551   :  { %29884 = vmatprep.mubr.f32.mxu0 %v20747_v3 }
0x1555   :  { %32031 = vmatpush3.bf16.xpose.msra.mxu0 %v35523_v53 }
0x1556   :  { %32033 = vmatprep.subr.bf16.mxu0 %v35334_v60 }
0x155c   :  { %29885 = vmatmul.mubr.f32.vlgmr.msra.gmra.mrb[56].mxu0 %v20757_v32 }
0x155d   :  { %29887 = vmatprep.mubr.f32.mxu0 %v20767_v36  ;;  %32035 = vmatpush3.bf16.xpose.msra.mxu0 %v35334_v60 }
0x155e   :  { %32037 = vmatprep.subr.bf16.mxu0 %v35367_v29 }
0x1560   :  { %29888 = vmatmul.mubr.f32.gmra.mrb[58].mxu0 %v20777_v9 }
0x1561   :  { %29898 = vmatprep.mubr.f32.mxu0 %v20748_v7 }
0x1565   :  { %32039 = vmatpush3.bf16.xpose.msra.mxu0 %v35367_v29 }
0x1566   :  { %32041 = vmatprep.subr.bf16.mxu0 %v35538_v54 }
0x156c   :  { %29899 = vmatmul.mubr.f32.vlgmr.msra.gmra.mrb[56].mxu0 %v20758_v15 }
0x156d   :  { %29901 = vmatprep.mubr.f32.mxu0 %v20768_v1  ;;  %32043 = vmatpush3.bf16.xpose.msra.mxu0 %v35538_v54 }
0x156e   :  { %32045 = vmatprep.subr.bf16.mxu0 %v35546_v49 }
0x1570   :  { %29902 = vmatmul.mubr.f32.gmra.mrb[58].mxu0 %v20778_v33 }
0x1571   :  { %29912 = vmatprep.mubr.f32.mxu0 %v36255_v25 }
0x1575   :  { %32047 = vmatpush3.bf16.xpose.msra.mxu0 %v35546_v49 }
0x1576   :  { %32049 = vmatprep.subr.bf16.mxu0 %v35334_v60 }
0x157c   :  { %29913 = vmatmul.mubr.f32.vlgmr.msra.gmra.mrb[56].mxu0 %v20756_v62 }
0x157d   :  { %29915 = vmatprep.mubr.f32.mxu0 %v20766_v14  ;;  %32051 = vmatpush3.bf16.xpose.msra.mxu0 %v35334_v60 }
0x157e   :  { %32053 = vmatprep.subr.bf16.mxu0 %v35367_v29 }
0x1580   :  { %29916 = vmatmul.mubr.f32.gmra.mrb[58].mxu0 %v20776_v39 }
0x1581   :  { %29926 = vmatprep.mubr.f32.mxu0 %v36255_v25 }
0x1585   :  { %32055 = vmatpush3.bf16.xpose.msra.mxu0 %v35367_v29 }
0x1586   :  { %32105 = vmatprep.subr.bf16.mxu0 %v36154_v11 }
0x158c   :  { %29927 = vmatmul.mubr.f32.vlgmr.msra.gmra.mrb[56].mxu0 %v20756_v62 }
0x158d   :  { %29929 = vmatprep.mubr.f32.mxu0 %v20766_v14  ;;  %32107 = vmatpush3.bf16.msra.mxu0 %v36154_v11 }
0x158e   :  { %32109 = vmatprep.subr.bf16.mxu0 %v36161_v47 }
0x1590   :  { %29930 = vmatmul.mubr.f32.gmra.mrb[58].mxu0 %v20776_v39 }
0x1591   :  { %32111 = vmatpush3.bf16.msra.mxu0 %v36161_v47 }
0x1592   :  { %32113 = vmatprep.subr.bf16.mxu0 %v36173_v34 }
0x165f   :  { %v29928_v60 = vpop.f32.mrb[56].mxu0 }
0x1660   :  { %v32448_v31 = vadd.f32 %v29928_v60, %v34025_v22  ;;  %v21269_v13 = vpop.f32.mrb[57].mxu0 }
0x1661   :  { %v32449_v46 = vadd.f32 %v21269_v13, %v34028_v28 }
0x1662   :  { %v21294_v29 = vsel %vm713_vm1, %v32448_v31, -inf }
0x1663   :  { %21295 = vmax.xlane.f32.xlu1 %v21294_v29  ;;  %v29931_v53 = vpop.f32.mrb[58].mxu0  ;;  %v21291_v54 = vsel %vm713_vm1, %v32449_v46, -inf }
0x1664   :  { %v32450_v49 = vadd.f32 %v29931_v53, %v36831_v38  ;;  %v21281_v4 = vpop.f32.mrb[59].mxu0  ;;  %21292 = vmax.xlane.f32.xlu0 %v21291_v54 }
0x1665   :  { %v32451_v52 = vadd.f32 %v21281_v4, %v36832_v20 }
0x1666   :  { %v21300_v26 = vsel %vm713_vm1, %v32450_v49, -inf }
0x1667   :  { %21301 = vmax.xlane.f32.xlu1 %v21300_v26  ;;  %v21297_v22 = vsel %vm713_vm1, %v32451_v52, -inf }
0x1668   :  { %21298 = vmax.xlane.f32.xlu0 %v21297_v22 }
0x16f0   :  { %v21296_v10 = vpop.xlane.xlu1 %21295 }
0x16f1   :  { %v21304_v28 = vsub.f32 %v32448_v31, %v21296_v10  ;;  %v21293_v55 = vpop.xlane.xlu0 %21292 }
0x16f2   :  { %v21303_v58 = vsub.f32 %v32449_v46, %v21293_v55 }
0x16f3   :  { %v21309_v41 = vmul.f32 1.442695, %v21304_v28  ;;  %v36842_v28 = vld [vmem:[#allocation25_spill] sm:$0xff] }
0x16f4   :  { %v21307_v16 = vmul.f32 1.442695, %v21303_v58  ;;  %v21302_v24 = vpop.xlane.xlu1 %21301 }
0x16f5   :  { %33373 = vpow2.f32 %v21309_v41  ;;  %v21306_v61 = vsub.f32 %v32450_v49, %v21302_v24  ;;  %v21299_v38 = vpop.xlane.xlu0 %21298 }
0x16f6   :  { %33375 = vpow2.f32 %v21307_v16  ;;  %v21305_v40 = vsub.f32 %v32451_v52, %v21299_v38 }
0x16f7   :  { %v21313_v48 = vmul.f32 1.442695, %v21306_v61  ;;  %v36843_v61 = vld [vmem:[#allocation14_spill] sm:$0xff] }
0x16f8   :  { %v21311_v20 = vmul.f32 1.442695, %v21305_v40  ;;  %v36844_v40 = vld [vmem:[#allocation18_spill] sm:$0xff] }
0x16f9   :  { %33377 = vpow2.f32 %v21313_v48 }
0x16fa   :  { %33379 = vpow2.f32 %v21311_v20 }
0x16ff   :  { %v33374_v6 = vpop.eup %33373 }
0x1700   :  { %v33376_v51 = vpop.eup %33375  ;;  %v21318_v30 = vsel %vm713_vm1, %v33374_v6, 0.0 }
0x1701   :  { %21319 = vadd.xlane.f32.xlu1 %v21318_v30  ;;  %v21315_v43 = vsel %vm713_vm1, %v33376_v51, 0.0 }
0x1702   :  { %21316 = vadd.xlane.f32.xlu0 %v21315_v43 }
0x1703   :  { %v33378_v37 = vpop.eup %33377 }
0x1704   :  { %v33380_v45 = vpop.eup %33379  ;;  %v21324_v25 = vsel %vm713_vm1, %v33378_v37, 0.0 }
0x1705   :  { %21325 = vadd.xlane.f32.xlu1 %v21324_v25  ;;  %v21321_v3 = vsel %vm713_vm1, %v33380_v45, 0.0 }
0x1706   :  { %21322 = vadd.xlane.f32.xlu0 %v21321_v3 }
0x178e   :  { %v21320_v7 = vpop.xlane.xlu1 %21319 }
0x178f   :  { %33381 = vrcp.f32 %v21320_v7  ;;  %v21317_v42 = vpop.xlane.xlu0 %21316 }
0x1790   :  { %33383 = vrcp.f32 %v21317_v42 }
0x1792   :  { %v21326_v56 = vpop.xlane.xlu1 %21325 }
0x1793   :  { %33385 = vrcp.f32 %v21326_v56  ;;  %v21323_v12 = vpop.xlane.xlu0 %21322 }
0x1794   :  { %33387 = vrcp.f32 %v21323_v12 }
0x1799   :  { %v33382_v18 = vpop.eup %33381 }
0x179a   :  { %v33384_v5 = vpop.eup %33383  ;;  %v21330_v23 = vmul.f32 %v33382_v18, %v33374_v6 }
0x179b   :  { %v21328_v62 = vmul.f32 %v33384_v5, %v33376_v51 }
0x179c   :  { %v21958_v27 = vsel %vm713_vm1, %v21330_v23, 0 }
0x179d   :  { %v33386_v8 = vpop.eup %33385  ;;  %v36321_v14 = vand.u32 4294901760, %v21958_v27  ;;  %v21955_v32 = vsel %vm713_vm1, %v21328_v62, 0 }
0x179e   :  { %v33388_v39 = vpop.eup %33387  ;;  %v21334_v36 = vmul.f32 %v33386_v8, %v33378_v37  ;;  %v22035_v15 = vand.u32 4294901760, %v21955_v32 }
0x179f   :  { %v22046_v9 = vsub.f32 %v21958_v27, %v36321_v14  ;;  %v21332_v1 = vmul.f32 %v33388_v39, %v33380_v45 }
0x17a0   :  { %v22036_v19 = vsub.f32 %v21955_v32, %v22035_v15  ;;  %v21964_v33 = vsel %vm713_vm1, %v21334_v36, 0  ;;  %v25236_v36 = vld [vmem:[%s36721_s6 + $0x20] sm:$0xff] }
0x17a1   :  { %v22047_v0 = vand.u32 4294901760, %v22046_v9  ;;  %v21961_v63 = vsel %vm713_vm1, %v21332_v1, 0  ;;  %v22065_v35 = vand.u32 4294901760, %v21964_v33  ;;  %v22702_v1 = vand.u32 4294901760, %v25236_v36 }
0x17a2   :  { %v22037_v59 = vand.u32 4294901760, %v22036_v19  ;;  %v22055_v50 = vand.u32 4294901760, %v21961_v63 }
0x17a3   :  { %v22048_v60 = vsub.f32 %v22046_v9, %v22047_v0  ;;  %v22066_v31 = vsub.f32 %v21964_v33, %v22065_v35  ;;  %v25239_v33 = vld [vmem:[%s36721_s6 + $0x38] sm:$0xff] }
0x17a4   :  { %v22038_v13 = vsub.f32 %v22036_v19, %v22037_v59  ;;  %v22056_v46 = vsub.f32 %v21961_v63, %v22055_v50  ;;  %v22711_v63 = vand.u32 4294901760, %v25239_v33 }
0x17a5   :  { %v22067_v29 = vand.u32 4294901760, %v22066_v31  ;;  %v22049_v49 = vand.u32 4294901760, %v22048_v60 }
0x17a6   :  { %v22039_v53 = vand.u32 4294901760, %v22038_v13  ;;  %v22057_v54 = vand.u32 4294901760, %v22056_v46 }
0x17a7   :  { %v22068_v4 = vsub.f32 %v22066_v31, %v22067_v29 }
0x17a8   :  { %30024 = vmatprep.mubr.f32.mxu0 %v22039_v53  ;;  %v22058_v52 = vsub.f32 %v22056_v46, %v22057_v54 }
0x17a9   :  { %30025 = vmatmul.mubr.f32.vlgmr.msra.gmra.mrb[48].mxu0 %v22049_v49  ;;  %v22069_v22 = vand.u32 4294901760, %v22068_v4 }
0x17aa   :  { %32115 = vmatpush3.bf16.msra.mxu0 %v36173_v34  ;;  %v22059_v26 = vand.u32 4294901760, %v22058_v52 }
0x17ab   :  { %32117 = vmatprep.subr.bf16.mxu0 %v36179_v2 }
0x17ac   :  { %30027 = vmatprep.mubr.f32.mxu0 %v22059_v26 }
0x17ad   :  { %30028 = vmatmul.mubr.f32.gmra.mrb[50].mxu0 %v22069_v22 }
0x17ae   :  { %32119 = vmatpush3.bf16.msra.mxu0 %v36179_v2  ;;  %30038 = vmatprep.mubr.f32.mxu0 %v22035_v15 }
0x17af   :  { %32121 = vmatprep.subr.bf16.mxu0 %v36158_v44 }
0x17b1   :  { %30039 = vmatmul.mubr.f32.vlgmr.msra.gmra.mrb[48].mxu0 %v36321_v14 }
0x17b2   :  { %32123 = vmatpush3.bf16.msra.mxu0 %v36158_v44  ;;  %30041 = vmatprep.mubr.f32.mxu0 %v22055_v50  ;;  %v25231_v44 = vld [vmem:[%s36724_s9 + $0x6] ss:$0 sm:$0xff] }
0x17b3   :  { %32125 = vmatprep.subr.bf16.mxu0 %v36168_v21 }
0x17b5   :  { %30042 = vmatmul.mubr.f32.gmra.mrb[50].mxu0 %v22065_v35 }
0x17b6   :  { %32127 = vmatpush3.bf16.msra.mxu0 %v36168_v21  ;;  %30052 = vmatprep.mubr.f32.mxu0 %v22036_v19 }
0x17b7   :  { %32129 = vmatprep.subr.bf16.mxu0 %v36154_v11 }
0x17b9   :  { %30053 = vmatmul.mubr.f32.vlgmr.msra.gmra.mrb[48].mxu0 %v22046_v9  ;;  %v25238_v9 = vld [vmem:[%s36721_s6 + $0x30] sm:$0xff] }
0x17ba   :  { %32131 = vmatpush3.bf16.msra.mxu0 %v36154_v11  ;;  %30055 = vmatprep.mubr.f32.mxu0 %v22056_v46 }
0x17bb   :  { %32133 = vmatprep.subr.bf16.mxu0 %v36161_v47 }
0x17bd   :  { %30056 = vmatmul.mubr.f32.gmra.mrb[50].mxu0 %v22066_v31 }
0x17be   :  { %32135 = vmatpush3.bf16.msra.mxu0 %v36161_v47  ;;  %30066 = vmatprep.mubr.f32.mxu0 %v22037_v59 }
0x17bf   :  { %32137 = vmatprep.subr.bf16.mxu0 %v36166_v17 }
0x17c1   :  { %30067 = vmatmul.mubr.f32.vlgmr.msra.gmra.mrb[48].mxu0 %v22047_v0  ;;  %v22708_v0 = vand.u32 4294901760, %v25238_v9 }
0x17c2   :  { %32139 = vmatpush3.bf16.msra.mxu0 %v36166_v17  ;;  %30069 = vmatprep.mubr.f32.mxu0 %v22057_v54  ;;  %v22833_v54 = vsub.f32 %v25239_v33, %v22711_v63 }
0x17c3   :  { %32141 = vmatprep.subr.bf16.mxu0 %v36175_v57  ;;  %v36394_v59 = vpack.c.bf16 %v22711_v63, %v22708_v0  ;;  %v22826_v53 = vsub.f32 %v25238_v9, %v22708_v0 }
0x17c4   :  { %v22834_v26 = vand.u32 4294901760, %v22833_v54 }
0x17c5   :  { %30070 = vmatmul.mubr.f32.gmra.mrb[50].mxu0 %v22067_v29  ;;  %v22827_v52 = vand.u32 4294901760, %v22826_v53 }
0x17c6   :  { %32143 = vmatpush3.bf16.msra.mxu0 %v36175_v57  ;;  %30080 = vmatprep.mubr.f32.mxu0 %v22035_v15 }
0x17c7   :  { %32145 = vmatprep.subr.bf16.mxu0 %v36154_v11 }
0x17c9   :  { %30081 = vmatmul.mubr.f32.vlgmr.msra.gmra.mrb[48].mxu0 %v36321_v14 }
0x17ca   :  { %32147 = vmatpush3.bf16.msra.mxu0 %v36154_v11  ;;  %30083 = vmatprep.mubr.f32.mxu0 %v22055_v50  ;;  %v36841_v11 = vld [vmem:[#allocation24_spill] sm:$0xff] }
0x17cb   :  { %32149 = vmatprep.subr.bf16.mxu0 %v36161_v47 }
0x17cd   :  { %30084 = vmatmul.mubr.f32.gmra.mrb[50].mxu0 %v22065_v35 }
0x17ce   :  { %32151 = vmatpush3.bf16.msra.mxu0 %v36161_v47  ;;  %30094 = vmatprep.mubr.f32.mxu0 %v22035_v15  ;;  %v25237_v15 = vld [vmem:[%s36721_s6 + $0x28] sm:$0xff] }
0x17cf   :  { %v22705_v19 = vand.u32 4294901760, %v25237_v15 }
0x17d1   :  { %30095 = vmatmul.mubr.f32.vlgmr.msra.gmra.mrb[48].mxu0 %v36321_v14  ;;  %v22819_v60 = vsub.f32 %v25237_v15, %v22705_v19 }
0x17d2   :  { %30097 = vmatprep.mubr.f32.mxu0 %v22055_v50  ;;  %v22812_v50 = vsub.f32 %v25236_v36, %v22702_v1 }
0x17d3   :  { %v22820_v13 = vand.u32 4294901760, %v22819_v60 }
0x17d4   :  { %v22813_v31 = vand.u32 4294901760, %v22812_v50 }
0x17d5   :  { %30098 = vmatmul.mubr.f32.gmra.mrb[50].mxu0 %v22065_v35  ;;  %v36392_v35 = vpack.c.bf16 %v22705_v19, %v22702_v1  ;;  %v22821_v29 = vsub.f32 %v22819_v60, %v22820_v13 }
0x17d6   :  { %v22814_v46 = vsub.f32 %v22812_v50, %v22813_v31 }
0x17d7   :  { %32153 = vmatprep.subr.bf16.mxu1 %v36392_v35  ;;  %v22822_v4 = vand.u32 4294901760, %v22821_v29 }
0x17d8   :  { %32155 = vmatpush3.bf16.msra.mxu1 %v36392_v35  ;;  %v22815_v49 = vand.u32 4294901760, %v22814_v46 }
0x17d9   :  { %32157 = vmatprep.subr.bf16.mxu1 %v36394_v59 }
0x17da   :  { %v36400_v22 = vpack.c.bf16 %v22822_v4, %v22815_v49 }
0x17dc   :  { %32159 = vmatpush3.bf16.msra.mxu1 %v36394_v59 }
0x17dd   :  { %32161 = vmatprep.subr.bf16.mxu1 %v36400_v22 }
0x18a4   :  { %v30096_v17 = vpop.f32.mrb[48].mxu0 }
0x18a5   :  { %v22593_v21 = vadd.f32 %v30096_v17, %v25231_v44  ;;  %v22558_v34 = vpop.f32.mrb[49].mxu0  ;;  %v22835_v17 = vsub.f32 %v22833_v54, %v22834_v26 }
0x18a6   :  { %v22592_v57 = vadd.f32 %v25231_v44, %v22558_v34 }
0x18a7   :  { %v22597_v2 = vadd.f32 %v22593_v21, %v36841_v11  ;;  %v22836_v34 = vand.u32 4294901760, %v22835_v17  ;;  %v36405_v11 = vpack.c.bf16 %v22819_v60, %v22812_v50 }
0x18a8   :  { %v30099_v10 = vpop.f32.mrb[50].mxu0  ;;  %v22596_v55 = vadd.f32 %v22592_v57, %v36842_v28  ;;  %v36411_v28 = vpack.c.bf16 %v22834_v26, %v22827_v52 }
0x18a9   :  { %v22595_v58 = vadd.f32 %v30099_v10, %v25231_v44  ;;  %v22570_v47 = vpop.f32.mrb[51].mxu0  ;;  %v22607_v41 = vsel %vm713_vm1, %v22597_v2, 0.0  ;;  %v36409_v10 = vpack.c.bf16 %v22820_v13, %v22813_v31 }
0x18aa   :  { %v22594_v16 = vadd.f32 %v25231_v44, %v22570_v47  ;;  %22608 = vadd.xlane.f32.xlu1 %v22607_v41  ;;  %v22604_v24 = vsel %vm713_vm1, %v22596_v55, 0.0  ;;  %v22828_v44 = vsub.f32 %v22826_v53, %v22827_v52 }
0x18ab   :  { %22605 = vadd.xlane.f32.xlu0 %v22604_v24  ;;  %v22599_v38 = vadd.f32 %v22595_v58, %v36843_v61 }
0x18ac   :  { %v22598_v48 = vadd.f32 %v22594_v16, %v36844_v40  ;;  %v22829_v21 = vand.u32 4294901760, %v22828_v44 }
0x18ad   :  { %v22613_v20 = vsel %vm713_vm1, %v22599_v38, 0.0 }
0x18ae   :  { %22614 = vadd.xlane.f32.xlu1 %v22613_v20  ;;  %v22610_v6 = vsel %vm713_vm1, %v22598_v48, 0.0  ;;  %v36403_v57 = vpack.c.bf16 %v22836_v34, %v22829_v21  ;;  %v25243_v21 = vld [vmem:[%s36723_s8 + $0x48] sm:$0xff] }
0x18af   :  { %22611 = vadd.xlane.f32.xlu0 %v22610_v6 }
0x1937   :  { %v22609_v51 = vpop.xlane.xlu1 %22608 }
0x1938   :  { %v22617_v30 = vmul.f32 0.03125, %v22609_v51  ;;  %v22606_v43 = vpop.xlane.xlu0 %22605 }
0x1939   :  { %v22616_v37 = vmul.f32 0.03125, %v22606_v43 }
0x193a   :  { %v36360_v45 = vsub.f32 %v22597_v2, %v22617_v30  ;;  %v36407_v2 = vpack.c.bf16 %v22833_v54, %v22826_v53  ;;  %v25234_v30 = vld [vmem:[%s36724_s9 + $0x7] ss:$0 sm:$0xff] }
0x193b   :  { %v36362_v25 = vsub.f32 %v22596_v55, %v22616_v37  ;;  %v22615_v3 = vpop.xlane.xlu1 %22614 }
0x193c   :  { %v22619_v7 = vmul.f32 0.03125, %v22615_v3  ;;  %v22612_v42 = vpop.xlane.xlu0 %22611  ;;  %v22625_v56 = vmul.f32 %v36360_v45, %v36360_v45 }
0x193d   :  { %v22618_v12 = vmul.f32 0.03125, %v22612_v42  ;;  %v22624_v18 = vmul.f32 %v36362_v25, %v36362_v25 }
0x193e   :  { %v36368_v5 = vsub.f32 %v22599_v38, %v22619_v7  ;;  %v22631_v23 = vsel %vm713_vm1, %v22625_v56, 0.0  ;;  %v25235_v7 = vld [vmem:[%s36724_s9 + $0x8] ss:$0 sm:$0xff] }
0x193f   :  { %v36371_v62 = vsub.f32 %v22598_v48, %v22618_v12  ;;  %22632 = vadd.xlane.f32.xlu1 %v22631_v23  ;;  %v22628_v27 = vsel %vm713_vm1, %v22624_v18, 0.0 }
0x1940   :  { %22629 = vadd.xlane.f32.xlu0 %v22628_v27  ;;  %v22627_v8 = vmul.f32 %v36368_v5, %v36368_v5 }
0x1941   :  { %v22626_v14 = vmul.f32 %v36371_v62, %v36371_v62 }
0x1942   :  { %v22637_v32 = vsel %vm713_vm1, %v22627_v8, 0.0 }
0x1943   :  { %22638 = vadd.xlane.f32.xlu1 %v22637_v32  ;;  %v22634_v39 = vsel %vm713_vm1, %v22626_v14, 0.0 }
0x1944   :  { %22635 = vadd.xlane.f32.xlu0 %v22634_v39 }
0x19cc   :  { %v22633_v55 = vpop.xlane.xlu1 %22632 }
0x19cd   :  { %v22641_v58 = vmul.f32 0.03125, %v22633_v55  ;;  %v22630_v47 = vpop.xlane.xlu0 %22629  ;;  %v25246_v55 = vld [vmem:[%s36723_s8 + $0x60] sm:$0xff] }
0x19ce   :  { %v22640_v41 = vmul.f32 0.03125, %v22630_v47  ;;  %v23361_v47 = vand.u32 4294901760, %v25246_v55 }
0x19cf   :  { %v22645_v16 = vadd.f32 1e-05, %v22641_v58  ;;  %v25247_v58 = vld [vmem:[%s36723_s8 + $0x68] sm:$0xff] }
0x19d0   :  { %v22644_v24 = vadd.f32 1e-05, %v22640_v41  ;;  %v22639_v61 = vpop.xlane.xlu1 %22638  ;;  %v23364_v41 = vand.u32 4294901760, %v25247_v58 }
0x19d1   :  { %33389 = vrsqrt.f32 %v22645_v16  ;;  %v22643_v38 = vmul.f32 0.03125, %v22639_v61  ;;  %v22636_v40 = vpop.xlane.xlu0 %22635 }
0x19d2   :  { %33391 = vrsqrt.f32 %v22644_v24  ;;  %v22642_v48 = vmul.f32 0.03125, %v22636_v40  ;;  %v36490_v16 = vpack.c.bf16 %v23364_v41, %v23361_v47  ;;  %v25249_v40 = vld [vmem:[%s36723_s8 + $0x78] sm:$0xff] }
0x19d3   :  { %v22647_v20 = vadd.f32 1e-05, %v22643_v38  ;;  %v25248_v38 = vld [vmem:[%s36723_s8 + $0x70] sm:$0xff] }
0x19d4   :  { %v22646_v6 = vadd.f32 1e-05, %v22642_v48  ;;  %v23367_v48 = vand.u32 4294901760, %v25248_v38 }
0x19d5   :  { %33393 = vrsqrt.f32 %v22647_v20  ;;  %v23370_v20 = vand.u32 4294901760, %v25249_v40 }
0x19d6   :  { %33395 = vrsqrt.f32 %v22646_v6 }
0x19db   :  { %v33390_v51 = vpop.eup %33389 }
0x19dc   :  { %v33392_v43 = vpop.eup %33391  ;;  %v22653_v37 = vmul.f32 %v33390_v51, %v36360_v45 }
0x19dd   :  { %v22652_v3 = vmul.f32 %v33392_v43, %v36362_v25 }
0x19de   :  { %v22663_v42 = vmul.f32 %v25234_v30, %v22653_v37 }
0x19df   :  { %v33394_v56 = vpop.eup %33393  ;;  %v22662_v12 = vmul.f32 %v25234_v30, %v22652_v3 }
0x19e0   :  { %v33396_v18 = vpop.eup %33395  ;;  %v22655_v23 = vmul.f32 %v33394_v56, %v36368_v5  ;;  %v36422_v27 = vadd.f32 %v25235_v7, %v22663_v42 }
0x19e1   :  { %v22654_v8 = vmul.f32 %v33396_v18, %v36371_v62  ;;  %v36425_v14 = vadd.f32 %v25235_v7, %v22662_v12 }
0x19e2   :  { %v22693_v45 = vsel %vm713_vm1, %v36422_v27, 0  ;;  %v22665_v25 = vmul.f32 %v25234_v30, %v22655_v23 }
0x19e3   :  { %v22690_v32 = vsel %vm713_vm1, %v36425_v14, 0  ;;  %v36431_v39 = vand.u32 4294901760, %v22693_v45  ;;  %v22664_v36 = vmul.f32 %v25234_v30, %v22654_v8  ;;  %v36500_v30 = vpack.c.bf16 %v23370_v20, %v23367_v48 }
0x19e4   :  { %v22770_v15 = vand.u32 4294901760, %v22690_v32  ;;  %v36433_v9 = vadd.f32 %v25235_v7, %v22665_v25  ;;  %v23498_v25 = vsub.f32 %v25247_v58, %v23364_v41 }
0x19e5   :  { %v22781_v5 = vsub.f32 %v22693_v45, %v36431_v39  ;;  %v36436_v1 = vadd.f32 %v25235_v7, %v22664_v36  ;;  %v23491_v45 = vsub.f32 %v25246_v55, %v23361_v47 }
0x19e6   :  { %v22771_v62 = vsub.f32 %v22690_v32, %v22770_v15  ;;  %v22699_v19 = vsel %vm713_vm1, %v36433_v9, 0 }
0x19e7   :  { %v22782_v33 = vand.u32 4294901760, %v22781_v5  ;;  %v22696_v0 = vsel %vm713_vm1, %v36436_v1, 0  ;;  %v22800_v63 = vand.u32 4294901760, %v22699_v19  ;;  %v23492_v36 = vand.u32 4294901760, %v23491_v45 }
0x19e8   :  { %v22772_v50 = vand.u32 4294901760, %v22771_v62  ;;  %v22790_v60 = vand.u32 4294901760, %v22696_v0 }
0x19e9   :  { %v22783_v31 = vsub.f32 %v22781_v5, %v22782_v33  ;;  %v22801_v13 = vsub.f32 %v22699_v19, %v22800_v63 }
0x19ea   :  { %v22773_v46 = vsub.f32 %v22771_v62, %v22772_v50  ;;  %v22791_v29 = vsub.f32 %v22696_v0, %v22790_v60  ;;  %v23512_v0 = vsub.f32 %v25249_v40, %v23370_v20 }
0x19eb   :  { %v22802_v53 = vand.u32 4294901760, %v22801_v13  ;;  %v22784_v4 = vand.u32 4294901760, %v22783_v31 }
0x19ec   :  { %v22774_v54 = vand.u32 4294901760, %v22773_v46  ;;  %v22792_v49 = vand.u32 4294901760, %v22791_v29 }
0x19ed   :  { %v22803_v52 = vsub.f32 %v22801_v13, %v22802_v53 }
0x19ee   :  { %30108 = vmatprep.mubr.f32.mxu1 %v22774_v54  ;;  %v22793_v26 = vsub.f32 %v22791_v29, %v22792_v49 }
0x19ef   :  { %30109 = vmatmul.mubr.f32.vlgmr.msra.gmra.mrb[64].mxu1 %v22784_v4  ;;  %v22804_v17 = vand.u32 4294901760, %v22803_v52 }
0x19f0   :  { %32163 = vmatpush3.bf16.msra.mxu1 %v36400_v22  ;;  %v22794_v44 = vand.u32 4294901760, %v22793_v26  ;;  %v25242_v22 = vld [vmem:[%s36723_s8 + $0x40] sm:$0xff] }
0x19f1   :  { %32165 = vmatprep.subr.bf16.mxu1 %v36403_v57  ;;  %v23349_v34 = vand.u32 4294901760, %v25242_v22 }
0x19f2   :  { %30111 = vmatprep.mubr.f32.mxu1 %v22794_v44  ;;  %v36507_v44 = vpack.c.bf16 %v23498_v25, %v23491_v45 }
0x19f3   :  { %30112 = vmatmul.mubr.f32.gmra.mrb[66].mxu1 %v22804_v17  ;;  %v23463_v24 = vsub.f32 %v25242_v22, %v23349_v34 }
0x19f4   :  { %32167 = vmatpush3.bf16.msra.mxu1 %v36403_v57  ;;  %30122 = vmatprep.mubr.f32.mxu1 %v22770_v15 }
0x19f5   :  { %32169 = vmatprep.subr.bf16.mxu1 %v36405_v11  ;;  %v23464_v6 = vand.u32 4294901760, %v23463_v24 }
0x19f7   :  { %30123 = vmatmul.mubr.f32.vlgmr.msra.gmra.mrb[64].mxu1 %v36431_v39  ;;  %v23465_v43 = vsub.f32 %v23463_v24, %v23464_v6 }
0x19f8   :  { %30125 = vmatprep.mubr.f32.mxu1 %v22790_v60  ;;  %32171 = vmatpush3.bf16.msra.mxu1 %v36405_v11  ;;  %v25245_v11 = vld [vmem:[%s36723_s8 + $0x58] sm:$0xff] }
0x19f9   :  { %32173 = vmatprep.subr.bf16.mxu1 %v36407_v2  ;;  %v23466_v42 = vand.u32 4294901760, %v23465_v43 }
0x19fb   :  { %30126 = vmatmul.mubr.f32.gmra.mrb[66].mxu1 %v22800_v63 }
0x19fc   :  { %32175 = vmatpush3.bf16.msra.mxu1 %v36407_v2  ;;  %30136 = vmatprep.mubr.f32.mxu1 %v22771_v62  ;;  %v23493_v62 = vsub.f32 %v23491_v45, %v23492_v36 }
0x19fd   :  { %32177 = vmatprep.subr.bf16.mxu1 %v36392_v35 }
0x19ff   :  { %30137 = vmatmul.mubr.f32.vlgmr.msra.gmra.mrb[64].mxu1 %v22781_v5 }
0x1a00   :  { %30139 = vmatprep.mubr.f32.mxu1 %v22791_v29  ;;  %32179 = vmatpush3.bf16.msra.mxu1 %v36392_v35 }
0x1a01   :  { %32181 = vmatprep.subr.bf16.mxu1 %v36394_v59 }
0x1a03   :  { %30140 = vmatmul.mubr.f32.gmra.mrb[66].mxu1 %v22801_v13  ;;  %v23513_v13 = vand.u32 4294901760, %v23512_v0 }
0x1a04   :  { %32183 = vmatpush3.bf16.msra.mxu1 %v36394_v59  ;;  %30150 = vmatprep.mubr.f32.mxu1 %v22772_v50  ;;  %v23494_v50 = vand.u32 4294901760, %v23493_v62 }
0x1a05   :  { %32185 = vmatprep.subr.bf16.mxu1 %v36409_v10 }
0x1a07   :  { %30151 = vmatmul.mubr.f32.vlgmr.msra.gmra.mrb[64].mxu1 %v22782_v33  ;;  %v23505_v33 = vsub.f32 %v25248_v38, %v23367_v48 }
0x1a08   :  { %30153 = vmatprep.mubr.f32.mxu1 %v22792_v49  ;;  %32187 = vmatpush3.bf16.msra.mxu1 %v36409_v10  ;;  %v23358_v10 = vand.u32 4294901760, %v25245_v11 }
0x1a09   :  { %32189 = vmatprep.subr.bf16.mxu1 %v36411_v28  ;;  %v23506_v31 = vand.u32 4294901760, %v23505_v33  ;;  %v36509_v17 = vpack.c.bf16 %v23512_v0, %v23505_v33 }
0x1a0a   :  { %v23484_v7 = vsub.f32 %v25245_v11, %v23358_v10 }
0x1a0b   :  { %30154 = vmatmul.mubr.f32.gmra.mrb[66].mxu1 %v22802_v53  ;;  %v23507_v29 = vsub.f32 %v23505_v33, %v23506_v31  ;;  %v23514_v53 = vsub.f32 %v23512_v0, %v23513_v13 }
0x1a0c   :  { %32191 = vmatpush3.bf16.msra.mxu1 %v36411_v28  ;;  %30164 = vmatprep.mubr.f32.mxu1 %v22770_v15  ;;  %v23485_v18 = vand.u32 4294901760, %v23484_v7 }
0x1a0d   :  { %32193 = vmatprep.subr.bf16.mxu1 %v36392_v35  ;;  %v23508_v54 = vand.u32 4294901760, %v23507_v29  ;;  %v23515_v49 = vand.u32 4294901760, %v23514_v53 }
0x1a0e   :  { %v23486_v32 = vsub.f32 %v23484_v7, %v23485_v18 }
0x1a0f   :  { %30165 = vmatmul.mubr.f32.vlgmr.msra.gmra.mrb[64].mxu1 %v36431_v39  ;;  %v32228_v4 = vpack.c.bf16 %v23515_v49, %v23508_v54 }
0x1a10   :  { %30167 = vmatprep.mubr.f32.mxu1 %v22790_v60  ;;  %32195 = vmatpush3.bf16.msra.mxu1 %v36392_v35  ;;  %v23352_v35 = vand.u32 4294901760, %v25243_v21  ;;  %v23487_v5 = vand.u32 4294901760, %v23486_v32 }
0x1a11   :  { %32197 = vmatprep.subr.bf16.mxu1 %v36394_v59 }
0x1a12   :  { %v36470_v57 = vpack.c.bf16 %v23352_v35, %v23349_v34  ;;  %v23470_v61 = vsub.f32 %v25243_v21, %v23352_v35  ;;  %v36517_v35 = vpack.c.bf16 %v23513_v13, %v23506_v31 }
0x1a13   :  { %30168 = vmatmul.mubr.f32.gmra.mrb[66].mxu1 %v22800_v63 }
0x1a14   :  { %32199 = vmatpush3.bf16.msra.mxu1 %v36394_v59  ;;  %30178 = vmatprep.mubr.f32.mxu1 %v22770_v15  ;;  %v25244_v59 = vld [vmem:[%s36723_s8 + $0x50] sm:$0xff]  ;;  %v23471_v51 = vand.u32 4294901760, %v23470_v61  ;;  %v23499_v15 = vand.u32 4294901760, %v23498_v25  ;;  %v32232_v52 = vpack.c.bf16 %v23470_v61, %v23463_v24 }
0x1a15   :  { %32201 = vmatprep.subr.bf16.mxu1 %v36470_v57  ;;  %v23355_v2 = vand.u32 4294901760, %v25244_v59 }
0x1a16   :  { %v23472_v37 = vsub.f32 %v23470_v61, %v23471_v51  ;;  %v23500_v19 = vsub.f32 %v23498_v25, %v23499_v15  ;;  %v36511_v22 = vpack.c.bf16 %v23471_v51, %v23464_v6  ;;  %v36515_v34 = vpack.c.bf16 %v23499_v15, %v23492_v36 }
0x1a17   :  { %30179 = vmatmul.mubr.f32.vlgmr.msra.gmra.mrb[64].mxu1 %v36431_v39  ;;  %v36480_v28 = vpack.c.bf16 %v23358_v10, %v23355_v2  ;;  %v23477_v3 = vsub.f32 %v25244_v59, %v23355_v2  ;;  %v25241_v59 = vld [vmem:[%s36722_s7 + $0x1] ss:$0 sm:$0xff] }
0x1a18   :  { %30181 = vmatprep.mubr.f32.mxu1 %v22790_v60  ;;  %32203 = vmatpush3.bf16.msra.mxu1 %v36470_v57  ;;  %v23473_v56 = vand.u32 4294901760, %v23472_v37  ;;  %v23501_v60 = vand.u32 4294901760, %v23500_v19 }
0x1a19   :  { %32205 = vmatprep.subr.bf16.mxu1 %v36480_v28  ;;  %v23478_v12 = vand.u32 4294901760, %v23477_v3  ;;  %v32236_v26 = vpack.c.bf16 %v23484_v7, %v23477_v3 }
0x1a1a   :  { %v36504_v23 = vpack.c.bf16 %v23473_v56, %v23466_v42  ;;  %v32224_v46 = vpack.c.bf16 %v23501_v60, %v23494_v50 }
0x1a1b   :  { %30182 = vmatmul.mubr.f32.gmra.mrb[66].mxu1 %v22800_v63  ;;  %v23479_v8 = vsub.f32 %v23477_v3, %v23478_v12  ;;  %v36513_v21 = vpack.c.bf16 %v23485_v18, %v23478_v12 }
0x1a1c   :  { %32207 = vmatpush3.bf16.msra.mxu1 %v36480_v28 }
0x1a1d   :  { %32209 = vmatprep.subr.bf16.mxu1 %v36490_v16  ;;  %v23480_v39 = vand.u32 4294901760, %v23479_v8 }
0x1a1f   :  { %v32220_v63 = vpack.c.bf16 %v23487_v5, %v23480_v39 }
0x1a20   :  { %32211 = vmatpush3.bf16.msra.mxu1 %v36490_v16 }
0x1a21   :  { %32213 = vmatprep.subr.bf16.mxu1 %v36500_v30 }
0x1a24   :  { %32215 = vmatpush3.bf16.msra.mxu1 %v36500_v30 }
0x1a25   :  { %32217 = vmatprep.subr.bf16.mxu1 %v36504_v23 }
0x1aea   :  { %v30180_v11 = vpop.f32.mrb[64].mxu1 }
0x1aeb   :  { %v32452_v2 = vadd.f32 %v30180_v11, %v25241_v59  ;;  %v23293_v10 = vpop.f32.mrb[65].mxu1 }
0x1aec   :  { %v32453_v55 = vadd.f32 %v25241_v59, %v23293_v10 }
0x1aed   :  { %v23316_v58 = vmax.f32 %v32452_v2, 0.0 }
0x1aee   :  { %v23315_v47 = vmax.f32 %v32453_v55, 0.0  ;;  %v30183_v41 = vpop.f32.mrb[66].mxu1 }
0x1aef   :  { %v23340_v24 = vsel %vm11637_vm6, %v23316_v58, 0  ;;  %v32454_v61 = vadd.f32 %v30183_v41, %v25241_v59  ;;  %v23305_v38 = vpop.f32.mrb[67].mxu1 }
0x1af0   :  { %v36523_v40 = vand.u32 4294901760, %v23340_v24  ;;  %v23337_v48 = vsel %vm11637_vm6, %v23315_v47, 0  ;;  %v32455_v20 = vadd.f32 %v25241_v59, %v23305_v38 }
0x1af1   :  { %v36526_v6 = vand.u32 4294901760, %v23337_v48  ;;  %v23318_v51 = vmax.f32 %v32454_v61, 0.0 }
0x1af2   :  { %v23432_v43 = vsub.f32 %v23340_v24, %v36523_v40  ;;  %v23317_v37 = vmax.f32 %v32455_v20, 0.0 }
0x1af3   :  { %v23422_v3 = vsub.f32 %v23337_v48, %v36526_v6  ;;  %v23346_v7 = vsel %vm11637_vm6, %v23318_v51, 0 }
0x1af4   :  { %v23433_v42 = vand.u32 4294901760, %v23432_v43  ;;  %v36531_v56 = vand.u32 4294901760, %v23346_v7  ;;  %v23343_v12 = vsel %vm11637_vm6, %v23317_v37, 0 }
0x1af5   :  { %v36534_v18 = vand.u32 4294901760, %v23343_v12  ;;  %v23423_v8 = vand.u32 4294901760, %v23422_v3 }
0x1af6   :  { %v23434_v45 = vsub.f32 %v23432_v43, %v23433_v42  ;;  %v23452_v25 = vsub.f32 %v23346_v7, %v36531_v56 }
0x1af7   :  { %v23442_v32 = vsub.f32 %v23343_v12, %v36534_v18  ;;  %v23424_v39 = vsub.f32 %v23422_v3, %v23423_v8 }
0x1af8   :  { %v23453_v36 = vand.u32 4294901760, %v23452_v25  ;;  %v23435_v62 = vand.u32 4294901760, %v23434_v45 }
0x1af9   :  { %v23425_v15 = vand.u32 4294901760, %v23424_v39  ;;  %v23443_v5 = vand.u32 4294901760, %v23442_v32 }
0x1afa   :  { %v23454_v19 = vsub.f32 %v23452_v25, %v23453_v36 }
0x1afb   :  { %30200 = vmatprep.mubr.f32.mxu1 %v23425_v15  ;;  %v23444_v33 = vsub.f32 %v23442_v32, %v23443_v5 }
0x1afc   :  { %30201 = vmatmul.mubr.f32.vlgmr.msra.gmra.mrb[68].mxu1 %v23435_v62  ;;  %v23455_v50 = vand.u32 4294901760, %v23454_v19 }
0x1afd   :  { %32219 = vmatpush3.bf16.msra.mxu1 %v36504_v23  ;;  %v23445_v0 = vand.u32 4294901760, %v23444_v33 }
0x1afe   :  { %32221 = vmatprep.subr.bf16.mxu1 %v32220_v63 }
0x1aff   :  { %30203 = vmatprep.mubr.f32.mxu1 %v23445_v0 }
0x1b00   :  { %30204 = vmatmul.mubr.f32.gmra.mrb[70].mxu1 %v23455_v50 }
0x1b01   :  { %32223 = vmatpush3.bf16.msra.mxu1 %v32220_v63  ;;  %30222 = vmatprep.mubr.f32.mxu1 %v36526_v6 }
0x1b02   :  { %32225 = vmatprep.subr.bf16.mxu1 %v32224_v46 }
0x1b05   :  { %32227 = vmatpush3.bf16.msra.mxu1 %v32224_v46 }
0x1b06   :  { %32229 = vmatprep.subr.bf16.mxu1 %v32228_v4 }
0x1b09   :  { %32231 = vmatpush3.bf16.msra.mxu1 %v32228_v4 }
0x1b0a   :  { %32233 = vmatprep.subr.bf16.mxu1 %v32232_v52 }
0x1b0c   :  { %30223 = vmatmul.mubr.f32.vlgmr.msra.gmra.mrb[68].mxu1 %v36523_v40 }
0x1b0d   :  { %30225 = vmatprep.mubr.f32.mxu1 %v36534_v18  ;;  %32235 = vmatpush3.bf16.msra.mxu1 %v32232_v52 }
0x1b0e   :  { %32237 = vmatprep.subr.bf16.mxu1 %v32236_v26 }
0x1b10   :  { %30226 = vmatmul.mubr.f32.gmra.mrb[70].mxu1 %v36531_v56 }
0x1b11   :  { %32239 = vmatpush3.bf16.msra.mxu1 %v32236_v26  ;;  %30244 = vmatprep.mubr.f32.mxu1 %v23422_v3 }
0x1b12   :  { %32241 = vmatprep.subr.bf16.mxu1 %v36507_v44 }
0x1b15   :  { %32243 = vmatpush3.bf16.msra.mxu1 %v36507_v44 }
0x1b16   :  { %32245 = vmatprep.subr.bf16.mxu1 %v36509_v17 }
0x1b19   :  { %32247 = vmatpush3.bf16.msra.mxu1 %v36509_v17 }
0x1b1a   :  { %32249 = vmatprep.subr.bf16.mxu1 %v36470_v57 }
0x1b1c   :  { %30245 = vmatmul.mubr.f32.vlgmr.msra.gmra.mrb[68].mxu1 %v23432_v43 }
0x1b1d   :  { %30247 = vmatprep.mubr.f32.mxu1 %v23442_v32  ;;  %32251 = vmatpush3.bf16.msra.mxu1 %v36470_v57 }
0x1b1e   :  { %32253 = vmatprep.subr.bf16.mxu1 %v36480_v28 }
0x1b20   :  { %30248 = vmatmul.mubr.f32.gmra.mrb[70].mxu1 %v23452_v25  ;;  %v25255_v25 = vld [vmem:[%s36724_s9 + $0xb] ss:$0 sm:$0xff] }
0x1b21   :  { %32255 = vmatpush3.bf16.msra.mxu1 %v36480_v28  ;;  %30266 = vmatprep.mubr.f32.mxu1 %v23423_v8 }
0x1b22   :  { %32257 = vmatprep.subr.bf16.mxu1 %v36490_v16 }
0x1b25   :  { %32259 = vmatpush3.bf16.msra.mxu1 %v36490_v16 }
0x1b26   :  { %32261 = vmatprep.subr.bf16.mxu1 %v36500_v30 }
0x1b29   :  { %32263 = vmatpush3.bf16.msra.mxu1 %v36500_v30 }
0x1b2a   :  { %32265 = vmatprep.subr.bf16.mxu1 %v36511_v22 }
0x1b2c   :  { %30267 = vmatmul.mubr.f32.vlgmr.msra.gmra.mrb[68].mxu1 %v23433_v42 }
0x1b2d   :  { %30269 = vmatprep.mubr.f32.mxu1 %v23443_v5  ;;  %32267 = vmatpush3.bf16.msra.mxu1 %v36511_v22 }
0x1b2e   :  { %32269 = vmatprep.subr.bf16.mxu1 %v36513_v21 }
0x1b30   :  { %30270 = vmatmul.mubr.f32.gmra.mrb[70].mxu1 %v23453_v36 }
0x1b31   :  { %32271 = vmatpush3.bf16.msra.mxu1 %v36513_v21  ;;  %30288 = vmatprep.mubr.f32.mxu1 %v36526_v6 }
0x1b32   :  { %32273 = vmatprep.subr.bf16.mxu1 %v36515_v34 }
0x1b35   :  { %32275 = vmatpush3.bf16.msra.mxu1 %v36515_v34 }
0x1b36   :  { %32277 = vmatprep.subr.bf16.mxu1 %v36517_v35 }
0x1b39   :  { %32279 = vmatpush3.bf16.msra.mxu1 %v36517_v35 }
0x1b3a   :  { %32281 = vmatprep.subr.bf16.mxu1 %v36470_v57 }
0x1b3c   :  { %30289 = vmatmul.mubr.f32.vlgmr.msra.gmra.mrb[68].mxu1 %v36523_v40 }
0x1b3d   :  { %30291 = vmatprep.mubr.f32.mxu1 %v36534_v18  ;;  %32283 = vmatpush3.bf16.msra.mxu1 %v36470_v57  ;;  %v25251_v57 = vld [vmem:[%s36724_s9 + $0x9] ss:$0 sm:$0xff] }
0x1b3e   :  { %32285 = vmatprep.subr.bf16.mxu1 %v36480_v28 }
0x1b40   :  { %30292 = vmatmul.mubr.f32.gmra.mrb[70].mxu1 %v36531_v56 }
0x1b41   :  { %32287 = vmatpush3.bf16.msra.mxu1 %v36480_v28  ;;  %30310 = vmatprep.mubr.f32.mxu1 %v36526_v6 }
0x1b42   :  { %32289 = vmatprep.subr.bf16.mxu1 %v36490_v16 }
0x1b45   :  { %32291 = vmatpush3.bf16.msra.mxu1 %v36490_v16 }
0x1b46   :  { %32293 = vmatprep.subr.bf16.mxu1 %v36500_v30 }
0x1b49   :  { %32295 = vmatpush3.bf16.msra.mxu1 %v36500_v30 }
0x1b4c   :  { %30311 = vmatmul.mubr.f32.vlgmr.msra.gmra.mrb[68].mxu1 %v36523_v40 }
0x1b4d   :  { %30313 = vmatprep.mubr.f32.mxu1 %v36534_v18  ;;  %v25254_v18 = vld [vmem:[%s36724_s9 + $0xa] ss:$0 sm:$0xff] }
0x1b50   :  { %30314 = vmatmul.mubr.f32.gmra.mrb[70].mxu1 %v36531_v56 }
0x1c1f   :  { %v30312_v28 = vpop.f32.mrb[68].mxu1 }
0x1c20   :  { %v32456_v23 = vadd.f32 %v30312_v28, %v25251_v57  ;;  %v23992_v63 = vpop.f32.mrb[69].mxu1 }
0x1c21   :  { %v32457_v60 = vadd.f32 %v25251_v57, %v23992_v63 }
0x1c22   :  { %v24015_v16 = vadd.f32 %v32456_v23, %v36422_v27 }
0x1c23   :  { %v30315_v31 = vpop.f32.mrb[70].mxu1  ;;  %v24014_v13 = vadd.f32 %v32457_v60, %v36425_v14 }
0x1c24   :  { %v32458_v30 = vadd.f32 %v30315_v31, %v25251_v57  ;;  %v24004_v46 = vpop.f32.mrb[71].mxu1  ;;  %v24025_v29 = vsel %vm713_vm1, %v24015_v16, 0.0 }
0x1c25   :  { %v32459_v53 = vadd.f32 %v25251_v57, %v24004_v46  ;;  %24026 = vadd.xlane.f32.xlu1 %v24025_v29  ;;  %v24022_v54 = vsel %vm713_vm1, %v24014_v13, 0.0 }
0x1c26   :  { %24023 = vadd.xlane.f32.xlu0 %v24022_v54  ;;  %v24017_v49 = vadd.f32 %v32458_v30, %v36433_v9 }
0x1c27   :  { %v24016_v4 = vadd.f32 %v32459_v53, %v36436_v1 }
0x1c28   :  { %v24031_v52 = vsel %vm713_vm1, %v24017_v49, 0.0 }
0x1c29   :  { %24032 = vadd.xlane.f32.xlu1 %v24031_v52  ;;  %v24028_v27 = vsel %vm713_vm1, %v24016_v4, 0.0 }
0x1c2a   :  { %24029 = vadd.xlane.f32.xlu0 %v24028_v27 }
0x1cb2   :  { %v24027_v14 = vpop.xlane.xlu1 %24026 }
0x1cb3   :  { %v24035_v26 = vmul.f32 0.03125, %v24027_v14  ;;  %v24024_v44 = vpop.xlane.xlu0 %24023 }
0x1cb4   :  { %v24034_v17 = vmul.f32 0.03125, %v24024_v44 }
0x1cb5   :  { %v24039_v22 = vsub.f32 %v24015_v16, %v24035_v26 }
0x1cb6   :  { %v24038_v21 = vsub.f32 %v24014_v13, %v24034_v17  ;;  %v24033_v34 = vpop.xlane.xlu1 %24032 }
0x1cb7   :  { %v24037_v35 = vmul.f32 0.03125, %v24033_v34  ;;  %v24030_v59 = vpop.xlane.xlu0 %24029  ;;  %v24043_v11 = vmul.f32 %v24039_v22, %v24039_v22 }
0x1cb8   :  { %v24036_v2 = vmul.f32 0.03125, %v24030_v59  ;;  %v24042_v9 = vmul.f32 %v24038_v21, %v24038_v21 }
0x1cb9   :  { %v24041_v10 = vsub.f32 %v24017_v49, %v24037_v35  ;;  %v24049_v1 = vsel %vm713_vm1, %v24043_v11, 0.0 }
0x1cba   :  { %v24040_v55 = vsub.f32 %v24016_v4, %v24036_v2  ;;  %24050 = vadd.xlane.f32.xlu1 %v24049_v1  ;;  %v24046_v58 = vsel %vm713_vm1, %v24042_v9, 0.0  ;;  %v33465_v2 = vmov 0.0|0.0   ;;  %v33467_v9 = vmov 0.0  }
0x1cbb   :  { %24047 = vadd.xlane.f32.xlu0 %v24046_v58  ;;  %v24045_v47 = vmul.f32 %v24041_v10, %v24041_v10  ;;  %32296 = vmatprep.subr.bf16.mxu0 %v33465_v2 }
0x1cbc   :  { %v24044_v41 = vmul.f32 %v24040_v55, %v24040_v55  ;;  %30324 = vmatprep.mubr.msk.f32.mxu0 %vm33466_vm7, %v33467_v9 }
0x1cbd   :  { %v24055_v24 = vsel %vm713_vm1, %v24045_v47, 0.0 }
0x1cbe   :  { %24056 = vadd.xlane.f32.xlu1 %v24055_v24  ;;  %v24052_v61 = vsel %vm713_vm1, %v24044_v41, 0.0 }
0x1cbf   :  { %24053 = vadd.xlane.f32.xlu0 %v24052_v61 }
0x1d47   :  { %v24051_v38 = vpop.xlane.xlu1 %24050 }
0x1d48   :  { %v24059_v40 = vmul.f32 0.03125, %v24051_v38  ;;  %v24048_v48 = vpop.xlane.xlu0 %24047 }
0x1d49   :  { %v24058_v20 = vmul.f32 0.03125, %v24048_v48 }
0x1d4a   :  { %v24063_v6 = vadd.f32 1e-05, %v24059_v40 }
0x1d4b   :  { %v24062_v51 = vadd.f32 1e-05, %v24058_v20  ;;  %v24057_v43 = vpop.xlane.xlu1 %24056 }
0x1d4c   :  { %33397 = vrsqrt.f32 %v24063_v6  ;;  %v24061_v37 = vmul.f32 0.03125, %v24057_v43  ;;  %v24054_v3 = vpop.xlane.xlu0 %24053  ;;  %v36845_v6 = vld [vmem:[#allocation13_spill] sm:$0xff] }
0x1d4d   :  { %33399 = vrsqrt.f32 %v24062_v51  ;;  %v24060_v7 = vmul.f32 0.03125, %v24054_v3  ;;  %v36846_v51 = vld [vmem:[#allocation12_spill] sm:$0xff] }
0x1d4e   :  { %v24065_v42 = vadd.f32 1e-05, %v24061_v37  ;;  %v36847_v43 = vcvt.s32.f32 %v36846_v51  ;;  %v24663_v51 = vld [vmem:[%s36725_s10 + $0x18] sm:$0xff] }
0x1d4f   :  { %v24064_v56 = vadd.f32 1e-05, %v24060_v7  ;;  %v25258_v7 = vld [vmem:[%s36724_s9 + $0xc] ss:$0 sm:$0xff] }
0x1d50   :  { %33401 = vrsqrt.f32 %v24065_v42  ;;  %vm24170_vm8 = vcmp.eq.f32.partialorder %v36847_v43, %v36845_v6  ;;  %v24662_v6 = vld [vmem:[%s36725_s10 + $0x10] sm:$0xff] }
0x1d51   :  { %33403 = vrsqrt.f32 %v24064_v56  ;;  %v36615_v37 = vsel %vm24170_vm8, 0.25, %v33467_v9  ;;  %v24681_v43 = vand.u32 4294901760, %v24662_v6 }
0x1d52   :  { %v24173_v42 = vsel %vm713_vm1, %v36615_v37, 0 }
0x1d56   :  { %v33398_v12 = vpop.eup %33397 }
0x1d57   :  { %v33400_v8 = vpop.eup %33399  ;;  %v24071_v45 = vmul.f32 %v33398_v12, %v24039_v22 }
0x1d58   :  { %v24070_v32 = vmul.f32 %v33400_v8, %v24038_v21  ;;  %v25259_v8 = vld [vmem:[%s36724_s9 + $0xd] ss:$0 sm:$0xff] }
0x1d59   :  { %v24081_v39 = vmul.f32 %v25254_v18, %v24071_v45 }
0x1d5a   :  { %v33402_v36 = vpop.eup %33401  ;;  %v24080_v15 = vmul.f32 %v25254_v18, %v24070_v32 }
0x1d5b   :  { %v33404_v5 = vpop.eup %33403  ;;  %v24091_v62 = vadd.f32 %v25255_v25, %v24081_v39  ;;  %v24073_v19 = vmul.f32 %v33402_v36, %v24041_v10 }
0x1d5c   :  { %v24090_v33 = vadd.f32 %v25255_v25, %v24080_v15  ;;  %v24072_v0 = vmul.f32 %v33404_v5, %v24040_v55 }
0x1d5d   :  { %v24101_v50 = vsel %vm713_vm1, %v24091_v62, 0.0  ;;  %v24083_v57 = vmul.f32 %v25254_v18, %v24073_v19 }
0x1d5e   :  { %24102 = vadd.xlane.f32.xlu1 %v24101_v50  ;;  %v24098_v28 = vsel %vm713_vm1, %v24090_v33, 0.0  ;;  %v24082_v23 = vmul.f32 %v25254_v18, %v24072_v0 }
0x1d5f   :  { %24099 = vadd.xlane.f32.xlu0 %v24098_v28  ;;  %v24093_v63 = vadd.f32 %v25255_v25, %v24083_v57 }
0x1d60   :  { %v24092_v60 = vadd.f32 %v25255_v25, %v24082_v23  ;;  %v36625_v25 = vsub.f32 %v24173_v42, %v24173_v42 }
0x1d61   :  { %v24107_v16 = vsel %vm713_vm1, %v24093_v63, 0.0 }
0x1d62   :  { %24108 = vadd.xlane.f32.xlu1 %v24107_v16  ;;  %v24104_v31 = vsel %vm713_vm1, %v24092_v60, 0.0  ;;  %v24246_v50 = vand.u32 4294901760, %v36625_v25 }
0x1d63   :  { %24105 = vadd.xlane.f32.xlu0 %v24104_v31 }
0x1deb   :  { %v24103_v13 = vpop.xlane.xlu1 %24102 }
0x1dec   :  { %v24111_v30 = vmul.f32 0.03125, %v24103_v13  ;;  %v24100_v46 = vpop.xlane.xlu0 %24099 }
0x1ded   :  { %v24110_v29 = vmul.f32 0.03125, %v24100_v46 }
0x1dee   :  { %v24115_v53 = vsub.f32 %v24091_v62, %v24111_v30  ;;  %v24247_v30 = vsub.f32 %v36625_v25, %v24246_v50 }
0x1def   :  { %v24114_v54 = vsub.f32 %v24090_v33, %v24110_v29  ;;  %v24109_v49 = vpop.xlane.xlu1 %24108 }
0x1df0   :  { %v24113_v4 = vmul.f32 0.03125, %v24109_v49  ;;  %v24106_v52 = vpop.xlane.xlu0 %24105  ;;  %v24119_v27 = vmul.f32 %v24115_v53, %v24115_v53 }
0x1df1   :  { %v24112_v14 = vmul.f32 0.03125, %v24106_v52  ;;  %v24118_v26 = vmul.f32 %v24114_v54, %v24114_v54 }
0x1df2   :  { %v24117_v44 = vsub.f32 %v24093_v63, %v24113_v4  ;;  %v24125_v17 = vsel %vm713_vm1, %v24119_v27, 0.0 }
0x1df3   :  { %v24116_v22 = vsub.f32 %v24092_v60, %v24112_v14  ;;  %24126 = vadd.xlane.f32.xlu1 %v24125_v17  ;;  %v24122_v21 = vsel %vm713_vm1, %v24118_v26, 0.0  ;;  %v24248_v14 = vand.u32 4294901760, %v24247_v30 }
0x1df4   :  { %24123 = vadd.xlane.f32.xlu0 %v24122_v21  ;;  %v24121_v34 = vmul.f32 %v24117_v44, %v24117_v44 }
0x1df5   :  { %v24120_v35 = vmul.f32 %v24116_v22, %v24116_v22 }
0x1df6   :  { %v24131_v59 = vsel %vm713_vm1, %v24121_v34, 0.0 }
0x1df7   :  { %24132 = vadd.xlane.f32.xlu1 %v24131_v59  ;;  %v24128_v11 = vsel %vm713_vm1, %v24120_v35, 0.0 }
0x1df8   :  { %24129 = vadd.xlane.f32.xlu0 %v24128_v11 }
0x1e80   :  { %v24127_v10 = vpop.xlane.xlu1 %24126 }
0x1e81   :  { %v24135_v1 = vmul.f32 0.03125, %v24127_v10  ;;  %v24124_v55 = vpop.xlane.xlu0 %24123 }
0x1e82   :  { %v24134_v58 = vmul.f32 0.03125, %v24124_v55 }
0x1e83   :  { %v24139_v47 = vadd.f32 1e-05, %v24135_v1 }
0x1e84   :  { %v24138_v41 = vadd.f32 1e-05, %v24134_v58  ;;  %v24133_v24 = vpop.xlane.xlu1 %24132 }
0x1e85   :  { %33405 = vrsqrt.f32 %v24139_v47  ;;  %v24137_v61 = vmul.f32 0.03125, %v24133_v24  ;;  %v24130_v38 = vpop.xlane.xlu0 %24129  ;;  %v24661_v24 = vld [vmem:[%s36725_s10 + $0x8] sm:$0xff] }
0x1e86   :  { %33407 = vrsqrt.f32 %v24138_v41  ;;  %v24136_v40 = vmul.f32 0.03125, %v24130_v38  ;;  %v24660_v41 = vld [vmem:[%s36725_s10] sm:$0xff]  ;;  %v24678_v38 = vand.u32 4294901760, %v24661_v24 }
0x1e87   :  { %v24141_v48 = vadd.f32 1e-05, %v24137_v61  ;;  %v24675_v61 = vand.u32 4294901760, %v24660_v41 }
0x1e88   :  { %v24140_v20 = vadd.f32 1e-05, %v24136_v40 }
0x1e89   :  { %33409 = vrsqrt.f32 %v24141_v48  ;;  %v36666_v40 = vpack.c.bf16 %v24678_v38, %v24675_v61  ;;  %v24755_v48 = vsub.f32 %v24660_v41, %v24675_v61 }
0x1e8a   :  { %33411 = vrsqrt.f32 %v24140_v20  ;;  %v24762_v20 = vsub.f32 %v24661_v24, %v24678_v38 }
0x1e8f   :  { %v33406_v3 = vpop.eup %33405 }
0x1e90   :  { %v33408_v56 = vpop.eup %33407  ;;  %v24147_v12 = vmul.f32 %v33406_v3, %v24115_v53  ;;  %v24756_v3 = vand.u32 4294901760, %v24755_v48 }
0x1e91   :  { %v24146_v18 = vmul.f32 %v33408_v56, %v24114_v54  ;;  %v24769_v56 = vsub.f32 %v24662_v6, %v24681_v43 }
0x1e92   :  { %v24157_v45 = vmul.f32 %v25258_v7, %v24147_v12 }
0x1e93   :  { %v33410_v32 = vpop.eup %33409  ;;  %v24156_v39 = vmul.f32 %v25258_v7, %v24146_v18  ;;  %v24757_v18 = vsub.f32 %v24755_v48, %v24756_v3 }
0x1e94   :  { %v33412_v36 = vpop.eup %33411  ;;  %v24149_v15 = vmul.f32 %v33410_v32, %v24117_v44  ;;  %v24167_v5 = vadd.f32 %v25259_v8, %v24157_v45 }
0x1e95   :  { %v24148_v62 = vmul.f32 %v33412_v36, %v24116_v22  ;;  %v24166_v19 = vadd.f32 %v25259_v8, %v24156_v39  ;;  %v24758_v45 = vand.u32 4294901760, %v24757_v18 }
0x1e96   :  { %v24179_v33 = vand.u32 4294901760, %v24167_v5  ;;  %v24159_v0 = vmul.f32 %v25258_v7, %v24149_v15 }
0x1e97   :  { %v24176_v57 = vand.u32 4294901760, %v24166_v19  ;;  %v24158_v28 = vmul.f32 %v25258_v7, %v24148_v62  ;;  %v24763_v7 = vand.u32 4294901760, %v24762_v20 }
0x1e98   :  { %v24263_v23 = vsub.f32 %v24167_v5, %v24179_v33  ;;  %v24169_v63 = vadd.f32 %v25259_v8, %v24159_v0  ;;  %v32345_v0 = vpack.c.bf16 %v24762_v20, %v24755_v48 }
0x1e99   :  { %v32297_v60 = vpack.c.bf16 %v24179_v33, %v24176_v57  ;;  %v24256_v16 = vsub.f32 %v24166_v19, %v24176_v57  ;;  %v24168_v31 = vadd.f32 %v25259_v8, %v24158_v28  ;;  %v24764_v8 = vsub.f32 %v24762_v20, %v24763_v7 }
0x1e9a   :  { %v24185_v13 = vand.u32 4294901760, %v24169_v63  ;;  %v24264_v46 = vand.u32 4294901760, %v24263_v23  ;;  %v32357_v57 = vpack.c.bf16 %v24763_v7, %v24756_v3 }
0x1e9b   :  { %32298 = vmatpush3.bf16.msra.mxu0 %v32297_v60  ;;  %v24182_v29 = vand.u32 4294901760, %v24168_v31  ;;  %v24257_v53 = vand.u32 4294901760, %v24256_v16  ;;  %v32309_v1 = vpack.c.bf16 %v24263_v23, %v24256_v16  ;;  %v24765_v39 = vand.u32 4294901760, %v24764_v8 }
0x1e9c   :  { %32299 = vmatprep.subr.bf16.mxu0 %v33465_v2  ;;  %v24277_v54 = vsub.f32 %v24169_v63, %v24185_v13  ;;  %v24265_v49 = vsub.f32 %v24263_v23, %v24264_v46 }
0x1e9d   :  { %v32300_v4 = vpack.c.bf16 %v24185_v13, %v24182_v29  ;;  %v24270_v52 = vsub.f32 %v24168_v31, %v24182_v29  ;;  %v24258_v27 = vsub.f32 %v24256_v16, %v24257_v53  ;;  %v32321_v58 = vpack.c.bf16 %v24264_v46, %v24257_v53  ;;  %v25263_v29 = vld [vmem:[%s36726_s11] ss:$0 sm:$0xff] }
0x1e9e   :  { %v24266_v26 = vand.u32 4294901760, %v24265_v49  ;;  %v24278_v44 = vand.u32 4294901760, %v24277_v54  ;;  %v32339_v5 = vpack.c.bf16 %v24765_v39, %v24758_v45 }
0x1e9f   :  { %32301 = vmatpush3.bf16.msra.mxu0 %v32300_v4  ;;  %v24259_v17 = vand.u32 4294901760, %v24258_v27  ;;  %v24271_v22 = vand.u32 4294901760, %v24270_v52  ;;  %v32312_v55 = vpack.c.bf16 %v24277_v54, %v24270_v52 }
0x1ea0   :  { %32302 = vmatprep.subr.bf16.mxu0 %v33465_v2  ;;  %v24279_v21 = vsub.f32 %v24277_v54, %v24278_v44 }
0x1ea1   :  { %v32303_v34 = vpack.c.bf16 %v24266_v26, %v24259_v17  ;;  %v24272_v35 = vsub.f32 %v24270_v52, %v24271_v22  ;;  %v32324_v47 = vpack.c.bf16 %v24278_v44, %v24271_v22 }
0x1ea2   :  { %30325 = vmatmul.mubr.f32.vlgmr.msra.gmra.mrb[60].mxu0 %v24248_v14  ;;  %v24280_v59 = vand.u32 4294901760, %v24279_v21 }
0x1ea3   :  { %32304 = vmatpush3.bf16.msra.mxu0 %v32303_v34  ;;  %v24273_v11 = vand.u32 4294901760, %v24272_v35  ;;  %30335 = vmatprep.mubr.msk.f32.mxu0 %vm33466_vm7, %v33467_v9 }
0x1ea4   :  { %32305 = vmatprep.subr.bf16.mxu0 %v33465_v2 }
0x1ea5   :  { %v32306_v10 = vpack.c.bf16 %v24280_v59, %v24273_v11 }
0x1ea7   :  { %32307 = vmatpush3.bf16.msra.mxu0 %v32306_v10 }
0x1ea8   :  { %32308 = vmatprep.subr.bf16.mxu0 %v33465_v2 }
0x1eaa   :  { %30336 = vmatmul.mubr.msk.f32.vlgmr.msra.gmra.mrb[60].mxu0 %vm713_vm1, %v36615_v37 }
0x1eab   :  { %32310 = vmatpush3.bf16.msra.mxu0 %v32309_v1  ;;  %30346 = vmatprep.mubr.msk.f32.mxu0 %vm33466_vm7, %v33467_v9 }
0x1eac   :  { %32311 = vmatprep.subr.bf16.mxu0 %v33465_v2 }
0x1eaf   :  { %32313 = vmatpush3.bf16.msra.mxu0 %v32312_v55 }
0x1eb0   :  { %32314 = vmatprep.subr.bf16.mxu0 %v33465_v2 }
0x1eb2   :  { %30347 = vmatmul.mubr.f32.vlgmr.msra.gmra.mrb[60].mxu0 %v36625_v25  ;;  %v24770_v25 = vand.u32 4294901760, %v24769_v56 }
0x1eb3   :  { %32316 = vmatpush3.bf16.msra.mxu0 %v32297_v60  ;;  %30357 = vmatprep.mubr.msk.f32.mxu0 %vm33466_vm7, %v33467_v9 }
0x1eb4   :  { %32317 = vmatprep.subr.bf16.mxu0 %v33465_v2  ;;  %v24771_v36 = vsub.f32 %v24769_v56, %v24770_v25 }
0x1eb6   :  { %v24772_v62 = vand.u32 4294901760, %v24771_v36 }
0x1eb7   :  { %32319 = vmatpush3.bf16.msra.mxu0 %v32300_v4 }
0x1eb8   :  { %32320 = vmatprep.subr.bf16.mxu0 %v33465_v2 }
0x1eba   :  { %30358 = vmatmul.mubr.f32.vlgmr.msra.gmra.mrb[60].mxu0 %v24246_v50 }
0x1ebb   :  { %32322 = vmatpush3.bf16.msra.mxu0 %v32321_v58  ;;  %30368 = vmatprep.mubr.msk.f32.mxu0 %vm33466_vm7, %v33467_v9 }
0x1ebc   :  { %32323 = vmatprep.subr.bf16.mxu0 %v33465_v2 }
0x1ebf   :  { %32325 = vmatpush3.bf16.msra.mxu0 %v32324_v47 }
0x1ec0   :  { %32326 = vmatprep.subr.bf16.mxu0 %v33465_v2 }
0x1ec2   :  { %30369 = vmatmul.mubr.msk.f32.vlgmr.msra.gmra.mrb[60].mxu0 %vm713_vm1, %v36615_v37 }
0x1ec3   :  { %32328 = vmatpush3.bf16.msra.mxu0 %v32297_v60  ;;  %30379 = vmatprep.mubr.msk.f32.mxu0 %vm33466_vm7, %v33467_v9 }
0x1ec4   :  { %32329 = vmatprep.subr.bf16.mxu0 %v33465_v2 }
0x1ec7   :  { %32331 = vmatpush3.bf16.msra.mxu0 %v32300_v4 }
0x1ec8   :  { %32332 = vmatprep.subr.bf16.mxu0 %v33465_v2 }
0x1eca   :  { %30380 = vmatmul.mubr.msk.f32.vlgmr.msra.gmra.mrb[60].mxu0 %vm713_vm1, %v36615_v37  ;;  %v24684_v37 = vand.u32 4294901760, %v24663_v51 }
0x1ecb   :  { %30390 = vmatprep.mubr.msk.f32.mxu0 %vm33466_vm7, %v33467_v9  ;;  %32334 = vmatpush3.bf16.msra.mxu0 %v36666_v40 }
0x1ecc   :  { %32335 = vmatprep.subr.bf16.mxu0 %v33465_v2  ;;  %v32336_v42 = vpack.c.bf16 %v24684_v37, %v24681_v43  ;;  %v24776_v12 = vsub.f32 %v24663_v51, %v24684_v37 }
0x1ece   :  { %v24777_v32 = vand.u32 4294901760, %v24776_v12  ;;  %v32348_v50 = vpack.c.bf16 %v24776_v12, %v24769_v56 }
0x1ecf   :  { %32337 = vmatpush3.bf16.msra.mxu0 %v32336_v42 }
0x1ed0   :  { %32338 = vmatprep.subr.bf16.mxu0 %v33465_v2  ;;  %v24778_v15 = vsub.f32 %v24776_v12, %v24777_v32  ;;  %v32360_v28 = vpack.c.bf16 %v24777_v32, %v24770_v25 }
0x1ed2   :  { %v24779_v19 = vand.u32 4294901760, %v24778_v15 }
0x1ed4   :  { %v32342_v33 = vpack.c.bf16 %v24779_v19, %v24772_v62 }
0x1f9d   :  { %v24656_v23 = vpop.f32.mrb[60].mxu0 }
0x1f9e   :  { %v24672_v63 = vsel %vm713_vm1, %v24656_v23, 0  ;;  %v30381_v60 = vpop.f32.mrb[61].mxu0 }
0x1f9f   :  { %v24743_v16 = vand.u32 4294901760, %v24672_v63 }
0x1fa1   :  { %v24744_v31 = vsub.f32 %v24672_v63, %v24743_v16 }
0x1fa3   :  { %v24745_v13 = vand.u32 4294901760, %v24744_v31 }
0x1fa5   :  { %v24746_v30 = vsub.f32 %v24744_v31, %v24745_v13 }
0x1fa7   :  { %v24747_v46 = vand.u32 4294901760, %v24746_v30 }
0x1fa9   :  { %30391 = vmatmul.mubr.f32.vlgmr.msra.gmra.mrb[62].mxu0 %v24747_v46 }
0x1faa   :  { %32340 = vmatpush3.bf16.msra.mxu0 %v32339_v5  ;;  %30401 = vmatprep.mubr.msk.f32.mxu0 %vm33466_vm7, %v33467_v9 }
0x1fab   :  { %32341 = vmatprep.subr.bf16.mxu0 %v33465_v2 }
0x1fae   :  { %32343 = vmatpush3.bf16.msra.mxu0 %v32342_v33 }
0x1faf   :  { %32344 = vmatprep.subr.bf16.mxu0 %v33465_v2 }
0x1fb1   :  { %30402 = vmatmul.mubr.f32.vlgmr.msra.gmra.mrb[62].mxu0 %v24743_v16 }
0x1fb2   :  { %32346 = vmatpush3.bf16.msra.mxu0 %v32345_v0  ;;  %30412 = vmatprep.mubr.msk.f32.mxu0 %vm33466_vm7, %v33467_v9 }
0x1fb3   :  { %32347 = vmatprep.subr.bf16.mxu0 %v33465_v2 }
0x1fb6   :  { %32349 = vmatpush3.bf16.msra.mxu0 %v32348_v50 }
0x1fb7   :  { %32350 = vmatprep.subr.bf16.mxu0 %v33465_v2 }
0x1fb9   :  { %30413 = vmatmul.mubr.f32.vlgmr.msra.gmra.mrb[62].mxu0 %v24744_v31 }
0x1fba   :  { %32352 = vmatpush3.bf16.msra.mxu0 %v36666_v40  ;;  %30423 = vmatprep.mubr.msk.f32.mxu0 %vm33466_vm7, %v33467_v9 }
0x1fbb   :  { %32353 = vmatprep.subr.bf16.mxu0 %v33465_v2 }
0x1fbe   :  { %32355 = vmatpush3.bf16.msra.mxu0 %v32336_v42 }
0x1fbf   :  { %32356 = vmatprep.subr.bf16.mxu0 %v33465_v2 }
0x1fc1   :  { %30424 = vmatmul.mubr.f32.vlgmr.msra.gmra.mrb[62].mxu0 %v24745_v13 }
0x1fc2   :  { %32358 = vmatpush3.bf16.msra.mxu0 %v32357_v57  ;;  %30434 = vmatprep.mubr.msk.f32.mxu0 %vm33466_vm7, %v33467_v9 }
0x1fc3   :  { %32359 = vmatprep.subr.bf16.mxu0 %v33465_v2 }
0x1fc6   :  { %32361 = vmatpush3.bf16.msra.mxu0 %v32360_v28 }
0x1fc7   :  { %32362 = vmatprep.subr.bf16.mxu0 %v33465_v2 }
0x1fc9   :  { %30435 = vmatmul.mubr.f32.vlgmr.msra.gmra.mrb[62].mxu0 %v24743_v16 }
0x1fca   :  { %32364 = vmatpush3.bf16.msra.mxu0 %v36666_v40  ;;  %30445 = vmatprep.mubr.msk.f32.mxu0 %vm33466_vm7, %v33467_v9 }
0x1fcb   :  { %32365 = vmatprep.subr.bf16.mxu0 %v33465_v2 }
0x1fce   :  { %32367 = vmatpush3.bf16.msra.mxu0 %v32336_v42 }
0x1fd1   :  { %30446 = vmatmul.mubr.f32.vlgmr.msra.gmra.mrb[62].mxu0 %v24743_v16 }
0x20a4   :  { %v25155_v53 = vpop.f32.mrb[62].mxu0 }
0x20a5   :  { %v32460_v54 = vadd.f32 %v25263_v29, %v25155_v53  ;;  %v30447_v49 = vpop.f32.mrb[63].mxu0 }
0x20a7   :  { %25159 = vst.msk [vmem:[#allocation5] sm:$0xff] %vm101_vm0, %v32460_v54 }
0x20a8   :  { %33446 = shalt.err (!%p33443_p12)
}
0x20a9   :  { %s33447_s22 = scalar_lea.hbm %s36727_s12, 128 }
0x20aa   :  { %p33448_p13 = scmp.ne.s32.totalorder %s36727_s12, %s33447_s22  ;;  %p33451_p0 = scmp.lt.u32.totalorder %s33447_s22, %s36727_s12 }
0x20ac   :  { %p33453_p1 = pnand %p33451_p0, %p33448_p13 }
0x20ae   :  { %33456 = shalt.err (!%p33453_p1)
}
0x20af   :  { %25169 = dma.vmem_to_hbm [thread:$0]  %s25167_s23, 128, %s36727_s12, [#allocation4]  }
0x20b0   :  { %33459 = dma.done.wait [#allocation4], 128  }
0x20b1   :  { %33460 = vsyncadd [#allocation4], 4294967168 }
0x20b2   :  { %25173 = vsyncpa [#allocation3], 1 }
0x20b3   :  { %25174 = vsyncpa [#allocation4], 1 }

</bundles_post_ra>
